<compile_context>
chip_gen: v6e
topology: v6e:2x2x1
jax: 0.10.0
libtpu: 0.0.40
codegen_flags: <defaults>
</compile_context>

<pallas_src>
import jax
import jax.numpy as jnp
import numpy as np
from jax.experimental import pallas as pl
from jax.experimental.pallas import tpu as pltpu

# Whole-array, VMEM-resident operands (total working set < 2 MiB).
VMEM = pl.BlockSpec(memory_space=pltpu.MemorySpace.VMEM)


# ---------------------------------------------------------------------------
# Fused forward kernel
# ---------------------------------------------------------------------------
def _net_kernel(xe_ref, xo_ref, t3_ref, w2b_ref, b1_ref, b2_ref, g_ref,
                bf1_ref, wf2_ref, bf2_ref, out_ref):
    batch = xe_ref.shape[0]
    # Batch is tiny (2) and unrolled in Python; for large batches this loop
    # would become a "parallel" grid axis (v7x second TensorCore).
    for b in range(batch):
        xph = (xe_ref[b], xo_ref[b])          # even / odd image rows, (14, 28)

        # ---- conv1 fused with 2x2 max pool -------------------------------
        # Evaluate the 5x5 conv directly at the 4 corners of every pooling
        # window; each corner is 5 lane-dense matmuls against Toeplitz-style
        # weight slabs (t3_ref), output lanes = (pw, cout) -> width 120.
        corners = []
        for di in range(2):
            for dj in range(2):
                acc = None
                for i in range(5):
                    t = di + i
                    lhs = xph[t % 2][t // 2: t // 2 + 12, :]          # (12, 28)
                    term = jnp.dot(lhs, t3_ref[i * 2 + dj],
                                   preferred_element_type=jnp.float32)  # (12, 120)
                    acc = term if acc is None else acc + term
                corners.append(acc)
        h1 = jnp.maximum(jnp.maximum(corners[0], corners[1]),
                         jnp.maximum(corners[2], corners[3]))
        h1 = jnp.maximum(h1 + b1_ref[...], 0.0)   # (12, 120) = pooled relu act.

        # ---- conv2: 25 lane-dense matmuls vs block-diagonal weights ------
        # h1 lanes are (pw, cin); a kernel tap (i2, j2) needs the contiguous
        # lane slab [j2*10, j2*10+80) and rows [i2, i2+8).
        c2 = None
        for t in range(25):
            i2, j2 = divmod(t, 5)
            v = h1[i2:i2 + 8, j2 * 10: j2 * 10 + 80]                   # (8, 80)
            term = jnp.dot(v, w2b_ref[t],
                           preferred_element_type=jnp.float32)         # (8, 160)
            c2 = term if c2 is None else c2 + term
        c2 = c2 + b2_ref[...]                     # (8, 160), lanes = (ow, cout)

        # ---- 2x2 max pool of conv2 + ReLU --------------------------------
        # Corner max via unit-stride row / lane shifts; the even-(oh, ow)
        # decimation is folded into the fc1 weight (g_ref).
        m2 = jnp.maximum(jnp.maximum(c2[0:7, 0:140], c2[1:8, 0:140]),
                         jnp.maximum(c2[0:7, 20:160], c2[1:8, 20:160]))  # (7, 140)
        m2 = jnp.maximum(m2, 0.0)

        # ---- fc1 (torch flatten order + pool decimation folded into g) ---
        f1 = None
        for qh in range(4):
            term = jnp.dot(m2[2 * qh: 2 * qh + 1, :], g_ref[qh],
                           preferred_element_type=jnp.float32)          # (1, 50)
            f1 = term if f1 is None else f1 + term
        f1 = jnp.maximum(f1 + bf1_ref[...], 0.0)

        # ---- fc2 + log_softmax epilogue ----------------------------------
        f2 = jnp.dot(f1, wf2_ref[...],
                     preferred_element_type=jnp.float32) + bf2_ref[...]  # (1, 10)
        s = f2 - jnp.max(f2, axis=-1, keepdims=True)
        lse = jnp.log(jnp.sum(jnp.exp(s), axis=-1, keepdims=True))
        out_ref[pl.ds(b, 1), :] = (s - lse).astype(out_ref.dtype)


# ---------------------------------------------------------------------------
# Wrapper: parameter / input re-layout (trace-time, tiny) + single pallas_call
# ---------------------------------------------------------------------------
# (d, j, p, w) -> 1.0 iff w == 2*p + d + j (compile-time constant).
_TAP_MASK = (np.arange(28)[None, None, None, :]
             == (2 * np.arange(12)[None, None, :, None]
                 + np.arange(2)[:, None, None, None]
                 + np.arange(5)[None, :, None, None])).astype(np.float32)


def net_forward(x_nchw, p):
    B = x_nchw.shape[0]
    f32 = jnp.float32
    x = x_nchw.reshape(B, 28, 28).astype(f32)         # Cin == 1
    xe = x[:, 0::2, :]                                # (B, 14, 28) even rows
    xo = x[:, 1::2, :]                                # (B, 14, 28) odd rows

    # conv1 weights -> Toeplitz-style slabs: t3[kh*2+dj][w, pw*10+co]
    w1s = p["w1"].reshape(5, 5, 10).astype(f32)
    t3 = jnp.einsum('ijc,djpw->idwpc', w1s, jnp.asarray(_TAP_MASK))
    t3 = t3.reshape(10, 28, 120)

    # conv2 weights -> 25 block-diagonal (80, 160) matrices (lanes (ow, co)).
    w2r = p["w2"].reshape(25, 10, 20).astype(f32)
    w2blk = jnp.einsum('ab,tcd->tacbd', jnp.eye(8, dtype=f32), w2r)
    w2blk = w2blk.reshape(25, 80, 160)

    # fc1 weight: fold in torch's (C,H,W) flatten order and the even-(oh,ow)
    # selection of the (7, 7*20) pre-pool slab (odd columns get zero rows).
    wf1_r = p["wf1"].astype(f32).reshape(20, 4, 4, 50)        # (c, h, w, f)
    blocks = jnp.transpose(wf1_r, (1, 2, 0, 3))               # (h, w, c, f)
    inter = jnp.stack([blocks, jnp.zeros_like(blocks)], axis=2)
    g = inter.reshape(4, 8, 20, 50)[:, :7].reshape(4, 140, 50)

    b1t = jnp.tile(p["b1"].astype(f32), 12).reshape(1, 120)
    b2t = jnp.tile(p["b2"].astype(f32), 8).reshape(1, 160)
    bf1 = p["bf1"].astype(f32).reshape(1, 50)
    bf2 = p["bf2"].astype(f32).reshape(1, 10)
    wf2 = p["wf2"].astype(f32)

    return pl.pallas_call(
        _net_kernel,
        out_shape=jax.ShapeDtypeStruct((B, 10), jnp.float32),
        in_specs=[VMEM] * 10,
        out_specs=VMEM,
    )(xe, xo, t3, w2blk, b1t, b2t, g, bf1, wf2, bf2)


# ---------------------------------------------------------------------------
# Pure-JAX reference (mirrors the PyTorch Net.forward) and params
# ---------------------------------------------------------------------------
def _pool2x2(y):
    B, H, W, C = y.shape
    return y.reshape(B, H // 2, 2, W // 2, 2, C).max(axis=(2, 4))


def net_forward_ref(x_nchw, p):
    B = x_nchw.shape[0]
    y = jnp.transpose(x_nchw, (0, 2, 3, 1)).astype(jnp.float32)
    y = jax.lax.conv_general_dilated(
        y, p["w1"], (1, 1), "VALID",
        dimension_numbers=("NHWC", "HWIO", "NHWC")) + p["b1"]
    y = jnp.maximum(_pool2x2(y), 0.0)
    y = jax.lax.conv_general_dilated(
        y, p["w2"], (1, 1), "VALID",
        dimension_numbers=("NHWC", "HWIO", "NHWC")) + p["b2"]
    y = jnp.maximum(_pool2x2(y), 0.0)
    y = jnp.transpose(y, (0, 3, 1, 2)).reshape(B, 320)     # torch .view order
    y = jnp.maximum(y @ p["wf1"] + p["bf1"], 0.0)
    y = y @ p["wf2"] + p["bf2"]
    return jax.nn.log_softmax(y, axis=1)


def init_params(key):
    ks = jax.random.split(key, 8)

    def u(k, shape, fan_in):
        lim = 1.0 / float(fan_in) ** 0.5
        return jax.random.uniform(k, shape, jnp.float32, -lim, lim)

    return dict(
        w1=u(ks[0], (5, 5, 1, 10), 25),    b1=u(ks[1], (10,), 25),
        w2=u(ks[2], (5, 5, 10, 20), 250),  b2=u(ks[3], (20,), 250),
        wf1=u(ks[4], (320, 50), 320),      bf1=u(ks[5], (50,), 320),
        wf2=u(ks[6], (50, 10), 50),        bf2=u(ks[7], (10,), 50),
    )


if __name__ == "__main__":
    key = jax.random.PRNGKey(0)
    k_x, k_p = jax.random.split(key)
    x = jax.random.normal(k_x, (2, 1, 28, 28), dtype=jnp.float32)
    params = init_params(k_p)

    out = jax.block_until_ready(jax.jit(net_forward)(x, params))
    ref = jax.block_until_ready(jax.jit(net_forward_ref)(x, params))

    assert out.shape == (2, 10), out.shape
    # log_softmax rows must exp-sum to 1 and match the plain-JAX reference.
    assert bool(jnp.allclose(jnp.sum(jnp.exp(out), axis=1), 1.0, atol=1e-4))
    assert bool(jnp.allclose(out, ref, atol=3e-2, rtol=3e-2)), (
        float(jnp.max(jnp.abs(out - ref))))
    print("KERNEL_OK")
</pallas_src>

<mosaic_0001>
module attributes {stable_mosaic.version = 11 : i64} {
  func.func @_net_kernel(%arg0: memref<2x14x28xf32, #tpu.memory_space<vmem>>, %arg1: memref<2x14x28xf32, #tpu.memory_space<vmem>>, %arg2: memref<10x28x120xf32, #tpu.memory_space<vmem>>, %arg3: memref<25x80x160xf32, #tpu.memory_space<vmem>>, %arg4: memref<1x120xf32, #tpu.memory_space<vmem>>, %arg5: memref<1x160xf32, #tpu.memory_space<vmem>>, %arg6: memref<4x140x50xf32, #tpu.memory_space<vmem>>, %arg7: memref<1x50xf32, #tpu.memory_space<vmem>>, %arg8: memref<50x10xf32, #tpu.memory_space<vmem>>, %arg9: memref<1x10xf32, #tpu.memory_space<vmem>>, %arg10: memref<2x10xf32, #tpu.memory_space<vmem>>) attributes {dimension_semantics = [], scalar_prefetch = 0 : i64, scratch_operands = 0 : i64, tpu.core_type = #tpu.core_type<tc>} {
    %c0 = arith.constant 0 : index
    %c0_0 = arith.constant 0 : index
    %c0_1 = arith.constant 0 : index
    %0 = vector.load %arg0[%c0, %c0_0, %c0_1] : memref<2x14x28xf32, #tpu.memory_space<vmem>>, vector<1x14x28xf32>
    %1 = vector.shape_cast %0 : vector<1x14x28xf32> to vector<14x28xf32>
    %c0_2 = arith.constant 0 : index
    %c0_3 = arith.constant 0 : index
    %c0_4 = arith.constant 0 : index
    %2 = vector.load %arg1[%c0_2, %c0_3, %c0_4] : memref<2x14x28xf32, #tpu.memory_space<vmem>>, vector<1x14x28xf32>
    %3 = vector.shape_cast %2 : vector<1x14x28xf32> to vector<14x28xf32>
    %4 = vector.extract_strided_slice %1 {offsets = [0, 0], sizes = [12, 28], strides = [1, 1]} : vector<14x28xf32> to vector<12x28xf32>
    %c0_5 = arith.constant 0 : index
    %c0_6 = arith.constant 0 : index
    %c0_7 = arith.constant 0 : index
    %5 = vector.load %arg2[%c0_5, %c0_6, %c0_7] : memref<10x28x120xf32, #tpu.memory_space<vmem>>, vector<1x28x120xf32>
    %6 = vector.shape_cast %5 : vector<1x28x120xf32> to vector<28x120xf32>
    %cst = arith.constant dense<0.000000e+00> : vector<12x120xf32>
    %7 = tpu.matmul %4, %6, %cst {dimension_numbers = #tpu.dot_dimension_numbers<[1], [0], [0], [1], [0, 0, 1, 1], [], []>} : vector<12x28xf32>, vector<28x120xf32>, vector<12x120xf32> -> vector<12x120xf32>
    %8 = vector.extract_strided_slice %3 {offsets = [0, 0], sizes = [12, 28], strides = [1, 1]} : vector<14x28xf32> to vector<12x28xf32>
    %c2 = arith.constant 2 : index
    %c0_8 = arith.constant 0 : index
    %c0_9 = arith.constant 0 : index
    %9 = vector.load %arg2[%c2, %c0_8, %c0_9] : memref<10x28x120xf32, #tpu.memory_space<vmem>>, vector<1x28x120xf32>
    %10 = vector.shape_cast %9 : vector<1x28x120xf32> to vector<28x120xf32>
    %cst_10 = arith.constant dense<0.000000e+00> : vector<12x120xf32>
    %11 = tpu.matmul %8, %10, %cst_10 {dimension_numbers = #tpu.dot_dimension_numbers<[1], [0], [0], [1], [0, 0, 1, 1], [], []>} : vector<12x28xf32>, vector<28x120xf32>, vector<12x120xf32> -> vector<12x120xf32>
    %12 = arith.addf %7, %11 : vector<12x120xf32>
    %13 = vector.extract_strided_slice %1 {offsets = [1, 0], sizes = [12, 28], strides = [1, 1]} : vector<14x28xf32> to vector<12x28xf32>
    %c4 = arith.constant 4 : index
    %c0_11 = arith.constant 0 : index
    %c0_12 = arith.constant 0 : index
    %14 = vector.load %arg2[%c4, %c0_11, %c0_12] : memref<10x28x120xf32, #tpu.memory_space<vmem>>, vector<1x28x120xf32>
    %15 = vector.shape_cast %14 : vector<1x28x120xf32> to vector<28x120xf32>
    %cst_13 = arith.constant dense<0.000000e+00> : vector<12x120xf32>
    %16 = tpu.matmul %13, %15, %cst_13 {dimension_numbers = #tpu.dot_dimension_numbers<[1], [0], [0], [1], [0, 0, 1, 1], [], []>} : vector<12x28xf32>, vector<28x120xf32>, vector<12x120xf32> -> vector<12x120xf32>
    %17 = arith.addf %12, %16 : vector<12x120xf32>
    %18 = vector.extract_strided_slice %3 {offsets = [1, 0], sizes = [12, 28], strides = [1, 1]} : vector<14x28xf32> to vector<12x28xf32>
    %c6 = arith.constant 6 : index
    %c0_14 = arith.constant 0 : index
    %c0_15 = arith.constant 0 : index
    %19 = vector.load %arg2[%c6, %c0_14, %c0_15] : memref<10x28x120xf32, #tpu.memory_space<vmem>>, vector<1x28x120xf32>
    %20 = vector.shape_cast %19 : vector<1x28x120xf32> to vector<28x120xf32>
    %cst_16 = arith.constant dense<0.000000e+00> : vector<12x120xf32>
    %21 = tpu.matmul %18, %20, %cst_16 {dimension_numbers = #tpu.dot_dimension_numbers<[1], [0], [0], [1], [0, 0, 1, 1], [], []>} : vector<12x28xf32>, vector<28x120xf32>, vector<12x120xf32> -> vector<12x120xf32>
    %22 = arith.addf %17, %21 : vector<12x120xf32>
    %23 = vector.extract_strided_slice %1 {offsets = [2, 0], sizes = [12, 28], strides = [1, 1]} : vector<14x28xf32> to vector<12x28xf32>
    %c8 = arith.constant 8 : index
    %c0_17 = arith.constant 0 : index
    %c0_18 = arith.constant 0 : index
    %24 = vector.load %arg2[%c8, %c0_17, %c0_18] : memref<10x28x120xf32, #tpu.memory_space<vmem>>, vector<1x28x120xf32>
    %25 = vector.shape_cast %24 : vector<1x28x120xf32> to vector<28x120xf32>
    %cst_19 = arith.constant dense<0.000000e+00> : vector<12x120xf32>
    %26 = tpu.matmul %23, %25, %cst_19 {dimension_numbers = #tpu.dot_dimension_numbers<[1], [0], [0], [1], [0, 0, 1, 1], [], []>} : vector<12x28xf32>, vector<28x120xf32>, vector<12x120xf32> -> vector<12x120xf32>
    %27 = arith.addf %22, %26 : vector<12x120xf32>
    %28 = vector.extract_strided_slice %1 {offsets = [0, 0], sizes = [12, 28], strides = [1, 1]} : vector<14x28xf32> to vector<12x28xf32>
    %c1 = arith.constant 1 : index
    %c0_20 = arith.constant 0 : index
    %c0_21 = arith.constant 0 : index
    %29 = vector.load %arg2[%c1, %c0_20, %c0_21] : memref<10x28x120xf32, #tpu.memory_space<vmem>>, vector<1x28x120xf32>
    %30 = vector.shape_cast %29 : vector<1x28x120xf32> to vector<28x120xf32>
    %cst_22 = arith.constant dense<0.000000e+00> : vector<12x120xf32>
    %31 = tpu.matmul %28, %30, %cst_22 {dimension_numbers = #tpu.dot_dimension_numbers<[1], [0], [0], [1], [0, 0, 1, 1], [], []>} : vector<12x28xf32>, vector<28x120xf32>, vector<12x120xf32> -> vector<12x120xf32>
    %32 = vector.extract_strided_slice %3 {offsets = [0, 0], sizes = [12, 28], strides = [1, 1]} : vector<14x28xf32> to vector<12x28xf32>
    %c3 = arith.constant 3 : index
    %c0_23 = arith.constant 0 : index
    %c0_24 = arith.constant 0 : index
    %33 = vector.load %arg2[%c3, %c0_23, %c0_24] : memref<10x28x120xf32, #tpu.memory_space<vmem>>, vector<1x28x120xf32>
    %34 = vector.shape_cast %33 : vector<1x28x120xf32> to vector<28x120xf32>
    %cst_25 = arith.constant dense<0.000000e+00> : vector<12x120xf32>
    %35 = tpu.matmul %32, %34, %cst_25 {dimension_numbers = #tpu.dot_dimension_numbers<[1], [0], [0], [1], [0, 0, 1, 1], [], []>} : vector<12x28xf32>, vector<28x120xf32>, vector<12x120xf32> -> vector<12x120xf32>
    %36 = arith.addf %31, %35 : vector<12x120xf32>
    %37 = vector.extract_strided_slice %1 {offsets = [1, 0], sizes = [12, 28], strides = [1, 1]} : vector<14x28xf32> to vector<12x28xf32>
    %c5 = arith.constant 5 : index
    %c0_26 = arith.constant 0 : index
    %c0_27 = arith.constant 0 : index
    %38 = vector.load %arg2[%c5, %c0_26, %c0_27] : memref<10x28x120xf32, #tpu.memory_space<vmem>>, vector<1x28x120xf32>
    %39 = vector.shape_cast %38 : vector<1x28x120xf32> to vector<28x120xf32>
    %cst_28 = arith.constant dense<0.000000e+00> : vector<12x120xf32>
    %40 = tpu.matmul %37, %39, %cst_28 {dimension_numbers = #tpu.dot_dimension_numbers<[1], [0], [0], [1], [0, 0, 1, 1], [], []>} : vector<12x28xf32>, vector<28x120xf32>, vector<12x120xf32> -> vector<12x120xf32>
    %41 = arith.addf %36, %40 : vector<12x120xf32>
    %42 = vector.extract_strided_slice %3 {offsets = [1, 0], sizes = [12, 28], strides = [1, 1]} : vector<14x28xf32> to vector<12x28xf32>
    %c7 = arith.constant 7 : index
    %c0_29 = arith.constant 0 : index
    %c0_30 = arith.constant 0 : index
    %43 = vector.load %arg2[%c7, %c0_29, %c0_30] : memref<10x28x120xf32, #tpu.memory_space<vmem>>, vector<1x28x120xf32>
    %44 = vector.shape_cast %43 : vector<1x28x120xf32> to vector<28x120xf32>
    %cst_31 = arith.constant dense<0.000000e+00> : vector<12x120xf32>
    %45 = tpu.matmul %42, %44, %cst_31 {dimension_numbers = #tpu.dot_dimension_numbers<[1], [0], [0], [1], [0, 0, 1, 1], [], []>} : vector<12x28xf32>, vector<28x120xf32>, vector<12x120xf32> -> vector<12x120xf32>
    %46 = arith.addf %41, %45 : vector<12x120xf32>
    %47 = vector.extract_strided_slice %1 {offsets = [2, 0], sizes = [12, 28], strides = [1, 1]} : vector<14x28xf32> to vector<12x28xf32>
    %c9 = arith.constant 9 : index
    %c0_32 = arith.constant 0 : index
    %c0_33 = arith.constant 0 : index
    %48 = vector.load %arg2[%c9, %c0_32, %c0_33] : memref<10x28x120xf32, #tpu.memory_space<vmem>>, vector<1x28x120xf32>
    %49 = vector.shape_cast %48 : vector<1x28x120xf32> to vector<28x120xf32>
    %cst_34 = arith.constant dense<0.000000e+00> : vector<12x120xf32>
    %50 = tpu.matmul %47, %49, %cst_34 {dimension_numbers = #tpu.dot_dimension_numbers<[1], [0], [0], [1], [0, 0, 1, 1], [], []>} : vector<12x28xf32>, vector<28x120xf32>, vector<12x120xf32> -> vector<12x120xf32>
    %51 = arith.addf %46, %50 : vector<12x120xf32>
    %52 = vector.extract_strided_slice %3 {offsets = [0, 0], sizes = [12, 28], strides = [1, 1]} : vector<14x28xf32> to vector<12x28xf32>
    %c0_35 = arith.constant 0 : index
    %c0_36 = arith.constant 0 : index
    %c0_37 = arith.constant 0 : index
    %53 = vector.load %arg2[%c0_35, %c0_36, %c0_37] : memref<10x28x120xf32, #tpu.memory_space<vmem>>, vector<1x28x120xf32>
    %54 = vector.shape_cast %53 : vector<1x28x120xf32> to vector<28x120xf32>
    %cst_38 = arith.constant dense<0.000000e+00> : vector<12x120xf32>
    %55 = tpu.matmul %52, %54, %cst_38 {dimension_numbers = #tpu.dot_dimension_numbers<[1], [0], [0], [1], [0, 0, 1, 1], [], []>} : vector<12x28xf32>, vector<28x120xf32>, vector<12x120xf32> -> vector<12x120xf32>
    %56 = vector.extract_strided_slice %1 {offsets = [1, 0], sizes = [12, 28], strides = [1, 1]} : vector<14x28xf32> to vector<12x28xf32>
    %c2_39 = arith.constant 2 : index
    %c0_40 = arith.constant 0 : index
    %c0_41 = arith.constant 0 : index
    %57 = vector.load %arg2[%c2_39, %c0_40, %c0_41] : memref<10x28x120xf32, #tpu.memory_space<vmem>>, vector<1x28x120xf32>
    %58 = vector.shape_cast %57 : vector<1x28x120xf32> to vector<28x120xf32>
    %cst_42 = arith.constant dense<0.000000e+00> : vector<12x120xf32>
    %59 = tpu.matmul %56, %58, %cst_42 {dimension_numbers = #tpu.dot_dimension_numbers<[1], [0], [0], [1], [0, 0, 1, 1], [], []>} : vector<12x28xf32>, vector<28x120xf32>, vector<12x120xf32> -> vector<12x120xf32>
    %60 = arith.addf %55, %59 : vector<12x120xf32>
    %61 = vector.extract_strided_slice %3 {offsets = [1, 0], sizes = [12, 28], strides = [1, 1]} : vector<14x28xf32> to vector<12x28xf32>
    %c4_43 = arith.constant 4 : index
    %c0_44 = arith.constant 0 : index
    %c0_45 = arith.constant 0 : index
    %62 = vector.load %arg2[%c4_43, %c0_44, %c0_45] : memref<10x28x120xf32, #tpu.memory_space<vmem>>, vector<1x28x120xf32>
    %63 = vector.shape_cast %62 : vector<1x28x120xf32> to vector<28x120xf32>
    %cst_46 = arith.constant dense<0.000000e+00> : vector<12x120xf32>
    %64 = tpu.matmul %61, %63, %cst_46 {dimension_numbers = #tpu.dot_dimension_numbers<[1], [0], [0], [1], [0, 0, 1, 1], [], []>} : vector<12x28xf32>, vector<28x120xf32>, vector<12x120xf32> -> vector<12x120xf32>
    %65 = arith.addf %60, %64 : vector<12x120xf32>
    %66 = vector.extract_strided_slice %1 {offsets = [2, 0], sizes = [12, 28], strides = [1, 1]} : vector<14x28xf32> to vector<12x28xf32>
    %c6_47 = arith.constant 6 : index
    %c0_48 = arith.constant 0 : index
    %c0_49 = arith.constant 0 : index
    %67 = vector.load %arg2[%c6_47, %c0_48, %c0_49] : memref<10x28x120xf32, #tpu.memory_space<vmem>>, vector<1x28x120xf32>
    %68 = vector.shape_cast %67 : vector<1x28x120xf32> to vector<28x120xf32>
    %cst_50 = arith.constant dense<0.000000e+00> : vector<12x120xf32>
    %69 = tpu.matmul %66, %68, %cst_50 {dimension_numbers = #tpu.dot_dimension_numbers<[1], [0], [0], [1], [0, 0, 1, 1], [], []>} : vector<12x28xf32>, vector<28x120xf32>, vector<12x120xf32> -> vector<12x120xf32>
    %70 = arith.addf %65, %69 : vector<12x120xf32>
    %71 = vector.extract_strided_slice %3 {offsets = [2, 0], sizes = [12, 28], strides = [1, 1]} : vector<14x28xf32> to vector<12x28xf32>
    %c8_51 = arith.constant 8 : index
    %c0_52 = arith.constant 0 : index
    %c0_53 = arith.constant 0 : index
    %72 = vector.load %arg2[%c8_51, %c0_52, %c0_53] : memref<10x28x120xf32, #tpu.memory_space<vmem>>, vector<1x28x120xf32>
    %73 = vector.shape_cast %72 : vector<1x28x120xf32> to vector<28x120xf32>
    %cst_54 = arith.constant dense<0.000000e+00> : vector<12x120xf32>
    %74 = tpu.matmul %71, %73, %cst_54 {dimension_numbers = #tpu.dot_dimension_numbers<[1], [0], [0], [1], [0, 0, 1, 1], [], []>} : vector<12x28xf32>, vector<28x120xf32>, vector<12x120xf32> -> vector<12x120xf32>
    %75 = arith.addf %70, %74 : vector<12x120xf32>
    %76 = vector.extract_strided_slice %3 {offsets = [0, 0], sizes = [12, 28], strides = [1, 1]} : vector<14x28xf32> to vector<12x28xf32>
    %c1_55 = arith.constant 1 : index
    %c0_56 = arith.constant 0 : index
    %c0_57 = arith.constant 0 : index
    %77 = vector.load %arg2[%c1_55, %c0_56, %c0_57] : memref<10x28x120xf32, #tpu.memory_space<vmem>>, vector<1x28x120xf32>
    %78 = vector.shape_cast %77 : vector<1x28x120xf32> to vector<28x120xf32>
    %cst_58 = arith.constant dense<0.000000e+00> : vector<12x120xf32>
    %79 = tpu.matmul %76, %78, %cst_58 {dimension_numbers = #tpu.dot_dimension_numbers<[1], [0], [0], [1], [0, 0, 1, 1], [], []>} : vector<12x28xf32>, vector<28x120xf32>, vector<12x120xf32> -> vector<12x120xf32>
    %80 = vector.extract_strided_slice %1 {offsets = [1, 0], sizes = [12, 28], strides = [1, 1]} : vector<14x28xf32> to vector<12x28xf32>
    %c3_59 = arith.constant 3 : index
    %c0_60 = arith.constant 0 : index
    %c0_61 = arith.constant 0 : index
    %81 = vector.load %arg2[%c3_59, %c0_60, %c0_61] : memref<10x28x120xf32, #tpu.memory_space<vmem>>, vector<1x28x120xf32>
    %82 = vector.shape_cast %81 : vector<1x28x120xf32> to vector<28x120xf32>
    %cst_62 = arith.constant dense<0.000000e+00> : vector<12x120xf32>
    %83 = tpu.matmul %80, %82, %cst_62 {dimension_numbers = #tpu.dot_dimension_numbers<[1], [0], [0], [1], [0, 0, 1, 1], [], []>} : vector<12x28xf32>, vector<28x120xf32>, vector<12x120xf32> -> vector<12x120xf32>
    %84 = arith.addf %79, %83 : vector<12x120xf32>
    %85 = vector.extract_strided_slice %3 {offsets = [1, 0], sizes = [12, 28], strides = [1, 1]} : vector<14x28xf32> to vector<12x28xf32>
    %c5_63 = arith.constant 5 : index
    %c0_64 = arith.constant 0 : index
    %c0_65 = arith.constant 0 : index
    %86 = vector.load %arg2[%c5_63, %c0_64, %c0_65] : memref<10x28x120xf32, #tpu.memory_space<vmem>>, vector<1x28x120xf32>
    %87 = vector.shape_cast %86 : vector<1x28x120xf32> to vector<28x120xf32>
    %cst_66 = arith.constant dense<0.000000e+00> : vector<12x120xf32>
    %88 = tpu.matmul %85, %87, %cst_66 {dimension_numbers = #tpu.dot_dimension_numbers<[1], [0], [0], [1], [0, 0, 1, 1], [], []>} : vector<12x28xf32>, vector<28x120xf32>, vector<12x120xf32> -> vector<12x120xf32>
    %89 = arith.addf %84, %88 : vector<12x120xf32>
    %90 = vector.extract_strided_slice %1 {offsets = [2, 0], sizes = [12, 28], strides = [1, 1]} : vector<14x28xf32> to vector<12x28xf32>
    %c7_67 = arith.constant 7 : index
    %c0_68 = arith.constant 0 : index
    %c0_69 = arith.constant 0 : index
    %91 = vector.load %arg2[%c7_67, %c0_68, %c0_69] : memref<10x28x120xf32, #tpu.memory_space<vmem>>, vector<1x28x120xf32>
    %92 = vector.shape_cast %91 : vector<1x28x120xf32> to vector<28x120xf32>
    %cst_70 = arith.constant dense<0.000000e+00> : vector<12x120xf32>
    %93 = tpu.matmul %90, %92, %cst_70 {dimension_numbers = #tpu.dot_dimension_numbers<[1], [0], [0], [1], [0, 0, 1, 1], [], []>} : vector<12x28xf32>, vector<28x120xf32>, vector<12x120xf32> -> vector<12x120xf32>
    %94 = arith.addf %89, %93 : vector<12x120xf32>
    %95 = vector.extract_strided_slice %3 {offsets = [2, 0], sizes = [12, 28], strides = [1, 1]} : vector<14x28xf32> to vector<12x28xf32>
    %c9_71 = arith.constant 9 : index
    %c0_72 = arith.constant 0 : index
    %c0_73 = arith.constant 0 : index
    %96 = vector.load %arg2[%c9_71, %c0_72, %c0_73] : memref<10x28x120xf32, #tpu.memory_space<vmem>>, vector<1x28x120xf32>
    %97 = vector.shape_cast %96 : vector<1x28x120xf32> to vector<28x120xf32>
    %cst_74 = arith.constant dense<0.000000e+00> : vector<12x120xf32>
    %98 = tpu.matmul %95, %97, %cst_74 {dimension_numbers = #tpu.dot_dimension_numbers<[1], [0], [0], [1], [0, 0, 1, 1], [], []>} : vector<12x28xf32>, vector<28x120xf32>, vector<12x120xf32> -> vector<12x120xf32>
    %99 = arith.addf %94, %98 : vector<12x120xf32>
    %100 = arith.maximumf %27, %51 : vector<12x120xf32>
    %101 = arith.maximumf %75, %99 : vector<12x120xf32>
    %102 = arith.maximumf %100, %101 : vector<12x120xf32>
    %c0_75 = arith.constant 0 : index
    %c0_76 = arith.constant 0 : index
    %103 = vector.load %arg4[%c0_75, %c0_76] : memref<1x120xf32, #tpu.memory_space<vmem>>, vector<1x120xf32>
    %104 = vector.broadcast %103 : vector<1x120xf32> to vector<12x120xf32>
    %105 = arith.addf %102, %104 : vector<12x120xf32>
    %cst_77 = arith.constant 0.000000e+00 : f32
    %106 = vector.broadcast %cst_77 : f32 to vector<12x120xf32>
    %107 = arith.maximumf %105, %106 : vector<12x120xf32>
    %108 = vector.extract_strided_slice %107 {offsets = [0, 0], sizes = [8, 80], strides = [1, 1]} : vector<12x120xf32> to vector<8x80xf32>
    %c0_78 = arith.constant 0 : index
    %c0_79 = arith.constant 0 : index
    %c0_80 = arith.constant 0 : index
    %109 = vector.load %arg3[%c0_78, %c0_79, %c0_80] : memref<25x80x160xf32, #tpu.memory_space<vmem>>, vector<1x80x160xf32>
    %110 = vector.shape_cast %109 : vector<1x80x160xf32> to vector<80x160xf32>
    %cst_81 = arith.constant dense<0.000000e+00> : vector<8x160xf32>
    %111 = tpu.matmul %108, %110, %cst_81 {dimension_numbers = #tpu.dot_dimension_numbers<[1], [0], [0], [1], [0, 0, 1, 1], [], []>} : vector<8x80xf32>, vector<80x160xf32>, vector<8x160xf32> -> vector<8x160xf32>
    %112 = vector.extract_strided_slice %107 {offsets = [0, 10], sizes = [8, 80], strides = [1, 1]} : vector<12x120xf32> to vector<8x80xf32>
    %c1_82 = arith.constant 1 : index
    %c0_83 = arith.constant 0 : index
    %c0_84 = arith.constant 0 : index
    %113 = vector.load %arg3[%c1_82, %c0_83, %c0_84] : memref<25x80x160xf32, #tpu.memory_space<vmem>>, vector<1x80x160xf32>
    %114 = vector.shape_cast %113 : vector<1x80x160xf32> to vector<80x160xf32>
    %cst_85 = arith.constant dense<0.000000e+00> : vector<8x160xf32>
    %115 = tpu.matmul %112, %114, %cst_85 {dimension_numbers = #tpu.dot_dimension_numbers<[1], [0], [0], [1], [0, 0, 1, 1], [], []>} : vector<8x80xf32>, vector<80x160xf32>, vector<8x160xf32> -> vector<8x160xf32>
    %116 = arith.addf %111, %115 : vector<8x160xf32>
    %117 = vector.extract_strided_slice %107 {offsets = [0, 20], sizes = [8, 80], strides = [1, 1]} : vector<12x120xf32> to vector<8x80xf32>
    %c2_86 = arith.constant 2 : index
    %c0_87 = arith.constant 0 : index
    %c0_88 = arith.constant 0 : index
    %118 = vector.load %arg3[%c2_86, %c0_87, %c0_88] : memref<25x80x160xf32, #tpu.memory_space<vmem>>, vector<1x80x160xf32>
    %119 = vector.shape_cast %118 : vector<1x80x160xf32> to vector<80x160xf32>
    %cst_89 = arith.constant dense<0.000000e+00> : vector<8x160xf32>
    %120 = tpu.matmul %117, %119, %cst_89 {dimension_numbers = #tpu.dot_dimension_numbers<[1], [0], [0], [1], [0, 0, 1, 1], [], []>} : vector<8x80xf32>, vector<80x160xf32>, vector<8x160xf32> -> vector<8x160xf32>
    %121 = arith.addf %116, %120 : vector<8x160xf32>
    %122 = vector.extract_strided_slice %107 {offsets = [0, 30], sizes = [8, 80], strides = [1, 1]} : vector<12x120xf32> to vector<8x80xf32>
    %c3_90 = arith.constant 3 : index
    %c0_91 = arith.constant 0 : index
    %c0_92 = arith.constant 0 : index
    %123 = vector.load %arg3[%c3_90, %c0_91, %c0_92] : memref<25x80x160xf32, #tpu.memory_space<vmem>>, vector<1x80x160xf32>
    %124 = vector.shape_cast %123 : vector<1x80x160xf32> to vector<80x160xf32>
    %cst_93 = arith.constant dense<0.000000e+00> : vector<8x160xf32>
    %125 = tpu.matmul %122, %124, %cst_93 {dimension_numbers = #tpu.dot_dimension_numbers<[1], [0], [0], [1], [0, 0, 1, 1], [], []>} : vector<8x80xf32>, vector<80x160xf32>, vector<8x160xf32> -> vector<8x160xf32>
    %126 = arith.addf %121, %125 : vector<8x160xf32>
    %127 = vector.extract_strided_slice %107 {offsets = [0, 40], sizes = [8, 80], strides = [1, 1]} : vector<12x120xf32> to vector<8x80xf32>
    %c4_94 = arith.constant 4 : index
    %c0_95 = arith.constant 0 : index
    %c0_96 = arith.constant 0 : index
    %128 = vector.load %arg3[%c4_94, %c0_95, %c0_96] : memref<25x80x160xf32, #tpu.memory_space<vmem>>, vector<1x80x160xf32>
    %129 = vector.shape_cast %128 : vector<1x80x160xf32> to vector<80x160xf32>
    %cst_97 = arith.constant dense<0.000000e+00> : vector<8x160xf32>
    %130 = tpu.matmul %127, %129, %cst_97 {dimension_numbers = #tpu.dot_dimension_numbers<[1], [0], [0], [1], [0, 0, 1, 1], [], []>} : vector<8x80xf32>, vector<80x160xf32>, vector<8x160xf32> -> vector<8x160xf32>
    %131 = arith.addf %126, %130 : vector<8x160xf32>
    %132 = vector.extract_strided_slice %107 {offsets = [1, 0], sizes = [8, 80], strides = [1, 1]} : vector<12x120xf32> to vector<8x80xf32>
    %c5_98 = arith.constant 5 : index
    %c0_99 = arith.constant 0 : index
    %c0_100 = arith.constant 0 : index
    %133 = vector.load %arg3[%c5_98, %c0_99, %c0_100] : memref<25x80x160xf32, #tpu.memory_space<vmem>>, vector<1x80x160xf32>
    %134 = vector.shape_cast %133 : vector<1x80x160xf32> to vector<80x160xf32>
    %cst_101 = arith.constant dense<0.000000e+00> : vector<8x160xf32>
    %135 = tpu.matmul %132, %134, %cst_101 {dimension_numbers = #tpu.dot_dimension_numbers<[1], [0], [0], [1], [0, 0, 1, 1], [], []>} : vector<8x80xf32>, vector<80x160xf32>, vector<8x160xf32> -> vector<8x160xf32>
    %136 = arith.addf %131, %135 : vector<8x160xf32>
    %137 = vector.extract_strided_slice %107 {offsets = [1, 10], sizes = [8, 80], strides = [1, 1]} : vector<12x120xf32> to vector<8x80xf32>
    %c6_102 = arith.constant 6 : index
    %c0_103 = arith.constant 0 : index
    %c0_104 = arith.constant 0 : index
    %138 = vector.load %arg3[%c6_102, %c0_103, %c0_104] : memref<25x80x160xf32, #tpu.memory_space<vmem>>, vector<1x80x160xf32>
    %139 = vector.shape_cast %138 : vector<1x80x160xf32> to vector<80x160xf32>
    %cst_105 = arith.constant dense<0.000000e+00> : vector<8x160xf32>
    %140 = tpu.matmul %137, %139, %cst_105 {dimension_numbers = #tpu.dot_dimension_numbers<[1], [0], [0], [1], [0, 0, 1, 1], [], []>} : vector<8x80xf32>, vector<80x160xf32>, vector<8x160xf32> -> vector<8x160xf32>
    %141 = arith.addf %136, %140 : vector<8x160xf32>
    %142 = vector.extract_strided_slice %107 {offsets = [1, 20], sizes = [8, 80], strides = [1, 1]} : vector<12x120xf32> to vector<8x80xf32>
    %c7_106 = arith.constant 7 : index
    %c0_107 = arith.constant 0 : index
    %c0_108 = arith.constant 0 : index
    %143 = vector.load %arg3[%c7_106, %c0_107, %c0_108] : memref<25x80x160xf32, #tpu.memory_space<vmem>>, vector<1x80x160xf32>
    %144 = vector.shape_cast %143 : vector<1x80x160xf32> to vector<80x160xf32>
    %cst_109 = arith.constant dense<0.000000e+00> : vector<8x160xf32>
    %145 = tpu.matmul %142, %144, %cst_109 {dimension_numbers = #tpu.dot_dimension_numbers<[1], [0], [0], [1], [0, 0, 1, 1], [], []>} : vector<8x80xf32>, vector<80x160xf32>, vector<8x160xf32> -> vector<8x160xf32>
    %146 = arith.addf %141, %145 : vector<8x160xf32>
    %147 = vector.extract_strided_slice %107 {offsets = [1, 30], sizes = [8, 80], strides = [1, 1]} : vector<12x120xf32> to vector<8x80xf32>
    %c8_110 = arith.constant 8 : index
    %c0_111 = arith.constant 0 : index
    %c0_112 = arith.constant 0 : index
    %148 = vector.load %arg3[%c8_110, %c0_111, %c0_112] : memref<25x80x160xf32, #tpu.memory_space<vmem>>, vector<1x80x160xf32>
    %149 = vector.shape_cast %148 : vector<1x80x160xf32> to vector<80x160xf32>
    %cst_113 = arith.constant dense<0.000000e+00> : vector<8x160xf32>
    %150 = tpu.matmul %147, %149, %cst_113 {dimension_numbers = #tpu.dot_dimension_numbers<[1], [0], [0], [1], [0, 0, 1, 1], [], []>} : vector<8x80xf32>, vector<80x160xf32>, vector<8x160xf32> -> vector<8x160xf32>
    %151 = arith.addf %146, %150 : vector<8x160xf32>
    %152 = vector.extract_strided_slice %107 {offsets = [1, 40], sizes = [8, 80], strides = [1, 1]} : vector<12x120xf32> to vector<8x80xf32>
    %c9_114 = arith.constant 9 : index
    %c0_115 = arith.constant 0 : index
    %c0_116 = arith.constant 0 : index
    %153 = vector.load %arg3[%c9_114, %c0_115, %c0_116] : memref<25x80x160xf32, #tpu.memory_space<vmem>>, vector<1x80x160xf32>
    %154 = vector.shape_cast %153 : vector<1x80x160xf32> to vector<80x160xf32>
    %cst_117 = arith.constant dense<0.000000e+00> : vector<8x160xf32>
    %155 = tpu.matmul %152, %154, %cst_117 {dimension_numbers = #tpu.dot_dimension_numbers<[1], [0], [0], [1], [0, 0, 1, 1], [], []>} : vector<8x80xf32>, vector<80x160xf32>, vector<8x160xf32> -> vector<8x160xf32>
    %156 = arith.addf %151, %155 : vector<8x160xf32>
    %157 = vector.extract_strided_slice %107 {offsets = [2, 0], sizes = [8, 80], strides = [1, 1]} : vector<12x120xf32> to vector<8x80xf32>
    %c10 = arith.constant 10 : index
    %c0_118 = arith.constant 0 : index
    %c0_119 = arith.constant 0 : index
    %158 = vector.load %arg3[%c10, %c0_118, %c0_119] : memref<25x80x160xf32, #tpu.memory_space<vmem>>, vector<1x80x160xf32>
    %159 = vector.shape_cast %158 : vector<1x80x160xf32> to vector<80x160xf32>
    %cst_120 = arith.constant dense<0.000000e+00> : vector<8x160xf32>
    %160 = tpu.matmul %157, %159, %cst_120 {dimension_numbers = #tpu.dot_dimension_numbers<[1], [0], [0], [1], [0, 0, 1, 1], [], []>} : vector<8x80xf32>, vector<80x160xf32>, vector<8x160xf32> -> vector<8x160xf32>
    %161 = arith.addf %156, %160 : vector<8x160xf32>
    %162 = vector.extract_strided_slice %107 {offsets = [2, 10], sizes = [8, 80], strides = [1, 1]} : vector<12x120xf32> to vector<8x80xf32>
    %c11 = arith.constant 11 : index
    %c0_121 = arith.constant 0 : index
    %c0_122 = arith.constant 0 : index
    %163 = vector.load %arg3[%c11, %c0_121, %c0_122] : memref<25x80x160xf32, #tpu.memory_space<vmem>>, vector<1x80x160xf32>
    %164 = vector.shape_cast %163 : vector<1x80x160xf32> to vector<80x160xf32>
    %cst_123 = arith.constant dense<0.000000e+00> : vector<8x160xf32>
    %165 = tpu.matmul %162, %164, %cst_123 {dimension_numbers = #tpu.dot_dimension_numbers<[1], [0], [0], [1], [0, 0, 1, 1], [], []>} : vector<8x80xf32>, vector<80x160xf32>, vector<8x160xf32> -> vector<8x160xf32>
    %166 = arith.addf %161, %165 : vector<8x160xf32>
    %167 = vector.extract_strided_slice %107 {offsets = [2, 20], sizes = [8, 80], strides = [1, 1]} : vector<12x120xf32> to vector<8x80xf32>
    %c12 = arith.constant 12 : index
    %c0_124 = arith.constant 0 : index
    %c0_125 = arith.constant 0 : index
    %168 = vector.load %arg3[%c12, %c0_124, %c0_125] : memref<25x80x160xf32, #tpu.memory_space<vmem>>, vector<1x80x160xf32>
    %169 = vector.shape_cast %168 : vector<1x80x160xf32> to vector<80x160xf32>
    %cst_126 = arith.constant dense<0.000000e+00> : vector<8x160xf32>
    %170 = tpu.matmul %167, %169, %cst_126 {dimension_numbers = #tpu.dot_dimension_numbers<[1], [0], [0], [1], [0, 0, 1, 1], [], []>} : vector<8x80xf32>, vector<80x160xf32>, vector<8x160xf32> -> vector<8x160xf32>
    %171 = arith.addf %166, %170 : vector<8x160xf32>
    %172 = vector.extract_strided_slice %107 {offsets = [2, 30], sizes = [8, 80], strides = [1, 1]} : vector<12x120xf32> to vector<8x80xf32>
    %c13 = arith.constant 13 : index
    %c0_127 = arith.constant 0 : index
    %c0_128 = arith.constant 0 : index
    %173 = vector.load %arg3[%c13, %c0_127, %c0_128] : memref<25x80x160xf32, #tpu.memory_space<vmem>>, vector<1x80x160xf32>
    %174 = vector.shape_cast %173 : vector<1x80x160xf32> to vector<80x160xf32>
    %cst_129 = arith.constant dense<0.000000e+00> : vector<8x160xf32>
    %175 = tpu.matmul %172, %174, %cst_129 {dimension_numbers = #tpu.dot_dimension_numbers<[1], [0], [0], [1], [0, 0, 1, 1], [], []>} : vector<8x80xf32>, vector<80x160xf32>, vector<8x160xf32> -> vector<8x160xf32>
    %176 = arith.addf %171, %175 : vector<8x160xf32>
    %177 = vector.extract_strided_slice %107 {offsets = [2, 40], sizes = [8, 80], strides = [1, 1]} : vector<12x120xf32> to vector<8x80xf32>
    %c14 = arith.constant 14 : index
    %c0_130 = arith.constant 0 : index
    %c0_131 = arith.constant 0 : index
    %178 = vector.load %arg3[%c14, %c0_130, %c0_131] : memref<25x80x160xf32, #tpu.memory_space<vmem>>, vector<1x80x160xf32>
    %179 = vector.shape_cast %178 : vector<1x80x160xf32> to vector<80x160xf32>
    %cst_132 = arith.constant dense<0.000000e+00> : vector<8x160xf32>
    %180 = tpu.matmul %177, %179, %cst_132 {dimension_numbers = #tpu.dot_dimension_numbers<[1], [0], [0], [1], [0, 0, 1, 1], [], []>} : vector<8x80xf32>, vector<80x160xf32>, vector<8x160xf32> -> vector<8x160xf32>
    %181 = arith.addf %176, %180 : vector<8x160xf32>
    %182 = vector.extract_strided_slice %107 {offsets = [3, 0], sizes = [8, 80], strides = [1, 1]} : vector<12x120xf32> to vector<8x80xf32>
    %c15 = arith.constant 15 : index
    %c0_133 = arith.constant 0 : index
    %c0_134 = arith.constant 0 : index
    %183 = vector.load %arg3[%c15, %c0_133, %c0_134] : memref<25x80x160xf32, #tpu.memory_space<vmem>>, vector<1x80x160xf32>
    %184 = vector.shape_cast %183 : vector<1x80x160xf32> to vector<80x160xf32>
    %cst_135 = arith.constant dense<0.000000e+00> : vector<8x160xf32>
    %185 = tpu.matmul %182, %184, %cst_135 {dimension_numbers = #tpu.dot_dimension_numbers<[1], [0], [0], [1], [0, 0, 1, 1], [], []>} : vector<8x80xf32>, vector<80x160xf32>, vector<8x160xf32> -> vector<8x160xf32>
    %186 = arith.addf %181, %185 : vector<8x160xf32>
    %187 = vector.extract_strided_slice %107 {offsets = [3, 10], sizes = [8, 80], strides = [1, 1]} : vector<12x120xf32> to vector<8x80xf32>
    %c16 = arith.constant 16 : index
    %c0_136 = arith.constant 0 : index
    %c0_137 = arith.constant 0 : index
    %188 = vector.load %arg3[%c16, %c0_136, %c0_137] : memref<25x80x160xf32, #tpu.memory_space<vmem>>, vector<1x80x160xf32>
    %189 = vector.shape_cast %188 : vector<1x80x160xf32> to vector<80x160xf32>
    %cst_138 = arith.constant dense<0.000000e+00> : vector<8x160xf32>
    %190 = tpu.matmul %187, %189, %cst_138 {dimension_numbers = #tpu.dot_dimension_numbers<[1], [0], [0], [1], [0, 0, 1, 1], [], []>} : vector<8x80xf32>, vector<80x160xf32>, vector<8x160xf32> -> vector<8x160xf32>
    %191 = arith.addf %186, %190 : vector<8x160xf32>
    %192 = vector.extract_strided_slice %107 {offsets = [3, 20], sizes = [8, 80], strides = [1, 1]} : vector<12x120xf32> to vector<8x80xf32>
    %c17 = arith.constant 17 : index
    %c0_139 = arith.constant 0 : index
    %c0_140 = arith.constant 0 : index
    %193 = vector.load %arg3[%c17, %c0_139, %c0_140] : memref<25x80x160xf32, #tpu.memory_space<vmem>>, vector<1x80x160xf32>
    %194 = vector.shape_cast %193 : vector<1x80x160xf32> to vector<80x160xf32>
    %cst_141 = arith.constant dense<0.000000e+00> : vector<8x160xf32>
    %195 = tpu.matmul %192, %194, %cst_141 {dimension_numbers = #tpu.dot_dimension_numbers<[1], [0], [0], [1], [0, 0, 1, 1], [], []>} : vector<8x80xf32>, vector<80x160xf32>, vector<8x160xf32> -> vector<8x160xf32>
    %196 = arith.addf %191, %195 : vector<8x160xf32>
    %197 = vector.extract_strided_slice %107 {offsets = [3, 30], sizes = [8, 80], strides = [1, 1]} : vector<12x120xf32> to vector<8x80xf32>
    %c18 = arith.constant 18 : index
    %c0_142 = arith.constant 0 : index
    %c0_143 = arith.constant 0 : index
    %198 = vector.load %arg3[%c18, %c0_142, %c0_143] : memref<25x80x160xf32, #tpu.memory_space<vmem>>, vector<1x80x160xf32>
    %199 = vector.shape_cast %198 : vector<1x80x160xf32> to vector<80x160xf32>
    %cst_144 = arith.constant dense<0.000000e+00> : vector<8x160xf32>
    %200 = tpu.matmul %197, %199, %cst_144 {dimension_numbers = #tpu.dot_dimension_numbers<[1], [0], [0], [1], [0, 0, 1, 1], [], []>} : vector<8x80xf32>, vector<80x160xf32>, vector<8x160xf32> -> vector<8x160xf32>
    %201 = arith.addf %196, %200 : vector<8x160xf32>
    %202 = vector.extract_strided_slice %107 {offsets = [3, 40], sizes = [8, 80], strides = [1, 1]} : vector<12x120xf32> to vector<8x80xf32>
    %c19 = arith.constant 19 : index
    %c0_145 = arith.constant 0 : index
    %c0_146 = arith.constant 0 : index
    %203 = vector.load %arg3[%c19, %c0_145, %c0_146] : memref<25x80x160xf32, #tpu.memory_space<vmem>>, vector<1x80x160xf32>
    %204 = vector.shape_cast %203 : vector<1x80x160xf32> to vector<80x160xf32>
    %cst_147 = arith.constant dense<0.000000e+00> : vector<8x160xf32>
    %205 = tpu.matmul %202, %204, %cst_147 {dimension_numbers = #tpu.dot_dimension_numbers<[1], [0], [0], [1], [0, 0, 1, 1], [], []>} : vector<8x80xf32>, vector<80x160xf32>, vector<8x160xf32> -> vector<8x160xf32>
    %206 = arith.addf %201, %205 : vector<8x160xf32>
    %207 = vector.extract_strided_slice %107 {offsets = [4, 0], sizes = [8, 80], strides = [1, 1]} : vector<12x120xf32> to vector<8x80xf32>
    %c20 = arith.constant 20 : index
    %c0_148 = arith.constant 0 : index
    %c0_149 = arith.constant 0 : index
    %208 = vector.load %arg3[%c20, %c0_148, %c0_149] : memref<25x80x160xf32, #tpu.memory_space<vmem>>, vector<1x80x160xf32>
    %209 = vector.shape_cast %208 : vector<1x80x160xf32> to vector<80x160xf32>
    %cst_150 = arith.constant dense<0.000000e+00> : vector<8x160xf32>
    %210 = tpu.matmul %207, %209, %cst_150 {dimension_numbers = #tpu.dot_dimension_numbers<[1], [0], [0], [1], [0, 0, 1, 1], [], []>} : vector<8x80xf32>, vector<80x160xf32>, vector<8x160xf32> -> vector<8x160xf32>
    %211 = arith.addf %206, %210 : vector<8x160xf32>
    %212 = vector.extract_strided_slice %107 {offsets = [4, 10], sizes = [8, 80], strides = [1, 1]} : vector<12x120xf32> to vector<8x80xf32>
    %c21 = arith.constant 21 : index
    %c0_151 = arith.constant 0 : index
    %c0_152 = arith.constant 0 : index
    %213 = vector.load %arg3[%c21, %c0_151, %c0_152] : memref<25x80x160xf32, #tpu.memory_space<vmem>>, vector<1x80x160xf32>
    %214 = vector.shape_cast %213 : vector<1x80x160xf32> to vector<80x160xf32>
    %cst_153 = arith.constant dense<0.000000e+00> : vector<8x160xf32>
    %215 = tpu.matmul %212, %214, %cst_153 {dimension_numbers = #tpu.dot_dimension_numbers<[1], [0], [0], [1], [0, 0, 1, 1], [], []>} : vector<8x80xf32>, vector<80x160xf32>, vector<8x160xf32> -> vector<8x160xf32>
    %216 = arith.addf %211, %215 : vector<8x160xf32>
    %217 = vector.extract_strided_slice %107 {offsets = [4, 20], sizes = [8, 80], strides = [1, 1]} : vector<12x120xf32> to vector<8x80xf32>
    %c22 = arith.constant 22 : index
    %c0_154 = arith.constant 0 : index
    %c0_155 = arith.constant 0 : index
    %218 = vector.load %arg3[%c22, %c0_154, %c0_155] : memref<25x80x160xf32, #tpu.memory_space<vmem>>, vector<1x80x160xf32>
    %219 = vector.shape_cast %218 : vector<1x80x160xf32> to vector<80x160xf32>
    %cst_156 = arith.constant dense<0.000000e+00> : vector<8x160xf32>
    %220 = tpu.matmul %217, %219, %cst_156 {dimension_numbers = #tpu.dot_dimension_numbers<[1], [0], [0], [1], [0, 0, 1, 1], [], []>} : vector<8x80xf32>, vector<80x160xf32>, vector<8x160xf32> -> vector<8x160xf32>
    %221 = arith.addf %216, %220 : vector<8x160xf32>
    %222 = vector.extract_strided_slice %107 {offsets = [4, 30], sizes = [8, 80], strides = [1, 1]} : vector<12x120xf32> to vector<8x80xf32>
    %c23 = arith.constant 23 : index
    %c0_157 = arith.constant 0 : index
    %c0_158 = arith.constant 0 : index
    %223 = vector.load %arg3[%c23, %c0_157, %c0_158] : memref<25x80x160xf32, #tpu.memory_space<vmem>>, vector<1x80x160xf32>
    %224 = vector.shape_cast %223 : vector<1x80x160xf32> to vector<80x160xf32>
    %cst_159 = arith.constant dense<0.000000e+00> : vector<8x160xf32>
    %225 = tpu.matmul %222, %224, %cst_159 {dimension_numbers = #tpu.dot_dimension_numbers<[1], [0], [0], [1], [0, 0, 1, 1], [], []>} : vector<8x80xf32>, vector<80x160xf32>, vector<8x160xf32> -> vector<8x160xf32>
    %226 = arith.addf %221, %225 : vector<8x160xf32>
    %227 = vector.extract_strided_slice %107 {offsets = [4, 40], sizes = [8, 80], strides = [1, 1]} : vector<12x120xf32> to vector<8x80xf32>
    %c24 = arith.constant 24 : index
    %c0_160 = arith.constant 0 : index
    %c0_161 = arith.constant 0 : index
    %228 = vector.load %arg3[%c24, %c0_160, %c0_161] : memref<25x80x160xf32, #tpu.memory_space<vmem>>, vector<1x80x160xf32>
    %229 = vector.shape_cast %228 : vector<1x80x160xf32> to vector<80x160xf32>
    %cst_162 = arith.constant dense<0.000000e+00> : vector<8x160xf32>
    %230 = tpu.matmul %227, %229, %cst_162 {dimension_numbers = #tpu.dot_dimension_numbers<[1], [0], [0], [1], [0, 0, 1, 1], [], []>} : vector<8x80xf32>, vector<80x160xf32>, vector<8x160xf32> -> vector<8x160xf32>
    %231 = arith.addf %226, %230 : vector<8x160xf32>
    %c0_163 = arith.constant 0 : index
    %c0_164 = arith.constant 0 : index
    %232 = vector.load %arg5[%c0_163, %c0_164] : memref<1x160xf32, #tpu.memory_space<vmem>>, vector<1x160xf32>
    %233 = vector.broadcast %232 : vector<1x160xf32> to vector<8x160xf32>
    %234 = arith.addf %231, %233 : vector<8x160xf32>
    %235 = vector.extract_strided_slice %234 {offsets = [0, 0], sizes = [7, 140], strides = [1, 1]} : vector<8x160xf32> to vector<7x140xf32>
    %236 = vector.extract_strided_slice %234 {offsets = [1, 0], sizes = [7, 140], strides = [1, 1]} : vector<8x160xf32> to vector<7x140xf32>
    %237 = arith.maximumf %235, %236 : vector<7x140xf32>
    %238 = vector.extract_strided_slice %234 {offsets = [0, 20], sizes = [7, 140], strides = [1, 1]} : vector<8x160xf32> to vector<7x140xf32>
    %239 = vector.extract_strided_slice %234 {offsets = [1, 20], sizes = [7, 140], strides = [1, 1]} : vector<8x160xf32> to vector<7x140xf32>
    %240 = arith.maximumf %238, %239 : vector<7x140xf32>
    %241 = arith.maximumf %237, %240 : vector<7x140xf32>
    %cst_165 = arith.constant 0.000000e+00 : f32
    %242 = vector.broadcast %cst_165 : f32 to vector<7x140xf32>
    %243 = arith.maximumf %241, %242 : vector<7x140xf32>
    %244 = vector.extract_strided_slice %243 {offsets = [0, 0], sizes = [1, 140], strides = [1, 1]} : vector<7x140xf32> to vector<1x140xf32>
    %c0_166 = arith.constant 0 : index
    %c0_167 = arith.constant 0 : index
    %c0_168 = arith.constant 0 : index
    %245 = vector.load %arg6[%c0_166, %c0_167, %c0_168] : memref<4x140x50xf32, #tpu.memory_space<vmem>>, vector<1x140x50xf32>
    %246 = vector.shape_cast %245 : vector<1x140x50xf32> to vector<140x50xf32>
    %cst_169 = arith.constant dense<0.000000e+00> : vector<1x50xf32>
    %247 = tpu.matmul %244, %246, %cst_169 {dimension_numbers = #tpu.dot_dimension_numbers<[1], [0], [0], [1], [0, 0, 1, 1], [], []>} : vector<1x140xf32>, vector<140x50xf32>, vector<1x50xf32> -> vector<1x50xf32>
    %248 = vector.extract_strided_slice %243 {offsets = [2, 0], sizes = [1, 140], strides = [1, 1]} : vector<7x140xf32> to vector<1x140xf32>
    %c1_170 = arith.constant 1 : index
    %c0_171 = arith.constant 0 : index
    %c0_172 = arith.constant 0 : index
    %249 = vector.load %arg6[%c1_170, %c0_171, %c0_172] : memref<4x140x50xf32, #tpu.memory_space<vmem>>, vector<1x140x50xf32>
    %250 = vector.shape_cast %249 : vector<1x140x50xf32> to vector<140x50xf32>
    %cst_173 = arith.constant dense<0.000000e+00> : vector<1x50xf32>
    %251 = tpu.matmul %248, %250, %cst_173 {dimension_numbers = #tpu.dot_dimension_numbers<[1], [0], [0], [1], [0, 0, 1, 1], [], []>} : vector<1x140xf32>, vector<140x50xf32>, vector<1x50xf32> -> vector<1x50xf32>
    %252 = arith.addf %247, %251 : vector<1x50xf32>
    %253 = vector.extract_strided_slice %243 {offsets = [4, 0], sizes = [1, 140], strides = [1, 1]} : vector<7x140xf32> to vector<1x140xf32>
    %c2_174 = arith.constant 2 : index
    %c0_175 = arith.constant 0 : index
    %c0_176 = arith.constant 0 : index
    %254 = vector.load %arg6[%c2_174, %c0_175, %c0_176] : memref<4x140x50xf32, #tpu.memory_space<vmem>>, vector<1x140x50xf32>
    %255 = vector.shape_cast %254 : vector<1x140x50xf32> to vector<140x50xf32>
    %cst_177 = arith.constant dense<0.000000e+00> : vector<1x50xf32>
    %256 = tpu.matmul %253, %255, %cst_177 {dimension_numbers = #tpu.dot_dimension_numbers<[1], [0], [0], [1], [0, 0, 1, 1], [], []>} : vector<1x140xf32>, vector<140x50xf32>, vector<1x50xf32> -> vector<1x50xf32>
    %257 = arith.addf %252, %256 : vector<1x50xf32>
    %258 = vector.extract_strided_slice %243 {offsets = [6, 0], sizes = [1, 140], strides = [1, 1]} : vector<7x140xf32> to vector<1x140xf32>
    %c3_178 = arith.constant 3 : index
    %c0_179 = arith.constant 0 : index
    %c0_180 = arith.constant 0 : index
    %259 = vector.load %arg6[%c3_178, %c0_179, %c0_180] : memref<4x140x50xf32, #tpu.memory_space<vmem>>, vector<1x140x50xf32>
    %260 = vector.shape_cast %259 : vector<1x140x50xf32> to vector<140x50xf32>
    %cst_181 = arith.constant dense<0.000000e+00> : vector<1x50xf32>
    %261 = tpu.matmul %258, %260, %cst_181 {dimension_numbers = #tpu.dot_dimension_numbers<[1], [0], [0], [1], [0, 0, 1, 1], [], []>} : vector<1x140xf32>, vector<140x50xf32>, vector<1x50xf32> -> vector<1x50xf32>
    %262 = arith.addf %257, %261 : vector<1x50xf32>
    %c0_182 = arith.constant 0 : index
    %c0_183 = arith.constant 0 : index
    %263 = vector.load %arg7[%c0_182, %c0_183] : memref<1x50xf32, #tpu.memory_space<vmem>>, vector<1x50xf32>
    %264 = arith.addf %262, %263 : vector<1x50xf32>
    %cst_184 = arith.constant 0.000000e+00 : f32
    %265 = vector.broadcast %cst_184 : f32 to vector<1x50xf32>
    %266 = arith.maximumf %264, %265 : vector<1x50xf32>
    %c0_185 = arith.constant 0 : index
    %c0_186 = arith.constant 0 : index
    %267 = vector.load %arg8[%c0_185, %c0_186] : memref<50x10xf32, #tpu.memory_space<vmem>>, vector<50x10xf32>
    %cst_187 = arith.constant dense<0.000000e+00> : vector<1x10xf32>
    %268 = tpu.matmul %266, %267, %cst_187 {dimension_numbers = #tpu.dot_dimension_numbers<[1], [0], [0], [1], [0, 0, 1, 1], [], []>} : vector<1x50xf32>, vector<50x10xf32>, vector<1x10xf32> -> vector<1x10xf32>
    %c0_188 = arith.constant 0 : index
    %c0_189 = arith.constant 0 : index
    %269 = vector.load %arg9[%c0_188, %c0_189] : memref<1x10xf32, #tpu.memory_space<vmem>>, vector<1x10xf32>
    %270 = arith.addf %268, %269 : vector<1x10xf32>
    %cst_190 = arith.constant dense<0xFF800000> : vector<1xf32>
    %271 = vector.multi_reduction <maximumf>, %270, %cst_190 [1] : vector<1x10xf32> to vector<1xf32>
    %272 = vector.shape_cast %271 : vector<1xf32> to vector<1x1xf32>
    %273 = vector.broadcast %272 : vector<1x1xf32> to vector<1x10xf32>
    %274 = arith.subf %270, %273 : vector<1x10xf32>
    %275 = math.exp %274 : vector<1x10xf32>
    %cst_191 = arith.constant dense<0.000000e+00> : vector<1xf32>
    %276 = vector.multi_reduction <add>, %275, %cst_191 [1] : vector<1x10xf32> to vector<1xf32>
    %277 = vector.shape_cast %276 : vector<1xf32> to vector<1x1xf32>
    %278 = math.log %277 : vector<1x1xf32>
    %279 = vector.broadcast %278 : vector<1x1xf32> to vector<1x10xf32>
    %280 = arith.subf %274, %279 : vector<1x10xf32>
    %c0_192 = arith.constant 0 : index
    %c0_193 = arith.constant 0 : index
    %281 = vector.load %arg10[%c0_192, %c0_193] : memref<2x10xf32, #tpu.memory_space<vmem>>, vector<1x10xf32>
    tpu.vector_store %arg10[%c0_192, %c0_193], %280 {strides = array<i32>} : memref<2x10xf32, #tpu.memory_space<vmem>>, vector<1x10xf32>,
    %c1_194 = arith.constant 1 : index
    %c0_195 = arith.constant 0 : index
    %c0_196 = arith.constant 0 : index
    %282 = vector.load %arg0[%c1_194, %c0_195, %c0_196] : memref<2x14x28xf32, #tpu.memory_space<vmem>>, vector<1x14x28xf32>
    %283 = vector.shape_cast %282 : vector<1x14x28xf32> to vector<14x28xf32>
    %c1_197 = arith.constant 1 : index
    %c0_198 = arith.constant 0 : index
    %c0_199 = arith.constant 0 : index
    %284 = vector.load %arg1[%c1_197, %c0_198, %c0_199] : memref<2x14x28xf32, #tpu.memory_space<vmem>>, vector<1x14x28xf32>
    %285 = vector.shape_cast %284 : vector<1x14x28xf32> to vector<14x28xf32>
    %286 = vector.extract_strided_slice %283 {offsets = [0, 0], sizes = [12, 28], strides = [1, 1]} : vector<14x28xf32> to vector<12x28xf32>
    %c0_200 = arith.constant 0 : index
    %c0_201 = arith.constant 0 : index
    %c0_202 = arith.constant 0 : index
    %287 = vector.load %arg2[%c0_200, %c0_201, %c0_202] : memref<10x28x120xf32, #tpu.memory_space<vmem>>, vector<1x28x120xf32>
    %288 = vector.shape_cast %287 : vector<1x28x120xf32> to vector<28x120xf32>
    %cst_203 = arith.constant dense<0.000000e+00> : vector<12x120xf32>
    %289 = tpu.matmul %286, %288, %cst_203 {dimension_numbers = #tpu.dot_dimension_numbers<[1], [0], [0], [1], [0, 0, 1, 1], [], []>} : vector<12x28xf32>, vector<28x120xf32>, vector<12x120xf32> -> vector<12x120xf32>
    %290 = vector.extract_strided_slice %285 {offsets = [0, 0], sizes = [12, 28], strides = [1, 1]} : vector<14x28xf32> to vector<12x28xf32>
    %c2_204 = arith.constant 2 : index
    %c0_205 = arith.constant 0 : index
    %c0_206 = arith.constant 0 : index
    %291 = vector.load %arg2[%c2_204, %c0_205, %c0_206] : memref<10x28x120xf32, #tpu.memory_space<vmem>>, vector<1x28x120xf32>
    %292 = vector.shape_cast %291 : vector<1x28x120xf32> to vector<28x120xf32>
    %cst_207 = arith.constant dense<0.000000e+00> : vector<12x120xf32>
    %293 = tpu.matmul %290, %292, %cst_207 {dimension_numbers = #tpu.dot_dimension_numbers<[1], [0], [0], [1], [0, 0, 1, 1], [], []>} : vector<12x28xf32>, vector<28x120xf32>, vector<12x120xf32> -> vector<12x120xf32>
    %294 = arith.addf %289, %293 : vector<12x120xf32>
    %295 = vector.extract_strided_slice %283 {offsets = [1, 0], sizes = [12, 28], strides = [1, 1]} : vector<14x28xf32> to vector<12x28xf32>
    %c4_208 = arith.constant 4 : index
    %c0_209 = arith.constant 0 : index
    %c0_210 = arith.constant 0 : index
    %296 = vector.load %arg2[%c4_208, %c0_209, %c0_210] : memref<10x28x120xf32, #tpu.memory_space<vmem>>, vector<1x28x120xf32>
    %297 = vector.shape_cast %296 : vector<1x28x120xf32> to vector<28x120xf32>
    %cst_211 = arith.constant dense<0.000000e+00> : vector<12x120xf32>
    %298 = tpu.matmul %295, %297, %cst_211 {dimension_numbers = #tpu.dot_dimension_numbers<[1], [0], [0], [1], [0, 0, 1, 1], [], []>} : vector<12x28xf32>, vector<28x120xf32>, vector<12x120xf32> -> vector<12x120xf32>
    %299 = arith.addf %294, %298 : vector<12x120xf32>
    %300 = vector.extract_strided_slice %285 {offsets = [1, 0], sizes = [12, 28], strides = [1, 1]} : vector<14x28xf32> to vector<12x28xf32>
    %c6_212 = arith.constant 6 : index
    %c0_213 = arith.constant 0 : index
    %c0_214 = arith.constant 0 : index
    %301 = vector.load %arg2[%c6_212, %c0_213, %c0_214] : memref<10x28x120xf32, #tpu.memory_space<vmem>>, vector<1x28x120xf32>
    %302 = vector.shape_cast %301 : vector<1x28x120xf32> to vector<28x120xf32>
    %cst_215 = arith.constant dense<0.000000e+00> : vector<12x120xf32>
    %303 = tpu.matmul %300, %302, %cst_215 {dimension_numbers = #tpu.dot_dimension_numbers<[1], [0], [0], [1], [0, 0, 1, 1], [], []>} : vector<12x28xf32>, vector<28x120xf32>, vector<12x120xf32> -> vector<12x120xf32>
    %304 = arith.addf %299, %303 : vector<12x120xf32>
    %305 = vector.extract_strided_slice %283 {offsets = [2, 0], sizes = [12, 28], strides = [1, 1]} : vector<14x28xf32> to vector<12x28xf32>
    %c8_216 = arith.constant 8 : index
    %c0_217 = arith.constant 0 : index
    %c0_218 = arith.constant 0 : index
    %306 = vector.load %arg2[%c8_216, %c0_217, %c0_218] : memref<10x28x120xf32, #tpu.memory_space<vmem>>, vector<1x28x120xf32>
    %307 = vector.shape_cast %306 : vector<1x28x120xf32> to vector<28x120xf32>
    %cst_219 = arith.constant dense<0.000000e+00> : vector<12x120xf32>
    %308 = tpu.matmul %305, %307, %cst_219 {dimension_numbers = #tpu.dot_dimension_numbers<[1], [0], [0], [1], [0, 0, 1, 1], [], []>} : vector<12x28xf32>, vector<28x120xf32>, vector<12x120xf32> -> vector<12x120xf32>
    %309 = arith.addf %304, %308 : vector<12x120xf32>
    %310 = vector.extract_strided_slice %283 {offsets = [0, 0], sizes = [12, 28], strides = [1, 1]} : vector<14x28xf32> to vector<12x28xf32>
    %c1_220 = arith.constant 1 : index
    %c0_221 = arith.constant 0 : index
    %c0_222 = arith.constant 0 : index
    %311 = vector.load %arg2[%c1_220, %c0_221, %c0_222] : memref<10x28x120xf32, #tpu.memory_space<vmem>>, vector<1x28x120xf32>
    %312 = vector.shape_cast %311 : vector<1x28x120xf32> to vector<28x120xf32>
    %cst_223 = arith.constant dense<0.000000e+00> : vector<12x120xf32>
    %313 = tpu.matmul %310, %312, %cst_223 {dimension_numbers = #tpu.dot_dimension_numbers<[1], [0], [0], [1], [0, 0, 1, 1], [], []>} : vector<12x28xf32>, vector<28x120xf32>, vector<12x120xf32> -> vector<12x120xf32>
    %314 = vector.extract_strided_slice %285 {offsets = [0, 0], sizes = [12, 28], strides = [1, 1]} : vector<14x28xf32> to vector<12x28xf32>
    %c3_224 = arith.constant 3 : index
    %c0_225 = arith.constant 0 : index
    %c0_226 = arith.constant 0 : index
    %315 = vector.load %arg2[%c3_224, %c0_225, %c0_226] : memref<10x28x120xf32, #tpu.memory_space<vmem>>, vector<1x28x120xf32>
    %316 = vector.shape_cast %315 : vector<1x28x120xf32> to vector<28x120xf32>
    %cst_227 = arith.constant dense<0.000000e+00> : vector<12x120xf32>
    %317 = tpu.matmul %314, %316, %cst_227 {dimension_numbers = #tpu.dot_dimension_numbers<[1], [0], [0], [1], [0, 0, 1, 1], [], []>} : vector<12x28xf32>, vector<28x120xf32>, vector<12x120xf32> -> vector<12x120xf32>
    %318 = arith.addf %313, %317 : vector<12x120xf32>
    %319 = vector.extract_strided_slice %283 {offsets = [1, 0], sizes = [12, 28], strides = [1, 1]} : vector<14x28xf32> to vector<12x28xf32>
    %c5_228 = arith.constant 5 : index
    %c0_229 = arith.constant 0 : index
    %c0_230 = arith.constant 0 : index
    %320 = vector.load %arg2[%c5_228, %c0_229, %c0_230] : memref<10x28x120xf32, #tpu.memory_space<vmem>>, vector<1x28x120xf32>
    %321 = vector.shape_cast %320 : vector<1x28x120xf32> to vector<28x120xf32>
    %cst_231 = arith.constant dense<0.000000e+00> : vector<12x120xf32>
    %322 = tpu.matmul %319, %321, %cst_231 {dimension_numbers = #tpu.dot_dimension_numbers<[1], [0], [0], [1], [0, 0, 1, 1], [], []>} : vector<12x28xf32>, vector<28x120xf32>, vector<12x120xf32> -> vector<12x120xf32>
    %323 = arith.addf %318, %322 : vector<12x120xf32>
    %324 = vector.extract_strided_slice %285 {offsets = [1, 0], sizes = [12, 28], strides = [1, 1]} : vector<14x28xf32> to vector<12x28xf32>
    %c7_232 = arith.constant 7 : index
    %c0_233 = arith.constant 0 : index
    %c0_234 = arith.constant 0 : index
    %325 = vector.load %arg2[%c7_232, %c0_233, %c0_234] : memref<10x28x120xf32, #tpu.memory_space<vmem>>, vector<1x28x120xf32>
    %326 = vector.shape_cast %325 : vector<1x28x120xf32> to vector<28x120xf32>
    %cst_235 = arith.constant dense<0.000000e+00> : vector<12x120xf32>
    %327 = tpu.matmul %324, %326, %cst_235 {dimension_numbers = #tpu.dot_dimension_numbers<[1], [0], [0], [1], [0, 0, 1, 1], [], []>} : vector<12x28xf32>, vector<28x120xf32>, vector<12x120xf32> -> vector<12x120xf32>
    %328 = arith.addf %323, %327 : vector<12x120xf32>
    %329 = vector.extract_strided_slice %283 {offsets = [2, 0], sizes = [12, 28], strides = [1, 1]} : vector<14x28xf32> to vector<12x28xf32>
    %c9_236 = arith.constant 9 : index
    %c0_237 = arith.constant 0 : index
    %c0_238 = arith.constant 0 : index
    %330 = vector.load %arg2[%c9_236, %c0_237, %c0_238] : memref<10x28x120xf32, #tpu.memory_space<vmem>>, vector<1x28x120xf32>
    %331 = vector.shape_cast %330 : vector<1x28x120xf32> to vector<28x120xf32>
    %cst_239 = arith.constant dense<0.000000e+00> : vector<12x120xf32>
    %332 = tpu.matmul %329, %331, %cst_239 {dimension_numbers = #tpu.dot_dimension_numbers<[1], [0], [0], [1], [0, 0, 1, 1], [], []>} : vector<12x28xf32>, vector<28x120xf32>, vector<12x120xf32> -> vector<12x120xf32>
    %333 = arith.addf %328, %332 : vector<12x120xf32>
    %334 = vector.extract_strided_slice %285 {offsets = [0, 0], sizes = [12, 28], strides = [1, 1]} : vector<14x28xf32> to vector<12x28xf32>
    %c0_240 = arith.constant 0 : index
    %c0_241 = arith.constant 0 : index
    %c0_242 = arith.constant 0 : index
    %335 = vector.load %arg2[%c0_240, %c0_241, %c0_242] : memref<10x28x120xf32, #tpu.memory_space<vmem>>, vector<1x28x120xf32>
    %336 = vector.shape_cast %335 : vector<1x28x120xf32> to vector<28x120xf32>
    %cst_243 = arith.constant dense<0.000000e+00> : vector<12x120xf32>
    %337 = tpu.matmul %334, %336, %cst_243 {dimension_numbers = #tpu.dot_dimension_numbers<[1], [0], [0], [1], [0, 0, 1, 1], [], []>} : vector<12x28xf32>, vector<28x120xf32>, vector<12x120xf32> -> vector<12x120xf32>
    %338 = vector.extract_strided_slice %283 {offsets = [1, 0], sizes = [12, 28], strides = [1, 1]} : vector<14x28xf32> to vector<12x28xf32>
    %c2_244 = arith.constant 2 : index
    %c0_245 = arith.constant 0 : index
    %c0_246 = arith.constant 0 : index
    %339 = vector.load %arg2[%c2_244, %c0_245, %c0_246] : memref<10x28x120xf32, #tpu.memory_space<vmem>>, vector<1x28x120xf32>
    %340 = vector.shape_cast %339 : vector<1x28x120xf32> to vector<28x120xf32>
    %cst_247 = arith.constant dense<0.000000e+00> : vector<12x120xf32>
    %341 = tpu.matmul %338, %340, %cst_247 {dimension_numbers = #tpu.dot_dimension_numbers<[1], [0], [0], [1], [0, 0, 1, 1], [], []>} : vector<12x28xf32>, vector<28x120xf32>, vector<12x120xf32> -> vector<12x120xf32>
    %342 = arith.addf %337, %341 : vector<12x120xf32>
    %343 = vector.extract_strided_slice %285 {offsets = [1, 0], sizes = [12, 28], strides = [1, 1]} : vector<14x28xf32> to vector<12x28xf32>
    %c4_248 = arith.constant 4 : index
    %c0_249 = arith.constant 0 : index
    %c0_250 = arith.constant 0 : index
    %344 = vector.load %arg2[%c4_248, %c0_249, %c0_250] : memref<10x28x120xf32, #tpu.memory_space<vmem>>, vector<1x28x120xf32>
    %345 = vector.shape_cast %344 : vector<1x28x120xf32> to vector<28x120xf32>
    %cst_251 = arith.constant dense<0.000000e+00> : vector<12x120xf32>
    %346 = tpu.matmul %343, %345, %cst_251 {dimension_numbers = #tpu.dot_dimension_numbers<[1], [0], [0], [1], [0, 0, 1, 1], [], []>} : vector<12x28xf32>, vector<28x120xf32>, vector<12x120xf32> -> vector<12x120xf32>
    %347 = arith.addf %342, %346 : vector<12x120xf32>
    %348 = vector.extract_strided_slice %283 {offsets = [2, 0], sizes = [12, 28], strides = [1, 1]} : vector<14x28xf32> to vector<12x28xf32>
    %c6_252 = arith.constant 6 : index
    %c0_253 = arith.constant 0 : index
    %c0_254 = arith.constant 0 : index
    %349 = vector.load %arg2[%c6_252, %c0_253, %c0_254] : memref<10x28x120xf32, #tpu.memory_space<vmem>>, vector<1x28x120xf32>
    %350 = vector.shape_cast %349 : vector<1x28x120xf32> to vector<28x120xf32>
    %cst_255 = arith.constant dense<0.000000e+00> : vector<12x120xf32>
    %351 = tpu.matmul %348, %350, %cst_255 {dimension_numbers = #tpu.dot_dimension_numbers<[1], [0], [0], [1], [0, 0, 1, 1], [], []>} : vector<12x28xf32>, vector<28x120xf32>, vector<12x120xf32> -> vector<12x120xf32>
    %352 = arith.addf %347, %351 : vector<12x120xf32>
    %353 = vector.extract_strided_slice %285 {offsets = [2, 0], sizes = [12, 28], strides = [1, 1]} : vector<14x28xf32> to vector<12x28xf32>
    %c8_256 = arith.constant 8 : index
    %c0_257 = arith.constant 0 : index
    %c0_258 = arith.constant 0 : index
    %354 = vector.load %arg2[%c8_256, %c0_257, %c0_258] : memref<10x28x120xf32, #tpu.memory_space<vmem>>, vector<1x28x120xf32>
    %355 = vector.shape_cast %354 : vector<1x28x120xf32> to vector<28x120xf32>
    %cst_259 = arith.constant dense<0.000000e+00> : vector<12x120xf32>
    %356 = tpu.matmul %353, %355, %cst_259 {dimension_numbers = #tpu.dot_dimension_numbers<[1], [0], [0], [1], [0, 0, 1, 1], [], []>} : vector<12x28xf32>, vector<28x120xf32>, vector<12x120xf32> -> vector<12x120xf32>
    %357 = arith.addf %352, %356 : vector<12x120xf32>
    %358 = vector.extract_strided_slice %285 {offsets = [0, 0], sizes = [12, 28], strides = [1, 1]} : vector<14x28xf32> to vector<12x28xf32>
    %c1_260 = arith.constant 1 : index
    %c0_261 = arith.constant 0 : index
    %c0_262 = arith.constant 0 : index
    %359 = vector.load %arg2[%c1_260, %c0_261, %c0_262] : memref<10x28x120xf32, #tpu.memory_space<vmem>>, vector<1x28x120xf32>
    %360 = vector.shape_cast %359 : vector<1x28x120xf32> to vector<28x120xf32>
    %cst_263 = arith.constant dense<0.000000e+00> : vector<12x120xf32>
    %361 = tpu.matmul %358, %360, %cst_263 {dimension_numbers = #tpu.dot_dimension_numbers<[1], [0], [0], [1], [0, 0, 1, 1], [], []>} : vector<12x28xf32>, vector<28x120xf32>, vector<12x120xf32> -> vector<12x120xf32>
    %362 = vector.extract_strided_slice %283 {offsets = [1, 0], sizes = [12, 28], strides = [1, 1]} : vector<14x28xf32> to vector<12x28xf32>
    %c3_264 = arith.constant 3 : index
    %c0_265 = arith.constant 0 : index
    %c0_266 = arith.constant 0 : index
    %363 = vector.load %arg2[%c3_264, %c0_265, %c0_266] : memref<10x28x120xf32, #tpu.memory_space<vmem>>, vector<1x28x120xf32>
    %364 = vector.shape_cast %363 : vector<1x28x120xf32> to vector<28x120xf32>
    %cst_267 = arith.constant dense<0.000000e+00> : vector<12x120xf32>
    %365 = tpu.matmul %362, %364, %cst_267 {dimension_numbers = #tpu.dot_dimension_numbers<[1], [0], [0], [1], [0, 0, 1, 1], [], []>} : vector<12x28xf32>, vector<28x120xf32>, vector<12x120xf32> -> vector<12x120xf32>
    %366 = arith.addf %361, %365 : vector<12x120xf32>
    %367 = vector.extract_strided_slice %285 {offsets = [1, 0], sizes = [12, 28], strides = [1, 1]} : vector<14x28xf32> to vector<12x28xf32>
    %c5_268 = arith.constant 5 : index
    %c0_269 = arith.constant 0 : index
    %c0_270 = arith.constant 0 : index
    %368 = vector.load %arg2[%c5_268, %c0_269, %c0_270] : memref<10x28x120xf32, #tpu.memory_space<vmem>>, vector<1x28x120xf32>
    %369 = vector.shape_cast %368 : vector<1x28x120xf32> to vector<28x120xf32>
    %cst_271 = arith.constant dense<0.000000e+00> : vector<12x120xf32>
    %370 = tpu.matmul %367, %369, %cst_271 {dimension_numbers = #tpu.dot_dimension_numbers<[1], [0], [0], [1], [0, 0, 1, 1], [], []>} : vector<12x28xf32>, vector<28x120xf32>, vector<12x120xf32> -> vector<12x120xf32>
    %371 = arith.addf %366, %370 : vector<12x120xf32>
    %372 = vector.extract_strided_slice %283 {offsets = [2, 0], sizes = [12, 28], strides = [1, 1]} : vector<14x28xf32> to vector<12x28xf32>
    %c7_272 = arith.constant 7 : index
    %c0_273 = arith.constant 0 : index
    %c0_274 = arith.constant 0 : index
    %373 = vector.load %arg2[%c7_272, %c0_273, %c0_274] : memref<10x28x120xf32, #tpu.memory_space<vmem>>, vector<1x28x120xf32>
    %374 = vector.shape_cast %373 : vector<1x28x120xf32> to vector<28x120xf32>
    %cst_275 = arith.constant dense<0.000000e+00> : vector<12x120xf32>
    %375 = tpu.matmul %372, %374, %cst_275 {dimension_numbers = #tpu.dot_dimension_numbers<[1], [0], [0], [1], [0, 0, 1, 1], [], []>} : vector<12x28xf32>, vector<28x120xf32>, vector<12x120xf32> -> vector<12x120xf32>
    %376 = arith.addf %371, %375 : vector<12x120xf32>
    %377 = vector.extract_strided_slice %285 {offsets = [2, 0], sizes = [12, 28], strides = [1, 1]} : vector<14x28xf32> to vector<12x28xf32>
    %c9_276 = arith.constant 9 : index
    %c0_277 = arith.constant 0 : index
    %c0_278 = arith.constant 0 : index
    %378 = vector.load %arg2[%c9_276, %c0_277, %c0_278] : memref<10x28x120xf32, #tpu.memory_space<vmem>>, vector<1x28x120xf32>
    %379 = vector.shape_cast %378 : vector<1x28x120xf32> to vector<28x120xf32>
    %cst_279 = arith.constant dense<0.000000e+00> : vector<12x120xf32>
    %380 = tpu.matmul %377, %379, %cst_279 {dimension_numbers = #tpu.dot_dimension_numbers<[1], [0], [0], [1], [0, 0, 1, 1], [], []>} : vector<12x28xf32>, vector<28x120xf32>, vector<12x120xf32> -> vector<12x120xf32>
    %381 = arith.addf %376, %380 : vector<12x120xf32>
    %382 = arith.maximumf %309, %333 : vector<12x120xf32>
    %383 = arith.maximumf %357, %381 : vector<12x120xf32>
    %384 = arith.maximumf %382, %383 : vector<12x120xf32>
    %c0_280 = arith.constant 0 : index
    %c0_281 = arith.constant 0 : index
    %385 = vector.load %arg4[%c0_280, %c0_281] : memref<1x120xf32, #tpu.memory_space<vmem>>, vector<1x120xf32>
    %386 = vector.broadcast %385 : vector<1x120xf32> to vector<12x120xf32>
    %387 = arith.addf %384, %386 : vector<12x120xf32>
    %cst_282 = arith.constant 0.000000e+00 : f32
    %388 = vector.broadcast %cst_282 : f32 to vector<12x120xf32>
    %389 = arith.maximumf %387, %388 : vector<12x120xf32>
    %390 = vector.extract_strided_slice %389 {offsets = [0, 0], sizes = [8, 80], strides = [1, 1]} : vector<12x120xf32> to vector<8x80xf32>
    %c0_283 = arith.constant 0 : index
    %c0_284 = arith.constant 0 : index
    %c0_285 = arith.constant 0 : index
    %391 = vector.load %arg3[%c0_283, %c0_284, %c0_285] : memref<25x80x160xf32, #tpu.memory_space<vmem>>, vector<1x80x160xf32>
    %392 = vector.shape_cast %391 : vector<1x80x160xf32> to vector<80x160xf32>
    %cst_286 = arith.constant dense<0.000000e+00> : vector<8x160xf32>
    %393 = tpu.matmul %390, %392, %cst_286 {dimension_numbers = #tpu.dot_dimension_numbers<[1], [0], [0], [1], [0, 0, 1, 1], [], []>} : vector<8x80xf32>, vector<80x160xf32>, vector<8x160xf32> -> vector<8x160xf32>
    %394 = vector.extract_strided_slice %389 {offsets = [0, 10], sizes = [8, 80], strides = [1, 1]} : vector<12x120xf32> to vector<8x80xf32>
    %c1_287 = arith.constant 1 : index
    %c0_288 = arith.constant 0 : index
    %c0_289 = arith.constant 0 : index
    %395 = vector.load %arg3[%c1_287, %c0_288, %c0_289] : memref<25x80x160xf32, #tpu.memory_space<vmem>>, vector<1x80x160xf32>
    %396 = vector.shape_cast %395 : vector<1x80x160xf32> to vector<80x160xf32>
    %cst_290 = arith.constant dense<0.000000e+00> : vector<8x160xf32>
    %397 = tpu.matmul %394, %396, %cst_290 {dimension_numbers = #tpu.dot_dimension_numbers<[1], [0], [0], [1], [0, 0, 1, 1], [], []>} : vector<8x80xf32>, vector<80x160xf32>, vector<8x160xf32> -> vector<8x160xf32>
    %398 = arith.addf %393, %397 : vector<8x160xf32>
    %399 = vector.extract_strided_slice %389 {offsets = [0, 20], sizes = [8, 80], strides = [1, 1]} : vector<12x120xf32> to vector<8x80xf32>
    %c2_291 = arith.constant 2 : index
    %c0_292 = arith.constant 0 : index
    %c0_293 = arith.constant 0 : index
    %400 = vector.load %arg3[%c2_291, %c0_292, %c0_293] : memref<25x80x160xf32, #tpu.memory_space<vmem>>, vector<1x80x160xf32>
    %401 = vector.shape_cast %400 : vector<1x80x160xf32> to vector<80x160xf32>
    %cst_294 = arith.constant dense<0.000000e+00> : vector<8x160xf32>
    %402 = tpu.matmul %399, %401, %cst_294 {dimension_numbers = #tpu.dot_dimension_numbers<[1], [0], [0], [1], [0, 0, 1, 1], [], []>} : vector<8x80xf32>, vector<80x160xf32>, vector<8x160xf32> -> vector<8x160xf32>
    %403 = arith.addf %398, %402 : vector<8x160xf32>
    %404 = vector.extract_strided_slice %389 {offsets = [0, 30], sizes = [8, 80], strides = [1, 1]} : vector<12x120xf32> to vector<8x80xf32>
    %c3_295 = arith.constant 3 : index
    %c0_296 = arith.constant 0 : index
    %c0_297 = arith.constant 0 : index
    %405 = vector.load %arg3[%c3_295, %c0_296, %c0_297] : memref<25x80x160xf32, #tpu.memory_space<vmem>>, vector<1x80x160xf32>
    %406 = vector.shape_cast %405 : vector<1x80x160xf32> to vector<80x160xf32>
    %cst_298 = arith.constant dense<0.000000e+00> : vector<8x160xf32>
    %407 = tpu.matmul %404, %406, %cst_298 {dimension_numbers = #tpu.dot_dimension_numbers<[1], [0], [0], [1], [0, 0, 1, 1], [], []>} : vector<8x80xf32>, vector<80x160xf32>, vector<8x160xf32> -> vector<8x160xf32>
    %408 = arith.addf %403, %407 : vector<8x160xf32>
    %409 = vector.extract_strided_slice %389 {offsets = [0, 40], sizes = [8, 80], strides = [1, 1]} : vector<12x120xf32> to vector<8x80xf32>
    %c4_299 = arith.constant 4 : index
    %c0_300 = arith.constant 0 : index
    %c0_301 = arith.constant 0 : index
    %410 = vector.load %arg3[%c4_299, %c0_300, %c0_301] : memref<25x80x160xf32, #tpu.memory_space<vmem>>, vector<1x80x160xf32>
    %411 = vector.shape_cast %410 : vector<1x80x160xf32> to vector<80x160xf32>
    %cst_302 = arith.constant dense<0.000000e+00> : vector<8x160xf32>
    %412 = tpu.matmul %409, %411, %cst_302 {dimension_numbers = #tpu.dot_dimension_numbers<[1], [0], [0], [1], [0, 0, 1, 1], [], []>} : vector<8x80xf32>, vector<80x160xf32>, vector<8x160xf32> -> vector<8x160xf32>
    %413 = arith.addf %408, %412 : vector<8x160xf32>
    %414 = vector.extract_strided_slice %389 {offsets = [1, 0], sizes = [8, 80], strides = [1, 1]} : vector<12x120xf32> to vector<8x80xf32>
    %c5_303 = arith.constant 5 : index
    %c0_304 = arith.constant 0 : index
    %c0_305 = arith.constant 0 : index
    %415 = vector.load %arg3[%c5_303, %c0_304, %c0_305] : memref<25x80x160xf32, #tpu.memory_space<vmem>>, vector<1x80x160xf32>
    %416 = vector.shape_cast %415 : vector<1x80x160xf32> to vector<80x160xf32>
    %cst_306 = arith.constant dense<0.000000e+00> : vector<8x160xf32>
    %417 = tpu.matmul %414, %416, %cst_306 {dimension_numbers = #tpu.dot_dimension_numbers<[1], [0], [0], [1], [0, 0, 1, 1], [], []>} : vector<8x80xf32>, vector<80x160xf32>, vector<8x160xf32> -> vector<8x160xf32>
    %418 = arith.addf %413, %417 : vector<8x160xf32>
    %419 = vector.extract_strided_slice %389 {offsets = [1, 10], sizes = [8, 80], strides = [1, 1]} : vector<12x120xf32> to vector<8x80xf32>
    %c6_307 = arith.constant 6 : index
    %c0_308 = arith.constant 0 : index
    %c0_309 = arith.constant 0 : index
    %420 = vector.load %arg3[%c6_307, %c0_308, %c0_309] : memref<25x80x160xf32, #tpu.memory_space<vmem>>, vector<1x80x160xf32>
    %421 = vector.shape_cast %420 : vector<1x80x160xf32> to vector<80x160xf32>
    %cst_310 = arith.constant dense<0.000000e+00> : vector<8x160xf32>
    %422 = tpu.matmul %419, %421, %cst_310 {dimension_numbers = #tpu.dot_dimension_numbers<[1], [0], [0], [1], [0, 0, 1, 1], [], []>} : vector<8x80xf32>, vector<80x160xf32>, vector<8x160xf32> -> vector<8x160xf32>
    %423 = arith.addf %418, %422 : vector<8x160xf32>
    %424 = vector.extract_strided_slice %389 {offsets = [1, 20], sizes = [8, 80], strides = [1, 1]} : vector<12x120xf32> to vector<8x80xf32>
    %c7_311 = arith.constant 7 : index
    %c0_312 = arith.constant 0 : index
    %c0_313 = arith.constant 0 : index
    %425 = vector.load %arg3[%c7_311, %c0_312, %c0_313] : memref<25x80x160xf32, #tpu.memory_space<vmem>>, vector<1x80x160xf32>
    %426 = vector.shape_cast %425 : vector<1x80x160xf32> to vector<80x160xf32>
    %cst_314 = arith.constant dense<0.000000e+00> : vector<8x160xf32>
    %427 = tpu.matmul %424, %426, %cst_314 {dimension_numbers = #tpu.dot_dimension_numbers<[1], [0], [0], [1], [0, 0, 1, 1], [], []>} : vector<8x80xf32>, vector<80x160xf32>, vector<8x160xf32> -> vector<8x160xf32>
    %428 = arith.addf %423, %427 : vector<8x160xf32>
    %429 = vector.extract_strided_slice %389 {offsets = [1, 30], sizes = [8, 80], strides = [1, 1]} : vector<12x120xf32> to vector<8x80xf32>
    %c8_315 = arith.constant 8 : index
    %c0_316 = arith.constant 0 : index
    %c0_317 = arith.constant 0 : index
    %430 = vector.load %arg3[%c8_315, %c0_316, %c0_317] : memref<25x80x160xf32, #tpu.memory_space<vmem>>, vector<1x80x160xf32>
    %431 = vector.shape_cast %430 : vector<1x80x160xf32> to vector<80x160xf32>
    %cst_318 = arith.constant dense<0.000000e+00> : vector<8x160xf32>
    %432 = tpu.matmul %429, %431, %cst_318 {dimension_numbers = #tpu.dot_dimension_numbers<[1], [0], [0], [1], [0, 0, 1, 1], [], []>} : vector<8x80xf32>, vector<80x160xf32>, vector<8x160xf32> -> vector<8x160xf32>
    %433 = arith.addf %428, %432 : vector<8x160xf32>
    %434 = vector.extract_strided_slice %389 {offsets = [1, 40], sizes = [8, 80], strides = [1, 1]} : vector<12x120xf32> to vector<8x80xf32>
    %c9_319 = arith.constant 9 : index
    %c0_320 = arith.constant 0 : index
    %c0_321 = arith.constant 0 : index
    %435 = vector.load %arg3[%c9_319, %c0_320, %c0_321] : memref<25x80x160xf32, #tpu.memory_space<vmem>>, vector<1x80x160xf32>
    %436 = vector.shape_cast %435 : vector<1x80x160xf32> to vector<80x160xf32>
    %cst_322 = arith.constant dense<0.000000e+00> : vector<8x160xf32>
    %437 = tpu.matmul %434, %436, %cst_322 {dimension_numbers = #tpu.dot_dimension_numbers<[1], [0], [0], [1], [0, 0, 1, 1], [], []>} : vector<8x80xf32>, vector<80x160xf32>, vector<8x160xf32> -> vector<8x160xf32>
    %438 = arith.addf %433, %437 : vector<8x160xf32>
    %439 = vector.extract_strided_slice %389 {offsets = [2, 0], sizes = [8, 80], strides = [1, 1]} : vector<12x120xf32> to vector<8x80xf32>
    %c10_323 = arith.constant 10 : index
    %c0_324 = arith.constant 0 : index
    %c0_325 = arith.constant 0 : index
    %440 = vector.load %arg3[%c10_323, %c0_324, %c0_325] : memref<25x80x160xf32, #tpu.memory_space<vmem>>, vector<1x80x160xf32>
    %441 = vector.shape_cast %440 : vector<1x80x160xf32> to vector<80x160xf32>
    %cst_326 = arith.constant dense<0.000000e+00> : vector<8x160xf32>
    %442 = tpu.matmul %439, %441, %cst_326 {dimension_numbers = #tpu.dot_dimension_numbers<[1], [0], [0], [1], [0, 0, 1, 1], [], []>} : vector<8x80xf32>, vector<80x160xf32>, vector<8x160xf32> -> vector<8x160xf32>
    %443 = arith.addf %438, %442 : vector<8x160xf32>
    %444 = vector.extract_strided_slice %389 {offsets = [2, 10], sizes = [8, 80], strides = [1, 1]} : vector<12x120xf32> to vector<8x80xf32>
    %c11_327 = arith.constant 11 : index
    %c0_328 = arith.constant 0 : index
    %c0_329 = arith.constant 0 : index
    %445 = vector.load %arg3[%c11_327, %c0_328, %c0_329] : memref<25x80x160xf32, #tpu.memory_space<vmem>>, vector<1x80x160xf32>
    %446 = vector.shape_cast %445 : vector<1x80x160xf32> to vector<80x160xf32>
    %cst_330 = arith.constant dense<0.000000e+00> : vector<8x160xf32>
    %447 = tpu.matmul %444, %446, %cst_330 {dimension_numbers = #tpu.dot_dimension_numbers<[1], [0], [0], [1], [0, 0, 1, 1], [], []>} : vector<8x80xf32>, vector<80x160xf32>, vector<8x160xf32> -> vector<8x160xf32>
    %448 = arith.addf %443, %447 : vector<8x160xf32>
    %449 = vector.extract_strided_slice %389 {offsets = [2, 20], sizes = [8, 80], strides = [1, 1]} : vector<12x120xf32> to vector<8x80xf32>
    %c12_331 = arith.constant 12 : index
    %c0_332 = arith.constant 0 : index
    %c0_333 = arith.constant 0 : index
    %450 = vector.load %arg3[%c12_331, %c0_332, %c0_333] : memref<25x80x160xf32, #tpu.memory_space<vmem>>, vector<1x80x160xf32>
    %451 = vector.shape_cast %450 : vector<1x80x160xf32> to vector<80x160xf32>
    %cst_334 = arith.constant dense<0.000000e+00> : vector<8x160xf32>
    %452 = tpu.matmul %449, %451, %cst_334 {dimension_numbers = #tpu.dot_dimension_numbers<[1], [0], [0], [1], [0, 0, 1, 1], [], []>} : vector<8x80xf32>, vector<80x160xf32>, vector<8x160xf32> -> vector<8x160xf32>
    %453 = arith.addf %448, %452 : vector<8x160xf32>
    %454 = vector.extract_strided_slice %389 {offsets = [2, 30], sizes = [8, 80], strides = [1, 1]} : vector<12x120xf32> to vector<8x80xf32>
    %c13_335 = arith.constant 13 : index
    %c0_336 = arith.constant 0 : index
    %c0_337 = arith.constant 0 : index
    %455 = vector.load %arg3[%c13_335, %c0_336, %c0_337] : memref<25x80x160xf32, #tpu.memory_space<vmem>>, vector<1x80x160xf32>
    %456 = vector.shape_cast %455 : vector<1x80x160xf32> to vector<80x160xf32>
    %cst_338 = arith.constant dense<0.000000e+00> : vector<8x160xf32>
    %457 = tpu.matmul %454, %456, %cst_338 {dimension_numbers = #tpu.dot_dimension_numbers<[1], [0], [0], [1], [0, 0, 1, 1], [], []>} : vector<8x80xf32>, vector<80x160xf32>, vector<8x160xf32> -> vector<8x160xf32>
    %458 = arith.addf %453, %457 : vector<8x160xf32>
    %459 = vector.extract_strided_slice %389 {offsets = [2, 40], sizes = [8, 80], strides = [1, 1]} : vector<12x120xf32> to vector<8x80xf32>
    %c14_339 = arith.constant 14 : index
    %c0_340 = arith.constant 0 : index
    %c0_341 = arith.constant 0 : index
    %460 = vector.load %arg3[%c14_339, %c0_340, %c0_341] : memref<25x80x160xf32, #tpu.memory_space<vmem>>, vector<1x80x160xf32>
    %461 = vector.shape_cast %460 : vector<1x80x160xf32> to vector<80x160xf32>
    %cst_342 = arith.constant dense<0.000000e+00> : vector<8x160xf32>
    %462 = tpu.matmul %459, %461, %cst_342 {dimension_numbers = #tpu.dot_dimension_numbers<[1], [0], [0], [1], [0, 0, 1, 1], [], []>} : vector<8x80xf32>, vector<80x160xf32>, vector<8x160xf32> -> vector<8x160xf32>
    %463 = arith.addf %458, %462 : vector<8x160xf32>
    %464 = vector.extract_strided_slice %389 {offsets = [3, 0], sizes = [8, 80], strides = [1, 1]} : vector<12x120xf32> to vector<8x80xf32>
    %c15_343 = arith.constant 15 : index
    %c0_344 = arith.constant 0 : index
    %c0_345 = arith.constant 0 : index
    %465 = vector.load %arg3[%c15_343, %c0_344, %c0_345] : memref<25x80x160xf32, #tpu.memory_space<vmem>>, vector<1x80x160xf32>
    %466 = vector.shape_cast %465 : vector<1x80x160xf32> to vector<80x160xf32>
    %cst_346 = arith.constant dense<0.000000e+00> : vector<8x160xf32>
    %467 = tpu.matmul %464, %466, %cst_346 {dimension_numbers = #tpu.dot_dimension_numbers<[1], [0], [0], [1], [0, 0, 1, 1], [], []>} : vector<8x80xf32>, vector<80x160xf32>, vector<8x160xf32> -> vector<8x160xf32>
    %468 = arith.addf %463, %467 : vector<8x160xf32>
    %469 = vector.extract_strided_slice %389 {offsets = [3, 10], sizes = [8, 80], strides = [1, 1]} : vector<12x120xf32> to vector<8x80xf32>
    %c16_347 = arith.constant 16 : index
    %c0_348 = arith.constant 0 : index
    %c0_349 = arith.constant 0 : index
    %470 = vector.load %arg3[%c16_347, %c0_348, %c0_349] : memref<25x80x160xf32, #tpu.memory_space<vmem>>, vector<1x80x160xf32>
    %471 = vector.shape_cast %470 : vector<1x80x160xf32> to vector<80x160xf32>
    %cst_350 = arith.constant dense<0.000000e+00> : vector<8x160xf32>
    %472 = tpu.matmul %469, %471, %cst_350 {dimension_numbers = #tpu.dot_dimension_numbers<[1], [0], [0], [1], [0, 0, 1, 1], [], []>} : vector<8x80xf32>, vector<80x160xf32>, vector<8x160xf32> -> vector<8x160xf32>
    %473 = arith.addf %468, %472 : vector<8x160xf32>
    %474 = vector.extract_strided_slice %389 {offsets = [3, 20], sizes = [8, 80], strides = [1, 1]} : vector<12x120xf32> to vector<8x80xf32>
    %c17_351 = arith.constant 17 : index
    %c0_352 = arith.constant 0 : index
    %c0_353 = arith.constant 0 : index
    %475 = vector.load %arg3[%c17_351, %c0_352, %c0_353] : memref<25x80x160xf32, #tpu.memory_space<vmem>>, vector<1x80x160xf32>
    %476 = vector.shape_cast %475 : vector<1x80x160xf32> to vector<80x160xf32>
    %cst_354 = arith.constant dense<0.000000e+00> : vector<8x160xf32>
    %477 = tpu.matmul %474, %476, %cst_354 {dimension_numbers = #tpu.dot_dimension_numbers<[1], [0], [0], [1], [0, 0, 1, 1], [], []>} : vector<8x80xf32>, vector<80x160xf32>, vector<8x160xf32> -> vector<8x160xf32>
    %478 = arith.addf %473, %477 : vector<8x160xf32>
    %479 = vector.extract_strided_slice %389 {offsets = [3, 30], sizes = [8, 80], strides = [1, 1]} : vector<12x120xf32> to vector<8x80xf32>
    %c18_355 = arith.constant 18 : index
    %c0_356 = arith.constant 0 : index
    %c0_357 = arith.constant 0 : index
    %480 = vector.load %arg3[%c18_355, %c0_356, %c0_357] : memref<25x80x160xf32, #tpu.memory_space<vmem>>, vector<1x80x160xf32>
    %481 = vector.shape_cast %480 : vector<1x80x160xf32> to vector<80x160xf32>
    %cst_358 = arith.constant dense<0.000000e+00> : vector<8x160xf32>
    %482 = tpu.matmul %479, %481, %cst_358 {dimension_numbers = #tpu.dot_dimension_numbers<[1], [0], [0], [1], [0, 0, 1, 1], [], []>} : vector<8x80xf32>, vector<80x160xf32>, vector<8x160xf32> -> vector<8x160xf32>
    %483 = arith.addf %478, %482 : vector<8x160xf32>
    %484 = vector.extract_strided_slice %389 {offsets = [3, 40], sizes = [8, 80], strides = [1, 1]} : vector<12x120xf32> to vector<8x80xf32>
    %c19_359 = arith.constant 19 : index
    %c0_360 = arith.constant 0 : index
    %c0_361 = arith.constant 0 : index
    %485 = vector.load %arg3[%c19_359, %c0_360, %c0_361] : memref<25x80x160xf32, #tpu.memory_space<vmem>>, vector<1x80x160xf32>
    %486 = vector.shape_cast %485 : vector<1x80x160xf32> to vector<80x160xf32>
    %cst_362 = arith.constant dense<0.000000e+00> : vector<8x160xf32>
    %487 = tpu.matmul %484, %486, %cst_362 {dimension_numbers = #tpu.dot_dimension_numbers<[1], [0], [0], [1], [0, 0, 1, 1], [], []>} : vector<8x80xf32>, vector<80x160xf32>, vector<8x160xf32> -> vector<8x160xf32>
    %488 = arith.addf %483, %487 : vector<8x160xf32>
    %489 = vector.extract_strided_slice %389 {offsets = [4, 0], sizes = [8, 80], strides = [1, 1]} : vector<12x120xf32> to vector<8x80xf32>
    %c20_363 = arith.constant 20 : index
    %c0_364 = arith.constant 0 : index
    %c0_365 = arith.constant 0 : index
    %490 = vector.load %arg3[%c20_363, %c0_364, %c0_365] : memref<25x80x160xf32, #tpu.memory_space<vmem>>, vector<1x80x160xf32>
    %491 = vector.shape_cast %490 : vector<1x80x160xf32> to vector<80x160xf32>
    %cst_366 = arith.constant dense<0.000000e+00> : vector<8x160xf32>
    %492 = tpu.matmul %489, %491, %cst_366 {dimension_numbers = #tpu.dot_dimension_numbers<[1], [0], [0], [1], [0, 0, 1, 1], [], []>} : vector<8x80xf32>, vector<80x160xf32>, vector<8x160xf32> -> vector<8x160xf32>
    %493 = arith.addf %488, %492 : vector<8x160xf32>
    %494 = vector.extract_strided_slice %389 {offsets = [4, 10], sizes = [8, 80], strides = [1, 1]} : vector<12x120xf32> to vector<8x80xf32>
    %c21_367 = arith.constant 21 : index
    %c0_368 = arith.constant 0 : index
    %c0_369 = arith.constant 0 : index
    %495 = vector.load %arg3[%c21_367, %c0_368, %c0_369] : memref<25x80x160xf32, #tpu.memory_space<vmem>>, vector<1x80x160xf32>
    %496 = vector.shape_cast %495 : vector<1x80x160xf32> to vector<80x160xf32>
    %cst_370 = arith.constant dense<0.000000e+00> : vector<8x160xf32>
    %497 = tpu.matmul %494, %496, %cst_370 {dimension_numbers = #tpu.dot_dimension_numbers<[1], [0], [0], [1], [0, 0, 1, 1], [], []>} : vector<8x80xf32>, vector<80x160xf32>, vector<8x160xf32> -> vector<8x160xf32>
    %498 = arith.addf %493, %497 : vector<8x160xf32>
    %499 = vector.extract_strided_slice %389 {offsets = [4, 20], sizes = [8, 80], strides = [1, 1]} : vector<12x120xf32> to vector<8x80xf32>
    %c22_371 = arith.constant 22 : index
    %c0_372 = arith.constant 0 : index
    %c0_373 = arith.constant 0 : index
    %500 = vector.load %arg3[%c22_371, %c0_372, %c0_373] : memref<25x80x160xf32, #tpu.memory_space<vmem>>, vector<1x80x160xf32>
    %501 = vector.shape_cast %500 : vector<1x80x160xf32> to vector<80x160xf32>
    %cst_374 = arith.constant dense<0.000000e+00> : vector<8x160xf32>
    %502 = tpu.matmul %499, %501, %cst_374 {dimension_numbers = #tpu.dot_dimension_numbers<[1], [0], [0], [1], [0, 0, 1, 1], [], []>} : vector<8x80xf32>, vector<80x160xf32>, vector<8x160xf32> -> vector<8x160xf32>
    %503 = arith.addf %498, %502 : vector<8x160xf32>
    %504 = vector.extract_strided_slice %389 {offsets = [4, 30], sizes = [8, 80], strides = [1, 1]} : vector<12x120xf32> to vector<8x80xf32>
    %c23_375 = arith.constant 23 : index
    %c0_376 = arith.constant 0 : index
    %c0_377 = arith.constant 0 : index
    %505 = vector.load %arg3[%c23_375, %c0_376, %c0_377] : memref<25x80x160xf32, #tpu.memory_space<vmem>>, vector<1x80x160xf32>
    %506 = vector.shape_cast %505 : vector<1x80x160xf32> to vector<80x160xf32>
    %cst_378 = arith.constant dense<0.000000e+00> : vector<8x160xf32>
    %507 = tpu.matmul %504, %506, %cst_378 {dimension_numbers = #tpu.dot_dimension_numbers<[1], [0], [0], [1], [0, 0, 1, 1], [], []>} : vector<8x80xf32>, vector<80x160xf32>, vector<8x160xf32> -> vector<8x160xf32>
    %508 = arith.addf %503, %507 : vector<8x160xf32>
    %509 = vector.extract_strided_slice %389 {offsets = [4, 40], sizes = [8, 80], strides = [1, 1]} : vector<12x120xf32> to vector<8x80xf32>
    %c24_379 = arith.constant 24 : index
    %c0_380 = arith.constant 0 : index
    %c0_381 = arith.constant 0 : index
    %510 = vector.load %arg3[%c24_379, %c0_380, %c0_381] : memref<25x80x160xf32, #tpu.memory_space<vmem>>, vector<1x80x160xf32>
    %511 = vector.shape_cast %510 : vector<1x80x160xf32> to vector<80x160xf32>
    %cst_382 = arith.constant dense<0.000000e+00> : vector<8x160xf32>
    %512 = tpu.matmul %509, %511, %cst_382 {dimension_numbers = #tpu.dot_dimension_numbers<[1], [0], [0], [1], [0, 0, 1, 1], [], []>} : vector<8x80xf32>, vector<80x160xf32>, vector<8x160xf32> -> vector<8x160xf32>
    %513 = arith.addf %508, %512 : vector<8x160xf32>
    %c0_383 = arith.constant 0 : index
    %c0_384 = arith.constant 0 : index
    %514 = vector.load %arg5[%c0_383, %c0_384] : memref<1x160xf32, #tpu.memory_space<vmem>>, vector<1x160xf32>
    %515 = vector.broadcast %514 : vector<1x160xf32> to vector<8x160xf32>
    %516 = arith.addf %513, %515 : vector<8x160xf32>
    %517 = vector.extract_strided_slice %516 {offsets = [0, 0], sizes = [7, 140], strides = [1, 1]} : vector<8x160xf32> to vector<7x140xf32>
    %518 = vector.extract_strided_slice %516 {offsets = [1, 0], sizes = [7, 140], strides = [1, 1]} : vector<8x160xf32> to vector<7x140xf32>
    %519 = arith.maximumf %517, %518 : vector<7x140xf32>
    %520 = vector.extract_strided_slice %516 {offsets = [0, 20], sizes = [7, 140], strides = [1, 1]} : vector<8x160xf32> to vector<7x140xf32>
    %521 = vector.extract_strided_slice %516 {offsets = [1, 20], sizes = [7, 140], strides = [1, 1]} : vector<8x160xf32> to vector<7x140xf32>
    %522 = arith.maximumf %520, %521 : vector<7x140xf32>
    %523 = arith.maximumf %519, %522 : vector<7x140xf32>
    %cst_385 = arith.constant 0.000000e+00 : f32
    %524 = vector.broadcast %cst_385 : f32 to vector<7x140xf32>
    %525 = arith.maximumf %523, %524 : vector<7x140xf32>
    %526 = vector.extract_strided_slice %525 {offsets = [0, 0], sizes = [1, 140], strides = [1, 1]} : vector<7x140xf32> to vector<1x140xf32>
    %c0_386 = arith.constant 0 : index
    %c0_387 = arith.constant 0 : index
    %c0_388 = arith.constant 0 : index
    %527 = vector.load %arg6[%c0_386, %c0_387, %c0_388] : memref<4x140x50xf32, #tpu.memory_space<vmem>>, vector<1x140x50xf32>
    %528 = vector.shape_cast %527 : vector<1x140x50xf32> to vector<140x50xf32>
    %cst_389 = arith.constant dense<0.000000e+00> : vector<1x50xf32>
    %529 = tpu.matmul %526, %528, %cst_389 {dimension_numbers = #tpu.dot_dimension_numbers<[1], [0], [0], [1], [0, 0, 1, 1], [], []>} : vector<1x140xf32>, vector<140x50xf32>, vector<1x50xf32> -> vector<1x50xf32>
    %530 = vector.extract_strided_slice %525 {offsets = [2, 0], sizes = [1, 140], strides = [1, 1]} : vector<7x140xf32> to vector<1x140xf32>
    %c1_390 = arith.constant 1 : index
    %c0_391 = arith.constant 0 : index
    %c0_392 = arith.constant 0 : index
    %531 = vector.load %arg6[%c1_390, %c0_391, %c0_392] : memref<4x140x50xf32, #tpu.memory_space<vmem>>, vector<1x140x50xf32>
    %532 = vector.shape_cast %531 : vector<1x140x50xf32> to vector<140x50xf32>
    %cst_393 = arith.constant dense<0.000000e+00> : vector<1x50xf32>
    %533 = tpu.matmul %530, %532, %cst_393 {dimension_numbers = #tpu.dot_dimension_numbers<[1], [0], [0], [1], [0, 0, 1, 1], [], []>} : vector<1x140xf32>, vector<140x50xf32>, vector<1x50xf32> -> vector<1x50xf32>
    %534 = arith.addf %529, %533 : vector<1x50xf32>
    %535 = vector.extract_strided_slice %525 {offsets = [4, 0], sizes = [1, 140], strides = [1, 1]} : vector<7x140xf32> to vector<1x140xf32>
    %c2_394 = arith.constant 2 : index
    %c0_395 = arith.constant 0 : index
    %c0_396 = arith.constant 0 : index
    %536 = vector.load %arg6[%c2_394, %c0_395, %c0_396] : memref<4x140x50xf32, #tpu.memory_space<vmem>>, vector<1x140x50xf32>
    %537 = vector.shape_cast %536 : vector<1x140x50xf32> to vector<140x50xf32>
    %cst_397 = arith.constant dense<0.000000e+00> : vector<1x50xf32>
    %538 = tpu.matmul %535, %537, %cst_397 {dimension_numbers = #tpu.dot_dimension_numbers<[1], [0], [0], [1], [0, 0, 1, 1], [], []>} : vector<1x140xf32>, vector<140x50xf32>, vector<1x50xf32> -> vector<1x50xf32>
    %539 = arith.addf %534, %538 : vector<1x50xf32>
    %540 = vector.extract_strided_slice %525 {offsets = [6, 0], sizes = [1, 140], strides = [1, 1]} : vector<7x140xf32> to vector<1x140xf32>
    %c3_398 = arith.constant 3 : index
    %c0_399 = arith.constant 0 : index
    %c0_400 = arith.constant 0 : index
    %541 = vector.load %arg6[%c3_398, %c0_399, %c0_400] : memref<4x140x50xf32, #tpu.memory_space<vmem>>, vector<1x140x50xf32>
    %542 = vector.shape_cast %541 : vector<1x140x50xf32> to vector<140x50xf32>
    %cst_401 = arith.constant dense<0.000000e+00> : vector<1x50xf32>
    %543 = tpu.matmul %540, %542, %cst_401 {dimension_numbers = #tpu.dot_dimension_numbers<[1], [0], [0], [1], [0, 0, 1, 1], [], []>} : vector<1x140xf32>, vector<140x50xf32>, vector<1x50xf32> -> vector<1x50xf32>
    %544 = arith.addf %539, %543 : vector<1x50xf32>
    %c0_402 = arith.constant 0 : index
    %c0_403 = arith.constant 0 : index
    %545 = vector.load %arg7[%c0_402, %c0_403] : memref<1x50xf32, #tpu.memory_space<vmem>>, vector<1x50xf32>
    %546 = arith.addf %544, %545 : vector<1x50xf32>
    %cst_404 = arith.constant 0.000000e+00 : f32
    %547 = vector.broadcast %cst_404 : f32 to vector<1x50xf32>
    %548 = arith.maximumf %546, %547 : vector<1x50xf32>
    %c0_405 = arith.constant 0 : index
    %c0_406 = arith.constant 0 : index
    %549 = vector.load %arg8[%c0_405, %c0_406] : memref<50x10xf32, #tpu.memory_space<vmem>>, vector<50x10xf32>
    %cst_407 = arith.constant dense<0.000000e+00> : vector<1x10xf32>
    %550 = tpu.matmul %548, %549, %cst_407 {dimension_numbers = #tpu.dot_dimension_numbers<[1], [0], [0], [1], [0, 0, 1, 1], [], []>} : vector<1x50xf32>, vector<50x10xf32>, vector<1x10xf32> -> vector<1x10xf32>
    %c0_408 = arith.constant 0 : index
    %c0_409 = arith.constant 0 : index
    %551 = vector.load %arg9[%c0_408, %c0_409] : memref<1x10xf32, #tpu.memory_space<vmem>>, vector<1x10xf32>
    %552 = arith.addf %550, %551 : vector<1x10xf32>
    %cst_410 = arith.constant dense<0xFF800000> : vector<1xf32>
    %553 = vector.multi_reduction <maximumf>, %552, %cst_410 [1] : vector<1x10xf32> to vector<1xf32>
    %554 = vector.shape_cast %553 : vector<1xf32> to vector<1x1xf32>
    %555 = vector.broadcast %554 : vector<1x1xf32> to vector<1x10xf32>
    %556 = arith.subf %552, %555 : vector<1x10xf32>
    %557 = math.exp %556 : vector<1x10xf32>
    %cst_411 = arith.constant dense<0.000000e+00> : vector<1xf32>
    %558 = vector.multi_reduction <add>, %557, %cst_411 [1] : vector<1x10xf32> to vector<1xf32>
    %559 = vector.shape_cast %558 : vector<1xf32> to vector<1x1xf32>
    %560 = math.log %559 : vector<1x1xf32>
    %561 = vector.broadcast %560 : vector<1x1xf32> to vector<1x10xf32>
    %562 = arith.subf %556, %561 : vector<1x10xf32>
    %c1_412 = arith.constant 1 : index
    %c0_413 = arith.constant 0 : index
    %563 = vector.load %arg10[%c1_412, %c0_413] : memref<2x10xf32, #tpu.memory_space<vmem>>, vector<1x10xf32>
    tpu.vector_store %arg10[%c1_412, %c0_413], %562 {strides = array<i32>} : memref<2x10xf32, #tpu.memory_space<vmem>>, vector<1x10xf32>,
    return
  }
}

</mosaic_0001>

<bundles_post_ra>
// kernel: tile.13
= control target key start
LH: loop header
LB: loop body
LE: loop exit
PB: predicated region body
PF: predicated region fallthrough
CT: control target
= control target key end

     0   :  { %s28_s0 = inlined_call_operand.vmem [shape: f32[10], index: 0, kind: input, shape index: {}]   ;;  %s29_s1 = inlined_call_operand.vmem [shape: f32[12,10], index: 1, kind: output, shape index: {}]  }
   0x1   :  { %v4_v0 = vld [vmem:[%s28_s0] ss:$0 sm:$0xff] }
   0x2   :  { %5 = vst [vmem:[%s29_s1] sm:$0xff] %v4_v0  ;;  %8 = vst [vmem:[%s29_s1 + $0x8] sm:$0xff] %v4_v0 }

// kernel: tile.14
= control target key start
LH: loop header
LB: loop body
LE: loop exit
PB: predicated region body
PF: predicated region fallthrough
CT: control target
= control target key end

     0   :  { %s101_s10 = smov 110   ;;  %s102_s11 = smov 90   ;;  %vm3_vm0 = vcmask 80896   ;;  %vm9_vm1 = vcmask 982896   ;;  %vm15_vm2 = vcmask 900896   ;;  %vm21_vm3 = vcmask 818896   ;;  %s161_s0 = inlined_call_operand.vmem [shape: f32[12,10], index: 0, kind: input, shape index: {}]   ;;  %s162_s1 = inlined_call_operand.vmem [shape: f32[1,120], index: 1, kind: output, shape index: {}]  }
   0x1   :  { %v79_v0 = vld [vmem:[%s161_s0 + $0xb] sm:$0x1]   ;;  %v81_v1 = vld [vmem:[%s161_s0 + $0x9] sm:$0x1]   ;;  %v80_v2 = vld [vmem:[%s161_s0 + $0xa] sm:$0x1]  }
   0x2   :  { %7 = vrot.lane.b32.xlu0 %v79_v0, %s101_s10  ;;  %19 = vrot.lane.b32.xlu1 %v81_v1, %s102_s11  ;;  %v82_v3 = vld [vmem:[%s161_s0 + $0x8] sm:$0x1]   ;;  %s103_s16 = smov 100   ;;  %s104_s17 = smov 80   ;;  %v83_v4 = vld [vmem:[%s161_s0 + $0x7] sm:$0x1]  }
   0x3   :  { %v2_v5 = vld [vmem:[%s161_s0] sm:$0x1]   ;;  %v84_v6 = vld [vmem:[%s161_s0 + $0x6] sm:$0x1]   ;;  %s105_s24 = smov 70   ;;  %s106_s25 = smov 60  }
   0x4   :  { %4 = vst.msk [vmem:[#allocation0] sm:$0x1] %vm3_vm0, %v2_v5   ;;  %v85_v7 = vld [vmem:[%s161_s0 + $0x5] sm:$0x1]   ;;  %v86_v8 = vld [vmem:[%s161_s0 + $0x4] sm:$0x1]  }
   0x5   :  { %s107_s30 = smov 50   ;;  %s108_s2 = smov 40   ;;  %v87_v9 = vld [vmem:[%s161_s0 + $0x3] sm:$0x1]   ;;  %v88_v10 = vld [vmem:[%s161_s0 + $0x2] sm:$0x1]  }
   0x6   :  { %13 = vrot.lane.b32.xlu0 %v80_v2, %s103_s16  ;;  %25 = vrot.lane.b32.xlu1 %v82_v3, %s104_s17  ;;  %s109_s7 = smov 30   ;;  %s110_s8 = smov 20   ;;  %v89_v11 = vld [vmem:[%s161_s0 + $0x1] sm:$0x1]   ;;  %vm27_vm4 = vcmask 736896   ;;  %vm33_vm5 = vcmask 654896  }
   0x7   :  { %s111_s0 = smov 10   ;;  %vm39_vm6 = vcmask 572896   ;;  %vm45_vm7 = vcmask 490896   ;;  %vm51_vm8 = vcmask 408896   ;;  %vm57_vm9 = vcmask 326896  }
   0x8   :  { %vm63_vm10 = vcmask 244896   ;;  %vm69_vm11 = vcmask 162896  }
   0xa   :  { %31 = vrot.lane.b32.xlu0 %v83_v4, %s105_s24  ;;  %37 = vrot.lane.b32.xlu1 %v84_v6, %s106_s25 }
   0xe   :  { %43 = vrot.lane.b32.xlu0 %v85_v7, %s107_s30  ;;  %49 = vrot.lane.b32.xlu1 %v86_v8, %s108_s2 }
  0x12   :  { %55 = vrot.lane.b32.xlu0 %v87_v9, %s109_s7  ;;  %61 = vrot.lane.b32.xlu1 %v88_v10, %s110_s8 }
  0x16   :  { %67 = vrot.lane.b32.xlu0 %v89_v11, %s111_s0 }
  0x74   :  { %v8_v12 = vpop.permute.xlu0 %7   ;;  %v20_v13 = vpop.permute.xlu1 %19  }
  0x75   :  { %10 = vst.msk [vmem:[#allocation0] sm:$0x1] %vm9_vm1, %v8_v12  }
  0x78   :  { %v14_v14 = vpop.permute.xlu0 %13   ;;  %v26_v15 = vpop.permute.xlu1 %25  }
  0x79   :  { %16 = vst.msk [vmem:[#allocation0] sm:$0x1] %vm15_vm2, %v14_v14  }
  0x7a   :  { %22 = vst.msk [vmem:[#allocation0] sm:$0x1] %vm21_vm3, %v20_v13  }
  0x7b   :  { %28 = vst.msk [vmem:[#allocation0] sm:$0x1] %vm27_vm4, %v26_v15  }
  0x7c   :  { %v32_v16 = vpop.permute.xlu0 %31   ;;  %v38_v17 = vpop.permute.xlu1 %37  }
  0x7d   :  { %34 = vst.msk [vmem:[#allocation0] sm:$0x1] %vm33_vm5, %v32_v16  }
  0x7e   :  { %40 = vst.msk [vmem:[#allocation0] sm:$0x1] %vm39_vm6, %v38_v17  }
  0x80   :  { %v44_v18 = vpop.permute.xlu0 %43   ;;  %v50_v19 = vpop.permute.xlu1 %49  }
  0x81   :  { %46 = vst.msk [vmem:[#allocation0] sm:$0x1] %vm45_vm7, %v44_v18  }
  0x82   :  { %52 = vst.msk [vmem:[#allocation0] sm:$0x1] %vm51_vm8, %v50_v19  }
  0x84   :  { %v56_v20 = vpop.permute.xlu0 %55   ;;  %v62_v21 = vpop.permute.xlu1 %61  }
  0x85   :  { %58 = vst.msk [vmem:[#allocation0] sm:$0x1] %vm57_vm9, %v56_v20  }
  0x86   :  { %64 = vst.msk [vmem:[#allocation0] sm:$0x1] %vm63_vm10, %v62_v21  }
  0x88   :  { %v68_v22 = vpop.permute.xlu0 %67  }
  0x89   :  { %70 = vst.msk [vmem:[#allocation0] sm:$0x1] %vm69_vm11, %v68_v22  }
  0x90   :  { %v75_v23 = vld [vmem:[#allocation0] sm:$0x1] }
  0x91   :  { %78 = vst [vmem:[%s162_s1] sm:$0x1] %v75_v23 }

// kernel: tile.18
= control target key start
LH: loop header
LB: loop body
LE: loop exit
PB: predicated region body
PF: predicated region fallthrough
CT: control target
= control target key end

     0   :  { %s22_s0 = inlined_call_operand.vmem [shape: f32[20], index: 0, kind: input, shape index: {}]   ;;  %s23_s1 = inlined_call_operand.vmem [shape: f32[8,20], index: 1, kind: output, shape index: {}]  }
   0x1   :  { %v4_v0 = vld [vmem:[%s22_s0] ss:$0 sm:$0xff] }
   0x2   :  { %5 = vst [vmem:[%s23_s1] sm:$0xff] %v4_v0 }

// kernel: tile.19
= control target key start
LH: loop header
LB: loop body
LE: loop exit
PB: predicated region body
PF: predicated region fallthrough
CT: control target
= control target key end

     0   :  { %vm9_vm0 = vcmask 64512   ;;  %s85_s12 = smov 120   ;;  %s86_s13 = smov 80   ;;  %vm3_vm1 = vcmask 162816   ;;  %vm13_vm2 = vcmask 97280   ;;  %vm16_vm3 = vcmask 1048512   ;;  %s135_s0 = inlined_call_operand.vmem [shape: f32[8,20], index: 0, kind: input, shape index: {}]   ;;  %s136_s1 = inlined_call_operand.vmem [shape: f32[1,160], index: 1, kind: output, shape index: {}]  }
   0x1   :  { %v69_v0 = vld [vmem:[%s135_s0 + $0x6] sm:$0x1]   ;;  %v72_v3 = vld [vmem:[%s135_s0 + $0x4] sm:$0x1]   ;;  %v71_v4 = vld [vmem:[%s135_s0 + $0x5] sm:$0x1]  }
   0x2   :  { %v70_v1 = vld [vmem:[%s135_s0 + $0x6] sm:$0x1]   ;;  %26 = vrot.lane.b32.xlu1 %v72_v3, %s86_s13  ;;  %v73_v5 = vld [vmem:[%s135_s0 + $0x3] sm:$0x1]   ;;  %v2_v6 = vld [vmem:[%s135_s0] sm:$0x1]  }
   0x3   :  { %v10_v2 = vsel %vm9_vm0, %v70_v1, %v69_v0  ;;  %4 = vst.msk [vmem:[#allocation0] sm:$0x1] %vm3_vm1, %v2_v6   ;;  %s87_s20 = smov 100   ;;  %s88_s21 = smov 60   ;;  %v74_v7 = vld [vmem:[%s135_s0 + $0x2] sm:$0x1]  }
   0x4   :  { %11 = vrot.lane.b32.xlu0 %v10_v2, %s85_s12  ;;  %v75_v8 = vld [vmem:[%s135_s0 + $0x1] sm:$0x1]   ;;  %s89_s26 = smov 40   ;;  %s90_s27 = smov 20   ;;  %v76_v9 = vld [vmem:[%s135_s0 + $0x7] sm:$0x1]  }
   0x5   :  { %s91_s0 = smov 12   ;;  %vm22_vm4 = vcmask 982816   ;;  %vm28_vm5 = vcmask 818816   ;;  %vm34_vm6 = vcmask 654816   ;;  %vm40_vm7 = vcmask 490816  }
   0x6   :  { %32 = vrot.lane.b32.xlu1 %v73_v5, %s88_s21  ;;  %vm46_vm8 = vcmask 326816   ;;  %vm52_vm9 = vcmask 261216  }
   0x8   :  { %20 = vrot.lane.b32.xlu0 %v71_v4, %s87_s20 }
   0xa   :  { %44 = vrot.lane.b32.xlu1 %v75_v8, %s90_s27 }
   0xc   :  { %38 = vrot.lane.b32.xlu0 %v74_v7, %s89_s26 }
  0x10   :  { %50 = vrot.lane.b32.xlu0 %v76_v9, %s91_s0 }
  0x74   :  { %v27_v11 = vpop.permute.xlu1 %26  }
  0x76   :  { %v12_v10 = vpop.permute.xlu0 %11  }
  0x77   :  { %15 = vst.msk [vmem:[#allocation0 + $0x8] sm:$0x1] %vm13_vm2, %v12_v10  }
  0x78   :  { %17 = vst.msk [vmem:[#allocation0] sm:$0x1] %vm16_vm3, %v12_v10   ;;  %v33_v13 = vpop.permute.xlu1 %32  }
  0x7a   :  { %v21_v12 = vpop.permute.xlu0 %20  }
  0x7b   :  { %23 = vst.msk [vmem:[#allocation0] sm:$0x1] %vm22_vm4, %v21_v12  }
  0x7c   :  { %29 = vst.msk [vmem:[#allocation0] sm:$0x1] %vm28_vm5, %v27_v11   ;;  %v45_v15 = vpop.permute.xlu1 %44  }
  0x7d   :  { %35 = vst.msk [vmem:[#allocation0] sm:$0x1] %vm34_vm6, %v33_v13  }
  0x7e   :  { %v39_v14 = vpop.permute.xlu0 %38  }
  0x7f   :  { %41 = vst.msk [vmem:[#allocation0] sm:$0x1] %vm40_vm7, %v39_v14  }
  0x80   :  { %47 = vst.msk [vmem:[#allocation0] sm:$0x1] %vm46_vm8, %v45_v15  }
  0x82   :  { %v51_v16 = vpop.permute.xlu0 %50  }
  0x83   :  { %54 = vst.msk [vmem:[#allocation0 + $0x8] sm:$0x1] %vm52_vm9, %v51_v16  }
  0x87   :  { %v59_v17 = vld [vmem:[#allocation0] sm:$0x1] }
  0x88   :  { %62 = vst [vmem:[%s136_s1] sm:$0x1] %v59_v17 }
  0x8a   :  { %v64_v18 = vld [vmem:[#allocation0 + $0x8] sm:$0x1] }
  0x8b   :  { %77 = vst [vmem:[%s136_s1 + $0x1] sm:$0x1] %v64_v18 }

// kernel: net_forward.1
= control target key start
LH: loop header
LB: loop body
LE: loop exit
PB: predicated region body
PF: predicated region fallthrough
CT: control target
= control target key end

     0   :  { %vm56_vm0 = vcmask 1043456   ;;  %vm49_vm1 = vcmask 228352   ;;  %vm224_vm2 = vcmask 1046528   ;;  %s16387_s0 = inlined_call_operand.vmem [shape: f32[2,14,28], index: 0, kind: input, shape index: {}]   ;;  %s16388_s1 = inlined_call_operand.vmem [shape: f32[2,14,28], index: 1, kind: input, shape index: {}]   ;;  %s16389_s2 = inlined_call_operand.vmem [shape: f32[10,28,120], index: 2, kind: input, shape index: {}]   ;;  %s16390_s3 = inlined_call_operand.vmem [shape: f32[25,80,160], index: 3, kind: input, shape index: {}]   ;;  %s16391_s4 = inlined_call_operand.vmem [shape: f32[1,120], index: 4, kind: input, shape index: {}]   ;;  %s16392_s5 = inlined_call_operand.vmem [shape: f32[1,160], index: 5, kind: input, shape index: {}]   ;;  %s16393_s6 = inlined_call_operand.vmem [shape: f32[4,140,50], index: 6, kind: input, shape index: {}]   ;;  %s16394_s7 = inlined_call_operand.vmem [shape: f32[1,50], index: 7, kind: input, shape index: {}]   ;;  %s16395_s8 = inlined_call_operand.vmem [shape: f32[50,10], index: 8, kind: input, shape index: {}]   ;;  %s16396_s9 = inlined_call_operand.vmem [shape: f32[1,10], index: 9, kind: input, shape index: {}]   ;;  %s16397_s10 = inlined_call_operand.hbm [shape: f32[2,10], index: 10, kind: output, shape index: {}]  }
   0x1   :  { %v11467_v0 = vld [vmem:[%s16389_s2 + $0x58] sm:$0xf]  ;;  %v11477_v2 = vld [vmem:[%s16389_s2 + $0x50] sm:$0xff]  ;;  %v11495_v4 = vld [vmem:[%s16389_s2 + $0x48] sm:$0xff] }
   0x2   :  { %v11472_v1 = vld [vmem:[%s16389_s2 + $0x18] sm:$0xf]  ;;  %10891 = vmatprep.subr.msk.mxu0 %vm56_vm0, %v11467_v0  ;;  %v11486_v3 = vld [vmem:[%s16389_s2 + $0x10] sm:$0xff]  ;;  %v11500_v5 = vld [vmem:[%s16389_s2 + $0x8] sm:$0xff] }
   0x3   :  { %10902 = vmatprep.subr.msk.mxu1 %vm56_vm0, %v11472_v1  ;;  %10892 = vmatpush3.msk.msra.mxu0 %vm56_vm0, %v11467_v0  ;;  %v11509_v6 = vld [vmem:[%s16389_s2 + $0x40] sm:$0xff]  ;;  %v11535_v10 = vld [vmem:[%s16388_s1 + $0x8] sm:$0x3f]  ;;  %v11548_v12 = vld [vmem:[%s16389_s2 + $0x98] sm:$0xf] }
   0x4   :  { %10903 = vmatpush3.msk.msra.mxu1 %vm56_vm0, %v11472_v1  ;;  %10893 = vmatprep.subr.mxu0 %v11477_v2  ;;  %v11514_v7 = vld [vmem:[%s16389_s2] sm:$0xff]  ;;  %v11540_v11 = vld [vmem:[%s16387_s0 + $0x8] sm:$0x3f]  ;;  %v11553_v13 = vld [vmem:[%s16389_s2 + $0xd8] sm:$0xf]  ;;  %v11598_v21 = vrot.slane %v11535_v10, 1 }
   0x5   :  { %10904 = vmatprep.subr.mxu1 %v11486_v3  ;;  %10894 = vmatpush3.msra.mxu0 %v11477_v2  ;;  %v11521_v8 = vld [vmem:[%s16388_s1] sm:$0xff]  ;;  %v11565_v14 = vld [vmem:[%s16389_s2 + $0x90] sm:$0xff]  ;;  %v11574_v17 = vrot.slane %v11540_v11, 1  ;;  %v11587_v18 = vld [vmem:[%s16389_s2 + $0x88] sm:$0xff] }
   0x6   :  { %10905 = vmatpush3.msra.mxu1 %v11486_v3  ;;  %10895 = vmatprep.subr.mxu0 %v11495_v4  ;;  %v11528_v9 = vld [vmem:[%s16387_s0] sm:$0xff]  ;;  %v11570_v15 = vld [vmem:[%s16389_s2 + $0xd0] sm:$0xff]  ;;  %v11592_v19 = vld [vmem:[%s16389_s2 + $0xc8] sm:$0xff]  ;;  %v317_v20 = vrot.slane %v11521_v8, 1 }
   0x7   :  { %10906 = vmatprep.subr.mxu1 %v11500_v5  ;;  %10896 = vmatpush3.msra.mxu0 %v11495_v4  ;;  %v225_v16 = vrot.slane %v11528_v9, 1  ;;  %v11605_v22 = vld [vmem:[%s16389_s2 + $0x80] sm:$0xff] }
   0x8   :  { %10907 = vmatpush3.msra.mxu1 %v11500_v5  ;;  %10897 = vmatprep.subr.mxu0 %v11509_v6  ;;  %v11610_v23 = vld [vmem:[%s16389_s2 + $0xc0] sm:$0xff] }
   0x9   :  { %10908 = vmatprep.subr.mxu1 %v11514_v7  ;;  %10898 = vmatpush3.msra.mxu0 %v11509_v6  ;;  %v11616_v24 = vsel %vm224_vm2, %v225_v16, %v11574_v17 }
   0xa   :  { %10899 = vmatprep.mubr.msk.f32.mxu0 %vm49_vm1, %v11521_v8  ;;  %10909 = vmatpush3.msra.mxu1 %v11514_v7 }
   0xb   :  { %10910 = vmatprep.mubr.msk.f32.mxu1 %vm49_vm1, %v11528_v9  ;;  %10900 = vmatmul.mubr.msk.f32.vlgmr.msra.gmra.mxu0 %vm49_vm1, %v11535_v10 }
   0xc   :  { %10911 = vmatmul.mubr.msk.f32.vlgmr.msra.gmra.mxu1 %vm49_vm1, %v11540_v11  ;;  %10913 = vmatprep.subr.msk.mxu0 %vm56_vm0, %v11548_v12 }
   0xd   :  { %10924 = vmatprep.subr.msk.mxu1 %vm56_vm0, %v11553_v13  ;;  %10914 = vmatpush3.msk.msra.mxu0 %vm56_vm0, %v11548_v12 }
   0xe   :  { %10925 = vmatpush3.msk.msra.mxu1 %vm56_vm0, %v11553_v13  ;;  %10915 = vmatprep.subr.mxu0 %v11565_v14 }
   0xf   :  { %10926 = vmatprep.subr.mxu1 %v11570_v15  ;;  %10916 = vmatpush3.msra.mxu0 %v11565_v14 }
  0x10   :  { %10927 = vmatpush3.msra.mxu1 %v11570_v15  ;;  %10917 = vmatprep.subr.mxu0 %v11587_v18 }
  0x11   :  { %10928 = vmatprep.subr.mxu1 %v11592_v19 }
  0x12   :  { %15 = vsyncpa [#allocation3], 0  ;;  %10918 = vmatpush3.msra.mxu0 %v11587_v18  ;;  %10929 = vmatpush3.msra.mxu1 %v11592_v19  ;;  %v11624_v25 = vsel %vm224_vm2, %v317_v20, %v11598_v21  ;;  %v11629_v26 = vld [vmem:[%s16389_s2 + $0x118] sm:$0xf]  ;;  %v11649_v28 = vld [vmem:[%s16389_s2 + $0x110] sm:$0xff]  ;;  %v410_v30 = vrot.slane %v11528_v9, 2 }
  0x13   :  { %10919 = vmatprep.subr.mxu0 %v11605_v22  ;;  %10930 = vmatprep.subr.mxu1 %v11610_v23  ;;  %v11637_v27 = vld [vmem:[%s16389_s2 + $0x78] sm:$0xf]  ;;  %v11654_v29 = vld [vmem:[%s16389_s2 + $0x70] sm:$0xff]  ;;  %v11658_v31 = vrot.slane %v11540_v11, 2  ;;  %v11671_v32 = vld [vmem:[%s16389_s2 + $0x108] sm:$0xff]  ;;  %vm409_vm3 = vcmask 1045504  }
  0x14   :  { %10920 = vmatpush3.msra.mxu0 %v11605_v22  ;;  %10921 = vmatprep.mubr.msk.f32.mxu0 %vm49_vm1, %v11616_v24  ;;  %v11676_v33 = vld [vmem:[%s16389_s2 + $0x68] sm:$0xff]  ;;  %v11685_v34 = vld [vmem:[%s16389_s2 + $0x100] sm:$0xff]  ;;  %v11705_v37 = vld [vmem:[%s16389_s2 + $0x38] sm:$0xf]  ;;  %v1222_v53 = vrot.slane %v11521_v8, 2  ;;  %v1223_v54 = vrot.slane %v11535_v10, 2 }
  0x15   :  { %10931 = vmatpush3.msra.mxu1 %v11610_v23  ;;  %10922 = vmatmul.mubr.msk.f32.vlgmr.msra.gmra.mxu0 %vm49_vm1, %v11574_v17  ;;  %v11690_v35 = vld [vmem:[%s16389_s2 + $0x60] sm:$0xff]  ;;  %v11696_v36 = vsel %vm409_vm3, %v410_v30, %v11658_v31  ;;  %v11713_v38 = vld [vmem:[%s16389_s2 + $0xb8] sm:$0xf]  ;;  %v11725_v39 = vld [vmem:[%s16389_s2 + $0x30] sm:$0xff]  ;;  %vm1748_vm4 = vcmask 654336   ;;  %s11403_s29 = smov 98  }
  0x16   :  { %10932 = vmatprep.mubr.msk.f32.mxu1 %vm49_vm1, %v11624_v25  ;;  %10935 = vmatprep.subr.msk.mxu0 %vm56_vm0, %v11629_v26  ;;  %v11730_v40 = vld [vmem:[%s16389_s2 + $0xb0] sm:$0xff]  ;;  %v11743_v41 = vld [vmem:[%s16389_s2 + $0x28] sm:$0xff]  ;;  %v11757_v43 = vld [vmem:[%s16389_s2 + $0x20] sm:$0xff]  ;;  %v1224_v55 = vsel %vm409_vm3, %v1222_v53, %v1223_v54  ;;  %s11404_s30 = smov 118   ;;  %s11405_s17 = smov 88   ;;  %vm3193_vm5 = vcmask 1044480  }
  0x17   :  { %10946 = vmatprep.subr.msk.mxu1 %vm56_vm0, %v11637_v27  ;;  %10933 = vmatmul.mubr.msk.f32.vlgmr.msra.gmra.mxu1 %vm49_vm1, %v11598_v21  ;;  %v11748_v42 = vld [vmem:[%s16389_s2 + $0xa8] sm:$0xff]  ;;  %v11762_v44 = vld [vmem:[%s16389_s2 + $0xa0] sm:$0xff]  ;;  %v11773_v45 = vld [vmem:[%s16389_s2 + $0xf8] sm:$0xf]  ;;  %s11406_s18 = smov 108   ;;  %vm4183_vm6 = vcmask 883712  }
  0x18   :  { %10936 = vmatpush3.msk.msra.mxu0 %vm56_vm0, %v11629_v26  ;;  %10947 = vmatpush3.msk.msra.mxu1 %vm56_vm0, %v11637_v27  ;;  %v11781_v46 = vld [vmem:[%s16389_s2 + $0x138] sm:$0xf]  ;;  %v11793_v47 = vld [vmem:[%s16389_s2 + $0xf0] sm:$0xff]  ;;  %v11811_v49 = vld [vmem:[%s16389_s2 + $0xe8] sm:$0xff]  ;;  %vm4233_vm7 = vcmask 97280   ;;  %vm4595_vm8 = vcmask 1041408  }
  0x19   :  { %10937 = vmatprep.subr.mxu0 %v11649_v28  ;;  %10948 = vmatprep.subr.mxu1 %v11654_v29  ;;  %v11798_v48 = vld [vmem:[%s16389_s2 + $0x130] sm:$0xff]  ;;  %v11816_v50 = vld [vmem:[%s16389_s2 + $0x128] sm:$0xff]  ;;  %v11825_v51 = vld [vmem:[%s16389_s2 + $0xe0] sm:$0xff]  ;;  %vm11407_vm9 = vmmov 0   ;;  %vm4591_vm10 = vcmask 408576   ;;  %vm4669_vm11 = vcmask 73728  }
  0x1a   :  { %10938 = vmatpush3.msra.mxu0 %v11649_v28  ;;  %10949 = vmatpush3.msra.mxu1 %v11654_v29  ;;  %v11830_v52 = vld [vmem:[%s16389_s2 + $0x120] sm:$0xff]  ;;  %v1723_v56 = vld [vmem:[%s16390_s3 + $0x98] sm:$0xff]  ;;  %v1722_v57 = vld [vmem:[%s16390_s3 + $0x90] sm:$0xff] }
  0x1b   :  { %10939 = vmatprep.subr.mxu0 %v11671_v32  ;;  %10950 = vmatprep.subr.mxu1 %v11676_v33  ;;  %v1721_v58 = vld [vmem:[%s16390_s3 + $0x88] sm:$0xff]  ;;  %v1720_v59 = vld [vmem:[%s16390_s3 + $0x80] sm:$0xff]  ;;  %v1719_v60 = vld [vmem:[%s16390_s3 + $0x78] sm:$0xff] }
  0x1c   :  { %10940 = vmatpush3.msra.mxu0 %v11671_v32  ;;  %10951 = vmatpush3.msra.mxu1 %v11676_v33  ;;  %v1718_v61 = vld [vmem:[%s16390_s3 + $0x70] sm:$0xff]  ;;  %v1717_v62 = vld [vmem:[%s16390_s3 + $0x68] sm:$0xff]  ;;  %v1716_v63 = vld [vmem:[%s16390_s3 + $0x60] sm:$0xff] }
  0x1d   :  { %10941 = vmatprep.subr.mxu0 %v11685_v34  ;;  %10952 = vmatprep.subr.mxu1 %v11690_v35  ;;  %v9413_v16 = vld [vmem:[%s16390_s3 + $0x128] sm:$0xff]  ;;  %v9399_v30 = vld [vmem:[%s16390_s3 + $0xb8] sm:$0xff] }
  0x1e   :  { %10942 = vmatpush3.msra.mxu0 %v11685_v34  ;;  %10943 = vmatprep.mubr.msk.f32.mxu0 %vm49_vm1, %v11696_v36  ;;  %v9409_v20 = vld [vmem:[%s16390_s3 + $0x108] sm:$0xff] }
  0x1f   :  { %10953 = vmatpush3.msra.mxu1 %v11690_v35  ;;  %10944 = vmatmul.mubr.msk.f32.vlgmr.msra.gmra.mxu0 %vm49_vm1, %v11658_v31 }
  0x20   :  { %10954 = vmatprep.mubr.msk.f32.mxu1 %vm49_vm1, %v11521_v8  ;;  %10957 = vmatprep.subr.msk.mxu0 %vm56_vm0, %v11705_v37 }
  0x21   :  { %10968 = vmatprep.subr.msk.mxu1 %vm56_vm0, %v11713_v38  ;;  %10955 = vmatmul.mubr.msk.f32.vlgmr.msra.gmra.mxu1 %vm49_vm1, %v11535_v10 }
  0x22   :  { %10958 = vmatpush3.msk.msra.mxu0 %vm56_vm0, %v11705_v37  ;;  %10969 = vmatpush3.msk.msra.mxu1 %vm56_vm0, %v11713_v38 }
  0x23   :  { %10959 = vmatprep.subr.mxu0 %v11725_v39  ;;  %10970 = vmatprep.subr.mxu1 %v11730_v40 }
  0x24   :  { %10960 = vmatpush3.msra.mxu0 %v11725_v39  ;;  %10971 = vmatpush3.msra.mxu1 %v11730_v40 }
  0x25   :  { %10961 = vmatprep.subr.mxu0 %v11743_v41  ;;  %10972 = vmatprep.subr.mxu1 %v11748_v42 }
  0x26   :  { %10962 = vmatpush3.msra.mxu0 %v11743_v41  ;;  %10973 = vmatpush3.msra.mxu1 %v11748_v42 }
  0x27   :  { %10963 = vmatprep.subr.mxu0 %v11757_v43  ;;  %10974 = vmatprep.subr.mxu1 %v11762_v44 }
  0x28   :  { %10964 = vmatpush3.msra.mxu0 %v11757_v43  ;;  %10965 = vmatprep.mubr.msk.f32.mxu0 %vm49_vm1, %v11528_v9  ;;  %v1706_v9 = vld [vmem:[%s16390_s3 + $0x10] sm:$0xff] }
  0x29   :  { %10975 = vmatpush3.msra.mxu1 %v11762_v44  ;;  %10966 = vmatmul.mubr.msk.f32.vlgmr.msra.gmra.mxu0 %vm49_vm1, %v11540_v11  ;;  %v1704_v11 = vld [vmem:[%s16390_s3] sm:$0xff] }
  0x2a   :  { %10976 = vmatprep.mubr.msk.f32.mxu1 %vm49_vm1, %v11616_v24  ;;  %10979 = vmatprep.subr.msk.mxu0 %vm56_vm0, %v11773_v45 }
  0x2b   :  { %10990 = vmatprep.subr.msk.mxu1 %vm56_vm0, %v11781_v46  ;;  %10977 = vmatmul.mubr.msk.f32.vlgmr.msra.gmra.mxu1 %vm49_vm1, %v11574_v17 }
  0x2c   :  { %10980 = vmatpush3.msk.msra.mxu0 %vm56_vm0, %v11773_v45  ;;  %10991 = vmatpush3.msk.msra.mxu1 %vm56_vm0, %v11781_v46 }
  0x2d   :  { %10981 = vmatprep.subr.mxu0 %v11793_v47  ;;  %10992 = vmatprep.subr.mxu1 %v11798_v48 }
  0x2e   :  { %10982 = vmatpush3.msra.mxu0 %v11793_v47  ;;  %10993 = vmatpush3.msra.mxu1 %v11798_v48 }
  0x2f   :  { %10983 = vmatprep.subr.mxu0 %v11811_v49  ;;  %10994 = vmatprep.subr.mxu1 %v11816_v50 }
  0x30   :  { %10984 = vmatpush3.msra.mxu0 %v11811_v49  ;;  %10995 = vmatpush3.msra.mxu1 %v11816_v50 }
  0x31   :  { %10985 = vmatprep.subr.mxu0 %v11825_v51  ;;  %10996 = vmatprep.subr.mxu1 %v11830_v52 }
  0x32   :  { %10986 = vmatpush3.msra.mxu0 %v11825_v51  ;;  %10987 = vmatprep.mubr.msk.f32.mxu0 %vm49_vm1, %v11624_v25 }
  0x33   :  { %10997 = vmatpush3.msra.mxu1 %v11830_v52  ;;  %10988 = vmatmul.mubr.msk.f32.vlgmr.msra.gmra.mxu0 %vm49_vm1, %v11598_v21 }
  0x34   :  { %10998 = vmatprep.mubr.msk.f32.mxu1 %vm49_vm1, %v11696_v36  ;;  %11001 = vmatprep.subr.msk.mxu0 %vm56_vm0, %v11467_v0 }
  0x35   :  { %11012 = vmatprep.subr.msk.mxu1 %vm56_vm0, %v11472_v1  ;;  %10999 = vmatmul.mubr.msk.f32.vlgmr.msra.gmra.mxu1 %vm49_vm1, %v11658_v31 }
  0x36   :  { %11002 = vmatpush3.msk.msra.mxu0 %vm56_vm0, %v11467_v0  ;;  %11013 = vmatpush3.msk.msra.mxu1 %vm56_vm0, %v11472_v1  ;;  %v1715_v0 = vld [vmem:[%s16390_s3 + $0x58] sm:$0xff]  ;;  %v1714_v1 = vld [vmem:[%s16390_s3 + $0x50] sm:$0xff] }
  0x37   :  { %11003 = vmatprep.subr.mxu0 %v11477_v2  ;;  %11014 = vmatprep.subr.mxu1 %v11486_v3 }
  0x38   :  { %11004 = vmatpush3.msra.mxu0 %v11477_v2  ;;  %11015 = vmatpush3.msra.mxu1 %v11486_v3  ;;  %v1713_v2 = vld [vmem:[%s16390_s3 + $0x48] sm:$0xff]  ;;  %v1712_v3 = vld [vmem:[%s16390_s3 + $0x40] sm:$0xff] }
  0x39   :  { %11005 = vmatprep.subr.mxu0 %v11495_v4  ;;  %11016 = vmatprep.subr.mxu1 %v11500_v5 }
  0x3a   :  { %11006 = vmatpush3.msra.mxu0 %v11495_v4  ;;  %11017 = vmatpush3.msra.mxu1 %v11500_v5  ;;  %v1711_v4 = vld [vmem:[%s16390_s3 + $0x38] sm:$0xff]  ;;  %v1710_v5 = vld [vmem:[%s16390_s3 + $0x30] sm:$0xff] }
  0x3b   :  { %11007 = vmatprep.subr.mxu0 %v11509_v6  ;;  %11018 = vmatprep.subr.mxu1 %v11514_v7 }
  0x3c   :  { %11008 = vmatpush3.msra.mxu0 %v11509_v6  ;;  %11009 = vmatprep.mubr.msk.f32.mxu0 %vm49_vm1, %v11616_v24  ;;  %v1709_v6 = vld [vmem:[%s16390_s3 + $0x28] sm:$0xff] }
  0x3d   :  { %11019 = vmatpush3.msra.mxu1 %v11514_v7  ;;  %11020 = vmatprep.mubr.msk.f32.mxu1 %vm49_vm1, %v11521_v8  ;;  %v1708_v7 = vld [vmem:[%s16390_s3 + $0x20] sm:$0xff] }
  0x3e   :  { %11010 = vmatmul.mubr.msk.f32.vlgmr.msra.gmra.mxu0 %vm49_vm1, %v11574_v17  ;;  %11021 = vmatmul.mubr.msk.f32.vlgmr.msra.gmra.mxu1 %vm49_vm1, %v11535_v10 }
  0x3f   :  { %11023 = vmatprep.subr.msk.mxu0 %vm56_vm0, %v11548_v12  ;;  %11034 = vmatprep.subr.msk.mxu1 %vm56_vm0, %v11553_v13 }
  0x40   :  { %11024 = vmatpush3.msk.msra.mxu0 %vm56_vm0, %v11548_v12  ;;  %11035 = vmatpush3.msk.msra.mxu1 %vm56_vm0, %v11553_v13  ;;  %v11402_v12 = vmov 0.0   ;;  %v9415_v13 = vld [vmem:[%s16390_s3 + $0x138] sm:$0xff] }
  0x41   :  { %11025 = vmatprep.subr.mxu0 %v11565_v14  ;;  %11036 = vmatprep.subr.mxu1 %v11570_v15 }
  0x42   :  { %11026 = vmatpush3.msra.mxu0 %v11565_v14  ;;  %11037 = vmatpush3.msra.mxu1 %v11570_v15  ;;  %v9458_v14 = vld [vmem:[%s16390_s3 + $0x278] sm:$0xff]  ;;  %v9414_v15 = vld [vmem:[%s16390_s3 + $0x130] sm:$0xff] }
  0x43   :  { %11027 = vmatprep.subr.mxu0 %v11587_v18  ;;  %11038 = vmatprep.subr.mxu1 %v11592_v19 }
  0x44   :  { %11028 = vmatpush3.msra.mxu0 %v11587_v18  ;;  %11039 = vmatpush3.msra.mxu1 %v11592_v19  ;;  %v9411_v18 = vld [vmem:[%s16390_s3 + $0x118] sm:$0xff]  ;;  %v9410_v19 = vld [vmem:[%s16390_s3 + $0x110] sm:$0xff] }
  0x45   :  { %11029 = vmatprep.subr.mxu0 %v11605_v22  ;;  %11040 = vmatprep.subr.mxu1 %v11610_v23 }
  0x46   :  { %11030 = vmatpush3.msra.mxu0 %v11605_v22  ;;  %11031 = vmatprep.mubr.msk.f32.mxu0 %vm49_vm1, %v11624_v25  ;;  %v9407_v22 = vld [vmem:[%s16390_s3 + $0xf8] sm:$0xff] }
  0x47   :  { %11041 = vmatpush3.msra.mxu1 %v11610_v23  ;;  %11032 = vmatmul.mubr.msk.f32.vlgmr.msra.gmra.mxu0 %vm49_vm1, %v11598_v21  ;;  %v9406_v23 = vld [vmem:[%s16390_s3 + $0xf0] sm:$0xff] }
  0x48   :  { %11042 = vmatprep.mubr.msk.f32.mxu1 %vm49_vm1, %v11696_v36  ;;  %11045 = vmatprep.subr.msk.mxu0 %vm56_vm0, %v11629_v26 }
  0x49   :  { %11056 = vmatprep.subr.msk.mxu1 %vm56_vm0, %v11637_v27  ;;  %11043 = vmatmul.mubr.msk.f32.vlgmr.msra.gmra.mxu1 %vm49_vm1, %v11658_v31 }
  0x4a   :  { %11046 = vmatpush3.msk.msra.mxu0 %vm56_vm0, %v11629_v26  ;;  %11057 = vmatpush3.msk.msra.mxu1 %vm56_vm0, %v11637_v27  ;;  %v9403_v26 = vld [vmem:[%s16390_s3 + $0xd8] sm:$0xff]  ;;  %v9402_v27 = vld [vmem:[%s16390_s3 + $0xd0] sm:$0xff] }
  0x4b   :  { %11047 = vmatprep.subr.mxu0 %v11649_v28  ;;  %11058 = vmatprep.subr.mxu1 %v11654_v29 }
  0x4c   :  { %11048 = vmatpush3.msra.mxu0 %v11649_v28  ;;  %11059 = vmatpush3.msra.mxu1 %v11654_v29  ;;  %v9401_v28 = vld [vmem:[%s16390_s3 + $0xc8] sm:$0xff]  ;;  %v9400_v29 = vld [vmem:[%s16390_s3 + $0xc0] sm:$0xff] }
  0x4d   :  { %11049 = vmatprep.subr.mxu0 %v11671_v32  ;;  %11060 = vmatprep.subr.mxu1 %v11676_v33 }
  0x4e   :  { %11050 = vmatpush3.msra.mxu0 %v11671_v32  ;;  %11061 = vmatpush3.msra.mxu1 %v11676_v33  ;;  %v9397_v32 = vld [vmem:[%s16390_s3 + $0xa8] sm:$0xff]  ;;  %v9396_v33 = vld [vmem:[%s16390_s3 + $0xa0] sm:$0xff] }
  0x4f   :  { %11051 = vmatprep.subr.mxu0 %v11685_v34  ;;  %11062 = vmatprep.subr.mxu1 %v11690_v35 }
  0x50   :  { %11052 = vmatpush3.msra.mxu0 %v11685_v34  ;;  %11053 = vmatprep.mubr.msk.f32.mxu0 %vm49_vm1, %v1224_v55  ;;  %v9437_v34 = vld [vmem:[%s16390_s3 + $0x1d8] sm:$0xff] }
  0x51   :  { %11063 = vmatpush3.msra.mxu1 %v11690_v35  ;;  %11054 = vmatmul.mubr.msk.f32.vlgmr.msra.gmra.mxu0 %vm49_vm1, %v1223_v54 }
  0x52   :  { %11064 = vmatprep.mubr.msk.f32.mxu1 %vm49_vm1, %v11616_v24  ;;  %11067 = vmatprep.subr.msk.mxu0 %vm56_vm0, %v11705_v37  ;;  %v9405_v24 = vld [vmem:[%s16390_s3 + $0xe8] sm:$0xff] }
  0x53   :  { %11078 = vmatprep.subr.msk.mxu1 %vm56_vm0, %v11713_v38  ;;  %11065 = vmatmul.mubr.msk.f32.vlgmr.msra.gmra.mxu1 %vm49_vm1, %v11574_v17  ;;  %v9412_v17 = vld [vmem:[%s16390_s3 + $0x120] sm:$0xff] }
  0x54   :  { %11068 = vmatpush3.msk.msra.mxu0 %vm56_vm0, %v11705_v37  ;;  %11079 = vmatpush3.msk.msra.mxu1 %vm56_vm0, %v11713_v38 }
  0x55   :  { %11069 = vmatprep.subr.mxu0 %v11725_v39  ;;  %11080 = vmatprep.subr.mxu1 %v11730_v40 }
  0x56   :  { %11070 = vmatpush3.msra.mxu0 %v11725_v39  ;;  %11081 = vmatpush3.msra.mxu1 %v11730_v40 }
  0x57   :  { %11071 = vmatprep.subr.mxu0 %v11743_v41  ;;  %11082 = vmatprep.subr.mxu1 %v11748_v42 }
  0x58   :  { %11072 = vmatpush3.msra.mxu0 %v11743_v41  ;;  %11083 = vmatpush3.msra.mxu1 %v11748_v42 }
  0x59   :  { %11073 = vmatprep.subr.mxu0 %v11757_v43  ;;  %11084 = vmatprep.subr.mxu1 %v11762_v44 }
  0x5a   :  { %11074 = vmatpush3.msra.mxu0 %v11757_v43  ;;  %11075 = vmatprep.mubr.msk.f32.mxu0 %vm49_vm1, %v11521_v8  ;;  %v1707_v8 = vld [vmem:[%s16390_s3 + $0x18] sm:$0xff] }
  0x5b   :  { %11085 = vmatpush3.msra.mxu1 %v11762_v44  ;;  %11076 = vmatmul.mubr.msk.f32.vlgmr.msra.gmra.mxu0 %vm49_vm1, %v11535_v10  ;;  %v1705_v10 = vld [vmem:[%s16390_s3 + $0x8] sm:$0xff] }
  0x5c   :  { %11086 = vmatprep.mubr.msk.f32.mxu1 %vm49_vm1, %v11624_v25  ;;  %11089 = vmatprep.subr.msk.mxu0 %vm56_vm0, %v11773_v45  ;;  %v9404_v25 = vld [vmem:[%s16390_s3 + $0xe0] sm:$0xff] }
  0x5d   :  { %11100 = vmatprep.subr.msk.mxu1 %vm56_vm0, %v11781_v46  ;;  %11087 = vmatmul.mubr.msk.f32.vlgmr.msra.gmra.mxu1 %vm49_vm1, %v11598_v21  ;;  %v9408_v21 = vld [vmem:[%s16390_s3 + $0x100] sm:$0xff] }
  0x5e   :  { %11090 = vmatpush3.msk.msra.mxu0 %vm56_vm0, %v11773_v45  ;;  %11101 = vmatpush3.msk.msra.mxu1 %vm56_vm0, %v11781_v46 }
  0x5f   :  { %11091 = vmatprep.subr.mxu0 %v11793_v47  ;;  %11102 = vmatprep.subr.mxu1 %v11798_v48 }
  0x60   :  { %11092 = vmatpush3.msra.mxu0 %v11793_v47  ;;  %11103 = vmatpush3.msra.mxu1 %v11798_v48 }
  0x61   :  { %11093 = vmatprep.subr.mxu0 %v11811_v49  ;;  %11104 = vmatprep.subr.mxu1 %v11816_v50 }
  0x62   :  { %11094 = vmatpush3.msra.mxu0 %v11811_v49  ;;  %11105 = vmatpush3.msra.mxu1 %v11816_v50 }
  0x63   :  { %11095 = vmatprep.subr.mxu0 %v11825_v51  ;;  %11106 = vmatprep.subr.mxu1 %v11830_v52 }
  0x64   :  { %11096 = vmatpush3.msra.mxu0 %v11825_v51  ;;  %11097 = vmatprep.mubr.msk.f32.mxu0 %vm49_vm1, %v11696_v36 }
  0x65   :  { %11107 = vmatpush3.msra.mxu1 %v11830_v52  ;;  %11108 = vmatprep.mubr.msk.f32.mxu1 %vm49_vm1, %v1224_v55 }
  0x66   :  { %11098 = vmatmul.mubr.msk.f32.vlgmr.msra.gmra.mxu0 %vm49_vm1, %v11658_v31  ;;  %11109 = vmatmul.mubr.msk.f32.vlgmr.msra.gmra.mxu1 %vm49_vm1, %v1223_v54  ;;  %v9398_v31 = vld [vmem:[%s16390_s3 + $0xb0] sm:$0xff] }
  0x67   :  { %1836 = vmatprep.subr.mxu1 %v1723_v56  ;;  %1888 = vmatprep.mubr.f32.mxu1 %v11402_v12 }
  0x68   :  { %1837 = vmatpush1.msra.mxu1 %v1722_v57  ;;  %1815 = vmatprep.mubr.f32.mxu0 %v11402_v12 }
  0x69   :  { %1838 = vmatprep.subr.mxu1 %v1721_v58  ;;  %1763 = vmatprep.subr.mxu0 %v9415_v13 }
  0x6a   :  { %1839 = vmatpush1.msra.mxu1 %v1720_v59  ;;  %1764 = vmatpush1.msra.mxu0 %v9414_v15 }
  0x6b   :  { %1840 = vmatprep.subr.mxu1 %v1719_v60  ;;  %1765 = vmatprep.subr.mxu0 %v9413_v16 }
  0x6c   :  { %1841 = vmatpush1.msra.mxu1 %v1718_v61  ;;  %1766 = vmatpush1.msra.mxu0 %v9412_v17 }
  0x6d   :  { %1842 = vmatprep.subr.mxu1 %v1717_v62  ;;  %1767 = vmatprep.subr.mxu0 %v9411_v18 }
  0x6e   :  { %1843 = vmatpush1.msra.mxu1 %v1716_v63  ;;  %1768 = vmatpush1.msra.mxu0 %v9410_v19 }
  0x6f   :  { %1844 = vmatprep.subr.mxu1 %v1715_v0  ;;  %1769 = vmatprep.subr.mxu0 %v9409_v20 }
  0x70   :  { %1845 = vmatpush1.msra.mxu1 %v1714_v1  ;;  %1770 = vmatpush1.msra.mxu0 %v9408_v21 }
  0x71   :  { %1846 = vmatprep.subr.mxu1 %v1713_v2  ;;  %1771 = vmatprep.subr.mxu0 %v9407_v22 }
  0x72   :  { %1847 = vmatpush1.msra.mxu1 %v1712_v3  ;;  %1772 = vmatpush1.msra.mxu0 %v9406_v23 }
  0x73   :  { %1848 = vmatprep.subr.mxu1 %v1711_v4  ;;  %1773 = vmatprep.subr.mxu0 %v9405_v24 }
  0x74   :  { %1849 = vmatpush1.msra.mxu1 %v1710_v5  ;;  %1774 = vmatpush1.msra.mxu0 %v9404_v25 }
  0x75   :  { %1850 = vmatprep.subr.mxu1 %v1709_v6  ;;  %1775 = vmatprep.subr.mxu0 %v9403_v26 }
  0x76   :  { %1851 = vmatpush1.msra.mxu1 %v1708_v7  ;;  %1776 = vmatpush1.msra.mxu0 %v9402_v27 }
  0x77   :  { %1852 = vmatprep.subr.mxu1 %v1707_v8  ;;  %1777 = vmatprep.subr.mxu0 %v9401_v28 }
  0x78   :  { %1853 = vmatpush1.msra.mxu1 %v1706_v9  ;;  %1778 = vmatpush1.msra.mxu0 %v9400_v29 }
  0x79   :  { %1854 = vmatprep.subr.mxu1 %v1705_v10  ;;  %1779 = vmatprep.subr.mxu0 %v9399_v30 }
  0x7a   :  { %1855 = vmatpush1.msra.mxu1 %v1704_v11  ;;  %1780 = vmatpush1.msra.mxu0 %v9398_v31 }
  0x7b   :  { %2030 = vmatprep.subr.mxu1 %v9458_v14  ;;  %1781 = vmatprep.subr.mxu0 %v9397_v32 }
  0x7c   :  { %1782 = vmatpush1.msra.mxu0 %v9396_v33 }
  0x7d   :  { %1932 = vmatprep.subr.mxu0 %v9437_v34 }
  0xcb   :  { %v10901_v35 = vpop.f32.mrf.mxu0 }
  0xcc   :  { %v10912_v36 = vpop.f32.mrf.mxu1 }
  0xcd   :  { %v126_v37 = vpop.f32.mrf.mxu0  ;;  %v216_v10 = vadd.f32 %v10912_v36, %v10901_v35 }
  0xce   :  { %v210_v39 = vpop.f32.mrf.mxu1 }
  0xcf   :  { %v211_v11 = vadd.f32 %v210_v39, %v126_v37 }
  0xd5   :  { %v10923_v38 = vpop.f32.mrf.mxu0 }
  0xd6   :  { %v311_v18 = vadd.f32 %v10923_v38, %v216_v10  ;;  %v9444_v10 = vld [vmem:[%s16390_s3 + $0x208] sm:$0xff] }
  0xd7   :  { %v10934_v40 = vpop.f32.mrf.mxu1  ;;  %v301_v41 = vpop.f32.mrf.mxu0 }
  0xd8   :  { %v310_v19 = vadd.f32 %v301_v41, %v211_v11  ;;  %v403_v30 = vadd.f32 %v10934_v40, %v311_v18  ;;  %v9395_v40 = vld [vmem:[%s16391_s4] ss:$0 sm:$0xff] }
  0xd9   :  { %v393_v43 = vpop.f32.mrf.mxu1  ;;  %v9443_v11 = vld [vmem:[%s16390_s3 + $0x200] sm:$0xff] }
  0xda   :  { %v402_v31 = vadd.f32 %v393_v43, %v310_v19  ;;  %v9439_v19 = vld [vmem:[%s16390_s3 + $0x1e0] sm:$0xff] }
  0xdf   :  { %v10945_v42 = vpop.f32.mrf.mxu0 }
  0xe0   :  { %v496_v39 = vadd.f32 %v10945_v42, %v403_v30  ;;  %v9457_v42 = vld [vmem:[%s16390_s3 + $0x270] sm:$0xff]  ;;  %v9434_v30 = vld [vmem:[%s16390_s3 + $0x1c0] sm:$0xff] }
  0xe1   :  { %v10956_v44 = vpop.f32.mrf.mxu1  ;;  %v486_v45 = vpop.f32.mrf.mxu0 }
  0xe3   :  { %v576_v47 = vpop.f32.mrf.mxu1 }
  0xe9   :  { %v10967_v46 = vpop.f32.mrf.mxu0 }
  0xea   :  { %v660_v3 = vadd.f32 %v10967_v46, %v10956_v44  ;;  %v495_v44 = vadd.f32 %v486_v45, %v402_v31  ;;  %v9456_v45 = vld [vmem:[%s16390_s3 + $0x268] sm:$0xff]  ;;  %v9497_v31 = vld [vmem:[%s16390_s3 + $0x3a0] sm:$0xff] }
  0xeb   :  { %v10978_v48 = vpop.f32.mrf.mxu1  ;;  %v654_v49 = vpop.f32.mrf.mxu0 }
  0xec   :  { %v655_v4 = vadd.f32 %v654_v49, %v576_v47  ;;  %v747_v13 = vadd.f32 %v10978_v48, %v660_v3 }
  0xed   :  { %v737_v51 = vpop.f32.mrf.mxu1 }
  0xee   :  { %v746_v14 = vadd.f32 %v737_v51, %v655_v4  ;;  %v9448_v4 = vld [vmem:[%s16390_s3 + $0x228] sm:$0xff] }
  0xf3   :  { %v10989_v50 = vpop.f32.mrf.mxu0 }
  0xf4   :  { %v832_v20 = vadd.f32 %v10989_v50, %v747_v13 }
  0xf5   :  { %v11000_v52 = vpop.f32.mrf.mxu1  ;;  %v822_v53 = vpop.f32.mrf.mxu0 }
  0xf6   :  { %v831_v21 = vadd.f32 %v822_v53, %v746_v14  ;;  %v917_v32 = vadd.f32 %v11000_v52, %v832_v20  ;;  %v9442_v14 = vld [vmem:[%s16390_s3 + $0x1f8] sm:$0xff] }
  0xf7   :  { %v907_v55 = vpop.f32.mrf.mxu1  ;;  %v9500_v20 = vld [vmem:[%s16390_s3 + $0x3b8] sm:$0xff] }
  0xf8   :  { %v916_v33 = vadd.f32 %v907_v55, %v831_v21  ;;  %v1688_v49 = vmax.f32 %v496_v39, %v917_v32  ;;  %v9433_v32 = vld [vmem:[%s16390_s3 + $0x1b8] sm:$0xff]  ;;  %v9493_v39 = vld [vmem:[%s16390_s3 + $0x380] sm:$0xff] }
  0xfa   :  { %v1687_v50 = vmax.f32 %v495_v44, %v916_v33  ;;  %v9496_v33 = vld [vmem:[%s16390_s3 + $0x398] sm:$0xff] }
  0xfb   :  { %v9492_v44 = vld [vmem:[%s16390_s3 + $0x378] sm:$0xff] }
  0xfe   :  { %v11011_v54 = vpop.f32.mrf.mxu0  ;;  %v11022_v56 = vpop.f32.mrf.mxu1 }
  0xff   :  { %v1065_v8 = vadd.f32 %v11022_v56, %v11011_v54 }
 0x100   :  { %v984_v57 = vpop.f32.mrf.mxu0  ;;  %v1059_v59 = vpop.f32.mrf.mxu1 }
 0x101   :  { %v1060_v15 = vadd.f32 %v1059_v59, %v984_v57  ;;  %v9455_v57 = vld [vmem:[%s16390_s3 + $0x260] sm:$0xff]  ;;  %v9454_v59 = vld [vmem:[%s16390_s3 + $0x258] sm:$0xff] }
 0x107   :  { %v11033_v58 = vpop.f32.mrf.mxu0 }
 0x108   :  { %v1144_v16 = vadd.f32 %v11033_v58, %v1065_v8 }
 0x109   :  { %v11044_v60 = vpop.f32.mrf.mxu1  ;;  %v1134_v61 = vpop.f32.mrf.mxu0 }
 0x10a   :  { %v1143_v23 = vadd.f32 %v1134_v61, %v1060_v15  ;;  %v1221_v27 = vadd.f32 %v11044_v60, %v1144_v16  ;;  %v9453_v60 = vld [vmem:[%s16390_s3 + $0x250] sm:$0xff] }
 0x10b   :  { %v1211_v63 = vpop.f32.mrf.mxu1  ;;  %v9441_v15 = vld [vmem:[%s16390_s3 + $0x1f0] sm:$0xff] }
 0x10c   :  { %v1220_v35 = vadd.f32 %v1211_v63, %v1143_v23 }
 0x111   :  { %v11055_v62 = vpop.f32.mrf.mxu0 }
 0x112   :  { %v1305_v36 = vadd.f32 %v11055_v62, %v1221_v27  ;;  %v9452_v62 = vld [vmem:[%s16390_s3 + $0x248] sm:$0xff] }
 0x113   :  { %v11066_v0 = vpop.f32.mrf.mxu1  ;;  %v1295_v1 = vpop.f32.mrf.mxu0 }
 0x114   :  { %v1304_v46 = vadd.f32 %v1295_v1, %v1220_v35  ;;  %v9450_v1 = vld [vmem:[%s16390_s3 + $0x238] sm:$0xff]  ;;  %v9495_v35 = vld [vmem:[%s16390_s3 + $0x390] sm:$0xff] }
 0x115   :  { %v1372_v5 = vpop.f32.mrf.mxu1 }
 0x11b   :  { %v11077_v2 = vpop.f32.mrf.mxu0 }
 0x11c   :  { %v1453_v9 = vadd.f32 %v11077_v2, %v11066_v0  ;;  %v9451_v0 = vld [vmem:[%s16390_s3 + $0x240] sm:$0xff]  ;;  %v9449_v2 = vld [vmem:[%s16390_s3 + $0x230] sm:$0xff] }
 0x11d   :  { %v11088_v6 = vpop.f32.mrf.mxu1  ;;  %v1447_v7 = vpop.f32.mrf.mxu0 }
 0x11e   :  { %v1448_v17 = vadd.f32 %v1447_v7, %v1372_v5  ;;  %v1532_v24 = vadd.f32 %v11088_v6, %v1453_v9  ;;  %v9447_v5 = vld [vmem:[%s16390_s3 + $0x220] sm:$0xff]  ;;  %v9446_v7 = vld [vmem:[%s16390_s3 + $0x218] sm:$0xff]  ;;  %v9445_v9 = vld [vmem:[%s16390_s3 + $0x210] sm:$0xff] }
 0x11f   :  { %v1522_v22 = vpop.f32.mrf.mxu1 }
 0x120   :  { %v1531_v28 = vadd.f32 %v1522_v22, %v1448_v17  ;;  %v9440_v17 = vld [vmem:[%s16390_s3 + $0x1e8] sm:$0xff] }
 0x126   :  { %v11099_v25 = vpop.f32.mrf.mxu0  ;;  %v11110_v26 = vpop.f32.mrf.mxu1 }
 0x127   :  { %v1609_v29 = vadd.f32 %v11099_v25, %v1532_v24  ;;  %v9436_v24 = vld [vmem:[%s16390_s3 + $0x1d0] sm:$0xff] }
 0x128   :  { %v1599_v34 = vpop.f32.mrf.mxu0  ;;  %v1676_v41 = vpop.f32.mrf.mxu1  ;;  %v9499_v25 = vld [vmem:[%s16390_s3 + $0x3b0] sm:$0xff] }
 0x129   :  { %v1686_v37 = vadd.f32 %v11110_v26, %v1609_v29  ;;  %v1608_v38 = vadd.f32 %v1599_v34, %v1531_v28  ;;  %v9435_v28 = vld [vmem:[%s16390_s3 + $0x1c8] sm:$0xff]  ;;  %v9432_v34 = vld [vmem:[%s16390_s3 + $0x1b0] sm:$0xff] }
 0x12a   :  { %v9498_v29 = vld [vmem:[%s16390_s3 + $0x3a8] sm:$0xff] }
 0x12b   :  { %v1690_v47 = vmax.f32 %v1305_v36, %v1686_v37  ;;  %v1685_v48 = vadd.f32 %v1676_v41, %v1608_v38  ;;  %v9431_v36 = vld [vmem:[%s16390_s3 + $0x1a8] sm:$0xff]  ;;  %v9430_v38 = vld [vmem:[%s16390_s3 + $0x1a0] sm:$0xff]  ;;  %v9429_v41 = vld [vmem:[%s16390_s3 + $0x198] sm:$0xff] }
 0x12c   :  { %v9494_v37 = vld [vmem:[%s16390_s3 + $0x388] sm:$0xff] }
 0x12d   :  { %v1689_v51 = vmax.f32 %v1304_v46, %v1685_v48  ;;  %v1692_v53 = vmax.f32 %v1688_v49, %v1690_v47  ;;  %v9428_v46 = vld [vmem:[%s16390_s3 + $0x190] sm:$0xff]  ;;  %v9427_v48 = vld [vmem:[%s16390_s3 + $0x188] sm:$0xff] }
 0x12e   :  { %v9491_v47 = vld [vmem:[%s16390_s3 + $0x370] sm:$0xff]  ;;  %v9490_v49 = vld [vmem:[%s16390_s3 + $0x368] sm:$0xff] }
 0x12f   :  { %v1691_v43 = vmax.f32 %v1687_v50, %v1689_v51  ;;  %v1701_v54 = vadd.f32 %v9395_v40, %v1692_v53  ;;  %v9426_v50 = vld [vmem:[%s16390_s3 + $0x180] sm:$0xff]  ;;  %v9425_v53 = vld [vmem:[%s16390_s3 + $0x178] sm:$0xff] }
 0x130   :  { %v9489_v51 = vld [vmem:[%s16390_s3 + $0x360] sm:$0xff] }
 0x131   :  { %v1700_v52 = vadd.f32 %v9395_v40, %v1691_v43  ;;  %v12130_v56 = vmax.f32 %v1701_v54, 0.0  ;;  %v9488_v40 = vld [vmem:[%s16390_s3 + $0x358] sm:$0xff]  ;;  %v9424_v43 = vld [vmem:[%s16390_s3 + $0x170] sm:$0xff]  ;;  %v9423_v54 = vld [vmem:[%s16390_s3 + $0x168] sm:$0xff] }
 0x133   :  { %v12118_v55 = vmax.f32 %v1700_v52, 0.0  ;;  %v2212_v61 = vrot.slane %v12130_v56, 1  ;;  %v2703_v6 = vrot.slane %v12130_v56, 2  ;;  %v3195_v16 = vrot.slane %v12130_v56, 3  ;;  %v9487_v52 = vld [vmem:[%s16390_s3 + $0x350] sm:$0xff] }
 0x134   :  { %v3686_v22 = vrot.slane %v12130_v56, 4  ;;  %v9421_v56 = vld [vmem:[%s16390_s3 + $0x158] sm:$0xff] }
 0x135   :  { %2014 = vrot.lane.b32.xlu1 %v12118_v55, %s11403_s29  ;;  %1746 = vrot.lane.b32.xlu0 %v12118_v55, %s11404_s30  ;;  %v2211_v58 = vrot.slane %v12118_v55, 1  ;;  %v2702_v3 = vrot.slane %v12118_v55, 2  ;;  %v3194_v13 = vrot.slane %v12118_v55, 3  ;;  %v3685_v21 = vrot.slane %v12118_v55, 4 }
 0x136   :  { %9417 = vmatmul.mubr.msk.f32.vlgmr.msra.gmra.mxu1 %vm1748_vm4, %v12118_v55 }
 0x137   :  { %2031 = vmatpush1.msra.mxu1 %v9457_v42  ;;  %2082 = vmatprep.mubr.f32.mxu1 %v11402_v12  ;;  %v12154_v63 = vsel %vm224_vm2, %v2211_v58, %v2212_v61  ;;  %v12185_v8 = vsel %vm409_vm3, %v2702_v3, %v2703_v6  ;;  %v12216_v18 = vsel %vm3193_vm5, %v3194_v13, %v3195_v16  ;;  %v9422_v42 = vld [vmem:[%s16390_s3 + $0x160] sm:$0xff]  ;;  %v9420_v58 = vld [vmem:[%s16390_s3 + $0x150] sm:$0xff]  ;;  %v9482_v61 = vld [vmem:[%s16390_s3 + $0x328] sm:$0xff] }
 0x138   :  { %2032 = vmatprep.subr.mxu1 %v9456_v45  ;;  %v12235_v23 = vsel %vm56_vm0, %v3685_v21, %v3686_v22  ;;  %v9485_v45 = vld [vmem:[%s16390_s3 + $0x340] sm:$0xff]  ;;  %v9477_v6 = vld [vmem:[%s16390_s3 + $0x308] sm:$0xff]  ;;  %v9538_v13 = vld [vmem:[%s16390_s3 + $0x4d8] sm:$0xff] }
 0x139   :  { %2112 = vrot.lane.b32.xlu1 %v12118_v55, %s11405_s17  ;;  %1916 = vrot.lane.b32.xlu0 %v12118_v55, %s11406_s18  ;;  %v9486_v55 = vld [vmem:[%s16390_s3 + $0x348] sm:$0xff]  ;;  %v9534_v21 = vld [vmem:[%s16390_s3 + $0x4b8] sm:$0xff] }
 0x13a   :  { %2033 = vmatpush1.msra.mxu1 %v9455_v57  ;;  %v9484_v57 = vld [vmem:[%s16390_s3 + $0x338] sm:$0xff]  ;;  %v9536_v16 = vld [vmem:[%s16390_s3 + $0x4c8] sm:$0xff]  ;;  %v9470_v22 = vld [vmem:[%s16390_s3 + $0x2d0] sm:$0xff] }
 0x13b   :  { %2034 = vmatprep.subr.mxu1 %v9454_v59  ;;  %v9483_v59 = vld [vmem:[%s16390_s3 + $0x330] sm:$0xff] }
 0x13c   :  { %2035 = vmatpush1.msra.mxu1 %v9453_v60  ;;  %v9419_v60 = vld [vmem:[%s16390_s3 + $0x148] sm:$0xff] }
 0x13d   :  { %2408 = vrot.lane.b32.xlu1 %v12154_v63, %s11406_s18  ;;  %2310 = vrot.lane.b32.xlu0 %v12154_v63, %s11404_s30 }
 0x13e   :  { %2036 = vmatprep.subr.mxu1 %v9452_v62  ;;  %v9418_v62 = vld [vmem:[%s16390_s3 + $0x140] sm:$0xff] }
 0x13f   :  { %2037 = vmatpush1.msra.mxu1 %v9451_v0  ;;  %v9481_v0 = vld [vmem:[%s16390_s3 + $0x320] sm:$0xff] }
 0x140   :  { %2038 = vmatprep.subr.mxu1 %v9450_v1  ;;  %v9479_v1 = vld [vmem:[%s16390_s3 + $0x318] sm:$0xff] }
 0x141   :  { %2604 = vrot.lane.b32.xlu1 %v12154_v63, %s11405_s17  ;;  %2506 = vrot.lane.b32.xlu0 %v12154_v63, %s11403_s29 }
 0x142   :  { %2039 = vmatpush1.msra.mxu1 %v9449_v2  ;;  %v9542_v2 = vld [vmem:[%s16390_s3 + $0x4f8] sm:$0xff] }
 0x143   :  { %2040 = vmatprep.subr.mxu1 %v9448_v4  ;;  %v9478_v4 = vld [vmem:[%s16390_s3 + $0x310] sm:$0xff] }
 0x144   :  { %2041 = vmatpush1.msra.mxu1 %v9447_v5  ;;  %v9541_v5 = vld [vmem:[%s16390_s3 + $0x4f0] sm:$0xff] }
 0x145   :  { %2899 = vrot.lane.b32.xlu1 %v12185_v8, %s11406_s18  ;;  %2801 = vrot.lane.b32.xlu0 %v12185_v8, %s11404_s30 }
 0x146   :  { %2042 = vmatprep.subr.mxu1 %v9446_v7  ;;  %v9540_v7 = vld [vmem:[%s16390_s3 + $0x4e8] sm:$0xff] }
 0x147   :  { %2043 = vmatpush1.msra.mxu1 %v9445_v9  ;;  %v9476_v9 = vld [vmem:[%s16390_s3 + $0x300] sm:$0xff] }
 0x148   :  { %2044 = vmatprep.subr.mxu1 %v9444_v10  ;;  %v9539_v10 = vld [vmem:[%s16390_s3 + $0x4e0] sm:$0xff] }
 0x149   :  { %3095 = vrot.lane.b32.xlu1 %v12185_v8, %s11405_s17  ;;  %2997 = vrot.lane.b32.xlu0 %v12185_v8, %s11403_s29 }
 0x14a   :  { %2045 = vmatpush1.msra.mxu1 %v9443_v11  ;;  %v9475_v11 = vld [vmem:[%s16390_s3 + $0x2f8] sm:$0xff] }
 0x14b   :  { %2046 = vmatprep.subr.mxu1 %v9442_v14  ;;  %v9537_v14 = vld [vmem:[%s16390_s3 + $0x4d0] sm:$0xff] }
 0x14c   :  { %2047 = vmatpush1.msra.mxu1 %v9441_v15  ;;  %v9473_v15 = vld [vmem:[%s16390_s3 + $0x2e8] sm:$0xff] }
 0x14d   :  { %3391 = vrot.lane.b32.xlu1 %v12216_v18, %s11406_s18  ;;  %3293 = vrot.lane.b32.xlu0 %v12216_v18, %s11404_s30 }
 0x14e   :  { %2048 = vmatprep.subr.mxu1 %v9440_v17  ;;  %v9472_v17 = vld [vmem:[%s16390_s3 + $0x2e0] sm:$0xff] }
 0x14f   :  { %2049 = vmatpush1.msra.mxu1 %v9439_v19  ;;  %v9535_v19 = vld [vmem:[%s16390_s3 + $0x4c0] sm:$0xff] }
 0x150   :  { %2228 = vmatprep.subr.mxu1 %v9500_v20  ;;  %v9471_v20 = vld [vmem:[%s16390_s3 + $0x2d8] sm:$0xff] }
 0x151   :  { %3587 = vrot.lane.b32.xlu1 %v12216_v18, %s11405_s17  ;;  %3489 = vrot.lane.b32.xlu0 %v12216_v18, %s11403_s29 }
 0x155   :  { %3882 = vrot.lane.b32.xlu1 %v12235_v23, %s11406_s18  ;;  %3784 = vrot.lane.b32.xlu0 %v12235_v23, %s11404_s30 }
 0x159   :  { %4078 = vrot.lane.b32.xlu1 %v12235_v23, %s11405_s17  ;;  %3980 = vrot.lane.b32.xlu0 %v12235_v23, %s11403_s29 }
 0x1a7   :  { %v2015_v26 = vpop.permute.xlu1 %2014  ;;  %v1747_v27 = vpop.permute.xlu0 %1746 }
 0x1a8   :  { %9416 = vmatmul.mubr.msk.f32.vlgmr.msra.gmra.mxu0 %vm1748_vm4, %v1747_v27  ;;  %9459 = vmatmul.mubr.msk.f32.vlgmr.msra.gmra.mxu1 %vm1748_vm4, %v2015_v26  ;;  %v9532_v26 = vld [vmem:[%s16390_s3 + $0x4a8] sm:$0xff]  ;;  %v9468_v27 = vld [vmem:[%s16390_s3 + $0x2c0] sm:$0xff] }
 0x1a9   :  { %1933 = vmatpush1.msra.mxu0 %v9436_v24  ;;  %2229 = vmatpush1.msra.mxu1 %v9499_v25  ;;  %v9533_v24 = vld [vmem:[%s16390_s3 + $0x4b0] sm:$0xff]  ;;  %v9469_v25 = vld [vmem:[%s16390_s3 + $0x2c8] sm:$0xff] }
 0x1aa   :  { %1934 = vmatprep.subr.mxu0 %v9435_v28  ;;  %2230 = vmatprep.subr.mxu1 %v9498_v29  ;;  %v9531_v28 = vld [vmem:[%s16390_s3 + $0x4a0] sm:$0xff]  ;;  %v9467_v29 = vld [vmem:[%s16390_s3 + $0x2b8] sm:$0xff] }
 0x1ab   :  { %1935 = vmatpush1.msra.mxu0 %v9434_v30  ;;  %2231 = vmatpush1.msra.mxu1 %v9497_v31  ;;  %v1917_v3 = vpop.permute.xlu0 %1916  ;;  %v9530_v30 = vld [vmem:[%s16390_s3 + $0x498] sm:$0xff]  ;;  %v9466_v31 = vld [vmem:[%s16390_s3 + $0x2b0] sm:$0xff] }
 0x1ac   :  { %1936 = vmatprep.subr.mxu0 %v9433_v32  ;;  %2232 = vmatprep.subr.mxu1 %v9496_v33  ;;  %v9529_v32 = vld [vmem:[%s16390_s3 + $0x490] sm:$0xff]  ;;  %v9465_v33 = vld [vmem:[%s16390_s3 + $0x2a8] sm:$0xff] }
 0x1ad   :  { %1937 = vmatpush1.msra.mxu0 %v9432_v34  ;;  %2233 = vmatpush1.msra.mxu1 %v9495_v35  ;;  %v9528_v34 = vld [vmem:[%s16390_s3 + $0x488] sm:$0xff]  ;;  %v9464_v35 = vld [vmem:[%s16390_s3 + $0x2a0] sm:$0xff] }
 0x1ae   :  { %1938 = vmatprep.subr.mxu0 %v9431_v36  ;;  %2234 = vmatprep.subr.mxu1 %v9494_v37  ;;  %v9527_v36 = vld [vmem:[%s16390_s3 + $0x480] sm:$0xff]  ;;  %v9463_v37 = vld [vmem:[%s16390_s3 + $0x298] sm:$0xff] }
 0x1af   :  { %1939 = vmatpush1.msra.mxu0 %v9430_v38  ;;  %2235 = vmatpush1.msra.mxu1 %v9493_v39  ;;  %v9526_v38 = vld [vmem:[%s16390_s3 + $0x478] sm:$0xff]  ;;  %v9462_v39 = vld [vmem:[%s16390_s3 + $0x290] sm:$0xff] }
 0x1b0   :  { %1940 = vmatprep.subr.mxu0 %v9429_v41  ;;  %2236 = vmatprep.subr.mxu1 %v9492_v44  ;;  %v9525_v41 = vld [vmem:[%s16390_s3 + $0x470] sm:$0xff]  ;;  %v2113_v44 = vpop.permute.xlu1 %2112 }
 0x1b1   :  { %1941 = vmatpush1.msra.mxu0 %v9428_v46  ;;  %2237 = vmatpush1.msra.mxu1 %v9491_v47  ;;  %v9461_v46 = vld [vmem:[%s16390_s3 + $0x288] sm:$0xff] }
 0x1b2   :  { %1942 = vmatprep.subr.mxu0 %v9427_v48  ;;  %2238 = vmatprep.subr.mxu1 %v9490_v49  ;;  %v9524_v47 = vld [vmem:[%s16390_s3 + $0x468] sm:$0xff]  ;;  %v9460_v48 = vld [vmem:[%s16390_s3 + $0x280] sm:$0xff] }
 0x1b3   :  { %1943 = vmatpush1.msra.mxu0 %v9426_v50  ;;  %2239 = vmatpush1.msra.mxu1 %v9489_v51  ;;  %v9523_v49 = vld [vmem:[%s16390_s3 + $0x460] sm:$0xff]  ;;  %v9521_v50 = vld [vmem:[%s16390_s3 + $0x458] sm:$0xff] }
 0x1b4   :  { %1944 = vmatprep.subr.mxu0 %v9425_v53  ;;  %2240 = vmatprep.subr.mxu1 %v9488_v40  ;;  %v9584_v51 = vld [vmem:[%s16390_s3 + $0x638] sm:$0xff]  ;;  %v9520_v53 = vld [vmem:[%s16390_s3 + $0x450] sm:$0xff] }
 0x1b5   :  { %1945 = vmatpush1.msra.mxu0 %v9424_v43  ;;  %2241 = vmatpush1.msra.mxu1 %v9487_v52  ;;  %v9583_v40 = vld [vmem:[%s16390_s3 + $0x630] sm:$0xff]  ;;  %v2409_v43 = vpop.permute.xlu1 %2408  ;;  %v9519_v52 = vld [vmem:[%s16390_s3 + $0x448] sm:$0xff] }
 0x1b6   :  { %1946 = vmatprep.subr.mxu0 %v9423_v54  ;;  %2242 = vmatprep.subr.mxu1 %v9486_v55  ;;  %v9582_v54 = vld [vmem:[%s16390_s3 + $0x628] sm:$0xff]  ;;  %v9518_v55 = vld [vmem:[%s16390_s3 + $0x440] sm:$0xff] }
 0x1b7   :  { %1947 = vmatpush1.msra.mxu0 %v9422_v42  ;;  %2243 = vmatpush1.msra.mxu1 %v9485_v45  ;;  %v9581_v42 = vld [vmem:[%s16390_s3 + $0x620] sm:$0xff]  ;;  %v9517_v45 = vld [vmem:[%s16390_s3 + $0x438] sm:$0xff] }
 0x1b8   :  { %1948 = vmatprep.subr.mxu0 %v9421_v56  ;;  %2244 = vmatprep.subr.mxu1 %v9484_v57  ;;  %v9580_v56 = vld [vmem:[%s16390_s3 + $0x618] sm:$0xff]  ;;  %v9516_v57 = vld [vmem:[%s16390_s3 + $0x430] sm:$0xff] }
 0x1b9   :  { %1949 = vmatpush1.msra.mxu0 %v9420_v58  ;;  %2245 = vmatpush1.msra.mxu1 %v9483_v59  ;;  %v9579_v58 = vld [vmem:[%s16390_s3 + $0x610] sm:$0xff]  ;;  %v9515_v59 = vld [vmem:[%s16390_s3 + $0x428] sm:$0xff] }
 0x1ba   :  { %1950 = vmatprep.subr.mxu0 %v9419_v60  ;;  %2246 = vmatprep.subr.mxu1 %v9482_v61  ;;  %v9578_v60 = vld [vmem:[%s16390_s3 + $0x608] sm:$0xff]  ;;  %v9514_v61 = vld [vmem:[%s16390_s3 + $0x420] sm:$0xff] }
 0x1bb   :  { %1951 = vmatpush1.msra.mxu0 %v9418_v62  ;;  %1984 = vmatprep.mubr.f32.mxu0 %v11402_v12  ;;  %v9577_v62 = vld [vmem:[%s16390_s3 + $0x600] sm:$0xff] }
 0x1bc   :  { %2247 = vmatpush1.msra.mxu1 %v9481_v0  ;;  %2280 = vmatprep.mubr.f32.mxu1 %v11402_v12  ;;  %v9513_v0 = vld [vmem:[%s16390_s3 + $0x418] sm:$0xff] }
 0x1bd   :  { %9438 = vmatmul.mubr.msk.f32.vlgmr.msra.gmra.mxu0 %vm1748_vm4, %v1917_v3  ;;  %2128 = vmatprep.subr.mxu0 %v9479_v1  ;;  %v9576_v1 = vld [vmem:[%s16390_s3 + $0x5f8] sm:$0xff]  ;;  %v9575_v3 = vld [vmem:[%s16390_s3 + $0x5f0] sm:$0xff] }
 0x1be   :  { %9501 = vmatmul.mubr.msk.f32.vlgmr.msra.gmra.mxu1 %vm1748_vm4, %v12154_v63  ;;  %2424 = vmatprep.subr.mxu1 %v9542_v2  ;;  %v9474_v63 = vld [vmem:[%s16390_s3 + $0x2f0] sm:$0xff] }
 0x1bf   :  { %2129 = vmatpush1.msra.mxu0 %v9478_v4  ;;  %2425 = vmatpush1.msra.mxu1 %v9541_v5  ;;  %v9512_v2 = vld [vmem:[%s16390_s3 + $0x410] sm:$0xff]  ;;  %v9511_v4 = vld [vmem:[%s16390_s3 + $0x408] sm:$0xff] }
 0x1c0   :  { %2130 = vmatprep.subr.mxu0 %v9477_v6  ;;  %2426 = vmatprep.subr.mxu1 %v9540_v7  ;;  %v9574_v5 = vld [vmem:[%s16390_s3 + $0x5e8] sm:$0xff]  ;;  %v9510_v6 = vld [vmem:[%s16390_s3 + $0x400] sm:$0xff] }
 0x1c1   :  { %2131 = vmatpush1.msra.mxu0 %v9476_v9  ;;  %2427 = vmatpush1.msra.mxu1 %v9539_v10  ;;  %v9573_v7 = vld [vmem:[%s16390_s3 + $0x5e0] sm:$0xff]  ;;  %v9509_v9 = vld [vmem:[%s16390_s3 + $0x3f8] sm:$0xff] }
 0x1c2   :  { %2132 = vmatprep.subr.mxu0 %v9475_v11  ;;  %2428 = vmatprep.subr.mxu1 %v9538_v13  ;;  %v9572_v10 = vld [vmem:[%s16390_s3 + $0x5d8] sm:$0xff]  ;;  %v9508_v11 = vld [vmem:[%s16390_s3 + $0x3f0] sm:$0xff] }
 0x1c3   :  { %2133 = vmatpush1.msra.mxu0 %v9474_v63  ;;  %2429 = vmatpush1.msra.mxu1 %v9537_v14  ;;  %v9571_v13 = vld [vmem:[%s16390_s3 + $0x5d0] sm:$0xff]  ;;  %v9507_v63 = vld [vmem:[%s16390_s3 + $0x3e8] sm:$0xff] }
 0x1c4   :  { %2134 = vmatprep.subr.mxu0 %v9473_v15  ;;  %2430 = vmatprep.subr.mxu1 %v9536_v16  ;;  %v9570_v14 = vld [vmem:[%s16390_s3 + $0x5c8] sm:$0xff]  ;;  %v9506_v15 = vld [vmem:[%s16390_s3 + $0x3e0] sm:$0xff] }
 0x1c5   :  { %2135 = vmatpush1.msra.mxu0 %v9472_v17  ;;  %2431 = vmatpush1.msra.mxu1 %v9535_v19  ;;  %v9569_v16 = vld [vmem:[%s16390_s3 + $0x5c0] sm:$0xff]  ;;  %v9505_v17 = vld [vmem:[%s16390_s3 + $0x3d8] sm:$0xff] }
 0x1c6   :  { %2136 = vmatprep.subr.mxu0 %v9471_v20  ;;  %2432 = vmatprep.subr.mxu1 %v9534_v21  ;;  %v9568_v19 = vld [vmem:[%s16390_s3 + $0x5b8] sm:$0xff]  ;;  %v9504_v20 = vld [vmem:[%s16390_s3 + $0x3d0] sm:$0xff] }
 0x1c7   :  { %2137 = vmatpush1.msra.mxu0 %v9470_v22  ;;  %2433 = vmatpush1.msra.mxu1 %v9533_v24  ;;  %v9567_v21 = vld [vmem:[%s16390_s3 + $0x5b0] sm:$0xff]  ;;  %v9503_v22 = vld [vmem:[%s16390_s3 + $0x3c8] sm:$0xff] }
 0x1c8   :  { %2138 = vmatprep.subr.mxu0 %v9469_v25  ;;  %2434 = vmatprep.subr.mxu1 %v9532_v26  ;;  %v9566_v24 = vld [vmem:[%s16390_s3 + $0x5a8] sm:$0xff]  ;;  %v9502_v25 = vld [vmem:[%s16390_s3 + $0x3c0] sm:$0xff] }
 0x1c9   :  { %2139 = vmatpush1.msra.mxu0 %v9468_v27  ;;  %2435 = vmatpush1.msra.mxu1 %v9531_v28  ;;  %v9565_v26 = vld [vmem:[%s16390_s3 + $0x5a0] sm:$0xff]  ;;  %v9563_v27 = vld [vmem:[%s16390_s3 + $0x598] sm:$0xff] }
 0x1ca   :  { %2140 = vmatprep.subr.mxu0 %v9467_v29  ;;  %2436 = vmatprep.subr.mxu1 %v9530_v30  ;;  %v9626_v28 = vld [vmem:[%s16390_s3 + $0x778] sm:$0xff]  ;;  %v2311_v29 = vpop.permute.xlu0 %2310  ;;  %v9562_v30 = vld [vmem:[%s16390_s3 + $0x590] sm:$0xff] }
 0x1cb   :  { %2141 = vmatpush1.msra.mxu0 %v9466_v31  ;;  %2437 = vmatpush1.msra.mxu1 %v9529_v32  ;;  %v9625_v31 = vld [vmem:[%s16390_s3 + $0x770] sm:$0xff]  ;;  %v2605_v32 = vpop.permute.xlu1 %2604 }
 0x1cc   :  { %2142 = vmatprep.subr.mxu0 %v9465_v33  ;;  %2438 = vmatprep.subr.mxu1 %v9528_v34  ;;  %v9561_v33 = vld [vmem:[%s16390_s3 + $0x588] sm:$0xff] }
 0x1cd   :  { %2143 = vmatpush1.msra.mxu0 %v9464_v35  ;;  %2439 = vmatpush1.msra.mxu1 %v9527_v36  ;;  %v9624_v34 = vld [vmem:[%s16390_s3 + $0x768] sm:$0xff]  ;;  %v9560_v35 = vld [vmem:[%s16390_s3 + $0x580] sm:$0xff] }
 0x1ce   :  { %2144 = vmatprep.subr.mxu0 %v9463_v37  ;;  %2440 = vmatprep.subr.mxu1 %v9526_v38  ;;  %v9623_v36 = vld [vmem:[%s16390_s3 + $0x760] sm:$0xff]  ;;  %v9559_v37 = vld [vmem:[%s16390_s3 + $0x578] sm:$0xff] }
 0x1cf   :  { %2145 = vmatpush1.msra.mxu0 %v9462_v39  ;;  %2441 = vmatpush1.msra.mxu1 %v9525_v41  ;;  %v9622_v38 = vld [vmem:[%s16390_s3 + $0x758] sm:$0xff]  ;;  %v9558_v39 = vld [vmem:[%s16390_s3 + $0x570] sm:$0xff] }
 0x1d0   :  { %2146 = vmatprep.subr.mxu0 %v9461_v46  ;;  %2442 = vmatprep.subr.mxu1 %v9524_v47  ;;  %v9621_v41 = vld [vmem:[%s16390_s3 + $0x750] sm:$0xff]  ;;  %v9620_v46 = vld [vmem:[%s16390_s3 + $0x748] sm:$0xff]  ;;  %v9556_v47 = vld [vmem:[%s16390_s3 + $0x560] sm:$0xff] }
 0x1d1   :  { %2147 = vmatpush1.msra.mxu0 %v9460_v48  ;;  %2180 = vmatprep.mubr.f32.mxu0 %v11402_v12  ;;  %v9619_v48 = vld [vmem:[%s16390_s3 + $0x740] sm:$0xff] }
 0x1d2   :  { %2443 = vmatpush1.msra.mxu1 %v9523_v49  ;;  %2476 = vmatprep.mubr.f32.mxu1 %v11402_v12  ;;  %v9555_v49 = vld [vmem:[%s16390_s3 + $0x558] sm:$0xff] }
 0x1d3   :  { %9480 = vmatmul.mubr.msk.f32.vlgmr.msra.gmra.mxu0 %vm1748_vm4, %v2113_v44  ;;  %2326 = vmatprep.subr.mxu0 %v9521_v50  ;;  %v9557_v44 = vld [vmem:[%s16390_s3 + $0x568] sm:$0xff]  ;;  %v9618_v50 = vld [vmem:[%s16390_s3 + $0x738] sm:$0xff] }
 0x1d4   :  { %9543 = vmatmul.mubr.msk.f32.vlgmr.msra.gmra.mxu1 %vm1748_vm4, %v2409_v43  ;;  %2620 = vmatprep.subr.mxu1 %v9584_v51  ;;  %v9554_v51 = vld [vmem:[%s16390_s3 + $0x550] sm:$0xff]  ;;  %v9616_v43 = vld [vmem:[%s16390_s3 + $0x728] sm:$0xff] }
 0x1d5   :  { %2327 = vmatpush1.msra.mxu0 %v9520_v53  ;;  %2621 = vmatpush1.msra.mxu1 %v9583_v40  ;;  %v9617_v53 = vld [vmem:[%s16390_s3 + $0x730] sm:$0xff]  ;;  %v9553_v40 = vld [vmem:[%s16390_s3 + $0x548] sm:$0xff] }
 0x1d6   :  { %2328 = vmatprep.subr.mxu0 %v9519_v52  ;;  %2622 = vmatprep.subr.mxu1 %v9582_v54  ;;  %v9552_v52 = vld [vmem:[%s16390_s3 + $0x540] sm:$0xff] }
 0x1d7   :  { %2329 = vmatpush1.msra.mxu0 %v9518_v55  ;;  %2623 = vmatpush1.msra.mxu1 %v9581_v42  ;;  %v9615_v54 = vld [vmem:[%s16390_s3 + $0x720] sm:$0xff]  ;;  %v9551_v55 = vld [vmem:[%s16390_s3 + $0x538] sm:$0xff] }
 0x1d8   :  { %2330 = vmatprep.subr.mxu0 %v9517_v45  ;;  %2624 = vmatprep.subr.mxu1 %v9580_v56  ;;  %v9614_v42 = vld [vmem:[%s16390_s3 + $0x718] sm:$0xff]  ;;  %v9550_v45 = vld [vmem:[%s16390_s3 + $0x530] sm:$0xff] }
 0x1d9   :  { %2331 = vmatpush1.msra.mxu0 %v9516_v57  ;;  %2625 = vmatpush1.msra.mxu1 %v9579_v58  ;;  %v9613_v56 = vld [vmem:[%s16390_s3 + $0x710] sm:$0xff]  ;;  %v9549_v57 = vld [vmem:[%s16390_s3 + $0x528] sm:$0xff] }
 0x1da   :  { %2332 = vmatprep.subr.mxu0 %v9515_v59  ;;  %2626 = vmatprep.subr.mxu1 %v9578_v60  ;;  %v9612_v58 = vld [vmem:[%s16390_s3 + $0x708] sm:$0xff]  ;;  %v9548_v59 = vld [vmem:[%s16390_s3 + $0x520] sm:$0xff] }
 0x1db   :  { %2333 = vmatpush1.msra.mxu0 %v9514_v61  ;;  %2627 = vmatpush1.msra.mxu1 %v9577_v62  ;;  %v9611_v60 = vld [vmem:[%s16390_s3 + $0x700] sm:$0xff]  ;;  %v9547_v61 = vld [vmem:[%s16390_s3 + $0x518] sm:$0xff] }
 0x1dc   :  { %2334 = vmatprep.subr.mxu0 %v9513_v0  ;;  %2628 = vmatprep.subr.mxu1 %v9576_v1  ;;  %v9610_v62 = vld [vmem:[%s16390_s3 + $0x6f8] sm:$0xff]  ;;  %v9546_v0 = vld [vmem:[%s16390_s3 + $0x510] sm:$0xff] }
 0x1dd   :  { %2335 = vmatpush1.msra.mxu0 %v9512_v2  ;;  %2629 = vmatpush1.msra.mxu1 %v9575_v3  ;;  %v9609_v1 = vld [vmem:[%s16390_s3 + $0x6f0] sm:$0xff]  ;;  %v2507_v2 = vpop.permute.xlu0 %2506  ;;  %v9545_v3 = vld [vmem:[%s16390_s3 + $0x508] sm:$0xff] }
 0x1de   :  { %2336 = vmatprep.subr.mxu0 %v9511_v4  ;;  %2630 = vmatprep.subr.mxu1 %v9574_v5  ;;  %v9608_v4 = vld [vmem:[%s16390_s3 + $0x6e8] sm:$0xff]  ;;  %v9544_v5 = vld [vmem:[%s16390_s3 + $0x500] sm:$0xff] }
 0x1df   :  { %2337 = vmatpush1.msra.mxu0 %v9510_v6  ;;  %2631 = vmatpush1.msra.mxu1 %v9573_v7  ;;  %v9607_v6 = vld [vmem:[%s16390_s3 + $0x6e0] sm:$0xff]  ;;  %v9605_v7 = vld [vmem:[%s16390_s3 + $0x6d8] sm:$0xff] }
 0x1e0   :  { %2338 = vmatprep.subr.mxu0 %v9509_v9  ;;  %2632 = vmatprep.subr.mxu1 %v9572_v10  ;;  %v9668_v9 = vld [vmem:[%s16390_s3 + $0x8b8] sm:$0xff]  ;;  %v9604_v10 = vld [vmem:[%s16390_s3 + $0x6d0] sm:$0xff] }
 0x1e1   :  { %2339 = vmatpush1.msra.mxu0 %v9508_v11  ;;  %2633 = vmatpush1.msra.mxu1 %v9571_v13  ;;  %v9667_v11 = vld [vmem:[%s16390_s3 + $0x8b0] sm:$0xff]  ;;  %v2802_v13 = vpop.permute.xlu0 %2801 }
 0x1e2   :  { %2340 = vmatprep.subr.mxu0 %v9507_v63  ;;  %2634 = vmatprep.subr.mxu1 %v9570_v14  ;;  %v9603_v63 = vld [vmem:[%s16390_s3 + $0x6c8] sm:$0xff] }
 0x1e3   :  { %2341 = vmatpush1.msra.mxu0 %v9506_v15  ;;  %2635 = vmatpush1.msra.mxu1 %v9569_v16  ;;  %v9666_v14 = vld [vmem:[%s16390_s3 + $0x8a8] sm:$0xff]  ;;  %v9602_v15 = vld [vmem:[%s16390_s3 + $0x6c0] sm:$0xff] }
 0x1e4   :  { %2342 = vmatprep.subr.mxu0 %v9505_v17  ;;  %2636 = vmatprep.subr.mxu1 %v9568_v19  ;;  %v9665_v16 = vld [vmem:[%s16390_s3 + $0x8a0] sm:$0xff]  ;;  %v9601_v17 = vld [vmem:[%s16390_s3 + $0x6b8] sm:$0xff] }
 0x1e5   :  { %2343 = vmatpush1.msra.mxu0 %v9504_v20  ;;  %2637 = vmatpush1.msra.mxu1 %v9567_v21  ;;  %v9664_v19 = vld [vmem:[%s16390_s3 + $0x898] sm:$0xff]  ;;  %v9600_v20 = vld [vmem:[%s16390_s3 + $0x6b0] sm:$0xff] }
 0x1e6   :  { %2344 = vmatprep.subr.mxu0 %v9503_v22  ;;  %2638 = vmatprep.subr.mxu1 %v9566_v24  ;;  %v9663_v21 = vld [vmem:[%s16390_s3 + $0x890] sm:$0xff]  ;;  %v9599_v22 = vld [vmem:[%s16390_s3 + $0x6a8] sm:$0xff] }
 0x1e7   :  { %2345 = vmatpush1.msra.mxu0 %v9502_v25  ;;  %2378 = vmatprep.mubr.f32.mxu0 %v11402_v12  ;;  %v9662_v24 = vld [vmem:[%s16390_s3 + $0x888] sm:$0xff]  ;;  %v9598_v25 = vld [vmem:[%s16390_s3 + $0x6a0] sm:$0xff] }
 0x1e8   :  { %2639 = vmatpush1.msra.mxu1 %v9565_v26  ;;  %2672 = vmatprep.mubr.f32.mxu1 %v11402_v12  ;;  %v9661_v26 = vld [vmem:[%s16390_s3 + $0x880] sm:$0xff] }
 0x1e9   :  { %9522 = vmatmul.mubr.msk.f32.vlgmr.msra.gmra.mxu0 %vm1748_vm4, %v2311_v29  ;;  %2522 = vmatprep.subr.mxu0 %v9563_v27  ;;  %v9597_v27 = vld [vmem:[%s16390_s3 + $0x698] sm:$0xff]  ;;  %v9596_v29 = vld [vmem:[%s16390_s3 + $0x690] sm:$0xff] }
 0x1ea   :  { %9585 = vmatmul.mubr.msk.f32.vlgmr.msra.gmra.mxu1 %vm1748_vm4, %v2605_v32  ;;  %2817 = vmatprep.subr.mxu1 %v9626_v28  ;;  %v9660_v28 = vld [vmem:[%s16390_s3 + $0x878] sm:$0xff]  ;;  %v9658_v32 = vld [vmem:[%s16390_s3 + $0x868] sm:$0xff] }
 0x1eb   :  { %2523 = vmatpush1.msra.mxu0 %v9562_v30  ;;  %2818 = vmatpush1.msra.mxu1 %v9625_v31  ;;  %v9659_v30 = vld [vmem:[%s16390_s3 + $0x870] sm:$0xff]  ;;  %v9595_v31 = vld [vmem:[%s16390_s3 + $0x688] sm:$0xff] }
 0x1ec   :  { %2524 = vmatprep.subr.mxu0 %v9561_v33  ;;  %2819 = vmatprep.subr.mxu1 %v9624_v34  ;;  %v9594_v33 = vld [vmem:[%s16390_s3 + $0x680] sm:$0xff] }
 0x1ed   :  { %2525 = vmatpush1.msra.mxu0 %v9560_v35  ;;  %2820 = vmatpush1.msra.mxu1 %v9623_v36  ;;  %v9657_v34 = vld [vmem:[%s16390_s3 + $0x860] sm:$0xff]  ;;  %v9593_v35 = vld [vmem:[%s16390_s3 + $0x678] sm:$0xff] }
 0x1ee   :  { %2526 = vmatprep.subr.mxu0 %v9559_v37  ;;  %2821 = vmatprep.subr.mxu1 %v9622_v38  ;;  %v9656_v36 = vld [vmem:[%s16390_s3 + $0x858] sm:$0xff]  ;;  %v9592_v37 = vld [vmem:[%s16390_s3 + $0x670] sm:$0xff] }
 0x1ef   :  { %2527 = vmatpush1.msra.mxu0 %v9558_v39  ;;  %2822 = vmatpush1.msra.mxu1 %v9621_v41  ;;  %v9655_v38 = vld [vmem:[%s16390_s3 + $0x850] sm:$0xff]  ;;  %v9591_v39 = vld [vmem:[%s16390_s3 + $0x668] sm:$0xff] }
 0x1f0   :  { %2528 = vmatprep.subr.mxu0 %v9557_v44  ;;  %2823 = vmatprep.subr.mxu1 %v9620_v46  ;;  %v9654_v41 = vld [vmem:[%s16390_s3 + $0x848] sm:$0xff]  ;;  %v9590_v44 = vld [vmem:[%s16390_s3 + $0x660] sm:$0xff] }
 0x1f1   :  { %2529 = vmatpush1.msra.mxu0 %v9556_v47  ;;  %2824 = vmatpush1.msra.mxu1 %v9619_v48  ;;  %v9653_v46 = vld [vmem:[%s16390_s3 + $0x840] sm:$0xff]  ;;  %v9589_v47 = vld [vmem:[%s16390_s3 + $0x658] sm:$0xff] }
 0x1f2   :  { %2530 = vmatprep.subr.mxu0 %v9555_v49  ;;  %2825 = vmatprep.subr.mxu1 %v9618_v50  ;;  %v9652_v48 = vld [vmem:[%s16390_s3 + $0x838] sm:$0xff]  ;;  %v9588_v49 = vld [vmem:[%s16390_s3 + $0x650] sm:$0xff] }
 0x1f3   :  { %2531 = vmatpush1.msra.mxu0 %v9554_v51  ;;  %2826 = vmatpush1.msra.mxu1 %v9617_v53  ;;  %v9651_v50 = vld [vmem:[%s16390_s3 + $0x830] sm:$0xff]  ;;  %v9587_v51 = vld [vmem:[%s16390_s3 + $0x648] sm:$0xff] }
 0x1f4   :  { %2532 = vmatprep.subr.mxu0 %v9553_v40  ;;  %2827 = vmatprep.subr.mxu1 %v9616_v43  ;;  %v9650_v53 = vld [vmem:[%s16390_s3 + $0x828] sm:$0xff]  ;;  %v9586_v40 = vld [vmem:[%s16390_s3 + $0x640] sm:$0xff] }
 0x1f5   :  { %2533 = vmatpush1.msra.mxu0 %v9552_v52  ;;  %2828 = vmatpush1.msra.mxu1 %v9615_v54  ;;  %v9649_v43 = vld [vmem:[%s16390_s3 + $0x820] sm:$0xff]  ;;  %v9647_v52 = vld [vmem:[%s16390_s3 + $0x818] sm:$0xff] }
 0x1f6   :  { %2534 = vmatprep.subr.mxu0 %v9551_v55  ;;  %2829 = vmatprep.subr.mxu1 %v9614_v42  ;;  %v9710_v54 = vld [vmem:[%s16390_s3 + $0x9f8] sm:$0xff]  ;;  %v9646_v55 = vld [vmem:[%s16390_s3 + $0x810] sm:$0xff] }
 0x1f7   :  { %2535 = vmatpush1.msra.mxu0 %v9550_v45  ;;  %2830 = vmatpush1.msra.mxu1 %v9613_v56  ;;  %v9709_v42 = vld [vmem:[%s16390_s3 + $0x9f0] sm:$0xff]  ;;  %v2998_v45 = vpop.permute.xlu0 %2997  ;;  %v9645_v56 = vld [vmem:[%s16390_s3 + $0x808] sm:$0xff] }
 0x1f8   :  { %2536 = vmatprep.subr.mxu0 %v9549_v57  ;;  %2831 = vmatprep.subr.mxu1 %v9612_v58  ;;  %v9708_v57 = vld [vmem:[%s16390_s3 + $0x9e8] sm:$0xff]  ;;  %v9644_v58 = vld [vmem:[%s16390_s3 + $0x800] sm:$0xff] }
 0x1f9   :  { %2537 = vmatpush1.msra.mxu0 %v9548_v59  ;;  %2832 = vmatpush1.msra.mxu1 %v9611_v60  ;;  %v9643_v59 = vld [vmem:[%s16390_s3 + $0x7f8] sm:$0xff] }
 0x1fa   :  { %2538 = vmatprep.subr.mxu0 %v9547_v61  ;;  %2833 = vmatprep.subr.mxu1 %v9610_v62  ;;  %v9706_v60 = vld [vmem:[%s16390_s3 + $0x9d8] sm:$0xff]  ;;  %v9642_v61 = vld [vmem:[%s16390_s3 + $0x7f0] sm:$0xff] }
 0x1fb   :  { %2539 = vmatpush1.msra.mxu0 %v9546_v0  ;;  %2834 = vmatpush1.msra.mxu1 %v9609_v1  ;;  %v9705_v62 = vld [vmem:[%s16390_s3 + $0x9d0] sm:$0xff]  ;;  %v9641_v0 = vld [vmem:[%s16390_s3 + $0x7e8] sm:$0xff] }
 0x1fc   :  { %2540 = vmatprep.subr.mxu0 %v9545_v3  ;;  %2835 = vmatprep.subr.mxu1 %v9608_v4  ;;  %v9704_v1 = vld [vmem:[%s16390_s3 + $0x9c8] sm:$0xff]  ;;  %v9703_v3 = vld [vmem:[%s16390_s3 + $0x9c0] sm:$0xff]  ;;  %v9639_v4 = vld [vmem:[%s16390_s3 + $0x7d8] sm:$0xff] }
 0x1fd   :  { %2541 = vmatpush1.msra.mxu0 %v9544_v5  ;;  %2574 = vmatprep.mubr.f32.mxu0 %v11402_v12  ;;  %v9702_v5 = vld [vmem:[%s16390_s3 + $0x9b8] sm:$0xff] }
 0x1fe   :  { %2836 = vmatpush1.msra.mxu1 %v9607_v6  ;;  %2869 = vmatprep.mubr.f32.mxu1 %v11402_v12  ;;  %v9638_v6 = vld [vmem:[%s16390_s3 + $0x7d0] sm:$0xff] }
 0x1ff   :  { %9564 = vmatmul.mubr.msk.f32.vlgmr.msra.gmra.mxu0 %vm1748_vm4, %v2507_v2  ;;  %2719 = vmatprep.subr.mxu0 %v9605_v7  ;;  %v9640_v2 = vld [vmem:[%s16390_s3 + $0x7e0] sm:$0xff]  ;;  %v9701_v7 = vld [vmem:[%s16390_s3 + $0x9b0] sm:$0xff] }
 0x200   :  { %9627 = vmatmul.mubr.msk.f32.vlgmr.msra.gmra.mxu1 %vm1748_vm4, %v2802_v13  ;;  %3013 = vmatprep.subr.mxu1 %v9668_v9  ;;  %v9637_v9 = vld [vmem:[%s16390_s3 + $0x7c8] sm:$0xff]  ;;  %v9699_v13 = vld [vmem:[%s16390_s3 + $0x9a0] sm:$0xff] }
 0x201   :  { %2720 = vmatpush1.msra.mxu0 %v9604_v10  ;;  %3014 = vmatpush1.msra.mxu1 %v9667_v11  ;;  %v9700_v10 = vld [vmem:[%s16390_s3 + $0x9a8] sm:$0xff]  ;;  %v9636_v11 = vld [vmem:[%s16390_s3 + $0x7c0] sm:$0xff] }
 0x202   :  { %2721 = vmatprep.subr.mxu0 %v9603_v63  ;;  %3015 = vmatprep.subr.mxu1 %v9666_v14  ;;  %v9635_v63 = vld [vmem:[%s16390_s3 + $0x7b8] sm:$0xff] }
 0x203   :  { %2722 = vmatpush1.msra.mxu0 %v9602_v15  ;;  %3016 = vmatpush1.msra.mxu1 %v9665_v16  ;;  %v9698_v14 = vld [vmem:[%s16390_s3 + $0x998] sm:$0xff]  ;;  %v9634_v15 = vld [vmem:[%s16390_s3 + $0x7b0] sm:$0xff] }
 0x204   :  { %2723 = vmatprep.subr.mxu0 %v9601_v17  ;;  %3017 = vmatprep.subr.mxu1 %v9664_v19  ;;  %v9697_v16 = vld [vmem:[%s16390_s3 + $0x990] sm:$0xff]  ;;  %v9633_v17 = vld [vmem:[%s16390_s3 + $0x7a8] sm:$0xff] }
 0x205   :  { %2724 = vmatpush1.msra.mxu0 %v9600_v20  ;;  %3018 = vmatpush1.msra.mxu1 %v9663_v21  ;;  %v9696_v19 = vld [vmem:[%s16390_s3 + $0x988] sm:$0xff]  ;;  %v9632_v20 = vld [vmem:[%s16390_s3 + $0x7a0] sm:$0xff] }
 0x206   :  { %2725 = vmatprep.subr.mxu0 %v9599_v22  ;;  %3019 = vmatprep.subr.mxu1 %v9662_v24  ;;  %v9695_v21 = vld [vmem:[%s16390_s3 + $0x980] sm:$0xff]  ;;  %v9631_v22 = vld [vmem:[%s16390_s3 + $0x798] sm:$0xff] }
 0x207   :  { %2726 = vmatpush1.msra.mxu0 %v9598_v25  ;;  %3020 = vmatpush1.msra.mxu1 %v9661_v26  ;;  %v9694_v24 = vld [vmem:[%s16390_s3 + $0x978] sm:$0xff]  ;;  %v9630_v25 = vld [vmem:[%s16390_s3 + $0x790] sm:$0xff] }
 0x208   :  { %2727 = vmatprep.subr.mxu0 %v9597_v27  ;;  %3021 = vmatprep.subr.mxu1 %v9660_v28  ;;  %v9693_v26 = vld [vmem:[%s16390_s3 + $0x970] sm:$0xff]  ;;  %v9629_v27 = vld [vmem:[%s16390_s3 + $0x788] sm:$0xff] }
 0x209   :  { %2728 = vmatpush1.msra.mxu0 %v9596_v29  ;;  %3022 = vmatpush1.msra.mxu1 %v9659_v30  ;;  %v9692_v28 = vld [vmem:[%s16390_s3 + $0x968] sm:$0xff]  ;;  %v9628_v29 = vld [vmem:[%s16390_s3 + $0x780] sm:$0xff] }
 0x20a   :  { %2729 = vmatprep.subr.mxu0 %v9595_v31  ;;  %3023 = vmatprep.subr.mxu1 %v9658_v32  ;;  %v9691_v30 = vld [vmem:[%s16390_s3 + $0x960] sm:$0xff]  ;;  %v9689_v31 = vld [vmem:[%s16390_s3 + $0x958] sm:$0xff] }
 0x20b   :  { %2730 = vmatpush1.msra.mxu0 %v9594_v33  ;;  %3024 = vmatpush1.msra.mxu1 %v9657_v34  ;;  %v9752_v32 = vld [vmem:[%s16390_s3 + $0xb38] sm:$0xff]  ;;  %v2900_v33 = vpop.permute.xlu1 %2899  ;;  %v9688_v34 = vld [vmem:[%s16390_s3 + $0x950] sm:$0xff] }
 0x20c   :  { %2731 = vmatprep.subr.mxu0 %v9593_v35  ;;  %3025 = vmatprep.subr.mxu1 %v9656_v36  ;;  %v9751_v35 = vld [vmem:[%s16390_s3 + $0xb30] sm:$0xff]  ;;  %v9687_v36 = vld [vmem:[%s16390_s3 + $0x948] sm:$0xff] }
 0x20d   :  { %2732 = vmatpush1.msra.mxu0 %v9592_v37  ;;  %3026 = vmatpush1.msra.mxu1 %v9655_v38  ;;  %v9750_v37 = vld [vmem:[%s16390_s3 + $0xb28] sm:$0xff]  ;;  %v9686_v38 = vld [vmem:[%s16390_s3 + $0x940] sm:$0xff] }
 0x20e   :  { %2733 = vmatprep.subr.mxu0 %v9591_v39  ;;  %3027 = vmatprep.subr.mxu1 %v9654_v41  ;;  %v9749_v39 = vld [vmem:[%s16390_s3 + $0xb20] sm:$0xff]  ;;  %v9685_v41 = vld [vmem:[%s16390_s3 + $0x938] sm:$0xff] }
 0x20f   :  { %2734 = vmatpush1.msra.mxu0 %v9590_v44  ;;  %3028 = vmatpush1.msra.mxu1 %v9653_v46  ;;  %v9748_v44 = vld [vmem:[%s16390_s3 + $0xb18] sm:$0xff]  ;;  %v9747_v46 = vld [vmem:[%s16390_s3 + $0xb10] sm:$0xff] }
 0x210   :  { %2735 = vmatprep.subr.mxu0 %v9589_v47  ;;  %3029 = vmatprep.subr.mxu1 %v9652_v48  ;;  %v9683_v47 = vld [vmem:[%s16390_s3 + $0x928] sm:$0xff] }
 0x211   :  { %2736 = vmatpush1.msra.mxu0 %v9588_v49  ;;  %3030 = vmatpush1.msra.mxu1 %v9651_v50  ;;  %v9746_v48 = vld [vmem:[%s16390_s3 + $0xb08] sm:$0xff]  ;;  %v9682_v49 = vld [vmem:[%s16390_s3 + $0x920] sm:$0xff] }
 0x212   :  { %2737 = vmatprep.subr.mxu0 %v9587_v51  ;;  %3031 = vmatprep.subr.mxu1 %v9650_v53  ;;  %v9745_v50 = vld [vmem:[%s16390_s3 + $0xb00] sm:$0xff]  ;;  %v9681_v51 = vld [vmem:[%s16390_s3 + $0x918] sm:$0xff] }
 0x213   :  { %2738 = vmatpush1.msra.mxu0 %v9586_v40  ;;  %2771 = vmatprep.mubr.f32.mxu0 %v11402_v12  ;;  %v9744_v53 = vld [vmem:[%s16390_s3 + $0xaf8] sm:$0xff]  ;;  %v9680_v40 = vld [vmem:[%s16390_s3 + $0x910] sm:$0xff] }
 0x214   :  { %3032 = vmatpush1.msra.mxu1 %v9649_v43  ;;  %3065 = vmatprep.mubr.f32.mxu1 %v11402_v12  ;;  %v9743_v43 = vld [vmem:[%s16390_s3 + $0xaf0] sm:$0xff] }
 0x215   :  { %9606 = vmatmul.mubr.msk.f32.vlgmr.msra.gmra.mxu0 %vm1748_vm4, %v12185_v8  ;;  %2915 = vmatprep.subr.mxu0 %v9647_v52  ;;  %v9707_v8 = vld [vmem:[%s16390_s3 + $0x9e0] sm:$0xff]  ;;  %v9679_v52 = vld [vmem:[%s16390_s3 + $0x908] sm:$0xff] }
 0x216   :  { %9669 = vmatmul.mubr.msk.f32.vlgmr.msra.gmra.mxu1 %vm1748_vm4, %v2998_v45  ;;  %3211 = vmatprep.subr.mxu1 %v9710_v54  ;;  %v9742_v54 = vld [vmem:[%s16390_s3 + $0xae8] sm:$0xff]  ;;  %v9677_v45 = vld [vmem:[%s16390_s3 + $0x8f8] sm:$0xff] }
 0x217   :  { %2916 = vmatpush1.msra.mxu0 %v9646_v55  ;;  %3212 = vmatpush1.msra.mxu1 %v9709_v42  ;;  %v9678_v55 = vld [vmem:[%s16390_s3 + $0x900] sm:$0xff] }
 0x218   :  { %2917 = vmatprep.subr.mxu0 %v9645_v56  ;;  %3213 = vmatprep.subr.mxu1 %v9708_v57  ;;  %v9741_v42 = vld [vmem:[%s16390_s3 + $0xae0] sm:$0xff]  ;;  %v9740_v56 = vld [vmem:[%s16390_s3 + $0xad8] sm:$0xff]  ;;  %v9676_v57 = vld [vmem:[%s16390_s3 + $0x8f0] sm:$0xff] }
 0x219   :  { %2918 = vmatpush1.msra.mxu0 %v9644_v58  ;;  %3214 = vmatpush1.msra.mxu1 %v9707_v8  ;;  %v9739_v58 = vld [vmem:[%s16390_s3 + $0xad0] sm:$0xff]  ;;  %v9675_v8 = vld [vmem:[%s16390_s3 + $0x8e8] sm:$0xff] }
 0x21a   :  { %2919 = vmatprep.subr.mxu0 %v9643_v59  ;;  %3215 = vmatprep.subr.mxu1 %v9706_v60  ;;  %v9738_v59 = vld [vmem:[%s16390_s3 + $0xac8] sm:$0xff]  ;;  %v9674_v60 = vld [vmem:[%s16390_s3 + $0x8e0] sm:$0xff] }
 0x21b   :  { %2920 = vmatpush1.msra.mxu0 %v9642_v61  ;;  %3216 = vmatpush1.msra.mxu1 %v9705_v62  ;;  %v9737_v61 = vld [vmem:[%s16390_s3 + $0xac0] sm:$0xff]  ;;  %v9673_v62 = vld [vmem:[%s16390_s3 + $0x8d8] sm:$0xff] }
 0x21c   :  { %2921 = vmatprep.subr.mxu0 %v9641_v0  ;;  %3217 = vmatprep.subr.mxu1 %v9704_v1  ;;  %v9736_v0 = vld [vmem:[%s16390_s3 + $0xab8] sm:$0xff]  ;;  %v9672_v1 = vld [vmem:[%s16390_s3 + $0x8d0] sm:$0xff] }
 0x21d   :  { %2922 = vmatpush1.msra.mxu0 %v9640_v2  ;;  %3218 = vmatpush1.msra.mxu1 %v9703_v3  ;;  %v9735_v2 = vld [vmem:[%s16390_s3 + $0xab0] sm:$0xff]  ;;  %v3096_v3 = vpop.permute.xlu1 %3095 }
 0x21e   :  { %2923 = vmatprep.subr.mxu0 %v9639_v4  ;;  %3219 = vmatprep.subr.mxu1 %v9702_v5  ;;  %v9671_v4 = vld [vmem:[%s16390_s3 + $0x8c8] sm:$0xff] }
 0x21f   :  { %2924 = vmatpush1.msra.mxu0 %v9638_v6  ;;  %3220 = vmatpush1.msra.mxu1 %v9701_v7  ;;  %v9734_v5 = vld [vmem:[%s16390_s3 + $0xaa8] sm:$0xff]  ;;  %v9670_v6 = vld [vmem:[%s16390_s3 + $0x8c0] sm:$0xff] }
 0x220   :  { %2925 = vmatprep.subr.mxu0 %v9637_v9  ;;  %3221 = vmatprep.subr.mxu1 %v9700_v10  ;;  %v9733_v7 = vld [vmem:[%s16390_s3 + $0xaa0] sm:$0xff]  ;;  %v9731_v9 = vld [vmem:[%s16390_s3 + $0xa98] sm:$0xff] }
 0x221   :  { %2926 = vmatpush1.msra.mxu0 %v9636_v11  ;;  %3222 = vmatpush1.msra.mxu1 %v9699_v13  ;;  %v9794_v10 = vld [vmem:[%s16390_s3 + $0xc78] sm:$0xff]  ;;  %v9730_v11 = vld [vmem:[%s16390_s3 + $0xa90] sm:$0xff] }
 0x222   :  { %2927 = vmatprep.subr.mxu0 %v9635_v63  ;;  %3223 = vmatprep.subr.mxu1 %v9698_v14  ;;  %v9793_v13 = vld [vmem:[%s16390_s3 + $0xc70] sm:$0xff]  ;;  %v3392_v63 = vpop.permute.xlu1 %3391  ;;  %v9729_v14 = vld [vmem:[%s16390_s3 + $0xa88] sm:$0xff] }
 0x223   :  { %2928 = vmatpush1.msra.mxu0 %v9634_v15  ;;  %3224 = vmatpush1.msra.mxu1 %v9697_v16  ;;  %v9792_v15 = vld [vmem:[%s16390_s3 + $0xc68] sm:$0xff]  ;;  %v9728_v16 = vld [vmem:[%s16390_s3 + $0xa80] sm:$0xff] }
 0x224   :  { %2929 = vmatprep.subr.mxu0 %v9633_v17  ;;  %3225 = vmatprep.subr.mxu1 %v9696_v19  ;;  %v9791_v17 = vld [vmem:[%s16390_s3 + $0xc60] sm:$0xff]  ;;  %v9727_v19 = vld [vmem:[%s16390_s3 + $0xa78] sm:$0xff] }
 0x225   :  { %2930 = vmatpush1.msra.mxu0 %v9632_v20  ;;  %3226 = vmatpush1.msra.mxu1 %v9695_v21  ;;  %v9790_v20 = vld [vmem:[%s16390_s3 + $0xc58] sm:$0xff]  ;;  %v9726_v21 = vld [vmem:[%s16390_s3 + $0xa70] sm:$0xff] }
 0x226   :  { %2931 = vmatprep.subr.mxu0 %v9631_v22  ;;  %3227 = vmatprep.subr.mxu1 %v9694_v24  ;;  %v9789_v22 = vld [vmem:[%s16390_s3 + $0xc50] sm:$0xff]  ;;  %v9725_v24 = vld [vmem:[%s16390_s3 + $0xa68] sm:$0xff] }
 0x227   :  { %2932 = vmatpush1.msra.mxu0 %v9630_v25  ;;  %3228 = vmatpush1.msra.mxu1 %v9693_v26  ;;  %v9788_v25 = vld [vmem:[%s16390_s3 + $0xc48] sm:$0xff]  ;;  %v9724_v26 = vld [vmem:[%s16390_s3 + $0xa60] sm:$0xff] }
 0x228   :  { %2933 = vmatprep.subr.mxu0 %v9629_v27  ;;  %3229 = vmatprep.subr.mxu1 %v9692_v28  ;;  %v9787_v27 = vld [vmem:[%s16390_s3 + $0xc40] sm:$0xff]  ;;  %v9723_v28 = vld [vmem:[%s16390_s3 + $0xa58] sm:$0xff] }
 0x229   :  { %2934 = vmatpush1.msra.mxu0 %v9628_v29  ;;  %2967 = vmatprep.mubr.f32.mxu0 %v11402_v12  ;;  %v9786_v29 = vld [vmem:[%s16390_s3 + $0xc38] sm:$0xff] }
 0x22a   :  { %3230 = vmatpush1.msra.mxu1 %v9691_v30  ;;  %3263 = vmatprep.mubr.f32.mxu1 %v11402_v12  ;;  %v9722_v30 = vld [vmem:[%s16390_s3 + $0xa50] sm:$0xff] }
 0x22b   :  { %9648 = vmatmul.mubr.msk.f32.vlgmr.msra.gmra.mxu0 %vm1748_vm4, %v2900_v33  ;;  %3111 = vmatprep.subr.mxu0 %v9689_v31  ;;  %v9785_v31 = vld [vmem:[%s16390_s3 + $0xc30] sm:$0xff]  ;;  %v9784_v33 = vld [vmem:[%s16390_s3 + $0xc28] sm:$0xff] }
 0x22c   :  { %9711 = vmatmul.mubr.msk.f32.vlgmr.msra.gmra.mxu1 %vm1748_vm4, %v12216_v18  ;;  %3407 = vmatprep.subr.mxu1 %v9752_v32  ;;  %v9684_v18 = vld [vmem:[%s16390_s3 + $0x930] sm:$0xff]  ;;  %v9721_v32 = vld [vmem:[%s16390_s3 + $0xa48] sm:$0xff] }
 0x22d   :  { %3112 = vmatpush1.msra.mxu0 %v9688_v34  ;;  %3408 = vmatpush1.msra.mxu1 %v9751_v35  ;;  %v9720_v34 = vld [vmem:[%s16390_s3 + $0xa40] sm:$0xff] }
 0x22e   :  { %3113 = vmatprep.subr.mxu0 %v9687_v36  ;;  %3409 = vmatprep.subr.mxu1 %v9750_v37  ;;  %v9783_v35 = vld [vmem:[%s16390_s3 + $0xc20] sm:$0xff]  ;;  %v9719_v36 = vld [vmem:[%s16390_s3 + $0xa38] sm:$0xff] }
 0x22f   :  { %3114 = vmatpush1.msra.mxu0 %v9686_v38  ;;  %3410 = vmatpush1.msra.mxu1 %v9749_v39  ;;  %v9782_v37 = vld [vmem:[%s16390_s3 + $0xc18] sm:$0xff]  ;;  %v9718_v38 = vld [vmem:[%s16390_s3 + $0xa30] sm:$0xff] }
 0x230   :  { %3115 = vmatprep.subr.mxu0 %v9685_v41  ;;  %3411 = vmatprep.subr.mxu1 %v9748_v44  ;;  %v9781_v39 = vld [vmem:[%s16390_s3 + $0xc10] sm:$0xff]  ;;  %v9717_v41 = vld [vmem:[%s16390_s3 + $0xa28] sm:$0xff] }
 0x231   :  { %3116 = vmatpush1.msra.mxu0 %v9684_v18  ;;  %3412 = vmatpush1.msra.mxu1 %v9747_v46  ;;  %v9780_v44 = vld [vmem:[%s16390_s3 + $0xc08] sm:$0xff]  ;;  %v9716_v18 = vld [vmem:[%s16390_s3 + $0xa20] sm:$0xff] }
 0x232   :  { %3117 = vmatprep.subr.mxu0 %v9683_v47  ;;  %3413 = vmatprep.subr.mxu1 %v9746_v48  ;;  %v9779_v46 = vld [vmem:[%s16390_s3 + $0xc00] sm:$0xff]  ;;  %v9715_v47 = vld [vmem:[%s16390_s3 + $0xa18] sm:$0xff] }
 0x233   :  { %3118 = vmatpush1.msra.mxu0 %v9682_v49  ;;  %3414 = vmatpush1.msra.mxu1 %v9745_v50  ;;  %v9778_v48 = vld [vmem:[%s16390_s3 + $0xbf8] sm:$0xff]  ;;  %v9714_v49 = vld [vmem:[%s16390_s3 + $0xa10] sm:$0xff] }
 0x234   :  { %3119 = vmatprep.subr.mxu0 %v9681_v51  ;;  %3415 = vmatprep.subr.mxu1 %v9744_v53  ;;  %v9777_v50 = vld [vmem:[%s16390_s3 + $0xbf0] sm:$0xff]  ;;  %v9713_v51 = vld [vmem:[%s16390_s3 + $0xa08] sm:$0xff] }
 0x235   :  { %3120 = vmatpush1.msra.mxu0 %v9680_v40  ;;  %3416 = vmatpush1.msra.mxu1 %v9743_v43  ;;  %v9776_v53 = vld [vmem:[%s16390_s3 + $0xbe8] sm:$0xff]  ;;  %v9712_v40 = vld [vmem:[%s16390_s3 + $0xa00] sm:$0xff] }
 0x236   :  { %3121 = vmatprep.subr.mxu0 %v9679_v52  ;;  %3417 = vmatprep.subr.mxu1 %v9742_v54  ;;  %v9775_v43 = vld [vmem:[%s16390_s3 + $0xbe0] sm:$0xff]  ;;  %v9773_v52 = vld [vmem:[%s16390_s3 + $0xbd8] sm:$0xff] }
 0x237   :  { %3122 = vmatpush1.msra.mxu0 %v9678_v55  ;;  %3418 = vmatpush1.msra.mxu1 %v9741_v42  ;;  %v9836_v54 = vld [vmem:[%s16390_s3 + $0xdb8] sm:$0xff]  ;;  %v3294_v55 = vpop.permute.xlu0 %3293  ;;  %v9772_v42 = vld [vmem:[%s16390_s3 + $0xbd0] sm:$0xff] }
 0x238   :  { %3123 = vmatprep.subr.mxu0 %v9677_v45  ;;  %3419 = vmatprep.subr.mxu1 %v9740_v56  ;;  %v9835_v45 = vld [vmem:[%s16390_s3 + $0xdb0] sm:$0xff]  ;;  %v3588_v56 = vpop.permute.xlu1 %3587 }
 0x239   :  { %3124 = vmatpush1.msra.mxu0 %v9676_v57  ;;  %3420 = vmatpush1.msra.mxu1 %v9739_v58  ;;  %v9771_v57 = vld [vmem:[%s16390_s3 + $0xbc8] sm:$0xff] }
 0x23a   :  { %3125 = vmatprep.subr.mxu0 %v9675_v8  ;;  %3421 = vmatprep.subr.mxu1 %v9738_v59  ;;  %v9834_v58 = vld [vmem:[%s16390_s3 + $0xda8] sm:$0xff]  ;;  %v9770_v8 = vld [vmem:[%s16390_s3 + $0xbc0] sm:$0xff] }
 0x23b   :  { %3126 = vmatpush1.msra.mxu0 %v9674_v60  ;;  %3422 = vmatpush1.msra.mxu1 %v9737_v61  ;;  %v9833_v59 = vld [vmem:[%s16390_s3 + $0xda0] sm:$0xff]  ;;  %v9769_v60 = vld [vmem:[%s16390_s3 + $0xbb8] sm:$0xff] }
 0x23c   :  { %3127 = vmatprep.subr.mxu0 %v9673_v62  ;;  %3423 = vmatprep.subr.mxu1 %v9736_v0  ;;  %v9832_v61 = vld [vmem:[%s16390_s3 + $0xd98] sm:$0xff]  ;;  %v9768_v62 = vld [vmem:[%s16390_s3 + $0xbb0] sm:$0xff] }
 0x23d   :  { %3128 = vmatpush1.msra.mxu0 %v9672_v1  ;;  %3424 = vmatpush1.msra.mxu1 %v9735_v2  ;;  %v9831_v0 = vld [vmem:[%s16390_s3 + $0xd90] sm:$0xff]  ;;  %v9767_v1 = vld [vmem:[%s16390_s3 + $0xba8] sm:$0xff] }
 0x23e   :  { %3129 = vmatprep.subr.mxu0 %v9671_v4  ;;  %3425 = vmatprep.subr.mxu1 %v9734_v5  ;;  %v9830_v2 = vld [vmem:[%s16390_s3 + $0xd88] sm:$0xff]  ;;  %v9829_v4 = vld [vmem:[%s16390_s3 + $0xd80] sm:$0xff]  ;;  %v9765_v5 = vld [vmem:[%s16390_s3 + $0xb98] sm:$0xff] }
 0x23f   :  { %3130 = vmatpush1.msra.mxu0 %v9670_v6  ;;  %3163 = vmatprep.mubr.f32.mxu0 %v11402_v12  ;;  %v9828_v6 = vld [vmem:[%s16390_s3 + $0xd78] sm:$0xff] }
 0x240   :  { %3426 = vmatpush1.msra.mxu1 %v9733_v7  ;;  %3459 = vmatprep.mubr.f32.mxu1 %v11402_v12  ;;  %v9764_v7 = vld [vmem:[%s16390_s3 + $0xb90] sm:$0xff] }
 0x241   :  { %9690 = vmatmul.mubr.msk.f32.vlgmr.msra.gmra.mxu0 %vm1748_vm4, %v3096_v3  ;;  %3309 = vmatprep.subr.mxu0 %v9731_v9  ;;  %v9766_v3 = vld [vmem:[%s16390_s3 + $0xba0] sm:$0xff]  ;;  %v9827_v9 = vld [vmem:[%s16390_s3 + $0xd70] sm:$0xff] }
 0x242   :  { %9753 = vmatmul.mubr.msk.f32.vlgmr.msra.gmra.mxu1 %vm1748_vm4, %v3392_v63  ;;  %3603 = vmatprep.subr.mxu1 %v9794_v10  ;;  %v9763_v10 = vld [vmem:[%s16390_s3 + $0xb88] sm:$0xff]  ;;  %v9825_v63 = vld [vmem:[%s16390_s3 + $0xd60] sm:$0xff] }
 0x243   :  { %3310 = vmatpush1.msra.mxu0 %v9730_v11  ;;  %3604 = vmatpush1.msra.mxu1 %v9793_v13  ;;  %v9826_v11 = vld [vmem:[%s16390_s3 + $0xd68] sm:$0xff]  ;;  %v9762_v13 = vld [vmem:[%s16390_s3 + $0xb80] sm:$0xff] }
 0x244   :  { %3311 = vmatprep.subr.mxu0 %v9729_v14  ;;  %3605 = vmatprep.subr.mxu1 %v9792_v15  ;;  %v9761_v14 = vld [vmem:[%s16390_s3 + $0xb78] sm:$0xff] }
 0x245   :  { %3312 = vmatpush1.msra.mxu0 %v9728_v16  ;;  %3606 = vmatpush1.msra.mxu1 %v9791_v17  ;;  %v9824_v15 = vld [vmem:[%s16390_s3 + $0xd58] sm:$0xff]  ;;  %v9760_v16 = vld [vmem:[%s16390_s3 + $0xb70] sm:$0xff] }
 0x246   :  { %3313 = vmatprep.subr.mxu0 %v9727_v19  ;;  %3607 = vmatprep.subr.mxu1 %v9790_v20  ;;  %v9823_v17 = vld [vmem:[%s16390_s3 + $0xd50] sm:$0xff]  ;;  %v9759_v19 = vld [vmem:[%s16390_s3 + $0xb68] sm:$0xff] }
 0x247   :  { %3314 = vmatpush1.msra.mxu0 %v9726_v21  ;;  %3608 = vmatpush1.msra.mxu1 %v9789_v22  ;;  %v9822_v20 = vld [vmem:[%s16390_s3 + $0xd48] sm:$0xff]  ;;  %v9758_v21 = vld [vmem:[%s16390_s3 + $0xb60] sm:$0xff] }
 0x248   :  { %3315 = vmatprep.subr.mxu0 %v9725_v24  ;;  %3609 = vmatprep.subr.mxu1 %v9788_v25  ;;  %v9821_v22 = vld [vmem:[%s16390_s3 + $0xd40] sm:$0xff]  ;;  %v9757_v24 = vld [vmem:[%s16390_s3 + $0xb58] sm:$0xff] }
 0x249   :  { %3316 = vmatpush1.msra.mxu0 %v9724_v26  ;;  %3610 = vmatpush1.msra.mxu1 %v9787_v27  ;;  %v9820_v25 = vld [vmem:[%s16390_s3 + $0xd38] sm:$0xff]  ;;  %v9756_v26 = vld [vmem:[%s16390_s3 + $0xb50] sm:$0xff] }
 0x24a   :  { %3317 = vmatprep.subr.mxu0 %v9723_v28  ;;  %3611 = vmatprep.subr.mxu1 %v9786_v29  ;;  %v9819_v27 = vld [vmem:[%s16390_s3 + $0xd30] sm:$0xff]  ;;  %v3490_v28 = vpop.permute.xlu0 %3489  ;;  %v9755_v29 = vld [vmem:[%s16390_s3 + $0xb48] sm:$0xff] }
 0x24b   :  { %3318 = vmatpush1.msra.mxu0 %v9722_v30  ;;  %3612 = vmatpush1.msra.mxu1 %v9785_v31  ;;  %v9818_v30 = vld [vmem:[%s16390_s3 + $0xd28] sm:$0xff]  ;;  %v9754_v31 = vld [vmem:[%s16390_s3 + $0xb40] sm:$0xff] }
 0x24c   :  { %3319 = vmatprep.subr.mxu0 %v9721_v32  ;;  %3613 = vmatprep.subr.mxu1 %v9784_v33  ;;  %v9817_v32 = vld [vmem:[%s16390_s3 + $0xd20] sm:$0xff]  ;;  %v9815_v33 = vld [vmem:[%s16390_s3 + $0xd18] sm:$0xff] }
 0x24d   :  { %3320 = vmatpush1.msra.mxu0 %v9720_v34  ;;  %3614 = vmatpush1.msra.mxu1 %v9783_v35  ;;  %v9878_v34 = vld [vmem:[%s16390_s3 + $0xef8] sm:$0xff]  ;;  %v9814_v35 = vld [vmem:[%s16390_s3 + $0xd10] sm:$0xff] }
 0x24e   :  { %3321 = vmatprep.subr.mxu0 %v9719_v36  ;;  %3615 = vmatprep.subr.mxu1 %v9782_v37  ;;  %v9877_v36 = vld [vmem:[%s16390_s3 + $0xef0] sm:$0xff]  ;;  %v3785_v37 = vpop.permute.xlu0 %3784 }
 0x24f   :  { %3322 = vmatpush1.msra.mxu0 %v9718_v38  ;;  %3616 = vmatpush1.msra.mxu1 %v9781_v39  ;;  %v9813_v38 = vld [vmem:[%s16390_s3 + $0xd08] sm:$0xff] }
 0x250   :  { %3323 = vmatprep.subr.mxu0 %v9717_v41  ;;  %3617 = vmatprep.subr.mxu1 %v9780_v44  ;;  %v9876_v39 = vld [vmem:[%s16390_s3 + $0xee8] sm:$0xff]  ;;  %v9812_v41 = vld [vmem:[%s16390_s3 + $0xd00] sm:$0xff] }
 0x251   :  { %3324 = vmatpush1.msra.mxu0 %v9716_v18  ;;  %3618 = vmatpush1.msra.mxu1 %v9779_v46  ;;  %v9875_v44 = vld [vmem:[%s16390_s3 + $0xee0] sm:$0xff]  ;;  %v9811_v18 = vld [vmem:[%s16390_s3 + $0xcf8] sm:$0xff] }
 0x252   :  { %3325 = vmatprep.subr.mxu0 %v9715_v47  ;;  %3619 = vmatprep.subr.mxu1 %v9778_v48  ;;  %v9874_v46 = vld [vmem:[%s16390_s3 + $0xed8] sm:$0xff]  ;;  %v9810_v47 = vld [vmem:[%s16390_s3 + $0xcf0] sm:$0xff] }
 0x253   :  { %3326 = vmatpush1.msra.mxu0 %v9714_v49  ;;  %3620 = vmatpush1.msra.mxu1 %v9777_v50  ;;  %v9873_v48 = vld [vmem:[%s16390_s3 + $0xed0] sm:$0xff]  ;;  %v9809_v49 = vld [vmem:[%s16390_s3 + $0xce8] sm:$0xff] }
 0x254   :  { %3327 = vmatprep.subr.mxu0 %v9713_v51  ;;  %3621 = vmatprep.subr.mxu1 %v9776_v53  ;;  %v9872_v50 = vld [vmem:[%s16390_s3 + $0xec8] sm:$0xff]  ;;  %v9808_v51 = vld [vmem:[%s16390_s3 + $0xce0] sm:$0xff] }
 0x255   :  { %3328 = vmatpush1.msra.mxu0 %v9712_v40  ;;  %3361 = vmatprep.mubr.f32.mxu0 %v11402_v12  ;;  %v9871_v53 = vld [vmem:[%s16390_s3 + $0xec0] sm:$0xff]  ;;  %v9807_v40 = vld [vmem:[%s16390_s3 + $0xcd8] sm:$0xff] }
 0x256   :  { %3622 = vmatpush1.msra.mxu1 %v9775_v43  ;;  %3655 = vmatprep.mubr.f32.mxu1 %v11402_v12  ;;  %v9870_v43 = vld [vmem:[%s16390_s3 + $0xeb8] sm:$0xff] }
 0x257   :  { %9732 = vmatmul.mubr.msk.f32.vlgmr.msra.gmra.mxu0 %vm1748_vm4, %v3294_v55  ;;  %3505 = vmatprep.subr.mxu0 %v9773_v52  ;;  %v9806_v52 = vld [vmem:[%s16390_s3 + $0xcd0] sm:$0xff]  ;;  %v9805_v55 = vld [vmem:[%s16390_s3 + $0xcc8] sm:$0xff] }
 0x258   :  { %9795 = vmatmul.mubr.msk.f32.vlgmr.msra.gmra.mxu1 %vm1748_vm4, %v3588_v56  ;;  %3800 = vmatprep.subr.mxu1 %v9836_v54  ;;  %v9869_v54 = vld [vmem:[%s16390_s3 + $0xeb0] sm:$0xff]  ;;  %v9867_v56 = vld [vmem:[%s16390_s3 + $0xea0] sm:$0xff] }
 0x259   :  { %3506 = vmatpush1.msra.mxu0 %v9772_v42  ;;  %3801 = vmatpush1.msra.mxu1 %v9835_v45  ;;  %v9868_v42 = vld [vmem:[%s16390_s3 + $0xea8] sm:$0xff]  ;;  %v9804_v45 = vld [vmem:[%s16390_s3 + $0xcc0] sm:$0xff] }
 0x25a   :  { %3507 = vmatprep.subr.mxu0 %v9771_v57  ;;  %3802 = vmatprep.subr.mxu1 %v9834_v58  ;;  %v9803_v57 = vld [vmem:[%s16390_s3 + $0xcb8] sm:$0xff] }
 0x25b   :  { %3508 = vmatpush1.msra.mxu0 %v9770_v8  ;;  %3803 = vmatpush1.msra.mxu1 %v9833_v59  ;;  %v9866_v58 = vld [vmem:[%s16390_s3 + $0xe98] sm:$0xff]  ;;  %v9802_v8 = vld [vmem:[%s16390_s3 + $0xcb0] sm:$0xff] }
 0x25c   :  { %3509 = vmatprep.subr.mxu0 %v9769_v60  ;;  %3804 = vmatprep.subr.mxu1 %v9832_v61  ;;  %v9865_v59 = vld [vmem:[%s16390_s3 + $0xe90] sm:$0xff]  ;;  %v9801_v60 = vld [vmem:[%s16390_s3 + $0xca8] sm:$0xff] }
 0x25d   :  { %3510 = vmatpush1.msra.mxu0 %v9768_v62  ;;  %3805 = vmatpush1.msra.mxu1 %v9831_v0  ;;  %v9864_v61 = vld [vmem:[%s16390_s3 + $0xe88] sm:$0xff]  ;;  %v9800_v62 = vld [vmem:[%s16390_s3 + $0xca0] sm:$0xff] }
 0x25e   :  { %3511 = vmatprep.subr.mxu0 %v9767_v1  ;;  %3806 = vmatprep.subr.mxu1 %v9830_v2  ;;  %v9863_v0 = vld [vmem:[%s16390_s3 + $0xe80] sm:$0xff]  ;;  %v9799_v1 = vld [vmem:[%s16390_s3 + $0xc98] sm:$0xff] }
 0x25f   :  { %3512 = vmatpush1.msra.mxu0 %v9766_v3  ;;  %3807 = vmatpush1.msra.mxu1 %v9829_v4  ;;  %v9862_v2 = vld [vmem:[%s16390_s3 + $0xe78] sm:$0xff]  ;;  %v9798_v3 = vld [vmem:[%s16390_s3 + $0xc90] sm:$0xff] }
 0x260   :  { %3513 = vmatprep.subr.mxu0 %v9765_v5  ;;  %3808 = vmatprep.subr.mxu1 %v9828_v6  ;;  %v9861_v4 = vld [vmem:[%s16390_s3 + $0xe70] sm:$0xff]  ;;  %v9797_v5 = vld [vmem:[%s16390_s3 + $0xc88] sm:$0xff] }
 0x261   :  { %3514 = vmatpush1.msra.mxu0 %v9764_v7  ;;  %3809 = vmatpush1.msra.mxu1 %v9827_v9  ;;  %v9860_v6 = vld [vmem:[%s16390_s3 + $0xe68] sm:$0xff]  ;;  %v9796_v7 = vld [vmem:[%s16390_s3 + $0xc80] sm:$0xff] }
 0x262   :  { %3515 = vmatprep.subr.mxu0 %v9763_v10  ;;  %3810 = vmatprep.subr.mxu1 %v9826_v11  ;;  %v9859_v9 = vld [vmem:[%s16390_s3 + $0xe60] sm:$0xff]  ;;  %v9857_v10 = vld [vmem:[%s16390_s3 + $0xe58] sm:$0xff]  ;;  %v9856_v11 = vld [vmem:[%s16390_s3 + $0xe50] sm:$0xff] }
 0x263   :  { %3516 = vmatpush1.msra.mxu0 %v9762_v13  ;;  %3811 = vmatpush1.msra.mxu1 %v9825_v63  ;;  %v9855_v13 = vld [vmem:[%s16390_s3 + $0xe48] sm:$0xff]  ;;  %v3981_v63 = vpop.permute.xlu0 %3980 }
 0x264   :  { %3517 = vmatprep.subr.mxu0 %v9761_v14  ;;  %3812 = vmatprep.subr.mxu1 %v9824_v15  ;;  %v9854_v14 = vld [vmem:[%s16390_s3 + $0xe40] sm:$0xff]  ;;  %v9853_v15 = vld [vmem:[%s16390_s3 + $0xe38] sm:$0xff] }
 0x265   :  { %3518 = vmatpush1.msra.mxu0 %v9760_v16  ;;  %3813 = vmatpush1.msra.mxu1 %v9823_v17  ;;  %v9852_v16 = vld [vmem:[%s16390_s3 + $0xe30] sm:$0xff]  ;;  %v9850_v17 = vld [vmem:[%s16390_s3 + $0xe20] sm:$0xff] }
 0x266   :  { %3519 = vmatprep.subr.mxu0 %v9759_v19  ;;  %3814 = vmatprep.subr.mxu1 %v9822_v20  ;;  %v9849_v19 = vld [vmem:[%s16390_s3 + $0xe18] sm:$0xff]  ;;  %v9848_v20 = vld [vmem:[%s16390_s3 + $0xe10] sm:$0xff] }
 0x267   :  { %3520 = vmatpush1.msra.mxu0 %v9758_v21  ;;  %3815 = vmatpush1.msra.mxu1 %v9821_v22  ;;  %v9847_v21 = vld [vmem:[%s16390_s3 + $0xe08] sm:$0xff]  ;;  %v9846_v22 = vld [vmem:[%s16390_s3 + $0xe00] sm:$0xff] }
 0x268   :  { %3521 = vmatprep.subr.mxu0 %v9757_v24  ;;  %3816 = vmatprep.subr.mxu1 %v9820_v25  ;;  %v9845_v24 = vld [vmem:[%s16390_s3 + $0xdf8] sm:$0xff]  ;;  %v9844_v25 = vld [vmem:[%s16390_s3 + $0xdf0] sm:$0xff] }
 0x269   :  { %3522 = vmatpush1.msra.mxu0 %v9756_v26  ;;  %3817 = vmatpush1.msra.mxu1 %v9819_v27  ;;  %v9843_v26 = vld [vmem:[%s16390_s3 + $0xde8] sm:$0xff]  ;;  %v9842_v27 = vld [vmem:[%s16390_s3 + $0xde0] sm:$0xff] }
 0x26a   :  { %3523 = vmatprep.subr.mxu0 %v9755_v29  ;;  %3818 = vmatprep.subr.mxu1 %v9818_v30  ;;  %v9840_v29 = vld [vmem:[%s16390_s3 + $0xdd0] sm:$0xff]  ;;  %v9839_v30 = vld [vmem:[%s16390_s3 + $0xdc8] sm:$0xff] }
 0x26b   :  { %3524 = vmatpush1.msra.mxu0 %v9754_v31  ;;  %3557 = vmatprep.mubr.f32.mxu0 %v11402_v12  ;;  %v9838_v31 = vld [vmem:[%s16390_s3 + $0xdc0] sm:$0xff] }
 0x26c   :  { %3819 = vmatpush1.msra.mxu1 %v9817_v32  ;;  %3852 = vmatprep.mubr.f32.mxu1 %v11402_v12  ;;  %v9899_v32 = vld [vmem:[%s16390_s3 + $0xf98] sm:$0xff] }
 0x26d   :  { %9774 = vmatmul.mubr.msk.f32.vlgmr.msra.gmra.mxu0 %vm1748_vm4, %v3490_v28  ;;  %3702 = vmatprep.subr.mxu0 %v9815_v33  ;;  %v9841_v28 = vld [vmem:[%s16390_s3 + $0xdd8] sm:$0xff]  ;;  %v9898_v33 = vld [vmem:[%s16390_s3 + $0xf90] sm:$0xff] }
 0x26e   :  { %9837 = vmatmul.mubr.msk.f32.vlgmr.msra.gmra.mxu1 %vm1748_vm4, %v3785_v37  ;;  %3996 = vmatprep.subr.mxu1 %v9878_v34  ;;  %v3883_v34 = vpop.permute.xlu1 %3882  ;;  %v9895_v37 = vld [vmem:[%s16390_s3 + $0xf78] sm:$0xff] }
 0x26f   :  { %3703 = vmatpush1.msra.mxu0 %v9814_v35  ;;  %3997 = vmatpush1.msra.mxu1 %v9877_v36  ;;  %v9897_v35 = vld [vmem:[%s16390_s3 + $0xf88] sm:$0xff]  ;;  %v9896_v36 = vld [vmem:[%s16390_s3 + $0xf80] sm:$0xff] }
 0x270   :  { %3704 = vmatprep.subr.mxu0 %v9813_v38  ;;  %3998 = vmatprep.subr.mxu1 %v9876_v39  ;;  %v9894_v38 = vld [vmem:[%s16390_s3 + $0xf70] sm:$0xff]  ;;  %v9893_v39 = vld [vmem:[%s16390_s3 + $0xf68] sm:$0xff] }
 0x271   :  { %3705 = vmatpush1.msra.mxu0 %v9812_v41  ;;  %3999 = vmatpush1.msra.mxu1 %v9875_v44  ;;  %v9892_v41 = vld [vmem:[%s16390_s3 + $0xf60] sm:$0xff]  ;;  %v9891_v44 = vld [vmem:[%s16390_s3 + $0xf58] sm:$0xff] }
 0x272   :  { %3706 = vmatprep.subr.mxu0 %v9811_v18  ;;  %4000 = vmatprep.subr.mxu1 %v9874_v46  ;;  %v9890_v18 = vld [vmem:[%s16390_s3 + $0xf50] sm:$0xff]  ;;  %v9889_v46 = vld [vmem:[%s16390_s3 + $0xf48] sm:$0xff] }
 0x273   :  { %3707 = vmatpush1.msra.mxu0 %v9810_v47  ;;  %4001 = vmatpush1.msra.mxu1 %v9873_v48  ;;  %v9888_v47 = vld [vmem:[%s16390_s3 + $0xf40] sm:$0xff]  ;;  %v9887_v48 = vld [vmem:[%s16390_s3 + $0xf38] sm:$0xff] }
 0x274   :  { %3708 = vmatprep.subr.mxu0 %v9809_v49  ;;  %4002 = vmatprep.subr.mxu1 %v9872_v50  ;;  %v9886_v49 = vld [vmem:[%s16390_s3 + $0xf30] sm:$0xff]  ;;  %v9885_v50 = vld [vmem:[%s16390_s3 + $0xf28] sm:$0xff] }
 0x275   :  { %3709 = vmatpush1.msra.mxu0 %v9808_v51  ;;  %4003 = vmatpush1.msra.mxu1 %v9871_v53  ;;  %v9884_v51 = vld [vmem:[%s16390_s3 + $0xf20] sm:$0xff]  ;;  %v9883_v53 = vld [vmem:[%s16390_s3 + $0xf18] sm:$0xff] }
 0x276   :  { %3710 = vmatprep.subr.mxu0 %v9807_v40  ;;  %4004 = vmatprep.subr.mxu1 %v9870_v43  ;;  %v9882_v40 = vld [vmem:[%s16390_s3 + $0xf10] sm:$0xff]  ;;  %v9881_v43 = vld [vmem:[%s16390_s3 + $0xf08] sm:$0xff] }
 0x277   :  { %3711 = vmatpush1.msra.mxu0 %v9806_v52  ;;  %4005 = vmatpush1.msra.mxu1 %v9869_v54  ;;  %v9880_v52 = vld [vmem:[%s16390_s3 + $0xf00] sm:$0xff]  ;;  %v4079_v54 = vpop.permute.xlu1 %4078 }
 0x278   :  { %3712 = vmatprep.subr.mxu0 %v9805_v55  ;;  %4006 = vmatprep.subr.mxu1 %v9868_v42  ;;  %v4206_v55 = vld [vmem:[%s16393_s6 + $0x78] sm:$0xff]  ;;  %v9916_v42 = vld [vmem:[%s16393_s6 + $0x108] sm:$0xff] }
 0x279   :  { %3713 = vmatpush1.msra.mxu0 %v9804_v45  ;;  %4007 = vmatpush1.msra.mxu1 %v9867_v56  ;;  %v4205_v45 = vld [vmem:[%s16393_s6 + $0x70] sm:$0xff]  ;;  %v9915_v56 = vld [vmem:[%s16393_s6 + $0x100] sm:$0xff] }
 0x27a   :  { %3714 = vmatprep.subr.mxu0 %v9803_v57  ;;  %4008 = vmatprep.subr.mxu1 %v9866_v58  ;;  %v4204_v57 = vld [vmem:[%s16393_s6 + $0x68] sm:$0xff]  ;;  %v9914_v58 = vld [vmem:[%s16393_s6 + $0xf8] sm:$0xff] }
 0x27b   :  { %3715 = vmatpush1.msra.mxu0 %v9802_v8  ;;  %4009 = vmatpush1.msra.mxu1 %v9865_v59  ;;  %v4203_v8 = vld [vmem:[%s16393_s6 + $0x60] sm:$0xff]  ;;  %v9913_v59 = vld [vmem:[%s16393_s6 + $0xf0] sm:$0xff] }
 0x27c   :  { %3716 = vmatprep.subr.mxu0 %v9801_v60  ;;  %4010 = vmatprep.subr.mxu1 %v9864_v61  ;;  %v4202_v60 = vld [vmem:[%s16393_s6 + $0x58] sm:$0xff]  ;;  %v9912_v61 = vld [vmem:[%s16393_s6 + $0xe8] sm:$0xff] }
 0x27d   :  { %3717 = vmatpush1.msra.mxu0 %v9800_v62  ;;  %4011 = vmatpush1.msra.mxu1 %v9863_v0  ;;  %v4201_v62 = vld [vmem:[%s16393_s6 + $0x50] sm:$0xff]  ;;  %v9911_v0 = vld [vmem:[%s16393_s6 + $0xe0] sm:$0xff] }
 0x27e   :  { %3718 = vmatprep.subr.mxu0 %v9799_v1  ;;  %4012 = vmatprep.subr.mxu1 %v9862_v2  ;;  %v4200_v1 = vld [vmem:[%s16393_s6 + $0x48] sm:$0xff]  ;;  %v9910_v2 = vld [vmem:[%s16393_s6 + $0xd8] sm:$0xff] }
 0x27f   :  { %3719 = vmatpush1.msra.mxu0 %v9798_v3  ;;  %4013 = vmatpush1.msra.mxu1 %v9861_v4  ;;  %v4199_v3 = vld [vmem:[%s16393_s6 + $0x40] sm:$0xff]  ;;  %v9909_v4 = vld [vmem:[%s16393_s6 + $0xd0] sm:$0xff] }
 0x280   :  { %3720 = vmatprep.subr.mxu0 %v9797_v5  ;;  %4014 = vmatprep.subr.mxu1 %v9860_v6  ;;  %v4198_v5 = vld [vmem:[%s16393_s6 + $0x38] sm:$0xff]  ;;  %v9908_v6 = vld [vmem:[%s16393_s6 + $0xc8] sm:$0xff] }
 0x281   :  { %3721 = vmatpush1.msra.mxu0 %v9796_v7  ;;  %3754 = vmatprep.mubr.f32.mxu0 %v11402_v12  ;;  %v4197_v7 = vld [vmem:[%s16393_s6 + $0x30] sm:$0xff] }
 0x282   :  { %4015 = vmatpush1.msra.mxu1 %v9859_v9  ;;  %4048 = vmatprep.mubr.f32.mxu1 %v11402_v12  ;;  %v9907_v9 = vld [vmem:[%s16393_s6 + $0xc0] sm:$0xff] }
 0x283   :  { %9816 = vmatmul.mubr.msk.f32.vlgmr.msra.gmra.mxu0 %vm1748_vm4, %v12235_v23  ;;  %3898 = vmatprep.subr.mxu0 %v9857_v10  ;;  %v9851_v23 = vld [vmem:[%s16390_s3 + $0xe28] sm:$0xff] }
 0x284   :  { %9879 = vmatmul.mubr.msk.f32.vlgmr.msra.gmra.mxu1 %vm1748_vm4, %v3981_v63  ;;  %3899 = vmatpush1.msra.mxu0 %v9856_v11  ;;  %v4196_v10 = vld [vmem:[%s16393_s6 + $0x28] sm:$0xff]  ;;  %v9906_v11 = vld [vmem:[%s16393_s6 + $0xb8] sm:$0xff]  ;;  %v9905_v63 = vld [vmem:[%s16393_s6 + $0xb0] sm:$0xff] }
 0x285   :  { %3900 = vmatprep.subr.mxu0 %v9855_v13  ;;  %3950 = vmatprep.mubr.f32.mxu0 %v11402_v12  ;;  %v4195_v13 = vld [vmem:[%s16393_s6 + $0x20] sm:$0xff] }
 0x286   :  { %3901 = vmatpush1.msra.mxu0 %v9854_v14  ;;  %4239 = vmatprep.subr.mxu1 %v11402_v12  ;;  %v4194_v14 = vld [vmem:[%s16393_s6 + $0x18] sm:$0xff] }
 0x287   :  { %3902 = vmatprep.subr.mxu0 %v9853_v15  ;;  %4240 = vmatpush1.msra.mxu1 %v9916_v42  ;;  %v9904_v15 = vld [vmem:[%s16393_s6 + $0xa8] sm:$0xff] }
 0x288   :  { %3903 = vmatpush1.msra.mxu0 %v9852_v16  ;;  %4241 = vmatprep.subr.mxu1 %v11402_v12  ;;  %v4193_v16 = vld [vmem:[%s16393_s6 + $0x10] sm:$0xff] }
 0x289   :  { %3904 = vmatprep.subr.mxu0 %v9851_v23  ;;  %4242 = vmatpush1.msra.mxu1 %v9915_v56  ;;  %v9903_v23 = vld [vmem:[%s16393_s6 + $0xa0] sm:$0xff] }
 0x28a   :  { %3905 = vmatpush1.msra.mxu0 %v9850_v17  ;;  %4243 = vmatprep.subr.mxu1 %v11402_v12  ;;  %v4192_v17 = vld [vmem:[%s16393_s6 + $0x8] sm:$0xff] }
 0x28b   :  { %3906 = vmatprep.subr.mxu0 %v9849_v19  ;;  %4244 = vmatpush1.msra.mxu1 %v9914_v58  ;;  %v1817_v19 = vpop.f32.mrf.mxu0 }
 0x28c   :  { %3907 = vmatpush1.msra.mxu0 %v9848_v20  ;;  %4245 = vmatprep.subr.mxu1 %v11402_v12 }
 0x28d   :  { %3908 = vmatprep.subr.mxu0 %v9847_v21  ;;  %4246 = vmatpush1.msra.mxu1 %v9913_v59  ;;  %v1819_v20 = vpop.f32.mrf.mxu0  ;;  %v1890_v21 = vpop.f32.mrf.mxu1 }
 0x28e   :  { %3909 = vmatpush1.msra.mxu0 %v9846_v22  ;;  %4247 = vmatprep.subr.mxu1 %v11402_v12 }
 0x28f   :  { %3910 = vmatprep.subr.mxu0 %v9845_v24  ;;  %4248 = vmatpush1.msra.mxu1 %v9912_v61  ;;  %v1986_v22 = vpop.f32.mrf.mxu0  ;;  %v1891_v24 = vadd.f32 %v1890_v21, %v1817_v19 }
 0x290   :  { %3911 = vmatpush1.msra.mxu0 %v9844_v25  ;;  %4249 = vmatprep.subr.mxu1 %v11402_v12  ;;  %v1892_v25 = vpop.f32.mrf.mxu1 }
 0x291   :  { %3912 = vmatprep.subr.mxu0 %v9843_v26  ;;  %4250 = vmatpush1.msra.mxu1 %v9911_v0  ;;  %v1988_v26 = vpop.f32.mrf.mxu0 }
 0x292   :  { %3913 = vmatpush1.msra.mxu0 %v9842_v27  ;;  %4251 = vmatprep.subr.mxu1 %v11402_v12  ;;  %v1893_v27 = vadd.f32 %v1892_v25, %v1819_v20 }
 0x293   :  { %3914 = vmatprep.subr.mxu0 %v9841_v28  ;;  %4252 = vmatpush1.msra.mxu1 %v9910_v2  ;;  %v1991_v28 = vadd.f32 %v1986_v22, %v1891_v24 }
 0x294   :  { %3915 = vmatpush1.msra.mxu0 %v9840_v29  ;;  %4253 = vmatprep.subr.mxu1 %v11402_v12  ;;  %v2084_v29 = vpop.f32.mrf.mxu1 }
 0x295   :  { %3916 = vmatprep.subr.mxu0 %v9839_v30  ;;  %4254 = vmatpush1.msra.mxu1 %v9909_v4  ;;  %v2182_v30 = vpop.f32.mrf.mxu0 }
 0x296   :  { %3917 = vmatpush1.msra.mxu0 %v9838_v31  ;;  %4255 = vmatprep.subr.mxu1 %v11402_v12  ;;  %v1992_v31 = vadd.f32 %v1988_v26, %v1893_v27 }
 0x297   :  { %9858 = vmatmul.mubr.msk.f32.vlgmr.msra.gmra.mxu0 %vm1748_vm4, %v3883_v34  ;;  %4094 = vmatprep.subr.mxu0 %v9899_v32  ;;  %v2089_v32 = vadd.f32 %v2084_v29, %v1991_v28  ;;  %v2184_v34 = vpop.f32.mrf.mxu0 }
 0x298   :  { %4095 = vmatpush1.msra.mxu0 %v9898_v33  ;;  %4146 = vmatprep.mubr.f32.mxu0 %v11402_v12  ;;  %v2086_v33 = vpop.f32.mrf.mxu1 }
 0x299   :  { %4096 = vmatprep.subr.mxu0 %v9897_v35  ;;  %4256 = vmatpush1.msra.mxu1 %v9908_v6  ;;  %v2187_v35 = vadd.f32 %v2182_v30, %v2089_v32 }
 0x29a   :  { %4097 = vmatpush1.msra.mxu0 %v9896_v36  ;;  %4257 = vmatprep.subr.mxu1 %v11402_v12  ;;  %v2090_v36 = vadd.f32 %v2086_v33, %v1992_v31 }
 0x29b   :  { %4098 = vmatprep.subr.mxu0 %v9895_v37  ;;  %4258 = vmatpush1.msra.mxu1 %v9907_v9  ;;  %v2282_v37 = vpop.f32.mrf.mxu1 }
 0x29c   :  { %4099 = vmatpush1.msra.mxu0 %v9894_v38  ;;  %4259 = vmatprep.subr.mxu1 %v11402_v12 }
 0x29d   :  { %4100 = vmatprep.subr.mxu0 %v9893_v39  ;;  %4260 = vmatpush1.msra.mxu1 %v9906_v11  ;;  %v2188_v39 = vadd.f32 %v2184_v34, %v2090_v36  ;;  %v4157_v34 = vlaneseq }
 0x29e   :  { %4101 = vmatpush1.msra.mxu0 %v9892_v41  ;;  %4261 = vmatprep.subr.mxu1 %v11402_v12  ;;  %v2287_v41 = vadd.f32 %v2282_v37, %v2187_v35 }
 0x29f   :  { %4102 = vmatprep.subr.mxu0 %v9891_v44  ;;  %4262 = vmatpush1.msra.mxu1 %v9905_v63  ;;  %v2284_v44 = vpop.f32.mrf.mxu1 }
 0x2a0   :  { %4103 = vmatpush1.msra.mxu0 %v9890_v18  ;;  %4263 = vmatprep.subr.mxu1 %v11402_v12 }
 0x2a1   :  { %4104 = vmatprep.subr.mxu0 %v9889_v46  ;;  %4264 = vmatpush1.msra.mxu1 %v9904_v15 }
 0x2a2   :  { %4105 = vmatpush1.msra.mxu0 %v9888_v47  ;;  %4265 = vmatprep.subr.mxu1 %v11402_v12  ;;  %v2288_v47 = vadd.f32 %v2284_v44, %v2188_v39 }
 0x2a3   :  { %4106 = vmatprep.subr.mxu0 %v9887_v48  ;;  %4266 = vmatpush1.msra.mxu1 %v9903_v23  ;;  %v2478_v48 = vpop.f32.mrf.mxu1 }
 0x2a4   :  { %4107 = vmatpush1.msra.mxu0 %v9886_v49  ;;  %4267 = vmatprep.subr.mxu1 %v11402_v12 }
 0x2a5   :  { %4108 = vmatprep.subr.mxu0 %v9885_v50 }
 0x2a6   :  { %4109 = vmatpush1.msra.mxu0 %v9884_v51 }
 0x2a7   :  { %4110 = vmatprep.subr.mxu0 %v9883_v53  ;;  %v2480_v53 = vpop.f32.mrf.mxu1 }
 0x2a8   :  { %4111 = vmatpush1.msra.mxu0 %v9882_v40 }
 0x2a9   :  { %4112 = vmatprep.subr.mxu0 %v9881_v43  ;;  %v2380_v38 = vpop.f32.mrf.mxu0 }
 0x2aa   :  { %4113 = vmatpush1.msra.mxu0 %v9880_v52  ;;  %v2385_v46 = vadd.f32 %v2380_v38, %v2287_v41 }
 0x2ab   :  { %9900 = vmatmul.mubr.msk.f32.vlgmr.msra.gmra.mxu0 %vm1748_vm4, %v4079_v54  ;;  %4314 = vmatprep.subr.mxu0 %v11402_v12  ;;  %v2382_v18 = vpop.f32.mrf.mxu0  ;;  %v2674_v54 = vpop.f32.mrf.mxu1 }
 0x2ac   :  { %4315 = vmatpush1.msra.mxu0 %v4206_v55  ;;  %v2386_v50 = vadd.f32 %v2382_v18, %v2288_v47  ;;  %v2483_v51 = vadd.f32 %v2478_v48, %v2385_v46  ;;  %v13727_v18 = vshrl.u32 %v4157_v34, 7  ;;  %v9933_v34 = vld [vmem:[%s16393_s6 + $0x170] sm:$0xff] }
 0x2ad   :  { %4316 = vmatprep.subr.mxu0 %v11402_v12  ;;  %v2676_v56 = vpop.f32.mrf.mxu1 }
 0x2ae   :  { %4317 = vmatpush1.msra.mxu0 %v4205_v45  ;;  %v2484_v52 = vadd.f32 %v2480_v53, %v2386_v50  ;;  %v9902_v53 = vld [vmem:[%s16393_s6 + $0x98] sm:$0xff] }
 0x2af   :  { %4318 = vmatprep.subr.mxu0 %v11402_v12  ;;  %4268 = vmatpush1.msra.mxu1 %v9902_v53  ;;  %v9946_v53 = vld [vmem:[%s16393_s6 + $0x1c8] sm:$0xff] }
 0x2b0   :  { %4319 = vmatpush1.msra.mxu0 %v4204_v57  ;;  %4269 = vmatprep.subr.mxu1 %v11402_v12 }
 0x2b1   :  { %4320 = vmatprep.subr.mxu0 %v11402_v12 }
 0x2b2   :  { %4321 = vmatpush1.msra.mxu0 %v4203_v8 }
 0x2b3   :  { %4322 = vmatprep.subr.mxu0 %v11402_v12 }
 0x2b4   :  { %4323 = vmatpush1.msra.mxu0 %v4202_v60 }
 0x2b5   :  { %4324 = vmatprep.subr.mxu0 %v11402_v12 }
 0x2b6   :  { %4325 = vmatpush1.msra.mxu0 %v4201_v62 }
 0x2b7   :  { %4326 = vmatprep.subr.mxu0 %v11402_v12 }
 0x2b8   :  { %4327 = vmatpush1.msra.mxu0 %v4200_v1 }
 0x2b9   :  { %4328 = vmatprep.subr.mxu0 %v11402_v12 }
 0x2ba   :  { %4329 = vmatpush1.msra.mxu0 %v4199_v3 }
 0x2bb   :  { %4330 = vmatprep.subr.mxu0 %v11402_v12 }
 0x2bc   :  { %4331 = vmatpush1.msra.mxu0 %v4198_v5 }
 0x2bd   :  { %4332 = vmatprep.subr.mxu0 %v11402_v12 }
 0x2be   :  { %4333 = vmatpush1.msra.mxu0 %v4197_v7 }
 0x2bf   :  { %4334 = vmatprep.subr.mxu0 %v11402_v12  ;;  %v2576_v49 = vpop.f32.mrf.mxu0 }
 0x2c0   :  { %4335 = vmatpush1.msra.mxu0 %v4196_v10  ;;  %v2581_v43 = vadd.f32 %v2576_v49, %v2483_v51  ;;  %v2871_v59 = vpop.f32.mrf.mxu1  ;;  %v4159_v51 = vsub.s32 0, %v13727_v18 }
 0x2c1   :  { %4336 = vmatprep.subr.mxu0 %v11402_v12  ;;  %v2578_v40 = vpop.f32.mrf.mxu0 }
 0x2c2   :  { %4337 = vmatpush1.msra.mxu0 %v4195_v13  ;;  %v2582_v42 = vadd.f32 %v2578_v40, %v2484_v52  ;;  %v2679_v45 = vadd.f32 %v2674_v54, %v2581_v43  ;;  %v2873_v0 = vpop.f32.mrf.mxu1  ;;  %v4191_v40 = vld [vmem:[%s16393_s6] sm:$0xff] }
 0x2c3   :  { %4338 = vmatprep.subr.mxu0 %v11402_v12  ;;  %v4155_v52 = vld [vmem:[%s16392_s5] sm:$0x3] }
 0x2c4   :  { %4339 = vmatpush1.msra.mxu0 %v4194_v14  ;;  %v2680_v8 = vadd.f32 %v2676_v56, %v2582_v42  ;;  %v9901_v56 = vld [vmem:[%s16393_s6 + $0x90] sm:$0xff] }
 0x2c5   :  { %4340 = vmatprep.subr.mxu0 %v11402_v12  ;;  %4270 = vmatpush1.msra.mxu1 %v9901_v56  ;;  %v9923_v56 = vld [vmem:[%s16393_s6 + $0x120] sm:$0xff] }
 0x2c6   :  { %4341 = vmatpush1.msra.mxu0 %v4193_v16  ;;  %4299 = vmatprep.subr.mxu1 %v11402_v12 }
 0x2c7   :  { %4342 = vmatprep.subr.mxu0 %v11402_v12 }
 0x2c8   :  { %4343 = vmatpush1.msra.mxu0 %v4192_v17 }
 0x2c9   :  { %4344 = vmatprep.subr.mxu0 %v11402_v12 }
 0x2ca   :  { %4345 = vmatpush1.msra.mxu0 %v4191_v40  ;;  %v9926_v40 = vld [vmem:[%s16393_s6 + $0x138] sm:$0xff] }
 0x2cb   :  { %4374 = vmatprep.subr.mxu0 %v11402_v12 }
 0x2d5   :  { %v2773_v55 = vpop.f32.mrf.mxu0 }
 0x2d6   :  { %v2778_v58 = vadd.f32 %v2773_v55, %v2679_v45  ;;  %v3067_v4 = vpop.f32.mrf.mxu1  ;;  %v4163_v55 = vsub.s32 1, %v13727_v18  ;;  %v4160_v45 = vrot.slane %v4155_v52, %v4159_v51 }
 0x2d7   :  { %v2775_v57 = vpop.f32.mrf.mxu0 }
 0x2d8   :  { %v2779_v61 = vadd.f32 %v2775_v57, %v2680_v8  ;;  %v2876_v62 = vadd.f32 %v2871_v59, %v2778_v58  ;;  %v3069_v9 = vpop.f32.mrf.mxu1  ;;  %v4208_v57 = vld [vmem:[%s16393_s6 + $0x88] sm:$0xf] }
 0x2d9   :  { %9921 = vmatpush2.msk.msra.mxu0 %vm56_vm0, %v4208_v57  ;;  %v9960_v57 = vld [vmem:[%s16393_s6 + $0x238] sm:$0xf] }
 0x2da   :  { %v2877_v3 = vadd.f32 %v2873_v0, %v2779_v61  ;;  %v4164_v61 = vrot.slane %v4155_v52, %v4163_v55  ;;  %4376 = vmatprep.subr.mxu0 %v11402_v12  ;;  %v4207_v0 = vld [vmem:[%s16393_s6 + $0x80] sm:$0xff]  ;;  %v9925_v52 = vld [vmem:[%s16393_s6 + $0x130] sm:$0xff] }
 0x2db   :  { %4377 = vmatpush2.msra.mxu0 %v4207_v0  ;;  %v4588_v0 = vld [vmem:[%s16395_s8 + $0x28] sm:$0xff] }
 0x2dc   :  { %4509 = vmatprep.subr.mxu0 %v11402_v12 }
 0x2eb   :  { %v2969_v60 = vpop.f32.mrf.mxu0 }
 0x2ec   :  { %v2974_v2 = vadd.f32 %v2969_v60, %v2876_v62  ;;  %v3265_v63 = vpop.f32.mrf.mxu1  ;;  %v9918_v62 = vld [vmem:[%s16393_s6 + $0x118] sm:$0xf] }
 0x2ed   :  { %v2971_v1 = vpop.f32.mrf.mxu0  ;;  %9919 = vmatpush2.msk.msra.mxu1 %vm56_vm0, %v9918_v62  ;;  %v4589_v62 = vld [vmem:[%s16395_s8 + $0x30] sm:$0x3] }
 0x2ee   :  { %v2975_v6 = vadd.f32 %v2971_v1, %v2877_v3  ;;  %v3072_v7 = vadd.f32 %v3067_v4, %v2974_v2  ;;  %v3267_v23 = vpop.f32.mrf.mxu1  ;;  %v9917_v2 = vld [vmem:[%s16393_s6 + $0x110] sm:$0xff]  ;;  %4301 = vmatprep.subr.mxu1 %v11402_v12 }
 0x2ef   :  { %4302 = vmatpush2.msra.mxu1 %v9917_v2  ;;  %v4586_v2 = vld [vmem:[%s16395_s8 + $0x18] sm:$0xff] }
 0x2f0   :  { %v3073_v13 = vadd.f32 %v3069_v9, %v2975_v6  ;;  %4411 = vmatprep.subr.mxu1 %v11402_v12 }
 0x301   :  { %v3165_v5 = vpop.f32.mrf.mxu0 }
 0x302   :  { %v3170_v11 = vadd.f32 %v3165_v5, %v3072_v7  ;;  %v3461_v21 = vpop.f32.mrf.mxu1 }
 0x303   :  { %v3167_v10 = vpop.f32.mrf.mxu0 }
 0x304   :  { %v3171_v15 = vadd.f32 %v3167_v10, %v3073_v13  ;;  %v3270_v16 = vadd.f32 %v3265_v63, %v3170_v11  ;;  %v3463_v26 = vpop.f32.mrf.mxu1 }
 0x306   :  { %v3271_v20 = vadd.f32 %v3267_v23, %v3171_v15 }
 0x317   :  { %v3363_v14 = vpop.f32.mrf.mxu0 }
 0x318   :  { %v3368_v19 = vadd.f32 %v3363_v14, %v3270_v16  ;;  %v3657_v30 = vpop.f32.mrf.mxu1 }
 0x319   :  { %v3365_v17 = vpop.f32.mrf.mxu0 }
 0x31a   :  { %v3369_v24 = vadd.f32 %v3365_v17, %v3271_v20  ;;  %v3466_v25 = vadd.f32 %v3461_v21, %v3368_v19  ;;  %v3659_v35 = vpop.f32.mrf.mxu1  ;;  %v9958_v17 = vld [vmem:[%s16393_s6 + $0x228] sm:$0xff] }
 0x31c   :  { %v3467_v29 = vadd.f32 %v3463_v26, %v3369_v24  ;;  %v9938_v24 = vld [vmem:[%s16393_s6 + $0x198] sm:$0xff]  ;;  %v9937_v26 = vld [vmem:[%s16393_s6 + $0x190] sm:$0xff] }
 0x32d   :  { %v3559_v22 = vpop.f32.mrf.mxu0 }
 0x32e   :  { %v3564_v28 = vadd.f32 %v3559_v22, %v3466_v25  ;;  %v3854_v39 = vpop.f32.mrf.mxu1  ;;  %v9957_v22 = vld [vmem:[%s16393_s6 + $0x220] sm:$0xff] }
 0x32f   :  { %v3561_v27 = vpop.f32.mrf.mxu0 }
 0x330   :  { %v3565_v32 = vadd.f32 %v3561_v27, %v3467_v29  ;;  %v3662_v33 = vadd.f32 %v3657_v30, %v3564_v28  ;;  %v3856_v47 = vpop.f32.mrf.mxu1  ;;  %v9956_v27 = vld [vmem:[%s16393_s6 + $0x218] sm:$0xff]  ;;  %v9936_v28 = vld [vmem:[%s16393_s6 + $0x188] sm:$0xff]  ;;  %v9955_v29 = vld [vmem:[%s16393_s6 + $0x210] sm:$0xff] }
 0x331   :  { %v9935_v30 = vld [vmem:[%s16393_s6 + $0x180] sm:$0xff] }
 0x332   :  { %v3663_v38 = vadd.f32 %v3659_v35, %v3565_v32  ;;  %v9934_v32 = vld [vmem:[%s16393_s6 + $0x178] sm:$0xff] }
 0x333   :  { %v9952_v35 = vld [vmem:[%s16393_s6 + $0x1f8] sm:$0xff] }
 0x343   :  { %v3756_v31 = vpop.f32.mrf.mxu0 }
 0x344   :  { %v3761_v37 = vadd.f32 %v3756_v31, %v3662_v33  ;;  %v4050_v43 = vpop.f32.mrf.mxu1  ;;  %v9954_v31 = vld [vmem:[%s16393_s6 + $0x208] sm:$0xff]  ;;  %v9953_v33 = vld [vmem:[%s16393_s6 + $0x200] sm:$0xff] }
 0x345   :  { %v3758_v36 = vpop.f32.mrf.mxu0 }
 0x346   :  { %v3762_v44 = vadd.f32 %v3758_v36, %v3663_v38  ;;  %v3859_v46 = vadd.f32 %v3854_v39, %v3761_v37  ;;  %v4052_v58 = vpop.f32.mrf.mxu1  ;;  %v9932_v36 = vld [vmem:[%s16393_s6 + $0x168] sm:$0xff]  ;;  %v9951_v37 = vld [vmem:[%s16393_s6 + $0x1f0] sm:$0xff]  ;;  %v9931_v38 = vld [vmem:[%s16393_s6 + $0x160] sm:$0xff] }
 0x347   :  { %v9950_v39 = vld [vmem:[%s16393_s6 + $0x1e8] sm:$0xff] }
 0x348   :  { %v3860_v50 = vadd.f32 %v3856_v47, %v3762_v44  ;;  %v9949_v44 = vld [vmem:[%s16393_s6 + $0x1e0] sm:$0xff]  ;;  %v9948_v47 = vld [vmem:[%s16393_s6 + $0x1d8] sm:$0xff] }
 0x357   :  { %v3952_v41 = vpop.f32.mrf.mxu0 }
 0x358   :  { %v3957_v49 = vadd.f32 %v3952_v41, %v3859_v46  ;;  %v9930_v41 = vld [vmem:[%s16393_s6 + $0x158] sm:$0xff]  ;;  %v9929_v46 = vld [vmem:[%s16393_s6 + $0x150] sm:$0xff] }
 0x359   :  { %v3954_v48 = vpop.f32.mrf.mxu0 }
 0x35a   :  { %v3958_v54 = vadd.f32 %v3954_v48, %v3860_v50  ;;  %v4055_v42 = vadd.f32 %v4050_v43, %v3957_v49  ;;  %v9928_v48 = vld [vmem:[%s16393_s6 + $0x148] sm:$0xff]  ;;  %v9947_v49 = vld [vmem:[%s16393_s6 + $0x1d0] sm:$0xff]  ;;  %v9927_v50 = vld [vmem:[%s16393_s6 + $0x140] sm:$0xff] }
 0x35b   :  { %v9945_v43 = vld [vmem:[%s16393_s6 + $0x1c0] sm:$0xff] }
 0x35c   :  { %v4056_v60 = vadd.f32 %v4052_v58, %v3958_v54  ;;  %v9944_v54 = vld [vmem:[%s16393_s6 + $0x1b8] sm:$0xff]  ;;  %v9940_v58 = vld [vmem:[%s16393_s6 + $0x1a8] sm:$0xf] }
 0x36b   :  { %v4148_v8 = vpop.f32.mrf.mxu0 }
 0x36c   :  { %v4153_v59 = vadd.f32 %v4148_v8, %v4055_v42  ;;  %v9924_v42 = vld [vmem:[%s16393_s6 + $0x128] sm:$0xff]  ;;  %v9959_v8 = vld [vmem:[%s16393_s6 + $0x230] sm:$0xff] }
 0x36d   :  { %v4150_v1 = vpop.f32.mrf.mxu0 }
 0x36e   :  { %v4167_v3 = vadd.f32 %v4160_v45, %v4153_v59  ;;  %v4154_v4 = vadd.f32 %v4150_v1, %v4056_v60  ;;  %v9943_v45 = vld [vmem:[%s16393_s6 + $0x1b0] sm:$0xff]  ;;  %v9939_v60 = vld [vmem:[%s16393_s6 + $0x1a0] sm:$0xff] }
 0x36f   :  { %v4587_v1 = vld [vmem:[%s16395_s8 + $0x20] sm:$0xff] }
 0x370   :  { %v4171_v5 = vrot.slane %v4167_v3, 1  ;;  %v4168_v6 = vadd.f32 %v4164_v61, %v4154_v4  ;;  %v4584_v4 = vld [vmem:[%s16395_s8 + $0x8] sm:$0xff] }
 0x372   :  { %v4172_v7 = vrot.slane %v4168_v6, 1  ;;  %v4175_v9 = vmax.f32 %v4167_v3, %v4171_v5  ;;  %v4585_v3 = vld [vmem:[%s16395_s8 + $0x10] sm:$0xff]  ;;  %v4583_v5 = vld [vmem:[%s16395_s8] sm:$0xff] }
 0x374   :  { %4179 = vrot.lane.b32.xlu0 %v4175_v9, %s11406_s18  ;;  %v4176_v10 = vmax.f32 %v4168_v6, %v4172_v7  ;;  %v13957_v6 = vld [vmem:[%s16389_s2 + $0x58] sm:$0xf] }
 0x375   :  { %v13962_v7 = vld [vmem:[%s16389_s2 + $0x18] sm:$0xf] }
 0x376   :  { %4181 = vrot.lane.b32.xlu1 %v4176_v10, %s11406_s18 }
 0x3e6   :  { %v4180_v11 = vpop.permute.xlu0 %4179 }
 0x3e8   :  { %v4182_v13 = vpop.permute.xlu1 %4181 }
 0x3e9   :  { %v4184_v63 = vsel %vm4183_vm6, %v4180_v11, %v4182_v13  ;;  %v4188_v14 = vmax.f32 %v4176_v10, %v4182_v13  ;;  %v13982_v10 = vld [vmem:[%s16389_s2 + $0x8] sm:$0xff]  ;;  %v13989_v11 = vld [vmem:[%s16389_s2] sm:$0xff]  ;;  %v13995_v13 = vld [vmem:[%s16387_s0 + $0x10] sm:$0xff] }
 0x3ea   :  { %v4187_v15 = vmax.f32 %v4175_v9, %v4184_v63  ;;  %v13975_v9 = vld [vmem:[%s16389_s2 + $0x10] sm:$0xff]  ;;  %v14003_v63 = vld [vmem:[%s16387_s0 + $0x18] sm:$0x3f] }
 0x3eb   :  { %v4190_v16 = vmax.f32 %v4188_v14, 0.0  ;;  %v14010_v14 = vld [vmem:[%s16389_s2 + $0xd8] sm:$0xf] }
 0x3ec   :  { %v13771_v23 = vmax.f32 %v4187_v15, 0.0  ;;  %v14017_v15 = vld [vmem:[%s16389_s2 + $0xd0] sm:$0xff] }
 0x3ed   :  { %9922 = vmatprep.mubr.msk.f32.mxu0 %vm4233_vm7, %v4190_v16  ;;  %v4231_v19 = vrot.slane %v4190_v16, 2  ;;  %v4502_v20 = vrot.slane %v4190_v16, 6  ;;  %v4404_v25 = vrot.slane %v4190_v16, 4  ;;  %v14025_v16 = vld [vmem:[%s16389_s2 + $0xc8] sm:$0xff] }
 0x3ee   :  { %4379 = vmatmul.mubr.f32.vlgmr.msra.gmra.mxu0 %v13771_v23  ;;  %v4230_v21 = vrot.slane %v13771_v23, 2  ;;  %v4501_v59 = vrot.slane %v13771_v23, 6  ;;  %v4403_v61 = vrot.slane %v13771_v23, 4  ;;  %v14030_v23 = vld [vmem:[%s16388_s1 + $0x10] sm:$0xff] }
 0x3ef   :  { %4510 = vmatpush1.msra.mxu0 %v9958_v17  ;;  %9920 = vmatprep.mubr.msk.f32.mxu1 %vm4233_vm7, %v4231_v19  ;;  %v14035_v17 = vld [vmem:[%s16388_s1 + $0x18] sm:$0x3f]  ;;  %v14042_v19 = vld [vmem:[%s16389_s2 + $0xc0] sm:$0xff] }
 0x3f0   :  { %4511 = vmatprep.subr.mxu0 %v11402_v12  ;;  %9962 = vmatprep.mubr.msk.f32.mxu0 %vm4233_vm7, %v4502_v20  ;;  %v4960_v20 = vrot.slane %v14030_v23, 1 }
 0x3f1   :  { %4304 = vmatmul.mubr.f32.vlgmr.msra.gmra.mxu1 %v4230_v21  ;;  %4512 = vmatpush1.msra.mxu0 %v9957_v22  ;;  %v14046_v21 = vrot.slane %v14035_v17, 1 }
 0x3f2   :  { %4412 = vmatpush1.msra.mxu1 %v9938_v24  ;;  %9942 = vmatprep.mubr.msk.f32.mxu1 %vm4233_vm7, %v4404_v25  ;;  %v14057_v24 = vld [vmem:[%s16389_s2 + $0x78] sm:$0xf]  ;;  %v14069_v25 = vld [vmem:[%s16389_s2 + $0x70] sm:$0xff] }
 0x3f3   :  { %4413 = vmatprep.subr.mxu1 %v11402_v12  ;;  %4513 = vmatprep.subr.mxu0 %v11402_v12  ;;  %v14052_v22 = vsel %vm224_vm2, %v4960_v20, %v14046_v21  ;;  %v10021_v20 = vld [vmem:[%s16389_s2 + $0xe0] sm:$0xff] }
 0x3f4   :  { %4414 = vmatpush1.msra.mxu1 %v9937_v26  ;;  %4514 = vmatpush1.msra.mxu0 %v9956_v27  ;;  %v14079_v26 = vld [vmem:[%s16389_s2 + $0x68] sm:$0xff]  ;;  %v4869_v27 = vrot.slane %v13995_v13, 1 }
 0x3f5   :  { %4415 = vmatprep.subr.mxu1 %v11402_v12  ;;  %4515 = vmatprep.subr.mxu0 %v11402_v12 }
 0x3f6   :  { %4416 = vmatpush1.msra.mxu1 %v9936_v28  ;;  %4516 = vmatpush1.msra.mxu0 %v9955_v29  ;;  %v14084_v28 = vrot.slane %v14003_v63, 1  ;;  %v14090_v29 = vld [vmem:[%s16389_s2 + $0x60] sm:$0xff] }
 0x3f7   :  { %4417 = vmatprep.subr.mxu1 %v11402_v12  ;;  %4517 = vmatprep.subr.mxu0 %v11402_v12 }
 0x3f8   :  { %4418 = vmatpush1.msra.mxu1 %v9935_v30  ;;  %4518 = vmatpush1.msra.mxu0 %v9954_v31  ;;  %v14097_v30 = vld [vmem:[%s16389_s2 + $0xb8] sm:$0xf]  ;;  %v14102_v31 = vsel %vm224_vm2, %v4869_v27, %v14084_v28  ;;  %v6350_v27 = vld [vmem:[%s16390_s3 + $0x50] sm:$0xff] }
 0x3f9   :  { %4419 = vmatprep.subr.mxu1 %v11402_v12  ;;  %4519 = vmatprep.subr.mxu0 %v11402_v12 }
 0x3fa   :  { %4420 = vmatpush1.msra.mxu1 %v9934_v32  ;;  %4520 = vmatpush1.msra.mxu0 %v9953_v33  ;;  %v10016_v32 = vld [vmem:[%s16389_s2 + $0xb0] sm:$0xff]  ;;  %v10015_v33 = vld [vmem:[%s16389_s2 + $0xa8] sm:$0xff] }
 0x3fb   :  { %4421 = vmatprep.subr.mxu1 %v11402_v12  ;;  %4521 = vmatprep.subr.mxu0 %v11402_v12 }
 0x3fc   :  { %4422 = vmatpush1.msra.mxu1 %v9933_v34  ;;  %4522 = vmatpush1.msra.mxu0 %v9952_v35  ;;  %v5051_v34 = vrot.slane %v13995_v13, 2  ;;  %v14120_v35 = vrot.slane %v14003_v63, 2 }
 0x3fd   :  { %4423 = vmatprep.subr.mxu1 %v11402_v12  ;;  %4523 = vmatprep.subr.mxu0 %v11402_v12 }
 0x3fe   :  { %4424 = vmatpush1.msra.mxu1 %v9932_v36  ;;  %4524 = vmatpush1.msra.mxu0 %v9951_v37  ;;  %v10014_v36 = vld [vmem:[%s16389_s2 + $0xa0] sm:$0xff]  ;;  %v10031_v37 = vld [vmem:[%s16389_s2 + $0x138] sm:$0xf] }
 0x3ff   :  { %4425 = vmatprep.subr.mxu1 %v11402_v12  ;;  %4525 = vmatprep.subr.mxu0 %v11402_v12 }
 0x400   :  { %4426 = vmatpush1.msra.mxu1 %v9931_v38  ;;  %4526 = vmatpush1.msra.mxu0 %v9950_v39  ;;  %v14130_v38 = vsel %vm409_vm3, %v5051_v34, %v14120_v35  ;;  %v10030_v39 = vld [vmem:[%s16389_s2 + $0x130] sm:$0xff]  ;;  %v6343_v34 = vld [vmem:[%s16390_s3 + $0x18] sm:$0xff] }
 0x401   :  { %4427 = vmatprep.subr.mxu1 %v11402_v12  ;;  %4527 = vmatprep.subr.mxu0 %v11402_v12 }
 0x402   :  { %4428 = vmatpush1.msra.mxu1 %v9930_v41  ;;  %4528 = vmatpush1.msra.mxu0 %v9949_v44  ;;  %v10029_v41 = vld [vmem:[%s16389_s2 + $0x128] sm:$0xff]  ;;  %v10028_v44 = vld [vmem:[%s16389_s2 + $0x120] sm:$0xff] }
 0x403   :  { %4429 = vmatprep.subr.mxu1 %v11402_v12  ;;  %4529 = vmatprep.subr.mxu0 %v11402_v12 }
 0x404   :  { %4430 = vmatpush1.msra.mxu1 %v9929_v46  ;;  %4530 = vmatpush1.msra.mxu0 %v9948_v47  ;;  %v5858_v46 = vrot.slane %v14030_v23, 2  ;;  %v14199_v47 = vrot.slane %v14035_v17, 2 }
 0x405   :  { %4431 = vmatprep.subr.mxu1 %v11402_v12  ;;  %4531 = vmatprep.subr.mxu0 %v11402_v12 }
 0x406   :  { %4432 = vmatpush1.msra.mxu1 %v9928_v48  ;;  %4532 = vmatpush1.msra.mxu0 %v9947_v49  ;;  %v14203_v48 = vsel %vm409_vm3, %v5858_v46, %v14199_v47  ;;  %v10083_v46 = vld [vmem:[%s16390_s3 + $0x128] sm:$0xff] }
 0x407   :  { %4433 = vmatprep.subr.mxu1 %v11402_v12  ;;  %4533 = vmatprep.subr.mxu0 %v11402_v12 }
 0x408   :  { %4434 = vmatpush1.msra.mxu1 %v9927_v50  ;;  %4534 = vmatpush1.msra.mxu0 %v9946_v53 }
 0x409   :  { %4435 = vmatprep.subr.mxu1 %v11402_v12  ;;  %4535 = vmatprep.subr.mxu0 %v11402_v12 }
 0x40a   :  { %4436 = vmatpush1.msra.mxu1 %v9926_v40  ;;  %4536 = vmatpush1.msra.mxu0 %v9945_v43 }
 0x40b   :  { %4437 = vmatprep.subr.mxu1 %v11402_v12  ;;  %4537 = vmatprep.subr.mxu0 %v11402_v12 }
 0x40c   :  { %4438 = vmatpush1.msra.mxu1 %v9925_v52  ;;  %4538 = vmatpush1.msra.mxu0 %v9944_v54 }
 0x40d   :  { %4439 = vmatprep.subr.mxu1 %v11402_v12  ;;  %4539 = vmatprep.subr.mxu0 %v11402_v12 }
 0x40e   :  { %4440 = vmatpush1.msra.mxu1 %v9924_v42  ;;  %4540 = vmatpush1.msra.mxu0 %v9943_v45 }
 0x40f   :  { %4441 = vmatprep.subr.mxu1 %v11402_v12  ;;  %4569 = vmatprep.subr.mxu0 %v11402_v12 }
 0x410   :  { %4442 = vmatpush1.msra.mxu1 %v9923_v56  ;;  %9961 = vmatpush2.msk.msra.mxu0 %vm56_vm0, %v9960_v57  ;;  %v4580_v56 = vld [vmem:[%s16394_s7] sm:$0x1] }
 0x411   :  { %4471 = vmatprep.subr.mxu1 %v11402_v12  ;;  %4571 = vmatprep.subr.mxu0 %v11402_v12 }
 0x412   :  { %9941 = vmatpush2.msk.msra.mxu1 %vm56_vm0, %v9940_v58  ;;  %4572 = vmatpush2.msra.mxu0 %v9959_v8 }
 0x413   :  { %4473 = vmatprep.subr.mxu1 %v11402_v12  ;;  %4574 = vmatmul.mubr.f32.vlgmr.msra.gmra.mxu0 %v4501_v59 }
 0x414   :  { %4474 = vmatpush2.msra.mxu1 %v9939_v60  ;;  %11139 = vmatprep.subr.msk.mxu0 %vm56_vm0, %v13962_v7  ;;  %v14220_v60 = vld [vmem:[%s16389_s2 + $0x50] sm:$0xff] }
 0x415   :  { %4476 = vmatmul.mubr.f32.vlgmr.msra.gmra.mxu1 %v4403_v61  ;;  %11111 = vmatprep.subr.mxu1 %v11402_v12  ;;  %v14228_v61 = vld [vmem:[%s16389_s2 + $0x48] sm:$0xff] }
 0x416   :  { %11112 = vmatpush3.msk.msra.mxu1 %vm4595_vm8, %v4589_v62  ;;  %11125 = vmatprep.mubr.msk.f32.mxu1 %vm11407_vm9, %v11402_v12  ;;  %v14237_v62 = vld [vmem:[%s16389_s2 + $0x40] sm:$0xff] }
 0x417   :  { %11113 = vmatprep.subr.mxu1 %v11402_v12  ;;  %11140 = vmatpush3.msk.msra.mxu0 %vm56_vm0, %v13962_v7 }
 0x418   :  { %11114 = vmatpush3.msra.mxu1 %v4588_v0  ;;  %11141 = vmatprep.subr.mxu0 %v13975_v9  ;;  %v14244_v0 = vld [vmem:[%s16389_s2 + $0x98] sm:$0xf] }
 0x419   :  { %11115 = vmatprep.subr.mxu1 %v11402_v12  ;;  %11142 = vmatpush3.msra.mxu0 %v13975_v9 }
 0x41a   :  { %11116 = vmatpush3.msra.mxu1 %v4587_v1  ;;  %11143 = vmatprep.subr.mxu0 %v13982_v10  ;;  %v14251_v1 = vld [vmem:[%s16389_s2 + $0x90] sm:$0xff] }
 0x41b   :  { %11117 = vmatprep.subr.mxu1 %v11402_v12  ;;  %11144 = vmatpush3.msra.mxu0 %v13982_v10 }
 0x41c   :  { %11118 = vmatpush3.msra.mxu1 %v4586_v2  ;;  %11145 = vmatprep.subr.mxu0 %v13989_v11  ;;  %v14262_v2 = vld [vmem:[%s16389_s2 + $0x88] sm:$0xff] }
 0x41d   :  { %11119 = vmatprep.subr.mxu1 %v11402_v12  ;;  %11146 = vmatpush3.msra.mxu0 %v13989_v11 }
 0x41e   :  { %11120 = vmatpush3.msra.mxu1 %v4585_v3  ;;  %11147 = vmatprep.mubr.msk.f32.mxu0 %vm49_vm1, %v13995_v13  ;;  %v14271_v3 = vld [vmem:[%s16389_s2 + $0x80] sm:$0xff] }
 0x41f   :  { %11121 = vmatprep.subr.mxu1 %v11402_v12  ;;  %11148 = vmatmul.mubr.msk.f32.vlgmr.msra.gmra.mxu0 %vm49_vm1, %v14003_v63 }
 0x420   :  { %11122 = vmatpush3.msra.mxu1 %v4584_v4  ;;  %11161 = vmatprep.subr.msk.mxu0 %vm56_vm0, %v14010_v14  ;;  %v14278_v4 = vld [vmem:[%s16389_s2 + $0x118] sm:$0xf] }
 0x421   :  { %11123 = vmatprep.subr.mxu1 %v11402_v12  ;;  %11162 = vmatpush3.msk.msra.mxu0 %vm56_vm0, %v14010_v14 }
 0x422   :  { %11124 = vmatpush3.msra.mxu1 %v4583_v5  ;;  %11163 = vmatprep.subr.mxu0 %v14017_v15  ;;  %v14285_v5 = vld [vmem:[%s16389_s2 + $0x110] sm:$0xff] }
 0x423   :  { %11128 = vmatprep.subr.msk.mxu1 %vm56_vm0, %v13957_v6  ;;  %11164 = vmatpush3.msra.mxu0 %v14017_v15 }
 0x424   :  { %11165 = vmatprep.subr.mxu0 %v14025_v16  ;;  %11169 = vmatprep.mubr.msk.f32.mxu0 %vm49_vm1, %v14052_v22 }
 0x425   :  { %11166 = vmatpush3.msra.mxu0 %v14025_v16 }
 0x426   :  { %11167 = vmatprep.subr.mxu0 %v14042_v19 }
 0x427   :  { %11168 = vmatpush3.msra.mxu0 %v14042_v19 }
 0x428   :  { %11183 = vmatprep.subr.msk.mxu0 %vm56_vm0, %v14057_v24  ;;  %11170 = vmatmul.mubr.msk.f32.vlgmr.msra.gmra.mxu0 %vm49_vm1, %v14046_v21 }
 0x429   :  { %11184 = vmatpush3.msk.msra.mxu0 %vm56_vm0, %v14057_v24  ;;  %11191 = vmatprep.mubr.msk.f32.mxu0 %vm49_vm1, %v14030_v23 }
 0x42a   :  { %11185 = vmatprep.subr.mxu0 %v14069_v25 }
 0x42b   :  { %11186 = vmatpush3.msra.mxu0 %v14069_v25 }
 0x42c   :  { %11187 = vmatprep.subr.mxu0 %v14079_v26 }
 0x42d   :  { %11188 = vmatpush3.msra.mxu0 %v14079_v26 }
 0x42e   :  { %11189 = vmatprep.subr.mxu0 %v14090_v29 }
 0x42f   :  { %11190 = vmatpush3.msra.mxu0 %v14090_v29 }
 0x430   :  { %11205 = vmatprep.subr.msk.mxu0 %vm56_vm0, %v14097_v30  ;;  %11192 = vmatmul.mubr.msk.f32.vlgmr.msra.gmra.mxu0 %vm49_vm1, %v14035_v17 }
 0x431   :  { %11206 = vmatpush3.msk.msra.mxu0 %vm56_vm0, %v14097_v30  ;;  %11213 = vmatprep.mubr.msk.f32.mxu0 %vm49_vm1, %v14102_v31 }
 0x432   :  { %11207 = vmatprep.subr.mxu0 %v10016_v32 }
 0x433   :  { %11208 = vmatpush3.msra.mxu0 %v10016_v32 }
 0x434   :  { %11209 = vmatprep.subr.mxu0 %v10015_v33 }
 0x435   :  { %11210 = vmatpush3.msra.mxu0 %v10015_v33 }
 0x436   :  { %11211 = vmatprep.subr.mxu0 %v10014_v36 }
 0x437   :  { %11212 = vmatpush3.msra.mxu0 %v10014_v36 }
 0x438   :  { %11227 = vmatprep.subr.msk.mxu0 %vm56_vm0, %v10031_v37  ;;  %11214 = vmatmul.mubr.msk.f32.vlgmr.msra.gmra.mxu0 %vm49_vm1, %v14084_v28 }
 0x439   :  { %11228 = vmatpush3.msk.msra.mxu0 %vm56_vm0, %v10031_v37  ;;  %11235 = vmatprep.mubr.msk.f32.mxu0 %vm49_vm1, %v14130_v38 }
 0x43a   :  { %11229 = vmatprep.subr.mxu0 %v10030_v39 }
 0x43b   :  { %11230 = vmatpush3.msra.mxu0 %v10030_v39 }
 0x43c   :  { %11231 = vmatprep.subr.mxu0 %v10029_v41 }
 0x43d   :  { %11232 = vmatpush3.msra.mxu0 %v10029_v41 }
 0x43e   :  { %11233 = vmatprep.subr.mxu0 %v10028_v44 }
 0x43f   :  { %11234 = vmatpush3.msra.mxu0 %v10028_v44 }
 0x440   :  { %11249 = vmatprep.subr.msk.mxu0 %vm56_vm0, %v13962_v7  ;;  %11236 = vmatmul.mubr.msk.f32.vlgmr.msra.gmra.mxu0 %vm49_vm1, %v14120_v35 }
 0x441   :  { %11250 = vmatpush3.msk.msra.mxu0 %vm56_vm0, %v13962_v7  ;;  %11257 = vmatprep.mubr.msk.f32.mxu0 %vm49_vm1, %v14030_v23  ;;  %v14296_v7 = vld [vmem:[%s16389_s2 + $0x108] sm:$0xff] }
 0x442   :  { %11251 = vmatprep.subr.mxu0 %v13975_v9 }
 0x443   :  { %11252 = vmatpush3.msra.mxu0 %v13975_v9  ;;  %v9993_v9 = vld [vmem:[%s16389_s2 + $0x100] sm:$0xff] }
 0x444   :  { %11253 = vmatprep.subr.mxu0 %v13982_v10 }
 0x445   :  { %11254 = vmatpush3.msra.mxu0 %v13982_v10  ;;  %v10003_v10 = vld [vmem:[%s16389_s2 + $0x38] sm:$0xf] }
 0x446   :  { %11255 = vmatprep.subr.mxu0 %v13989_v11 }
 0x447   :  { %11256 = vmatpush3.msra.mxu0 %v13989_v11  ;;  %v10002_v11 = vld [vmem:[%s16389_s2 + $0x30] sm:$0xff] }
 0x448   :  { %11258 = vmatmul.mubr.msk.f32.vlgmr.msra.gmra.mxu0 %vm49_vm1, %v14035_v17  ;;  %11271 = vmatprep.subr.msk.mxu0 %vm56_vm0, %v14010_v14 }
 0x449   :  { %11272 = vmatpush3.msk.msra.mxu0 %vm56_vm0, %v14010_v14  ;;  %11279 = vmatprep.mubr.msk.f32.mxu0 %vm49_vm1, %v14130_v38  ;;  %v10001_v14 = vld [vmem:[%s16389_s2 + $0x28] sm:$0xff] }
 0x44a   :  { %11273 = vmatprep.subr.mxu0 %v14017_v15 }
 0x44b   :  { %11274 = vmatpush3.msra.mxu0 %v14017_v15  ;;  %v10000_v15 = vld [vmem:[%s16389_s2 + $0x20] sm:$0xff] }
 0x44c   :  { %11275 = vmatprep.subr.mxu0 %v14025_v16 }
 0x44d   :  { %11276 = vmatpush3.msra.mxu0 %v14025_v16  ;;  %v10024_v16 = vld [vmem:[%s16389_s2 + $0xf8] sm:$0xf] }
 0x44e   :  { %11277 = vmatprep.subr.mxu0 %v14042_v19 }
 0x44f   :  { %11278 = vmatpush3.msra.mxu0 %v14042_v19  ;;  %v10023_v19 = vld [vmem:[%s16389_s2 + $0xf0] sm:$0xff] }
 0x450   :  { %11293 = vmatprep.subr.msk.mxu0 %vm56_vm0, %v14057_v24  ;;  %11280 = vmatmul.mubr.msk.f32.vlgmr.msra.gmra.mxu0 %vm49_vm1, %v14120_v35 }
 0x451   :  { %11294 = vmatpush3.msk.msra.mxu0 %vm56_vm0, %v14057_v24  ;;  %11301 = vmatprep.mubr.msk.f32.mxu0 %vm49_vm1, %v14102_v31  ;;  %v6353_v24 = vld [vmem:[%s16390_s3 + $0x68] sm:$0xff] }
 0x452   :  { %11295 = vmatprep.subr.mxu0 %v14069_v25 }
 0x453   :  { %11296 = vmatpush3.msra.mxu0 %v14069_v25  ;;  %v6352_v25 = vld [vmem:[%s16390_s3 + $0x60] sm:$0xff] }
 0x454   :  { %11297 = vmatprep.subr.mxu0 %v14079_v26 }
 0x455   :  { %11298 = vmatpush3.msra.mxu0 %v14079_v26  ;;  %v6351_v26 = vld [vmem:[%s16390_s3 + $0x58] sm:$0xff] }
 0x456   :  { %11299 = vmatprep.subr.mxu0 %v14090_v29 }
 0x457   :  { %11300 = vmatpush3.msra.mxu0 %v14090_v29  ;;  %v6348_v29 = vld [vmem:[%s16390_s3 + $0x40] sm:$0xff] }
 0x458   :  { %11315 = vmatprep.subr.msk.mxu0 %vm56_vm0, %v14097_v30  ;;  %11302 = vmatmul.mubr.msk.f32.vlgmr.msra.gmra.mxu0 %vm49_vm1, %v14084_v28 }
 0x459   :  { %11316 = vmatpush3.msk.msra.mxu0 %vm56_vm0, %v14097_v30  ;;  %11323 = vmatprep.mubr.msk.f32.mxu0 %vm49_vm1, %v14052_v22  ;;  %v6347_v30 = vld [vmem:[%s16390_s3 + $0x38] sm:$0xff] }
 0x45a   :  { %11317 = vmatprep.subr.mxu0 %v10016_v32 }
 0x45b   :  { %11318 = vmatpush3.msra.mxu0 %v10016_v32  ;;  %v6345_v32 = vld [vmem:[%s16390_s3 + $0x28] sm:$0xff] }
 0x45c   :  { %11319 = vmatprep.subr.mxu0 %v10015_v33 }
 0x45d   :  { %11320 = vmatpush3.msra.mxu0 %v10015_v33  ;;  %v6344_v33 = vld [vmem:[%s16390_s3 + $0x20] sm:$0xff] }
 0x45e   :  { %11321 = vmatprep.subr.mxu0 %v10014_v36 }
 0x45f   :  { %11322 = vmatpush3.msra.mxu0 %v10014_v36  ;;  %v6341_v36 = vld [vmem:[%s16390_s3 + $0x8] sm:$0xff] }
 0x460   :  { %11337 = vmatprep.subr.msk.mxu0 %vm56_vm0, %v10031_v37  ;;  %11324 = vmatmul.mubr.msk.f32.vlgmr.msra.gmra.mxu0 %vm49_vm1, %v14046_v21 }
 0x461   :  { %11338 = vmatpush3.msk.msra.mxu0 %vm56_vm0, %v10031_v37  ;;  %11345 = vmatprep.mubr.msk.f32.mxu0 %vm49_vm1, %v14203_v48  ;;  %v6340_v37 = vld [vmem:[%s16390_s3] sm:$0xff] }
 0x462   :  { %11339 = vmatprep.subr.mxu0 %v10030_v39 }
 0x463   :  { %11340 = vmatpush3.msra.mxu0 %v10030_v39 }
 0x464   :  { %11341 = vmatprep.subr.mxu0 %v10029_v41 }
 0x465   :  { %11342 = vmatpush3.msra.mxu0 %v10029_v41  ;;  %v10085_v41 = vld [vmem:[%s16390_s3 + $0x138] sm:$0xff] }
 0x466   :  { %11343 = vmatprep.subr.mxu0 %v10028_v44 }
 0x467   :  { %11344 = vmatpush3.msra.mxu0 %v10028_v44  ;;  %v10084_v44 = vld [vmem:[%s16390_s3 + $0x130] sm:$0xff] }
 0x468   :  { %11346 = vmatmul.mubr.msk.f32.vlgmr.msra.gmra.mxu0 %vm49_vm1, %v14199_v47 }
 0x469   :  { %6522 = vmatprep.mubr.f32.mxu0 %v11402_v12 }
 0x4ae   :  { %v4380_v49 = vpop.f32.mrf.mxu0 }
 0x4b0   :  { %v4382_v50 = vpop.f32.mrf.mxu0 }
 0x4b1   :  { %v4305_v53 = vpop.f32.mrf.mxu1  ;;  %v10080_v50 = vld [vmem:[%s16390_s3 + $0x110] sm:$0xff] }
 0x4b2   :  { %v4381_v52 = vadd.f32 %v4380_v49, %v4305_v53  ;;  %v10081_v49 = vld [vmem:[%s16390_s3 + $0x118] sm:$0xff]  ;;  %v10079_v53 = vld [vmem:[%s16390_s3 + $0x108] sm:$0xff] }
 0x4b3   :  { %v4307_v40 = vpop.f32.mrf.mxu1 }
 0x4b4   :  { %v10078_v40 = vld [vmem:[%s16390_s3 + $0x100] sm:$0xff] }
 0x4d3   :  { %v4575_v43 = vpop.f32.mrf.mxu0 }
 0x4d5   :  { %v4477_v54 = vpop.f32.mrf.mxu1  ;;  %v4577_v42 = vpop.f32.mrf.mxu0 }
 0x4d6   :  { %v4481_v45 = vadd.f32 %v4477_v54, %v4381_v52  ;;  %v10076_v52 = vld [vmem:[%s16390_s3 + $0xf0] sm:$0xff]  ;;  %v10075_v54 = vld [vmem:[%s16390_s3 + $0xe8] sm:$0xff]  ;;  %v10074_v42 = vld [vmem:[%s16390_s3 + $0xe0] sm:$0xff] }
 0x4d7   :  { %v4479_v57 = vpop.f32.mrf.mxu1 }
 0x4d8   :  { %v4579_v58 = vadd.f32 %v4575_v43, %v4481_v45  ;;  %v10077_v43 = vld [vmem:[%s16390_s3 + $0xf8] sm:$0xff]  ;;  %v10071_v57 = vld [vmem:[%s16390_s3 + $0xc8] sm:$0xff] }
 0x4d9   :  { %v10073_v45 = vld [vmem:[%s16390_s3 + $0xd8] sm:$0xff] }
 0x4da   :  { %v4581_v8 = vadd.f32 %v4580_v56, %v4579_v58  ;;  %v10072_v56 = vld [vmem:[%s16390_s3 + $0xd0] sm:$0xff]  ;;  %v10070_v58 = vld [vmem:[%s16390_s3 + $0xc0] sm:$0xff] }
 0x4dc   :  { %v4582_v59 = vmax.f32 %v4581_v8, 0.0  ;;  %v10069_v8 = vld [vmem:[%s16390_s3 + $0xb8] sm:$0xff] }
 0x4de   :  { %11126 = vmatmul.mubr.msk.f32.vlgmr.msra.gmra.mxu1 %vm4591_vm10, %v4582_v59  ;;  %v10068_v59 = vld [vmem:[%s16390_s3 + $0xb0] sm:$0xff] }
 0x4df   :  { %11129 = vmatpush3.msk.msra.mxu1 %vm56_vm0, %v13957_v6  ;;  %11136 = vmatprep.mubr.msk.f32.mxu1 %vm49_vm1, %v14030_v23 }
 0x4e0   :  { %11130 = vmatprep.subr.mxu1 %v14220_v60 }
 0x4e1   :  { %11131 = vmatpush3.msra.mxu1 %v14220_v60 }
 0x4e2   :  { %11132 = vmatprep.subr.mxu1 %v14228_v61 }
 0x4e3   :  { %11133 = vmatpush3.msra.mxu1 %v14228_v61 }
 0x4e4   :  { %11134 = vmatprep.subr.mxu1 %v14237_v62 }
 0x4e5   :  { %11135 = vmatpush3.msra.mxu1 %v14237_v62 }
 0x4e6   :  { %11137 = vmatmul.mubr.msk.f32.vlgmr.msra.gmra.mxu1 %vm49_vm1, %v14035_v17  ;;  %11150 = vmatprep.subr.msk.mxu1 %vm56_vm0, %v14244_v0 }
 0x4e7   :  { %11151 = vmatpush3.msk.msra.mxu1 %vm56_vm0, %v14244_v0  ;;  %11158 = vmatprep.mubr.msk.f32.mxu1 %vm49_vm1, %v14102_v31 }
 0x4e8   :  { %11152 = vmatprep.subr.mxu1 %v14251_v1 }
 0x4e9   :  { %11153 = vmatpush3.msra.mxu1 %v14251_v1 }
 0x4ea   :  { %11154 = vmatprep.subr.mxu1 %v14262_v2 }
 0x4eb   :  { %11155 = vmatpush3.msra.mxu1 %v14262_v2 }
 0x4ec   :  { %11156 = vmatprep.subr.mxu1 %v14271_v3 }
 0x4ed   :  { %11157 = vmatpush3.msra.mxu1 %v14271_v3 }
 0x4ee   :  { %11159 = vmatmul.mubr.msk.f32.vlgmr.msra.gmra.mxu1 %vm49_vm1, %v14084_v28  ;;  %11172 = vmatprep.subr.msk.mxu1 %vm56_vm0, %v14278_v4 }
 0x4ef   :  { %11173 = vmatpush3.msk.msra.mxu1 %vm56_vm0, %v14278_v4  ;;  %11180 = vmatprep.mubr.msk.f32.mxu1 %vm49_vm1, %v14130_v38 }
 0x4f0   :  { %11174 = vmatprep.subr.mxu1 %v14285_v5 }
 0x4f1   :  { %11175 = vmatpush3.msra.mxu1 %v14285_v5 }
 0x4f2   :  { %11176 = vmatprep.subr.mxu1 %v14296_v7 }
 0x4f3   :  { %11177 = vmatpush3.msra.mxu1 %v14296_v7 }
 0x4f4   :  { %11178 = vmatprep.subr.mxu1 %v9993_v9 }
 0x4f5   :  { %11179 = vmatpush3.msra.mxu1 %v9993_v9 }
 0x4f6   :  { %11181 = vmatmul.mubr.msk.f32.vlgmr.msra.gmra.mxu1 %vm49_vm1, %v14120_v35  ;;  %11194 = vmatprep.subr.msk.mxu1 %vm56_vm0, %v10003_v10 }
 0x4f7   :  { %11195 = vmatpush3.msk.msra.mxu1 %vm56_vm0, %v10003_v10  ;;  %11202 = vmatprep.mubr.msk.f32.mxu1 %vm49_vm1, %v13995_v13  ;;  %v10022_v13 = vld [vmem:[%s16389_s2 + $0xe8] sm:$0xff] }
 0x4f8   :  { %11196 = vmatprep.subr.mxu1 %v10002_v11 }
 0x4f9   :  { %11197 = vmatpush3.msra.mxu1 %v10002_v11 }
 0x4fa   :  { %11198 = vmatprep.subr.mxu1 %v10001_v14 }
 0x4fb   :  { %11199 = vmatpush3.msra.mxu1 %v10001_v14 }
 0x4fc   :  { %11200 = vmatprep.subr.mxu1 %v10000_v15 }
 0x4fd   :  { %11201 = vmatpush3.msra.mxu1 %v10000_v15 }
 0x4fe   :  { %11203 = vmatmul.mubr.msk.f32.vlgmr.msra.gmra.mxu1 %vm49_vm1, %v14003_v63  ;;  %11216 = vmatprep.subr.msk.mxu1 %vm56_vm0, %v10024_v16  ;;  %v6358_v63 = vld [vmem:[%s16390_s3 + $0x90] sm:$0xff] }
 0x4ff   :  { %11217 = vmatpush3.msk.msra.mxu1 %vm56_vm0, %v10024_v16  ;;  %11224 = vmatprep.mubr.msk.f32.mxu1 %vm49_vm1, %v14052_v22 }
 0x500   :  { %11218 = vmatprep.subr.mxu1 %v10023_v19 }
 0x501   :  { %11219 = vmatpush3.msra.mxu1 %v10023_v19 }
 0x502   :  { %11220 = vmatprep.subr.mxu1 %v10022_v13 }
 0x503   :  { %11221 = vmatpush3.msra.mxu1 %v10022_v13 }
 0x504   :  { %11222 = vmatprep.subr.mxu1 %v10021_v20 }
 0x505   :  { %11223 = vmatpush3.msra.mxu1 %v10021_v20 }
 0x506   :  { %11225 = vmatmul.mubr.msk.f32.vlgmr.msra.gmra.mxu1 %vm49_vm1, %v14046_v21  ;;  %11238 = vmatprep.subr.msk.mxu1 %vm56_vm0, %v13957_v6 }
 0x507   :  { %11239 = vmatpush3.msk.msra.mxu1 %vm56_vm0, %v13957_v6  ;;  %11246 = vmatprep.mubr.msk.f32.mxu1 %vm49_vm1, %v14102_v31  ;;  %v6359_v6 = vld [vmem:[%s16390_s3 + $0x98] sm:$0xff]  ;;  %v6346_v31 = vld [vmem:[%s16390_s3 + $0x30] sm:$0xff] }
 0x508   :  { %11240 = vmatprep.subr.mxu1 %v14220_v60  ;;  %6470 = vmatprep.subr.mxu0 %v6359_v6 }
 0x509   :  { %11241 = vmatpush3.msra.mxu1 %v14220_v60  ;;  %6471 = vmatpush1.msra.mxu0 %v6358_v63  ;;  %v10067_v60 = vld [vmem:[%s16390_s3 + $0xa8] sm:$0xff] }
 0x50a   :  { %11242 = vmatprep.subr.mxu1 %v14228_v61 }
 0x50b   :  { %11243 = vmatpush3.msra.mxu1 %v14228_v61  ;;  %v10066_v61 = vld [vmem:[%s16390_s3 + $0xa0] sm:$0xff] }
 0x50c   :  { %11244 = vmatprep.subr.mxu1 %v14237_v62 }
 0x50d   :  { %11245 = vmatpush3.msra.mxu1 %v14237_v62  ;;  %v10107_v62 = vld [vmem:[%s16390_s3 + $0x1d8] sm:$0xff] }
 0x50e   :  { %11247 = vmatmul.mubr.msk.f32.vlgmr.msra.gmra.mxu1 %vm49_vm1, %v14084_v28  ;;  %11260 = vmatprep.subr.msk.mxu1 %vm56_vm0, %v14244_v0  ;;  %v6349_v28 = vld [vmem:[%s16390_s3 + $0x48] sm:$0xff] }
 0x50f   :  { %11261 = vmatpush3.msk.msra.mxu1 %vm56_vm0, %v14244_v0  ;;  %11268 = vmatprep.mubr.msk.f32.mxu1 %vm49_vm1, %v14052_v22  ;;  %v6354_v22 = vld [vmem:[%s16390_s3 + $0x70] sm:$0xff] }
 0x510   :  { %11262 = vmatprep.subr.mxu1 %v14251_v1 }
 0x511   :  { %11263 = vmatpush3.msra.mxu1 %v14251_v1  ;;  %v11149_v1 = vpop.f32.mrf.mxu0 }
 0x512   :  { %11264 = vmatprep.subr.mxu1 %v14262_v2 }
 0x513   :  { %11265 = vmatpush3.msra.mxu1 %v14262_v2 }
 0x514   :  { %11266 = vmatprep.subr.mxu1 %v14271_v3 }
 0x515   :  { %11267 = vmatpush3.msra.mxu1 %v14271_v3  ;;  %v4856_v3 = vpop.f32.mrf.mxu0 }
 0x516   :  { %11269 = vmatmul.mubr.msk.f32.vlgmr.msra.gmra.mxu1 %vm49_vm1, %v14046_v21  ;;  %11282 = vmatprep.subr.msk.mxu1 %vm56_vm0, %v14278_v4  ;;  %v6355_v21 = vld [vmem:[%s16390_s3 + $0x78] sm:$0xff] }
 0x517   :  { %11283 = vmatpush3.msk.msra.mxu1 %vm56_vm0, %v14278_v4  ;;  %11290 = vmatprep.mubr.msk.f32.mxu1 %vm49_vm1, %v14203_v48  ;;  %v10128_v48 = vld [vmem:[%s16390_s3 + $0x278] sm:$0xff] }
 0x518   :  { %11284 = vmatprep.subr.mxu1 %v14285_v5 }
 0x519   :  { %11285 = vmatpush3.msra.mxu1 %v14285_v5  ;;  %v11171_v5 = vpop.f32.mrf.mxu0 }
 0x51a   :  { %11286 = vmatprep.subr.mxu1 %v14296_v7 }
 0x51b   :  { %11287 = vmatpush3.msra.mxu1 %v14296_v7 }
 0x51c   :  { %11288 = vmatprep.subr.mxu1 %v9993_v9 }
 0x51d   :  { %11289 = vmatpush3.msra.mxu1 %v9993_v9  ;;  %v5036_v9 = vpop.f32.mrf.mxu0 }
 0x51e   :  { %11291 = vmatmul.mubr.msk.f32.vlgmr.msra.gmra.mxu1 %vm49_vm1, %v14199_v47  ;;  %11304 = vmatprep.subr.msk.mxu1 %vm56_vm0, %v10003_v10  ;;  %v10082_v47 = vld [vmem:[%s16390_s3 + $0x120] sm:$0xff] }
 0x51f   :  { %11305 = vmatpush3.msk.msra.mxu1 %vm56_vm0, %v10003_v10  ;;  %11312 = vmatprep.mubr.msk.f32.mxu1 %vm49_vm1, %v14030_v23  ;;  %v6357_v23 = vld [vmem:[%s16390_s3 + $0x88] sm:$0xff] }
 0x520   :  { %11306 = vmatprep.subr.mxu1 %v10002_v11  ;;  %6472 = vmatprep.subr.mxu0 %v6357_v23 }
 0x521   :  { %11307 = vmatpush3.msra.mxu1 %v10002_v11  ;;  %v11193_v11 = vpop.f32.mrf.mxu0 }
 0x522   :  { %11308 = vmatprep.subr.mxu1 %v10001_v14 }
 0x523   :  { %11309 = vmatpush3.msra.mxu1 %v10001_v14 }
 0x524   :  { %11310 = vmatprep.subr.mxu1 %v10000_v15 }
 0x525   :  { %11311 = vmatpush3.msra.mxu1 %v10000_v15  ;;  %v5215_v15 = vpop.f32.mrf.mxu0 }
 0x526   :  { %11313 = vmatmul.mubr.msk.f32.vlgmr.msra.gmra.mxu1 %vm49_vm1, %v14035_v17  ;;  %11326 = vmatprep.subr.msk.mxu1 %vm56_vm0, %v10024_v16  ;;  %v6356_v17 = vld [vmem:[%s16390_s3 + $0x80] sm:$0xff] }
 0x527   :  { %11327 = vmatpush3.msk.msra.mxu1 %vm56_vm0, %v10024_v16  ;;  %11334 = vmatprep.mubr.msk.f32.mxu1 %vm49_vm1, %v14130_v38 }
 0x528   :  { %11328 = vmatprep.subr.mxu1 %v10023_v19  ;;  %6473 = vmatpush1.msra.mxu0 %v6356_v17 }
 0x529   :  { %11329 = vmatpush3.msra.mxu1 %v10023_v19  ;;  %6474 = vmatprep.subr.mxu0 %v6355_v21  ;;  %v11215_v19 = vpop.f32.mrf.mxu0 }
 0x52a   :  { %11330 = vmatprep.subr.mxu1 %v10022_v13  ;;  %6475 = vmatpush1.msra.mxu0 %v6354_v22 }
 0x52b   :  { %11331 = vmatpush3.msra.mxu1 %v10022_v13  ;;  %6476 = vmatprep.subr.mxu0 %v6353_v24 }
 0x52c   :  { %11332 = vmatprep.subr.mxu1 %v10021_v20  ;;  %6477 = vmatpush1.msra.mxu0 %v6352_v25 }
 0x52d   :  { %11333 = vmatpush3.msra.mxu1 %v10021_v20  ;;  %6478 = vmatprep.subr.mxu0 %v6351_v26  ;;  %v5375_v20 = vpop.f32.mrf.mxu0 }
 0x52e   :  { %11335 = vmatmul.mubr.msk.f32.vlgmr.msra.gmra.mxu1 %vm49_vm1, %v14120_v35  ;;  %6479 = vmatpush1.msra.mxu0 %v6350_v27  ;;  %v6342_v35 = vld [vmem:[%s16390_s3 + $0x10] sm:$0xff] }
 0x52f   :  { %6449 = vmatprep.mubr.f32.mxu1 %v11402_v12  ;;  %6480 = vmatprep.subr.mxu0 %v6349_v28  ;;  %v11237_v63 = vpop.f32.mrf.mxu0 }
 0x530   :  { %6481 = vmatpush1.msra.mxu0 %v6348_v29  ;;  %6397 = vmatprep.subr.mxu1 %v10085_v41 }
 0x531   :  { %6482 = vmatprep.subr.mxu0 %v6347_v30  ;;  %6398 = vmatpush1.msra.mxu1 %v10084_v44  ;;  %v5543_v17 = vpop.f32.mrf.mxu0 }
 0x532   :  { %6483 = vmatpush1.msra.mxu0 %v6346_v31  ;;  %6399 = vmatprep.subr.mxu1 %v10083_v46 }
 0x533   :  { %6484 = vmatprep.subr.mxu0 %v6345_v32  ;;  %6400 = vmatpush1.msra.mxu1 %v10082_v47  ;;  %v11259_v22 = vpop.f32.mrf.mxu0 }
 0x534   :  { %6485 = vmatpush1.msra.mxu0 %v6344_v33  ;;  %6401 = vmatprep.subr.mxu1 %v10081_v49 }
 0x535   :  { %6486 = vmatprep.subr.mxu0 %v6343_v34  ;;  %6402 = vmatpush1.msra.mxu1 %v10080_v50  ;;  %v5695_v25 = vpop.f32.mrf.mxu0 }
 0x536   :  { %6487 = vmatpush1.msra.mxu0 %v6342_v35  ;;  %6403 = vmatprep.subr.mxu1 %v10079_v53 }
 0x537   :  { %6488 = vmatprep.subr.mxu0 %v6341_v36  ;;  %6404 = vmatpush1.msra.mxu1 %v10078_v40  ;;  %v11281_v27 = vpop.f32.mrf.mxu0 }
 0x538   :  { %6489 = vmatpush1.msra.mxu0 %v6340_v37  ;;  %6405 = vmatprep.subr.mxu1 %v10077_v43 }
 0x539   :  { %6662 = vmatprep.subr.mxu0 %v10128_v48  ;;  %6406 = vmatpush1.msra.mxu1 %v10076_v52  ;;  %v5847_v29 = vpop.f32.mrf.mxu0 }
 0x53a   :  { %6407 = vmatprep.subr.mxu1 %v10075_v54 }
 0x53b   :  { %6408 = vmatpush1.msra.mxu1 %v10074_v42  ;;  %v11303_v31 = vpop.f32.mrf.mxu0 }
 0x53c   :  { %6409 = vmatprep.subr.mxu1 %v10073_v45 }
 0x53d   :  { %6410 = vmatpush1.msra.mxu1 %v10072_v56  ;;  %v6008_v35 = vpop.f32.mrf.mxu0 }
 0x53e   :  { %6411 = vmatprep.subr.mxu1 %v10071_v57 }
 0x53f   :  { %6412 = vmatpush1.msra.mxu1 %v10070_v58  ;;  %v11325_v37 = vpop.f32.mrf.mxu0 }
 0x540   :  { %6413 = vmatprep.subr.mxu1 %v10069_v8 }
 0x541   :  { %6414 = vmatpush1.msra.mxu1 %v10068_v59  ;;  %v6158_v45 = vpop.f32.mrf.mxu0 }
 0x542   :  { %6415 = vmatprep.subr.mxu1 %v10067_v60 }
 0x543   :  { %6416 = vmatpush1.msra.mxu1 %v10066_v61  ;;  %v11347_v8 = vpop.f32.mrf.mxu0 }
 0x544   :  { %6565 = vmatprep.subr.mxu1 %v10107_v62 }
 0x59e   :  { %v14458_v38 = vpop.f32.mrf.mxu1 }
 0x5a0   :  { %v11127_v39 = vpop.f32.mrf.mxu1 }
 0x5a6   :  { %v11138_v0 = vpop.f32.mrf.mxu1 }
 0x5a7   :  { %v4862_v46 = vadd.f32 %v11149_v1, %v11138_v0 }
 0x5a8   :  { %v4772_v2 = vpop.f32.mrf.mxu1 }
 0x5a9   :  { %v4857_v47 = vadd.f32 %v4856_v3, %v4772_v2 }
 0x5ae   :  { %v11160_v4 = vpop.f32.mrf.mxu1 }
 0x5af   :  { %v4955_v43 = vadd.f32 %v11160_v4, %v4862_v46 }
 0x5b0   :  { %v4945_v7 = vpop.f32.mrf.mxu1 }
 0x5b1   :  { %v4954_v52 = vadd.f32 %v4945_v7, %v4857_v47  ;;  %v5046_v62 = vadd.f32 %v11171_v5, %v4955_v43  ;;  %v10065_v5 = vld [vmem:[%s16391_s4] ss:$0 sm:$0xff]  ;;  %v10116_v47 = vld [vmem:[%s16390_s3 + $0x218] sm:$0xff] }
 0x5b2   :  { %v10112_v43 = vld [vmem:[%s16390_s3 + $0x1f8] sm:$0xff] }
 0x5b3   :  { %v5045_v0 = vadd.f32 %v5036_v9, %v4954_v52  ;;  %v10111_v52 = vld [vmem:[%s16390_s3 + $0x1f0] sm:$0xff] }
 0x5b6   :  { %v11182_v10 = vpop.f32.mrf.mxu1 }
 0x5b7   :  { %v5137_v7 = vadd.f32 %v11182_v10, %v5046_v62  ;;  %v10127_v10 = vld [vmem:[%s16390_s3 + $0x270] sm:$0xff]  ;;  %v10105_v62 = vld [vmem:[%s16390_s3 + $0x1c8] sm:$0xff] }
 0x5b8   :  { %v5127_v14 = vpop.f32.mrf.mxu1 }
 0x5be   :  { %v11204_v16 = vpop.f32.mrf.mxu1 }
 0x5bf   :  { %v5299_v33 = vadd.f32 %v11204_v16, %v11193_v11 }
 0x5c0   :  { %v5293_v13 = vpop.f32.mrf.mxu1 }
 0x5c1   :  { %v5294_v34 = vadd.f32 %v5293_v13, %v5215_v15  ;;  %v5385_v48 = vadd.f32 %v11215_v19, %v5299_v33  ;;  %v6312_v19 = vpop.f32.mrf.mxu0  ;;  %v5136_v13 = vadd.f32 %v5127_v14, %v5045_v0  ;;  %v10126_v14 = vld [vmem:[%s16390_s3 + $0x268] sm:$0xff]  ;;  %v10104_v0 = vld [vmem:[%s16390_s3 + $0x1c0] sm:$0xff] }
 0x5c2   :  { %v10122_v33 = vld [vmem:[%s16390_s3 + $0x248] sm:$0xff] }
 0x5c3   :  { %v5384_v49 = vadd.f32 %v5375_v20, %v5294_v34 }
 0x5c6   :  { %v11226_v6 = vpop.f32.mrf.mxu1 }
 0x5c7   :  { %v5469_v54 = vadd.f32 %v11226_v6, %v5385_v48 }
 0x5c8   :  { %v5459_v23 = vpop.f32.mrf.mxu1 }
 0x5c9   :  { %v5468_v42 = vadd.f32 %v5459_v23, %v5384_v49  ;;  %v5553_v1 = vadd.f32 %v11237_v63, %v5469_v54  ;;  %v10115_v49 = vld [vmem:[%s16390_s3 + $0x210] sm:$0xff] }
 0x5cb   :  { %v5552_v2 = vadd.f32 %v5543_v17, %v5468_v42  ;;  %v10110_v42 = vld [vmem:[%s16390_s3 + $0x1e8] sm:$0xff] }
 0x5ce   :  { %v11248_v21 = vpop.f32.mrf.mxu1 }
 0x5cf   :  { %v5701_v41 = vadd.f32 %v11259_v22, %v11248_v21  ;;  %v6324_v21 = vmax.f32 %v5137_v7, %v5553_v1  ;;  %v6323_v22 = vmax.f32 %v5136_v13, %v5552_v2  ;;  %v10103_v1 = vld [vmem:[%s16390_s3 + $0x1b8] sm:$0xff]  ;;  %v10102_v2 = vld [vmem:[%s16390_s3 + $0x1b0] sm:$0xff]  ;;  %v10167_v7 = vld [vmem:[%s16390_s3 + $0x3a0] sm:$0xff] }
 0x5d0   :  { %v5620_v24 = vpop.f32.mrf.mxu1  ;;  %v10166_v13 = vld [vmem:[%s16390_s3 + $0x398] sm:$0xff] }
 0x5d1   :  { %v5696_v50 = vadd.f32 %v5695_v25, %v5620_v24 }
 0x5d6   :  { %v11270_v26 = vpop.f32.mrf.mxu1 }
 0x5d7   :  { %v5780_v53 = vadd.f32 %v11270_v26, %v5701_v41  ;;  %v10118_v41 = vld [vmem:[%s16390_s3 + $0x228] sm:$0xff] }
 0x5d8   :  { %v5770_v28 = vpop.f32.mrf.mxu1 }
 0x5d9   :  { %v5779_v56 = vadd.f32 %v5770_v28, %v5696_v50  ;;  %v5857_v59 = vadd.f32 %v11281_v27, %v5780_v53  ;;  %v10125_v28 = vld [vmem:[%s16390_s3 + $0x260] sm:$0xff]  ;;  %v10114_v50 = vld [vmem:[%s16390_s3 + $0x208] sm:$0xff] }
 0x5da   :  { %v10113_v53 = vld [vmem:[%s16390_s3 + $0x200] sm:$0xff] }
 0x5db   :  { %v5856_v11 = vadd.f32 %v5847_v29, %v5779_v56  ;;  %v10109_v56 = vld [vmem:[%s16390_s3 + $0x1e0] sm:$0xff] }
 0x5de   :  { %v11292_v30 = vpop.f32.mrf.mxu1 }
 0x5df   :  { %v5941_v15 = vadd.f32 %v11292_v30, %v5857_v59  ;;  %v10124_v30 = vld [vmem:[%s16390_s3 + $0x258] sm:$0xff] }
 0x5e0   :  { %v5931_v32 = vpop.f32.mrf.mxu1 }
 0x5e1   :  { %v5940_v20 = vadd.f32 %v5931_v32, %v5856_v11 }
 0x5e6   :  { %v11314_v36 = vpop.f32.mrf.mxu1 }
 0x5e7   :  { %v6089_v44 = vadd.f32 %v11314_v36, %v11303_v31  ;;  %v10123_v31 = vld [vmem:[%s16390_s3 + $0x250] sm:$0xff]  ;;  %v10120_v36 = vld [vmem:[%s16390_s3 + $0x238] sm:$0xff] }
 0x5e8   :  { %v6083_v39 = vpop.f32.mrf.mxu1 }
 0x5e9   :  { %v6084_v40 = vadd.f32 %v6083_v39, %v6008_v35  ;;  %v6168_v57 = vadd.f32 %v11325_v37, %v6089_v44  ;;  %v10121_v35 = vld [vmem:[%s16390_s3 + $0x240] sm:$0xff]  ;;  %v10119_v37 = vld [vmem:[%s16390_s3 + $0x230] sm:$0xff] }
 0x5ea   :  { %v10117_v44 = vld [vmem:[%s16390_s3 + $0x220] sm:$0xff] }
 0x5eb   :  { %v6167_v60 = vadd.f32 %v6158_v45, %v6084_v40 }
 0x5ee   :  { %v11336_v58 = vpop.f32.mrf.mxu1 }
 0x5ef   :  { %v6245_v61 = vadd.f32 %v11336_v58, %v6168_v57  ;;  %v10170_v57 = vld [vmem:[%s16390_s3 + $0x3b8] sm:$0xff] }
 0x5f0   :  { %v6235_v3 = vpop.f32.mrf.mxu1 }
 0x5f1   :  { %v6322_v16 = vadd.f32 %v11347_v8, %v6245_v61  ;;  %v6244_v4 = vadd.f32 %v6235_v3, %v6167_v60  ;;  %v10106_v60 = vld [vmem:[%s16390_s3 + $0x1d0] sm:$0xff] }
 0x5f2   :  { %v10169_v3 = vld [vmem:[%s16390_s3 + $0x3b0] sm:$0xff] }
 0x5f3   :  { %v6326_v6 = vmax.f32 %v5941_v15, %v6322_v16  ;;  %v6321_v23 = vadd.f32 %v6312_v19, %v6244_v4  ;;  %v10101_v15 = vld [vmem:[%s16390_s3 + $0x1a8] sm:$0xff]  ;;  %v10100_v4 = vld [vmem:[%s16390_s3 + $0x1a0] sm:$0xff]  ;;  %v10099_v19 = vld [vmem:[%s16390_s3 + $0x198] sm:$0xff] }
 0x5f4   :  { %v10168_v16 = vld [vmem:[%s16390_s3 + $0x3a8] sm:$0xff] }
 0x5f5   :  { %v6325_v24 = vmax.f32 %v5940_v20, %v6321_v23  ;;  %v6328_v25 = vmax.f32 %v6324_v21, %v6326_v6  ;;  %v10098_v20 = vld [vmem:[%s16390_s3 + $0x190] sm:$0xff]  ;;  %v10097_v23 = vld [vmem:[%s16390_s3 + $0x188] sm:$0xff] }
 0x5f6   :  { %v10165_v6 = vld [vmem:[%s16390_s3 + $0x390] sm:$0xff]  ;;  %v10164_v21 = vld [vmem:[%s16390_s3 + $0x388] sm:$0xff] }
 0x5f7   :  { %v6327_v9 = vmax.f32 %v6323_v22, %v6325_v24  ;;  %v6337_v17 = vadd.f32 %v10065_v5, %v6328_v25  ;;  %v10096_v22 = vld [vmem:[%s16390_s3 + $0x180] sm:$0xff]  ;;  %v10095_v25 = vld [vmem:[%s16390_s3 + $0x178] sm:$0xff] }
 0x5f8   :  { %v10163_v24 = vld [vmem:[%s16390_s3 + $0x380] sm:$0xff] }
 0x5f9   :  { %v6336_v63 = vadd.f32 %v10065_v5, %v6327_v9  ;;  %v14541_v27 = vmax.f32 %v6337_v17, 0.0  ;;  %v10162_v5 = vld [vmem:[%s16390_s3 + $0x378] sm:$0xff]  ;;  %v10094_v9 = vld [vmem:[%s16390_s3 + $0x170] sm:$0xff]  ;;  %v10093_v17 = vld [vmem:[%s16390_s3 + $0x168] sm:$0xff] }
 0x5fb   :  { %v14529_v26 = vmax.f32 %v6336_v63, 0.0  ;;  %v6842_v32 = vrot.slane %v14541_v27, 1  ;;  %v7328_v46 = vrot.slane %v14541_v27, 2  ;;  %v7814_v54 = vrot.slane %v14541_v27, 3  ;;  %v10161_v63 = vld [vmem:[%s16390_s3 + $0x370] sm:$0xff] }
 0x5fc   :  { %v8300_v8 = vrot.slane %v14541_v27, 4  ;;  %v10091_v27 = vld [vmem:[%s16390_s3 + $0x158] sm:$0xff] }
 0x5fd   :  { %6549 = vrot.lane.b32.xlu1 %v14529_v26, %s11406_s18  ;;  %6381 = vrot.lane.b32.xlu0 %v14529_v26, %s11404_s30  ;;  %v6841_v29 = vrot.slane %v14529_v26, 1  ;;  %v7327_v39 = vrot.slane %v14529_v26, 2  ;;  %v7813_v40 = vrot.slane %v14529_v26, 3  ;;  %v8299_v58 = vrot.slane %v14529_v26, 4 }
 0x5fe   :  { %10087 = vmatmul.mubr.msk.f32.vlgmr.msra.gmra.mxu0 %vm1748_vm4, %v14529_v26 }
 0x5ff   :  { %6663 = vmatpush1.msra.mxu0 %v10127_v10  ;;  %6714 = vmatprep.mubr.f32.mxu0 %v11402_v12  ;;  %v14565_v34 = vsel %vm224_vm2, %v6841_v29, %v6842_v32  ;;  %v14596_v48 = vsel %vm409_vm3, %v7327_v39, %v7328_v46  ;;  %v14627_v45 = vsel %vm3193_vm5, %v7813_v40, %v7814_v54  ;;  %v10092_v10 = vld [vmem:[%s16390_s3 + $0x160] sm:$0xff]  ;;  %v10090_v29 = vld [vmem:[%s16390_s3 + $0x150] sm:$0xff]  ;;  %v10156_v32 = vld [vmem:[%s16390_s3 + $0x348] sm:$0xff] }
 0x600   :  { %6664 = vmatprep.subr.mxu0 %v10126_v14  ;;  %v14646_v59 = vsel %vm56_vm0, %v8299_v58, %v8300_v8  ;;  %v10159_v14 = vld [vmem:[%s16390_s3 + $0x360] sm:$0xff]  ;;  %v10148_v39 = vld [vmem:[%s16390_s3 + $0x310] sm:$0xff]  ;;  %v10147_v46 = vld [vmem:[%s16390_s3 + $0x308] sm:$0xff] }
 0x601   :  { %6743 = vrot.lane.b32.xlu1 %v14529_v26, %s11405_s17  ;;  %6646 = vrot.lane.b32.xlu0 %v14529_v26, %s11403_s29  ;;  %v10160_v26 = vld [vmem:[%s16390_s3 + $0x368] sm:$0xff]  ;;  %v10212_v40 = vld [vmem:[%s16390_s3 + $0x4f8] sm:$0xff] }
 0x602   :  { %6665 = vmatpush1.msra.mxu0 %v10125_v28  ;;  %v10158_v28 = vld [vmem:[%s16390_s3 + $0x358] sm:$0xff]  ;;  %v10143_v54 = vld [vmem:[%s16390_s3 + $0x2e8] sm:$0xff]  ;;  %v10140_v8 = vld [vmem:[%s16390_s3 + $0x2d0] sm:$0xff] }
 0x603   :  { %6666 = vmatprep.subr.mxu0 %v10124_v30  ;;  %v10157_v30 = vld [vmem:[%s16390_s3 + $0x350] sm:$0xff]  ;;  %v10141_v58 = vld [vmem:[%s16390_s3 + $0x2d8] sm:$0xff] }
 0x604   :  { %6667 = vmatpush1.msra.mxu0 %v10123_v31  ;;  %v10089_v31 = vld [vmem:[%s16390_s3 + $0x148] sm:$0xff] }
 0x605   :  { %7036 = vrot.lane.b32.xlu1 %v14565_v34, %s11406_s18  ;;  %6939 = vrot.lane.b32.xlu0 %v14565_v34, %s11404_s30 }
 0x606   :  { %6668 = vmatprep.subr.mxu0 %v10122_v33  ;;  %v10088_v33 = vld [vmem:[%s16390_s3 + $0x140] sm:$0xff] }
 0x607   :  { %6669 = vmatpush1.msra.mxu0 %v10121_v35  ;;  %v10155_v35 = vld [vmem:[%s16390_s3 + $0x340] sm:$0xff] }
 0x608   :  { %6670 = vmatprep.subr.mxu0 %v10120_v36  ;;  %v10149_v36 = vld [vmem:[%s16390_s3 + $0x318] sm:$0xff] }
 0x609   :  { %7230 = vrot.lane.b32.xlu1 %v14565_v34, %s11405_s17  ;;  %7133 = vrot.lane.b32.xlu0 %v14565_v34, %s11403_s29 }
 0x60a   :  { %6671 = vmatpush1.msra.mxu0 %v10119_v37  ;;  %v10154_v37 = vld [vmem:[%s16390_s3 + $0x338] sm:$0xff] }
 0x60b   :  { %6672 = vmatprep.subr.mxu0 %v10118_v41 }
 0x60c   :  { %6673 = vmatpush1.msra.mxu0 %v10117_v44  ;;  %v10153_v44 = vld [vmem:[%s16390_s3 + $0x330] sm:$0xff] }
 0x60d   :  { %7522 = vrot.lane.b32.xlu1 %v14596_v48, %s11406_s18  ;;  %7425 = vrot.lane.b32.xlu0 %v14596_v48, %s11404_s30 }
 0x60e   :  { %6674 = vmatprep.subr.mxu0 %v10116_v47  ;;  %v10152_v47 = vld [vmem:[%s16390_s3 + $0x328] sm:$0xff] }
 0x60f   :  { %6675 = vmatpush1.msra.mxu0 %v10115_v49  ;;  %v10146_v49 = vld [vmem:[%s16390_s3 + $0x300] sm:$0xff] }
 0x610   :  { %6676 = vmatprep.subr.mxu0 %v10114_v50  ;;  %v10151_v50 = vld [vmem:[%s16390_s3 + $0x320] sm:$0xff] }
 0x611   :  { %7716 = vrot.lane.b32.xlu1 %v14596_v48, %s11405_s17  ;;  %7619 = vrot.lane.b32.xlu0 %v14596_v48, %s11403_s29 }
 0x612   :  { %6677 = vmatpush1.msra.mxu0 %v10113_v53  ;;  %v10145_v53 = vld [vmem:[%s16390_s3 + $0x2f8] sm:$0xff] }
 0x613   :  { %6678 = vmatprep.subr.mxu0 %v10112_v43  ;;  %v10144_v43 = vld [vmem:[%s16390_s3 + $0x2f0] sm:$0xff] }
 0x614   :  { %6679 = vmatpush1.msra.mxu0 %v10111_v52  ;;  %v10211_v52 = vld [vmem:[%s16390_s3 + $0x4f0] sm:$0xff] }
 0x615   :  { %8008 = vrot.lane.b32.xlu1 %v14627_v45, %s11406_s18  ;;  %7911 = vrot.lane.b32.xlu0 %v14627_v45, %s11404_s30 }
 0x616   :  { %6680 = vmatprep.subr.mxu0 %v10110_v42  ;;  %v10210_v42 = vld [vmem:[%s16390_s3 + $0x4e8] sm:$0xff] }
 0x617   :  { %6681 = vmatpush1.msra.mxu0 %v10109_v56  ;;  %v10142_v56 = vld [vmem:[%s16390_s3 + $0x2e0] sm:$0xff] }
 0x618   :  { %6858 = vmatprep.subr.mxu0 %v10170_v57  ;;  %v10209_v57 = vld [vmem:[%s16390_s3 + $0x4e0] sm:$0xff] }
 0x619   :  { %8202 = vrot.lane.b32.xlu1 %v14627_v45, %s11405_s17  ;;  %8105 = vrot.lane.b32.xlu0 %v14627_v45, %s11403_s29 }
 0x61d   :  { %8494 = vrot.lane.b32.xlu1 %v14646_v59, %s11406_s18  ;;  %8397 = vrot.lane.b32.xlu0 %v14646_v59, %s11404_s30 }
 0x621   :  { %8688 = vrot.lane.b32.xlu1 %v14646_v59, %s11405_s17  ;;  %8591 = vrot.lane.b32.xlu0 %v14646_v59, %s11403_s29 }
 0x66f   :  { %v6382_v61 = vpop.permute.xlu0 %6381  ;;  %v6550_v41 = vpop.permute.xlu1 %6549 }
 0x670   :  { %10086 = vmatmul.mubr.msk.f32.vlgmr.msra.gmra.mxu1 %vm1748_vm4, %v6382_v61  ;;  %v10139_v61 = vld [vmem:[%s16390_s3 + $0x2c8] sm:$0xff] }
 0x671   :  { %6566 = vmatpush1.msra.mxu1 %v10106_v60  ;;  %6617 = vmatprep.mubr.f32.mxu1 %v11402_v12  ;;  %v10207_v60 = vld [vmem:[%s16390_s3 + $0x4d0] sm:$0xff] }
 0x672   :  { %6567 = vmatprep.subr.mxu1 %v10105_v62  ;;  %v10206_v62 = vld [vmem:[%s16390_s3 + $0x4c8] sm:$0xff] }
 0x673   :  { %6568 = vmatpush1.msra.mxu1 %v10104_v0  ;;  %v6647_v11 = vpop.permute.xlu0 %6646  ;;  %v10138_v0 = vld [vmem:[%s16390_s3 + $0x2c0] sm:$0xff] }
 0x674   :  { %6569 = vmatprep.subr.mxu1 %v10103_v1  ;;  %10129 = vmatmul.mubr.msk.f32.vlgmr.msra.gmra.mxu0 %vm1748_vm4, %v6647_v11  ;;  %v10205_v1 = vld [vmem:[%s16390_s3 + $0x4c0] sm:$0xff]  ;;  %v10136_v11 = vld [vmem:[%s16390_s3 + $0x2b0] sm:$0xff] }
 0x675   :  { %6570 = vmatpush1.msra.mxu1 %v10102_v2  ;;  %6859 = vmatpush1.msra.mxu0 %v10169_v3  ;;  %v10137_v2 = vld [vmem:[%s16390_s3 + $0x2b8] sm:$0xff] }
 0x676   :  { %6571 = vmatprep.subr.mxu1 %v10101_v15  ;;  %6860 = vmatprep.subr.mxu0 %v10168_v16  ;;  %v10204_v3 = vld [vmem:[%s16390_s3 + $0x4b8] sm:$0xff]  ;;  %v10203_v15 = vld [vmem:[%s16390_s3 + $0x4b0] sm:$0xff]  ;;  %v10135_v16 = vld [vmem:[%s16390_s3 + $0x2a8] sm:$0xff] }
 0x677   :  { %6572 = vmatpush1.msra.mxu1 %v10100_v4  ;;  %6861 = vmatpush1.msra.mxu0 %v10167_v7  ;;  %v10202_v4 = vld [vmem:[%s16390_s3 + $0x4a8] sm:$0xff]  ;;  %v10134_v7 = vld [vmem:[%s16390_s3 + $0x2a0] sm:$0xff] }
 0x678   :  { %6573 = vmatprep.subr.mxu1 %v10099_v19  ;;  %6862 = vmatprep.subr.mxu0 %v10166_v13  ;;  %v10201_v19 = vld [vmem:[%s16390_s3 + $0x4a0] sm:$0xff]  ;;  %v10133_v13 = vld [vmem:[%s16390_s3 + $0x298] sm:$0xff] }
 0x679   :  { %6574 = vmatpush1.msra.mxu1 %v10098_v20  ;;  %6863 = vmatpush1.msra.mxu0 %v10165_v6  ;;  %v10200_v20 = vld [vmem:[%s16390_s3 + $0x498] sm:$0xff]  ;;  %v10132_v6 = vld [vmem:[%s16390_s3 + $0x290] sm:$0xff] }
 0x67a   :  { %6575 = vmatprep.subr.mxu1 %v10097_v23  ;;  %6864 = vmatprep.subr.mxu0 %v10164_v21  ;;  %v10199_v23 = vld [vmem:[%s16390_s3 + $0x490] sm:$0xff]  ;;  %v10131_v21 = vld [vmem:[%s16390_s3 + $0x288] sm:$0xff] }
 0x67b   :  { %6576 = vmatpush1.msra.mxu1 %v10096_v22  ;;  %6865 = vmatpush1.msra.mxu0 %v10163_v24  ;;  %v10198_v22 = vld [vmem:[%s16390_s3 + $0x488] sm:$0xff]  ;;  %v10130_v24 = vld [vmem:[%s16390_s3 + $0x280] sm:$0xff] }
 0x67c   :  { %6577 = vmatprep.subr.mxu1 %v10095_v25  ;;  %6866 = vmatprep.subr.mxu0 %v10162_v5  ;;  %v10197_v25 = vld [vmem:[%s16390_s3 + $0x480] sm:$0xff]  ;;  %v10191_v5 = vld [vmem:[%s16390_s3 + $0x458] sm:$0xff] }
 0x67d   :  { %6578 = vmatpush1.msra.mxu1 %v10094_v9  ;;  %6867 = vmatpush1.msra.mxu0 %v10161_v63  ;;  %v6744_v9 = vpop.permute.xlu1 %6743  ;;  %v10196_v63 = vld [vmem:[%s16390_s3 + $0x478] sm:$0xff] }
 0x67e   :  { %6579 = vmatprep.subr.mxu1 %v10093_v17  ;;  %6868 = vmatprep.subr.mxu0 %v10160_v26  ;;  %v10190_v17 = vld [vmem:[%s16390_s3 + $0x450] sm:$0xff] }
 0x67f   :  { %6580 = vmatpush1.msra.mxu1 %v10092_v10  ;;  %6869 = vmatpush1.msra.mxu0 %v10159_v14  ;;  %v10195_v26 = vld [vmem:[%s16390_s3 + $0x470] sm:$0xff]  ;;  %v10189_v10 = vld [vmem:[%s16390_s3 + $0x448] sm:$0xff] }
 0x680   :  { %6581 = vmatprep.subr.mxu1 %v10091_v27  ;;  %6870 = vmatprep.subr.mxu0 %v10158_v28  ;;  %v10194_v14 = vld [vmem:[%s16390_s3 + $0x468] sm:$0xff]  ;;  %v10188_v27 = vld [vmem:[%s16390_s3 + $0x440] sm:$0xff] }
 0x681   :  { %6582 = vmatpush1.msra.mxu1 %v10090_v29  ;;  %6871 = vmatpush1.msra.mxu0 %v10157_v30  ;;  %v10193_v28 = vld [vmem:[%s16390_s3 + $0x460] sm:$0xff]  ;;  %v10187_v29 = vld [vmem:[%s16390_s3 + $0x438] sm:$0xff] }
 0x682   :  { %6583 = vmatprep.subr.mxu1 %v10089_v31  ;;  %6872 = vmatprep.subr.mxu0 %v10156_v32  ;;  %v10254_v30 = vld [vmem:[%s16390_s3 + $0x638] sm:$0xff]  ;;  %v10186_v31 = vld [vmem:[%s16390_s3 + $0x430] sm:$0xff]  ;;  %v7037_v32 = vpop.permute.xlu1 %7036 }
 0x683   :  { %6584 = vmatpush1.msra.mxu1 %v10088_v33  ;;  %6873 = vmatpush1.msra.mxu0 %v10155_v35  ;;  %v10253_v33 = vld [vmem:[%s16390_s3 + $0x630] sm:$0xff]  ;;  %v10185_v35 = vld [vmem:[%s16390_s3 + $0x428] sm:$0xff] }
 0x684   :  { %10108 = vmatmul.mubr.msk.f32.vlgmr.msra.gmra.mxu1 %vm1748_vm4, %v6550_v41  ;;  %6759 = vmatprep.subr.mxu1 %v10149_v36  ;;  %v10252_v36 = vld [vmem:[%s16390_s3 + $0x628] sm:$0xff]  ;;  %v10183_v41 = vld [vmem:[%s16390_s3 + $0x418] sm:$0xff] }
 0x685   :  { %6874 = vmatprep.subr.mxu0 %v10154_v37  ;;  %6760 = vmatpush1.msra.mxu1 %v10148_v39  ;;  %v10184_v37 = vld [vmem:[%s16390_s3 + $0x420] sm:$0xff] }
 0x686   :  { %6875 = vmatpush1.msra.mxu0 %v10153_v44  ;;  %6761 = vmatprep.subr.mxu1 %v10147_v46  ;;  %v10251_v39 = vld [vmem:[%s16390_s3 + $0x620] sm:$0xff]  ;;  %v10250_v44 = vld [vmem:[%s16390_s3 + $0x618] sm:$0xff]  ;;  %v10182_v46 = vld [vmem:[%s16390_s3 + $0x410] sm:$0xff] }
 0x687   :  { %6876 = vmatprep.subr.mxu0 %v10152_v47  ;;  %6762 = vmatpush1.msra.mxu1 %v10146_v49  ;;  %v10249_v47 = vld [vmem:[%s16390_s3 + $0x610] sm:$0xff]  ;;  %v10181_v49 = vld [vmem:[%s16390_s3 + $0x408] sm:$0xff] }
 0x688   :  { %6877 = vmatpush1.msra.mxu0 %v10151_v50  ;;  %6910 = vmatprep.mubr.f32.mxu0 %v11402_v12  ;;  %v10248_v50 = vld [vmem:[%s16390_s3 + $0x608] sm:$0xff] }
 0x689   :  { %6763 = vmatprep.subr.mxu1 %v10145_v53  ;;  %10171 = vmatmul.mubr.msk.f32.vlgmr.msra.gmra.mxu0 %vm1748_vm4, %v14565_v34  ;;  %v10208_v34 = vld [vmem:[%s16390_s3 + $0x4d8] sm:$0xff]  ;;  %v10180_v53 = vld [vmem:[%s16390_s3 + $0x400] sm:$0xff] }
 0x68a   :  { %7052 = vmatprep.subr.mxu0 %v10212_v40  ;;  %6764 = vmatpush1.msra.mxu1 %v10144_v43  ;;  %v10247_v40 = vld [vmem:[%s16390_s3 + $0x600] sm:$0xff]  ;;  %v10179_v43 = vld [vmem:[%s16390_s3 + $0x3f8] sm:$0xff] }
 0x68b   :  { %7053 = vmatpush1.msra.mxu0 %v10211_v52  ;;  %6765 = vmatprep.subr.mxu1 %v10143_v54  ;;  %v10246_v52 = vld [vmem:[%s16390_s3 + $0x5f8] sm:$0xff]  ;;  %v10178_v54 = vld [vmem:[%s16390_s3 + $0x3f0] sm:$0xff] }
 0x68c   :  { %7054 = vmatprep.subr.mxu0 %v10210_v42  ;;  %6766 = vmatpush1.msra.mxu1 %v10142_v56  ;;  %v10245_v42 = vld [vmem:[%s16390_s3 + $0x5f0] sm:$0xff]  ;;  %v10177_v56 = vld [vmem:[%s16390_s3 + $0x3e8] sm:$0xff] }
 0x68d   :  { %7055 = vmatpush1.msra.mxu0 %v10209_v57  ;;  %6767 = vmatprep.subr.mxu1 %v10141_v58  ;;  %v10244_v57 = vld [vmem:[%s16390_s3 + $0x5e8] sm:$0xff]  ;;  %v10176_v58 = vld [vmem:[%s16390_s3 + $0x3e0] sm:$0xff] }
 0x68e   :  { %7056 = vmatprep.subr.mxu0 %v10208_v34  ;;  %6768 = vmatpush1.msra.mxu1 %v10140_v8  ;;  %v10243_v34 = vld [vmem:[%s16390_s3 + $0x5e0] sm:$0xff]  ;;  %v10175_v8 = vld [vmem:[%s16390_s3 + $0x3d8] sm:$0xff] }
 0x68f   :  { %7057 = vmatpush1.msra.mxu0 %v10207_v60  ;;  %6769 = vmatprep.subr.mxu1 %v10139_v61  ;;  %v10242_v60 = vld [vmem:[%s16390_s3 + $0x5d8] sm:$0xff]  ;;  %v10174_v61 = vld [vmem:[%s16390_s3 + $0x3d0] sm:$0xff] }
 0x690   :  { %7058 = vmatprep.subr.mxu0 %v10206_v62  ;;  %6770 = vmatpush1.msra.mxu1 %v10138_v0  ;;  %v10241_v62 = vld [vmem:[%s16390_s3 + $0x5d0] sm:$0xff]  ;;  %v10173_v0 = vld [vmem:[%s16390_s3 + $0x3c8] sm:$0xff] }
 0x691   :  { %7059 = vmatpush1.msra.mxu0 %v10205_v1  ;;  %6771 = vmatprep.subr.mxu1 %v10137_v2  ;;  %v10240_v1 = vld [vmem:[%s16390_s3 + $0x5c8] sm:$0xff]  ;;  %v10172_v2 = vld [vmem:[%s16390_s3 + $0x3c0] sm:$0xff] }
 0x692   :  { %7060 = vmatprep.subr.mxu0 %v10204_v3  ;;  %6772 = vmatpush1.msra.mxu1 %v10136_v11  ;;  %v10239_v3 = vld [vmem:[%s16390_s3 + $0x5c0] sm:$0xff]  ;;  %v10233_v11 = vld [vmem:[%s16390_s3 + $0x598] sm:$0xff] }
 0x693   :  { %7061 = vmatpush1.msra.mxu0 %v10203_v15  ;;  %6773 = vmatprep.subr.mxu1 %v10135_v16  ;;  %v10238_v15 = vld [vmem:[%s16390_s3 + $0x5b8] sm:$0xff]  ;;  %v10232_v16 = vld [vmem:[%s16390_s3 + $0x590] sm:$0xff] }
 0x694   :  { %7062 = vmatprep.subr.mxu0 %v10202_v4  ;;  %6774 = vmatpush1.msra.mxu1 %v10134_v7  ;;  %v6940_v4 = vpop.permute.xlu0 %6939  ;;  %v10237_v7 = vld [vmem:[%s16390_s3 + $0x5b0] sm:$0xff] }
 0x695   :  { %7063 = vmatpush1.msra.mxu0 %v10201_v19  ;;  %6775 = vmatprep.subr.mxu1 %v10133_v13  ;;  %v10231_v19 = vld [vmem:[%s16390_s3 + $0x588] sm:$0xff] }
 0x696   :  { %7064 = vmatprep.subr.mxu0 %v10200_v20  ;;  %6776 = vmatpush1.msra.mxu1 %v10132_v6  ;;  %v10236_v13 = vld [vmem:[%s16390_s3 + $0x5a8] sm:$0xff]  ;;  %v10230_v20 = vld [vmem:[%s16390_s3 + $0x580] sm:$0xff] }
 0x697   :  { %7065 = vmatpush1.msra.mxu0 %v10199_v23  ;;  %6777 = vmatprep.subr.mxu1 %v10131_v21  ;;  %v10235_v6 = vld [vmem:[%s16390_s3 + $0x5a0] sm:$0xff]  ;;  %v10229_v23 = vld [vmem:[%s16390_s3 + $0x578] sm:$0xff] }
 0x698   :  { %7066 = vmatprep.subr.mxu0 %v10198_v22  ;;  %6778 = vmatpush1.msra.mxu1 %v10130_v24  ;;  %v10296_v21 = vld [vmem:[%s16390_s3 + $0x778] sm:$0xff]  ;;  %v10228_v22 = vld [vmem:[%s16390_s3 + $0x570] sm:$0xff]  ;;  %v7231_v24 = vpop.permute.xlu1 %7230 }
 0x699   :  { %6811 = vmatprep.mubr.f32.mxu1 %v11402_v12  ;;  %7067 = vmatpush1.msra.mxu0 %v10197_v25  ;;  %v10295_v25 = vld [vmem:[%s16390_s3 + $0x770] sm:$0xff] }
 0x69a   :  { %10150 = vmatmul.mubr.msk.f32.vlgmr.msra.gmra.mxu1 %vm1748_vm4, %v6744_v9  ;;  %6955 = vmatprep.subr.mxu1 %v10191_v5  ;;  %v10227_v5 = vld [vmem:[%s16390_s3 + $0x568] sm:$0xff] }
 0x69b   :  { %7068 = vmatprep.subr.mxu0 %v10196_v63  ;;  %6956 = vmatpush1.msra.mxu1 %v10190_v17  ;;  %v10294_v9 = vld [vmem:[%s16390_s3 + $0x768] sm:$0xff]  ;;  %v10226_v63 = vld [vmem:[%s16390_s3 + $0x560] sm:$0xff] }
 0x69c   :  { %7069 = vmatpush1.msra.mxu0 %v10195_v26  ;;  %6957 = vmatprep.subr.mxu1 %v10189_v10  ;;  %v10293_v17 = vld [vmem:[%s16390_s3 + $0x760] sm:$0xff]  ;;  %v10225_v26 = vld [vmem:[%s16390_s3 + $0x558] sm:$0xff] }
 0x69d   :  { %7070 = vmatprep.subr.mxu0 %v10194_v14  ;;  %6958 = vmatpush1.msra.mxu1 %v10188_v27  ;;  %v10292_v10 = vld [vmem:[%s16390_s3 + $0x758] sm:$0xff]  ;;  %v10224_v14 = vld [vmem:[%s16390_s3 + $0x550] sm:$0xff] }
 0x69e   :  { %7071 = vmatpush1.msra.mxu0 %v10193_v28  ;;  %7104 = vmatprep.mubr.f32.mxu0 %v11402_v12  ;;  %v10291_v27 = vld [vmem:[%s16390_s3 + $0x750] sm:$0xff]  ;;  %v10223_v28 = vld [vmem:[%s16390_s3 + $0x548] sm:$0xff] }
 0x69f   :  { %6959 = vmatprep.subr.mxu1 %v10187_v29  ;;  %10213 = vmatmul.mubr.msk.f32.vlgmr.msra.gmra.mxu0 %vm1748_vm4, %v7037_v32  ;;  %v10290_v29 = vld [vmem:[%s16390_s3 + $0x748] sm:$0xff]  ;;  %v10221_v32 = vld [vmem:[%s16390_s3 + $0x538] sm:$0xff] }
 0x6a0   :  { %7246 = vmatprep.subr.mxu0 %v10254_v30  ;;  %6960 = vmatpush1.msra.mxu1 %v10186_v31  ;;  %v10222_v30 = vld [vmem:[%s16390_s3 + $0x540] sm:$0xff] }
 0x6a1   :  { %7247 = vmatpush1.msra.mxu0 %v10253_v33  ;;  %6961 = vmatprep.subr.mxu1 %v10185_v35  ;;  %v10289_v31 = vld [vmem:[%s16390_s3 + $0x740] sm:$0xff]  ;;  %v10288_v33 = vld [vmem:[%s16390_s3 + $0x738] sm:$0xff]  ;;  %v10220_v35 = vld [vmem:[%s16390_s3 + $0x530] sm:$0xff] }
 0x6a2   :  { %7248 = vmatprep.subr.mxu0 %v10252_v36  ;;  %6962 = vmatpush1.msra.mxu1 %v10184_v37  ;;  %v10287_v36 = vld [vmem:[%s16390_s3 + $0x730] sm:$0xff]  ;;  %v10219_v37 = vld [vmem:[%s16390_s3 + $0x528] sm:$0xff] }
 0x6a3   :  { %7249 = vmatpush1.msra.mxu0 %v10251_v39  ;;  %6963 = vmatprep.subr.mxu1 %v10183_v41  ;;  %v10286_v39 = vld [vmem:[%s16390_s3 + $0x728] sm:$0xff]  ;;  %v10218_v41 = vld [vmem:[%s16390_s3 + $0x520] sm:$0xff] }
 0x6a4   :  { %7250 = vmatprep.subr.mxu0 %v10250_v44  ;;  %6964 = vmatpush1.msra.mxu1 %v10182_v46  ;;  %v10285_v44 = vld [vmem:[%s16390_s3 + $0x720] sm:$0xff]  ;;  %v10217_v46 = vld [vmem:[%s16390_s3 + $0x518] sm:$0xff] }
 0x6a5   :  { %7251 = vmatpush1.msra.mxu0 %v10249_v47  ;;  %6965 = vmatprep.subr.mxu1 %v10181_v49  ;;  %v10284_v47 = vld [vmem:[%s16390_s3 + $0x718] sm:$0xff]  ;;  %v10216_v49 = vld [vmem:[%s16390_s3 + $0x510] sm:$0xff] }
 0x6a6   :  { %7252 = vmatprep.subr.mxu0 %v10248_v50  ;;  %6966 = vmatpush1.msra.mxu1 %v10180_v53  ;;  %v10283_v50 = vld [vmem:[%s16390_s3 + $0x710] sm:$0xff]  ;;  %v10215_v53 = vld [vmem:[%s16390_s3 + $0x508] sm:$0xff] }
 0x6a7   :  { %7253 = vmatpush1.msra.mxu0 %v10247_v40  ;;  %6967 = vmatprep.subr.mxu1 %v10179_v43  ;;  %v10282_v40 = vld [vmem:[%s16390_s3 + $0x708] sm:$0xff]  ;;  %v10214_v43 = vld [vmem:[%s16390_s3 + $0x500] sm:$0xff] }
 0x6a8   :  { %7254 = vmatprep.subr.mxu0 %v10246_v52  ;;  %6968 = vmatpush1.msra.mxu1 %v10178_v54  ;;  %v10281_v52 = vld [vmem:[%s16390_s3 + $0x700] sm:$0xff]  ;;  %v10275_v54 = vld [vmem:[%s16390_s3 + $0x6d8] sm:$0xff] }
 0x6a9   :  { %7255 = vmatpush1.msra.mxu0 %v10245_v42  ;;  %6969 = vmatprep.subr.mxu1 %v10177_v56  ;;  %v7134_v42 = vpop.permute.xlu0 %7133  ;;  %v10280_v56 = vld [vmem:[%s16390_s3 + $0x6f8] sm:$0xff] }
 0x6aa   :  { %7256 = vmatprep.subr.mxu0 %v10244_v57  ;;  %6970 = vmatpush1.msra.mxu1 %v10176_v58  ;;  %v10274_v57 = vld [vmem:[%s16390_s3 + $0x6d0] sm:$0xff] }
 0x6ab   :  { %7257 = vmatpush1.msra.mxu0 %v10243_v34  ;;  %6971 = vmatprep.subr.mxu1 %v10175_v8  ;;  %v10279_v58 = vld [vmem:[%s16390_s3 + $0x6f0] sm:$0xff]  ;;  %v10273_v34 = vld [vmem:[%s16390_s3 + $0x6c8] sm:$0xff] }
 0x6ac   :  { %7258 = vmatprep.subr.mxu0 %v10242_v60  ;;  %6972 = vmatpush1.msra.mxu1 %v10174_v61  ;;  %v10278_v8 = vld [vmem:[%s16390_s3 + $0x6e8] sm:$0xff]  ;;  %v10272_v60 = vld [vmem:[%s16390_s3 + $0x6c0] sm:$0xff] }
 0x6ad   :  { %7259 = vmatpush1.msra.mxu0 %v10241_v62  ;;  %6973 = vmatprep.subr.mxu1 %v10173_v0  ;;  %v10277_v61 = vld [vmem:[%s16390_s3 + $0x6e0] sm:$0xff]  ;;  %v10271_v62 = vld [vmem:[%s16390_s3 + $0x6b8] sm:$0xff] }
 0x6ae   :  { %7260 = vmatprep.subr.mxu0 %v10240_v1  ;;  %6974 = vmatpush1.msra.mxu1 %v10172_v2  ;;  %v10338_v0 = vld [vmem:[%s16390_s3 + $0x8b8] sm:$0xff]  ;;  %v10270_v1 = vld [vmem:[%s16390_s3 + $0x6b0] sm:$0xff]  ;;  %v7426_v2 = vpop.permute.xlu0 %7425 }
 0x6af   :  { %7007 = vmatprep.mubr.f32.mxu1 %v11402_v12  ;;  %7261 = vmatpush1.msra.mxu0 %v10239_v3  ;;  %v10337_v3 = vld [vmem:[%s16390_s3 + $0x8b0] sm:$0xff] }
 0x6b0   :  { %10192 = vmatmul.mubr.msk.f32.vlgmr.msra.gmra.mxu1 %vm1748_vm4, %v6940_v4  ;;  %7149 = vmatprep.subr.mxu1 %v10233_v11  ;;  %v10269_v11 = vld [vmem:[%s16390_s3 + $0x6a8] sm:$0xff]  ;;  %v10335_v4 = vld [vmem:[%s16390_s3 + $0x8a0] sm:$0xff] }
 0x6b1   :  { %7262 = vmatprep.subr.mxu0 %v10238_v15  ;;  %7150 = vmatpush1.msra.mxu1 %v10232_v16  ;;  %v10336_v15 = vld [vmem:[%s16390_s3 + $0x8a8] sm:$0xff]  ;;  %v10268_v16 = vld [vmem:[%s16390_s3 + $0x6a0] sm:$0xff] }
 0x6b2   :  { %7263 = vmatpush1.msra.mxu0 %v10237_v7  ;;  %7151 = vmatprep.subr.mxu1 %v10231_v19  ;;  %v10267_v7 = vld [vmem:[%s16390_s3 + $0x698] sm:$0xff] }
 0x6b3   :  { %7264 = vmatprep.subr.mxu0 %v10236_v13  ;;  %7152 = vmatpush1.msra.mxu1 %v10230_v20  ;;  %v10334_v19 = vld [vmem:[%s16390_s3 + $0x898] sm:$0xff]  ;;  %v10266_v13 = vld [vmem:[%s16390_s3 + $0x690] sm:$0xff] }
 0x6b4   :  { %7265 = vmatpush1.msra.mxu0 %v10235_v6  ;;  %7298 = vmatprep.mubr.f32.mxu0 %v11402_v12  ;;  %v10333_v20 = vld [vmem:[%s16390_s3 + $0x890] sm:$0xff]  ;;  %v10265_v6 = vld [vmem:[%s16390_s3 + $0x688] sm:$0xff] }
 0x6b5   :  { %7153 = vmatprep.subr.mxu1 %v10229_v23  ;;  %10255 = vmatmul.mubr.msk.f32.vlgmr.msra.gmra.mxu0 %vm1748_vm4, %v7231_v24  ;;  %v10332_v23 = vld [vmem:[%s16390_s3 + $0x888] sm:$0xff]  ;;  %v10263_v24 = vld [vmem:[%s16390_s3 + $0x678] sm:$0xff] }
 0x6b6   :  { %7441 = vmatprep.subr.mxu0 %v10296_v21  ;;  %7154 = vmatpush1.msra.mxu1 %v10228_v22  ;;  %v10264_v21 = vld [vmem:[%s16390_s3 + $0x680] sm:$0xff] }
 0x6b7   :  { %7442 = vmatpush1.msra.mxu0 %v10295_v25  ;;  %7155 = vmatprep.subr.mxu1 %v10227_v5  ;;  %v10331_v22 = vld [vmem:[%s16390_s3 + $0x880] sm:$0xff]  ;;  %v10330_v25 = vld [vmem:[%s16390_s3 + $0x878] sm:$0xff]  ;;  %v10262_v5 = vld [vmem:[%s16390_s3 + $0x670] sm:$0xff] }
 0x6b8   :  { %7443 = vmatprep.subr.mxu0 %v10294_v9  ;;  %7156 = vmatpush1.msra.mxu1 %v10226_v63  ;;  %v10329_v9 = vld [vmem:[%s16390_s3 + $0x870] sm:$0xff]  ;;  %v10261_v63 = vld [vmem:[%s16390_s3 + $0x668] sm:$0xff] }
 0x6b9   :  { %7444 = vmatpush1.msra.mxu0 %v10293_v17  ;;  %7157 = vmatprep.subr.mxu1 %v10225_v26  ;;  %v10328_v17 = vld [vmem:[%s16390_s3 + $0x868] sm:$0xff]  ;;  %v10260_v26 = vld [vmem:[%s16390_s3 + $0x660] sm:$0xff] }
 0x6ba   :  { %7445 = vmatprep.subr.mxu0 %v10292_v10  ;;  %7158 = vmatpush1.msra.mxu1 %v10224_v14  ;;  %v10327_v10 = vld [vmem:[%s16390_s3 + $0x860] sm:$0xff]  ;;  %v10259_v14 = vld [vmem:[%s16390_s3 + $0x658] sm:$0xff] }
 0x6bb   :  { %7446 = vmatpush1.msra.mxu0 %v10291_v27  ;;  %7159 = vmatprep.subr.mxu1 %v10223_v28  ;;  %v10326_v27 = vld [vmem:[%s16390_s3 + $0x858] sm:$0xff]  ;;  %v10258_v28 = vld [vmem:[%s16390_s3 + $0x650] sm:$0xff] }
 0x6bc   :  { %7447 = vmatprep.subr.mxu0 %v10290_v29  ;;  %7160 = vmatpush1.msra.mxu1 %v10222_v30  ;;  %v10325_v29 = vld [vmem:[%s16390_s3 + $0x850] sm:$0xff]  ;;  %v10257_v30 = vld [vmem:[%s16390_s3 + $0x648] sm:$0xff] }
 0x6bd   :  { %7448 = vmatpush1.msra.mxu0 %v10289_v31  ;;  %7161 = vmatprep.subr.mxu1 %v10221_v32  ;;  %v10324_v31 = vld [vmem:[%s16390_s3 + $0x848] sm:$0xff]  ;;  %v10256_v32 = vld [vmem:[%s16390_s3 + $0x640] sm:$0xff] }
 0x6be   :  { %7449 = vmatprep.subr.mxu0 %v10288_v33  ;;  %7162 = vmatpush1.msra.mxu1 %v10220_v35  ;;  %v10323_v33 = vld [vmem:[%s16390_s3 + $0x840] sm:$0xff]  ;;  %v10317_v35 = vld [vmem:[%s16390_s3 + $0x818] sm:$0xff] }
 0x6bf   :  { %7450 = vmatpush1.msra.mxu0 %v10287_v36  ;;  %7163 = vmatprep.subr.mxu1 %v10219_v37  ;;  %v10322_v36 = vld [vmem:[%s16390_s3 + $0x838] sm:$0xff]  ;;  %v10316_v37 = vld [vmem:[%s16390_s3 + $0x810] sm:$0xff] }
 0x6c0   :  { %7451 = vmatprep.subr.mxu0 %v10286_v39  ;;  %7164 = vmatpush1.msra.mxu1 %v10218_v41  ;;  %v10321_v39 = vld [vmem:[%s16390_s3 + $0x830] sm:$0xff]  ;;  %v10315_v41 = vld [vmem:[%s16390_s3 + $0x808] sm:$0xff] }
 0x6c1   :  { %7452 = vmatpush1.msra.mxu0 %v10285_v44  ;;  %7165 = vmatprep.subr.mxu1 %v10217_v46  ;;  %v10320_v44 = vld [vmem:[%s16390_s3 + $0x828] sm:$0xff]  ;;  %v10314_v46 = vld [vmem:[%s16390_s3 + $0x800] sm:$0xff] }
 0x6c2   :  { %7453 = vmatprep.subr.mxu0 %v10284_v47  ;;  %7166 = vmatpush1.msra.mxu1 %v10216_v49  ;;  %v10319_v47 = vld [vmem:[%s16390_s3 + $0x820] sm:$0xff]  ;;  %v10380_v49 = vld [vmem:[%s16390_s3 + $0x9f8] sm:$0xff] }
 0x6c3   :  { %7454 = vmatpush1.msra.mxu0 %v10283_v50  ;;  %7167 = vmatprep.subr.mxu1 %v10215_v53  ;;  %v10312_v50 = vld [vmem:[%s16390_s3 + $0x7f0] sm:$0xff]  ;;  %v7620_v53 = vpop.permute.xlu0 %7619 }
 0x6c4   :  { %7455 = vmatprep.subr.mxu0 %v10282_v40  ;;  %7168 = vmatpush1.msra.mxu1 %v10214_v43  ;;  %v10379_v40 = vld [vmem:[%s16390_s3 + $0x9f0] sm:$0xff]  ;;  %v10311_v43 = vld [vmem:[%s16390_s3 + $0x7e8] sm:$0xff] }
 0x6c5   :  { %7201 = vmatprep.mubr.f32.mxu1 %v11402_v12  ;;  %7456 = vmatpush1.msra.mxu0 %v10281_v52  ;;  %v10378_v52 = vld [vmem:[%s16390_s3 + $0x9e8] sm:$0xff] }
 0x6c6   :  { %10234 = vmatmul.mubr.msk.f32.vlgmr.msra.gmra.mxu1 %vm1748_vm4, %v7134_v42  ;;  %7344 = vmatprep.subr.mxu1 %v10275_v54  ;;  %v10310_v54 = vld [vmem:[%s16390_s3 + $0x7e0] sm:$0xff] }
 0x6c7   :  { %7457 = vmatprep.subr.mxu0 %v10280_v56  ;;  %7345 = vmatpush1.msra.mxu1 %v10274_v57  ;;  %v10377_v42 = vld [vmem:[%s16390_s3 + $0x9e0] sm:$0xff]  ;;  %v10309_v56 = vld [vmem:[%s16390_s3 + $0x7d8] sm:$0xff] }
 0x6c8   :  { %7458 = vmatpush1.msra.mxu0 %v10279_v58  ;;  %7346 = vmatprep.subr.mxu1 %v10273_v34  ;;  %v10376_v57 = vld [vmem:[%s16390_s3 + $0x9d8] sm:$0xff]  ;;  %v10308_v58 = vld [vmem:[%s16390_s3 + $0x7d0] sm:$0xff] }
 0x6c9   :  { %7459 = vmatprep.subr.mxu0 %v10278_v8  ;;  %7347 = vmatpush1.msra.mxu1 %v10272_v60  ;;  %v10375_v34 = vld [vmem:[%s16390_s3 + $0x9d0] sm:$0xff]  ;;  %v10307_v8 = vld [vmem:[%s16390_s3 + $0x7c8] sm:$0xff] }
 0x6ca   :  { %7460 = vmatpush1.msra.mxu0 %v10277_v61  ;;  %7493 = vmatprep.mubr.f32.mxu0 %v11402_v12  ;;  %v10374_v60 = vld [vmem:[%s16390_s3 + $0x9c8] sm:$0xff]  ;;  %v10306_v61 = vld [vmem:[%s16390_s3 + $0x7c0] sm:$0xff] }
 0x6cb   :  { %7348 = vmatprep.subr.mxu1 %v10271_v62  ;;  %10297 = vmatmul.mubr.msk.f32.vlgmr.msra.gmra.mxu0 %vm1748_vm4, %v7426_v2  ;;  %v10373_v62 = vld [vmem:[%s16390_s3 + $0x9c0] sm:$0xff]  ;;  %v10304_v2 = vld [vmem:[%s16390_s3 + $0x7b0] sm:$0xff] }
 0x6cc   :  { %7635 = vmatprep.subr.mxu0 %v10338_v0  ;;  %7349 = vmatpush1.msra.mxu1 %v10270_v1  ;;  %v10305_v0 = vld [vmem:[%s16390_s3 + $0x7b8] sm:$0xff] }
 0x6cd   :  { %7636 = vmatpush1.msra.mxu0 %v10337_v3  ;;  %7350 = vmatprep.subr.mxu1 %v10269_v11  ;;  %v10372_v1 = vld [vmem:[%s16390_s3 + $0x9b8] sm:$0xff]  ;;  %v10371_v3 = vld [vmem:[%s16390_s3 + $0x9b0] sm:$0xff]  ;;  %v10303_v11 = vld [vmem:[%s16390_s3 + $0x7a8] sm:$0xff] }
 0x6ce   :  { %7637 = vmatprep.subr.mxu0 %v10336_v15  ;;  %7351 = vmatpush1.msra.mxu1 %v10268_v16  ;;  %v10370_v15 = vld [vmem:[%s16390_s3 + $0x9a8] sm:$0xff]  ;;  %v10302_v16 = vld [vmem:[%s16390_s3 + $0x7a0] sm:$0xff] }
 0x6cf   :  { %7638 = vmatpush1.msra.mxu0 %v10335_v4  ;;  %7352 = vmatprep.subr.mxu1 %v10267_v7  ;;  %v10369_v4 = vld [vmem:[%s16390_s3 + $0x9a0] sm:$0xff]  ;;  %v10301_v7 = vld [vmem:[%s16390_s3 + $0x798] sm:$0xff] }
 0x6d0   :  { %7639 = vmatprep.subr.mxu0 %v10334_v19  ;;  %7353 = vmatpush1.msra.mxu1 %v10266_v13  ;;  %v10368_v19 = vld [vmem:[%s16390_s3 + $0x998] sm:$0xff]  ;;  %v10300_v13 = vld [vmem:[%s16390_s3 + $0x790] sm:$0xff] }
 0x6d1   :  { %7640 = vmatpush1.msra.mxu0 %v10333_v20  ;;  %7354 = vmatprep.subr.mxu1 %v10265_v6  ;;  %v10367_v20 = vld [vmem:[%s16390_s3 + $0x990] sm:$0xff]  ;;  %v10299_v6 = vld [vmem:[%s16390_s3 + $0x788] sm:$0xff] }
 0x6d2   :  { %7641 = vmatprep.subr.mxu0 %v10332_v23  ;;  %7355 = vmatpush1.msra.mxu1 %v10264_v21  ;;  %v10366_v23 = vld [vmem:[%s16390_s3 + $0x988] sm:$0xff]  ;;  %v10298_v21 = vld [vmem:[%s16390_s3 + $0x780] sm:$0xff] }
 0x6d3   :  { %7642 = vmatpush1.msra.mxu0 %v10331_v22  ;;  %7356 = vmatprep.subr.mxu1 %v10263_v24  ;;  %v10365_v22 = vld [vmem:[%s16390_s3 + $0x980] sm:$0xff]  ;;  %v10359_v24 = vld [vmem:[%s16390_s3 + $0x958] sm:$0xff] }
 0x6d4   :  { %7643 = vmatprep.subr.mxu0 %v10330_v25  ;;  %7357 = vmatpush1.msra.mxu1 %v10262_v5  ;;  %v10364_v25 = vld [vmem:[%s16390_s3 + $0x978] sm:$0xff]  ;;  %v10358_v5 = vld [vmem:[%s16390_s3 + $0x950] sm:$0xff] }
 0x6d5   :  { %7644 = vmatpush1.msra.mxu0 %v10329_v9  ;;  %7358 = vmatprep.subr.mxu1 %v10261_v63  ;;  %v7523_v9 = vpop.permute.xlu1 %7522  ;;  %v10363_v63 = vld [vmem:[%s16390_s3 + $0x970] sm:$0xff] }
 0x6d6   :  { %7645 = vmatprep.subr.mxu0 %v10328_v17  ;;  %7359 = vmatpush1.msra.mxu1 %v10260_v26  ;;  %v10357_v17 = vld [vmem:[%s16390_s3 + $0x948] sm:$0xff] }
 0x6d7   :  { %7646 = vmatpush1.msra.mxu0 %v10327_v10  ;;  %7360 = vmatprep.subr.mxu1 %v10259_v14  ;;  %v10362_v26 = vld [vmem:[%s16390_s3 + $0x968] sm:$0xff]  ;;  %v10356_v10 = vld [vmem:[%s16390_s3 + $0x940] sm:$0xff] }
 0x6d8   :  { %7647 = vmatprep.subr.mxu0 %v10326_v27  ;;  %7361 = vmatpush1.msra.mxu1 %v10258_v28  ;;  %v10361_v14 = vld [vmem:[%s16390_s3 + $0x960] sm:$0xff]  ;;  %v10355_v27 = vld [vmem:[%s16390_s3 + $0x938] sm:$0xff] }
 0x6d9   :  { %7648 = vmatpush1.msra.mxu0 %v10325_v29  ;;  %7362 = vmatprep.subr.mxu1 %v10257_v30  ;;  %v10422_v28 = vld [vmem:[%s16390_s3 + $0xb38] sm:$0xff]  ;;  %v10354_v29 = vld [vmem:[%s16390_s3 + $0x930] sm:$0xff] }
 0x6da   :  { %7649 = vmatprep.subr.mxu0 %v10324_v31  ;;  %7363 = vmatpush1.msra.mxu1 %v10256_v32  ;;  %v10421_v30 = vld [vmem:[%s16390_s3 + $0xb30] sm:$0xff]  ;;  %v10353_v31 = vld [vmem:[%s16390_s3 + $0x928] sm:$0xff] }
 0x6db   :  { %7396 = vmatprep.mubr.f32.mxu1 %v11402_v12  ;;  %7650 = vmatpush1.msra.mxu0 %v10323_v33  ;;  %v10420_v32 = vld [vmem:[%s16390_s3 + $0xb28] sm:$0xff]  ;;  %v10352_v33 = vld [vmem:[%s16390_s3 + $0x920] sm:$0xff] }
 0x6dc   :  { %10276 = vmatmul.mubr.msk.f32.vlgmr.msra.gmra.mxu1 %vm1748_vm4, %v14596_v48  ;;  %7538 = vmatprep.subr.mxu1 %v10317_v35  ;;  %v10313_v48 = vld [vmem:[%s16390_s3 + $0x7f8] sm:$0xff]  ;;  %v10419_v35 = vld [vmem:[%s16390_s3 + $0xb20] sm:$0xff] }
 0x6dd   :  { %7651 = vmatprep.subr.mxu0 %v10322_v36  ;;  %7539 = vmatpush1.msra.mxu1 %v10316_v37  ;;  %v10351_v36 = vld [vmem:[%s16390_s3 + $0x918] sm:$0xff]  ;;  %v10350_v37 = vld [vmem:[%s16390_s3 + $0x910] sm:$0xff] }
 0x6de   :  { %7652 = vmatpush1.msra.mxu0 %v10321_v39  ;;  %7540 = vmatprep.subr.mxu1 %v10315_v41  ;;  %v10417_v39 = vld [vmem:[%s16390_s3 + $0xb10] sm:$0xff]  ;;  %v10349_v41 = vld [vmem:[%s16390_s3 + $0x908] sm:$0xff] }
 0x6df   :  { %7653 = vmatprep.subr.mxu0 %v10320_v44  ;;  %7541 = vmatpush1.msra.mxu1 %v10314_v46  ;;  %v10416_v44 = vld [vmem:[%s16390_s3 + $0xb08] sm:$0xff]  ;;  %v10348_v46 = vld [vmem:[%s16390_s3 + $0x900] sm:$0xff] }
 0x6e0   :  { %7654 = vmatpush1.msra.mxu0 %v10319_v47  ;;  %7687 = vmatprep.mubr.f32.mxu0 %v11402_v12  ;;  %v10415_v47 = vld [vmem:[%s16390_s3 + $0xb00] sm:$0xff] }
 0x6e1   :  { %7542 = vmatprep.subr.mxu1 %v10313_v48  ;;  %10339 = vmatmul.mubr.msk.f32.vlgmr.msra.gmra.mxu0 %vm1748_vm4, %v7620_v53  ;;  %v10347_v48 = vld [vmem:[%s16390_s3 + $0x8f8] sm:$0xff]  ;;  %v10413_v53 = vld [vmem:[%s16390_s3 + $0xaf0] sm:$0xff] }
 0x6e2   :  { %7830 = vmatprep.subr.mxu0 %v10380_v49  ;;  %7543 = vmatpush1.msra.mxu1 %v10312_v50  ;;  %v10414_v49 = vld [vmem:[%s16390_s3 + $0xaf8] sm:$0xff]  ;;  %v10346_v50 = vld [vmem:[%s16390_s3 + $0x8f0] sm:$0xff] }
 0x6e3   :  { %7831 = vmatpush1.msra.mxu0 %v10379_v40  ;;  %7544 = vmatprep.subr.mxu1 %v10311_v43  ;;  %v10345_v40 = vld [vmem:[%s16390_s3 + $0x8e8] sm:$0xff] }
 0x6e4   :  { %7832 = vmatprep.subr.mxu0 %v10378_v52  ;;  %7545 = vmatpush1.msra.mxu1 %v10310_v54  ;;  %v10412_v43 = vld [vmem:[%s16390_s3 + $0xae8] sm:$0xff]  ;;  %v10344_v52 = vld [vmem:[%s16390_s3 + $0x8e0] sm:$0xff] }
 0x6e5   :  { %7833 = vmatpush1.msra.mxu0 %v10377_v42  ;;  %7546 = vmatprep.subr.mxu1 %v10309_v56  ;;  %v10411_v54 = vld [vmem:[%s16390_s3 + $0xae0] sm:$0xff]  ;;  %v10343_v42 = vld [vmem:[%s16390_s3 + $0x8d8] sm:$0xff] }
 0x6e6   :  { %7834 = vmatprep.subr.mxu0 %v10376_v57  ;;  %7547 = vmatpush1.msra.mxu1 %v10308_v58  ;;  %v10410_v56 = vld [vmem:[%s16390_s3 + $0xad8] sm:$0xff]  ;;  %v10342_v57 = vld [vmem:[%s16390_s3 + $0x8d0] sm:$0xff] }
 0x6e7   :  { %7835 = vmatpush1.msra.mxu0 %v10375_v34  ;;  %7548 = vmatprep.subr.mxu1 %v10307_v8  ;;  %v10409_v58 = vld [vmem:[%s16390_s3 + $0xad0] sm:$0xff]  ;;  %v10341_v34 = vld [vmem:[%s16390_s3 + $0x8c8] sm:$0xff] }
 0x6e8   :  { %7836 = vmatprep.subr.mxu0 %v10374_v60  ;;  %7549 = vmatpush1.msra.mxu1 %v10306_v61  ;;  %v10408_v8 = vld [vmem:[%s16390_s3 + $0xac8] sm:$0xff]  ;;  %v10340_v60 = vld [vmem:[%s16390_s3 + $0x8c0] sm:$0xff] }
 0x6e9   :  { %7837 = vmatpush1.msra.mxu0 %v10373_v62  ;;  %7550 = vmatprep.subr.mxu1 %v10305_v0  ;;  %v10407_v61 = vld [vmem:[%s16390_s3 + $0xac0] sm:$0xff]  ;;  %v10401_v62 = vld [vmem:[%s16390_s3 + $0xa98] sm:$0xff]  ;;  %v7717_v0 = vpop.permute.xlu1 %7716 }
 0x6ea   :  { %7838 = vmatprep.subr.mxu0 %v10372_v1  ;;  %7551 = vmatpush1.msra.mxu1 %v10304_v2  ;;  %v10406_v1 = vld [vmem:[%s16390_s3 + $0xab8] sm:$0xff]  ;;  %v10400_v2 = vld [vmem:[%s16390_s3 + $0xa90] sm:$0xff] }
 0x6eb   :  { %7839 = vmatpush1.msra.mxu0 %v10371_v3  ;;  %7552 = vmatprep.subr.mxu1 %v10303_v11  ;;  %v10405_v3 = vld [vmem:[%s16390_s3 + $0xab0] sm:$0xff]  ;;  %v10399_v11 = vld [vmem:[%s16390_s3 + $0xa88] sm:$0xff] }
 0x6ec   :  { %7840 = vmatprep.subr.mxu0 %v10370_v15  ;;  %7553 = vmatpush1.msra.mxu1 %v10302_v16  ;;  %v10404_v15 = vld [vmem:[%s16390_s3 + $0xaa8] sm:$0xff]  ;;  %v10398_v16 = vld [vmem:[%s16390_s3 + $0xa80] sm:$0xff] }
 0x6ed   :  { %7841 = vmatpush1.msra.mxu0 %v10369_v4  ;;  %7554 = vmatprep.subr.mxu1 %v10301_v7  ;;  %v10403_v4 = vld [vmem:[%s16390_s3 + $0xaa0] sm:$0xff]  ;;  %v10397_v7 = vld [vmem:[%s16390_s3 + $0xa78] sm:$0xff] }
 0x6ee   :  { %7842 = vmatprep.subr.mxu0 %v10368_v19  ;;  %7555 = vmatpush1.msra.mxu1 %v10300_v13  ;;  %v10464_v19 = vld [vmem:[%s16390_s3 + $0xc78] sm:$0xff]  ;;  %v10396_v13 = vld [vmem:[%s16390_s3 + $0xa70] sm:$0xff] }
 0x6ef   :  { %7843 = vmatpush1.msra.mxu0 %v10367_v20  ;;  %7556 = vmatprep.subr.mxu1 %v10299_v6  ;;  %v8009_v20 = vpop.permute.xlu1 %8008  ;;  %v10463_v6 = vld [vmem:[%s16390_s3 + $0xc70] sm:$0xff] }
 0x6f0   :  { %7844 = vmatprep.subr.mxu0 %v10366_v23  ;;  %7557 = vmatpush1.msra.mxu1 %v10298_v21  ;;  %v10395_v23 = vld [vmem:[%s16390_s3 + $0xa68] sm:$0xff] }
 0x6f1   :  { %7590 = vmatprep.mubr.f32.mxu1 %v11402_v12  ;;  %7845 = vmatpush1.msra.mxu0 %v10365_v22  ;;  %v10462_v21 = vld [vmem:[%s16390_s3 + $0xc68] sm:$0xff]  ;;  %v10394_v22 = vld [vmem:[%s16390_s3 + $0xa60] sm:$0xff] }
 0x6f2   :  { %10318 = vmatmul.mubr.msk.f32.vlgmr.msra.gmra.mxu1 %vm1748_vm4, %v7523_v9  ;;  %7732 = vmatprep.subr.mxu1 %v10359_v24  ;;  %v10461_v24 = vld [vmem:[%s16390_s3 + $0xc60] sm:$0xff]  ;;  %v10392_v9 = vld [vmem:[%s16390_s3 + $0xa50] sm:$0xff] }
 0x6f3   :  { %7846 = vmatprep.subr.mxu0 %v10364_v25  ;;  %7733 = vmatpush1.msra.mxu1 %v10358_v5  ;;  %v10393_v25 = vld [vmem:[%s16390_s3 + $0xa58] sm:$0xff] }
 0x6f4   :  { %7847 = vmatpush1.msra.mxu0 %v10363_v63  ;;  %7734 = vmatprep.subr.mxu1 %v10357_v17  ;;  %v10460_v5 = vld [vmem:[%s16390_s3 + $0xc58] sm:$0xff]  ;;  %v10459_v63 = vld [vmem:[%s16390_s3 + $0xc50] sm:$0xff]  ;;  %v10391_v17 = vld [vmem:[%s16390_s3 + $0xa48] sm:$0xff] }
 0x6f5   :  { %7848 = vmatprep.subr.mxu0 %v10362_v26  ;;  %7735 = vmatpush1.msra.mxu1 %v10356_v10  ;;  %v10458_v26 = vld [vmem:[%s16390_s3 + $0xc48] sm:$0xff]  ;;  %v10390_v10 = vld [vmem:[%s16390_s3 + $0xa40] sm:$0xff] }
 0x6f6   :  { %7849 = vmatpush1.msra.mxu0 %v10361_v14  ;;  %7882 = vmatprep.mubr.f32.mxu0 %v11402_v12  ;;  %v10457_v14 = vld [vmem:[%s16390_s3 + $0xc40] sm:$0xff] }
 0x6f7   :  { %7736 = vmatprep.subr.mxu1 %v10355_v27  ;;  %10381 = vmatmul.mubr.msk.f32.vlgmr.msra.gmra.mxu0 %vm1748_vm4, %v14627_v45  ;;  %v10418_v45 = vld [vmem:[%s16390_s3 + $0xb18] sm:$0xff] }
 0x6f8   :  { %8024 = vmatprep.subr.mxu0 %v10422_v28  ;;  %7737 = vmatpush1.msra.mxu1 %v10354_v29  ;;  %v10389_v27 = vld [vmem:[%s16390_s3 + $0xa38] sm:$0xff]  ;;  %v10388_v29 = vld [vmem:[%s16390_s3 + $0xa30] sm:$0xff] }
 0x6f9   :  { %8025 = vmatpush1.msra.mxu0 %v10421_v30  ;;  %7738 = vmatprep.subr.mxu1 %v10353_v31  ;;  %v10456_v28 = vld [vmem:[%s16390_s3 + $0xc38] sm:$0xff]  ;;  %v10455_v30 = vld [vmem:[%s16390_s3 + $0xc30] sm:$0xff]  ;;  %v10387_v31 = vld [vmem:[%s16390_s3 + $0xa28] sm:$0xff] }
 0x6fa   :  { %8026 = vmatprep.subr.mxu0 %v10420_v32  ;;  %7739 = vmatpush1.msra.mxu1 %v10352_v33  ;;  %v10454_v32 = vld [vmem:[%s16390_s3 + $0xc28] sm:$0xff]  ;;  %v10386_v33 = vld [vmem:[%s16390_s3 + $0xa20] sm:$0xff] }
 0x6fb   :  { %8027 = vmatpush1.msra.mxu0 %v10419_v35  ;;  %7740 = vmatprep.subr.mxu1 %v10351_v36  ;;  %v10453_v35 = vld [vmem:[%s16390_s3 + $0xc20] sm:$0xff]  ;;  %v10385_v36 = vld [vmem:[%s16390_s3 + $0xa18] sm:$0xff] }
 0x6fc   :  { %8028 = vmatprep.subr.mxu0 %v10418_v45  ;;  %7741 = vmatpush1.msra.mxu1 %v10350_v37  ;;  %v10452_v45 = vld [vmem:[%s16390_s3 + $0xc18] sm:$0xff]  ;;  %v10384_v37 = vld [vmem:[%s16390_s3 + $0xa10] sm:$0xff] }
 0x6fd   :  { %8029 = vmatpush1.msra.mxu0 %v10417_v39  ;;  %7742 = vmatprep.subr.mxu1 %v10349_v41  ;;  %v10451_v39 = vld [vmem:[%s16390_s3 + $0xc10] sm:$0xff]  ;;  %v10383_v41 = vld [vmem:[%s16390_s3 + $0xa08] sm:$0xff] }
 0x6fe   :  { %8030 = vmatprep.subr.mxu0 %v10416_v44  ;;  %7743 = vmatpush1.msra.mxu1 %v10348_v46  ;;  %v10450_v44 = vld [vmem:[%s16390_s3 + $0xc08] sm:$0xff]  ;;  %v10382_v46 = vld [vmem:[%s16390_s3 + $0xa00] sm:$0xff] }
 0x6ff   :  { %8031 = vmatpush1.msra.mxu0 %v10415_v47  ;;  %7744 = vmatprep.subr.mxu1 %v10347_v48  ;;  %v10449_v47 = vld [vmem:[%s16390_s3 + $0xc00] sm:$0xff]  ;;  %v10443_v48 = vld [vmem:[%s16390_s3 + $0xbd8] sm:$0xff] }
 0x700   :  { %8032 = vmatprep.subr.mxu0 %v10414_v49  ;;  %7745 = vmatpush1.msra.mxu1 %v10346_v50  ;;  %v10448_v49 = vld [vmem:[%s16390_s3 + $0xbf8] sm:$0xff]  ;;  %v10442_v50 = vld [vmem:[%s16390_s3 + $0xbd0] sm:$0xff] }
 0x701   :  { %8033 = vmatpush1.msra.mxu0 %v10413_v53  ;;  %7746 = vmatprep.subr.mxu1 %v10345_v40  ;;  %v7912_v53 = vpop.permute.xlu0 %7911  ;;  %v10447_v40 = vld [vmem:[%s16390_s3 + $0xbf0] sm:$0xff] }
 0x702   :  { %8034 = vmatprep.subr.mxu0 %v10412_v43  ;;  %7747 = vmatpush1.msra.mxu1 %v10344_v52  ;;  %v10441_v43 = vld [vmem:[%s16390_s3 + $0xbc8] sm:$0xff] }
 0x703   :  { %8035 = vmatpush1.msra.mxu0 %v10411_v54  ;;  %7748 = vmatprep.subr.mxu1 %v10343_v42  ;;  %v10446_v52 = vld [vmem:[%s16390_s3 + $0xbe8] sm:$0xff]  ;;  %v10440_v54 = vld [vmem:[%s16390_s3 + $0xbc0] sm:$0xff] }
 0x704   :  { %8036 = vmatprep.subr.mxu0 %v10410_v56  ;;  %7749 = vmatpush1.msra.mxu1 %v10342_v57  ;;  %v10445_v42 = vld [vmem:[%s16390_s3 + $0xbe0] sm:$0xff]  ;;  %v10439_v56 = vld [vmem:[%s16390_s3 + $0xbb8] sm:$0xff] }
 0x705   :  { %8037 = vmatpush1.msra.mxu0 %v10409_v58  ;;  %7750 = vmatprep.subr.mxu1 %v10341_v34  ;;  %v10506_v57 = vld [vmem:[%s16390_s3 + $0xdb8] sm:$0xff]  ;;  %v10438_v58 = vld [vmem:[%s16390_s3 + $0xbb0] sm:$0xff]  ;;  %v8203_v34 = vpop.permute.xlu1 %8202 }
 0x706   :  { %8038 = vmatprep.subr.mxu0 %v10408_v8  ;;  %7751 = vmatpush1.msra.mxu1 %v10340_v60  ;;  %v10505_v8 = vld [vmem:[%s16390_s3 + $0xdb0] sm:$0xff]  ;;  %v10437_v60 = vld [vmem:[%s16390_s3 + $0xba8] sm:$0xff] }
 0x707   :  { %7784 = vmatprep.mubr.f32.mxu1 %v11402_v12  ;;  %8039 = vmatpush1.msra.mxu0 %v10407_v61  ;;  %v10504_v61 = vld [vmem:[%s16390_s3 + $0xda8] sm:$0xff] }
 0x708   :  { %10360 = vmatmul.mubr.msk.f32.vlgmr.msra.gmra.mxu1 %vm1748_vm4, %v7717_v0  ;;  %7927 = vmatprep.subr.mxu1 %v10401_v62  ;;  %v10436_v62 = vld [vmem:[%s16390_s3 + $0xba0] sm:$0xff] }
 0x709   :  { %8040 = vmatprep.subr.mxu0 %v10406_v1  ;;  %7928 = vmatpush1.msra.mxu1 %v10400_v2  ;;  %v10503_v0 = vld [vmem:[%s16390_s3 + $0xda0] sm:$0xff]  ;;  %v10435_v1 = vld [vmem:[%s16390_s3 + $0xb98] sm:$0xff] }
 0x70a   :  { %8041 = vmatpush1.msra.mxu0 %v10405_v3  ;;  %7929 = vmatprep.subr.mxu1 %v10399_v11  ;;  %v10502_v2 = vld [vmem:[%s16390_s3 + $0xd98] sm:$0xff]  ;;  %v10434_v3 = vld [vmem:[%s16390_s3 + $0xb90] sm:$0xff] }
 0x70b   :  { %8042 = vmatprep.subr.mxu0 %v10404_v15  ;;  %7930 = vmatpush1.msra.mxu1 %v10398_v16  ;;  %v10501_v11 = vld [vmem:[%s16390_s3 + $0xd90] sm:$0xff]  ;;  %v10433_v15 = vld [vmem:[%s16390_s3 + $0xb88] sm:$0xff] }
 0x70c   :  { %8043 = vmatpush1.msra.mxu0 %v10403_v4  ;;  %8076 = vmatprep.mubr.f32.mxu0 %v11402_v12  ;;  %v10500_v16 = vld [vmem:[%s16390_s3 + $0xd88] sm:$0xff]  ;;  %v10432_v4 = vld [vmem:[%s16390_s3 + $0xb80] sm:$0xff] }
 0x70d   :  { %7931 = vmatprep.subr.mxu1 %v10397_v7  ;;  %10423 = vmatmul.mubr.msk.f32.vlgmr.msra.gmra.mxu0 %vm1748_vm4, %v8009_v20  ;;  %v10499_v7 = vld [vmem:[%s16390_s3 + $0xd80] sm:$0xff]  ;;  %v10430_v20 = vld [vmem:[%s16390_s3 + $0xb70] sm:$0xff] }
 0x70e   :  { %8218 = vmatprep.subr.mxu0 %v10464_v19  ;;  %7932 = vmatpush1.msra.mxu1 %v10396_v13  ;;  %v10431_v19 = vld [vmem:[%s16390_s3 + $0xb78] sm:$0xff] }
 0x70f   :  { %8219 = vmatpush1.msra.mxu0 %v10463_v6  ;;  %7933 = vmatprep.subr.mxu1 %v10395_v23  ;;  %v10498_v13 = vld [vmem:[%s16390_s3 + $0xd78] sm:$0xff]  ;;  %v10497_v6 = vld [vmem:[%s16390_s3 + $0xd70] sm:$0xff]  ;;  %v10429_v23 = vld [vmem:[%s16390_s3 + $0xb68] sm:$0xff] }
 0x710   :  { %8220 = vmatprep.subr.mxu0 %v10462_v21  ;;  %7934 = vmatpush1.msra.mxu1 %v10394_v22  ;;  %v10496_v21 = vld [vmem:[%s16390_s3 + $0xd68] sm:$0xff]  ;;  %v10428_v22 = vld [vmem:[%s16390_s3 + $0xb60] sm:$0xff] }
 0x711   :  { %8221 = vmatpush1.msra.mxu0 %v10461_v24  ;;  %7935 = vmatprep.subr.mxu1 %v10393_v25  ;;  %v10495_v24 = vld [vmem:[%s16390_s3 + $0xd60] sm:$0xff]  ;;  %v10427_v25 = vld [vmem:[%s16390_s3 + $0xb58] sm:$0xff] }
 0x712   :  { %8222 = vmatprep.subr.mxu0 %v10460_v5  ;;  %7936 = vmatpush1.msra.mxu1 %v10392_v9  ;;  %v10494_v5 = vld [vmem:[%s16390_s3 + $0xd58] sm:$0xff]  ;;  %v10426_v9 = vld [vmem:[%s16390_s3 + $0xb50] sm:$0xff] }
 0x713   :  { %8223 = vmatpush1.msra.mxu0 %v10459_v63  ;;  %7937 = vmatprep.subr.mxu1 %v10391_v17  ;;  %v10493_v63 = vld [vmem:[%s16390_s3 + $0xd50] sm:$0xff]  ;;  %v10425_v17 = vld [vmem:[%s16390_s3 + $0xb48] sm:$0xff] }
 0x714   :  { %8224 = vmatprep.subr.mxu0 %v10458_v26  ;;  %7938 = vmatpush1.msra.mxu1 %v10390_v10  ;;  %v10492_v26 = vld [vmem:[%s16390_s3 + $0xd48] sm:$0xff]  ;;  %v10424_v10 = vld [vmem:[%s16390_s3 + $0xb40] sm:$0xff] }
 0x715   :  { %8225 = vmatpush1.msra.mxu0 %v10457_v14  ;;  %7939 = vmatprep.subr.mxu1 %v10389_v27  ;;  %v10491_v14 = vld [vmem:[%s16390_s3 + $0xd40] sm:$0xff]  ;;  %v10485_v27 = vld [vmem:[%s16390_s3 + $0xd18] sm:$0xff] }
 0x716   :  { %8226 = vmatprep.subr.mxu0 %v10456_v28  ;;  %7940 = vmatpush1.msra.mxu1 %v10388_v29  ;;  %v8106_v28 = vpop.permute.xlu0 %8105  ;;  %v10490_v29 = vld [vmem:[%s16390_s3 + $0xd38] sm:$0xff] }
 0x717   :  { %8227 = vmatpush1.msra.mxu0 %v10455_v30  ;;  %7941 = vmatprep.subr.mxu1 %v10387_v31  ;;  %v10484_v30 = vld [vmem:[%s16390_s3 + $0xd10] sm:$0xff] }
 0x718   :  { %8228 = vmatprep.subr.mxu0 %v10454_v32  ;;  %7942 = vmatpush1.msra.mxu1 %v10386_v33  ;;  %v10489_v31 = vld [vmem:[%s16390_s3 + $0xd30] sm:$0xff]  ;;  %v10483_v32 = vld [vmem:[%s16390_s3 + $0xd08] sm:$0xff] }
 0x719   :  { %8229 = vmatpush1.msra.mxu0 %v10453_v35  ;;  %7943 = vmatprep.subr.mxu1 %v10385_v36  ;;  %v10488_v33 = vld [vmem:[%s16390_s3 + $0xd28] sm:$0xff]  ;;  %v10482_v35 = vld [vmem:[%s16390_s3 + $0xd00] sm:$0xff] }
 0x71a   :  { %8230 = vmatprep.subr.mxu0 %v10452_v45  ;;  %7944 = vmatpush1.msra.mxu1 %v10384_v37  ;;  %v10487_v36 = vld [vmem:[%s16390_s3 + $0xd20] sm:$0xff]  ;;  %v10481_v45 = vld [vmem:[%s16390_s3 + $0xcf8] sm:$0xff] }
 0x71b   :  { %8231 = vmatpush1.msra.mxu0 %v10451_v39  ;;  %7945 = vmatprep.subr.mxu1 %v10383_v41  ;;  %v10548_v37 = vld [vmem:[%s16390_s3 + $0xef8] sm:$0xff]  ;;  %v10480_v39 = vld [vmem:[%s16390_s3 + $0xcf0] sm:$0xff]  ;;  %v8398_v41 = vpop.permute.xlu0 %8397 }
 0x71c   :  { %8232 = vmatprep.subr.mxu0 %v10450_v44  ;;  %7946 = vmatpush1.msra.mxu1 %v10382_v46  ;;  %v10547_v44 = vld [vmem:[%s16390_s3 + $0xef0] sm:$0xff]  ;;  %v10479_v46 = vld [vmem:[%s16390_s3 + $0xce8] sm:$0xff] }
 0x71d   :  { %7979 = vmatprep.mubr.f32.mxu1 %v11402_v12  ;;  %8233 = vmatpush1.msra.mxu0 %v10449_v47  ;;  %v10546_v47 = vld [vmem:[%s16390_s3 + $0xee8] sm:$0xff] }
 0x71e   :  { %10402 = vmatmul.mubr.msk.f32.vlgmr.msra.gmra.mxu1 %vm1748_vm4, %v7912_v53  ;;  %8121 = vmatprep.subr.mxu1 %v10443_v48  ;;  %v10478_v48 = vld [vmem:[%s16390_s3 + $0xce0] sm:$0xff]  ;;  %v10544_v53 = vld [vmem:[%s16390_s3 + $0xed8] sm:$0xff] }
 0x71f   :  { %8234 = vmatprep.subr.mxu0 %v10448_v49  ;;  %8122 = vmatpush1.msra.mxu1 %v10442_v50  ;;  %v10545_v49 = vld [vmem:[%s16390_s3 + $0xee0] sm:$0xff]  ;;  %v10477_v50 = vld [vmem:[%s16390_s3 + $0xcd8] sm:$0xff] }
 0x720   :  { %8235 = vmatpush1.msra.mxu0 %v10447_v40  ;;  %8123 = vmatprep.subr.mxu1 %v10441_v43  ;;  %v10476_v40 = vld [vmem:[%s16390_s3 + $0xcd0] sm:$0xff] }
 0x721   :  { %8236 = vmatprep.subr.mxu0 %v10446_v52  ;;  %8124 = vmatpush1.msra.mxu1 %v10440_v54  ;;  %v10543_v43 = vld [vmem:[%s16390_s3 + $0xed0] sm:$0xff]  ;;  %v10475_v52 = vld [vmem:[%s16390_s3 + $0xcc8] sm:$0xff] }
 0x722   :  { %8237 = vmatpush1.msra.mxu0 %v10445_v42  ;;  %8270 = vmatprep.mubr.f32.mxu0 %v11402_v12  ;;  %v10542_v54 = vld [vmem:[%s16390_s3 + $0xec8] sm:$0xff]  ;;  %v10474_v42 = vld [vmem:[%s16390_s3 + $0xcc0] sm:$0xff] }
 0x723   :  { %8125 = vmatprep.subr.mxu1 %v10439_v56  ;;  %10465 = vmatmul.mubr.msk.f32.vlgmr.msra.gmra.mxu0 %vm1748_vm4, %v8203_v34  ;;  %v10541_v56 = vld [vmem:[%s16390_s3 + $0xec0] sm:$0xff]  ;;  %v10472_v34 = vld [vmem:[%s16390_s3 + $0xcb0] sm:$0xff] }
 0x724   :  { %8413 = vmatprep.subr.mxu0 %v10506_v57  ;;  %8126 = vmatpush1.msra.mxu1 %v10438_v58  ;;  %v10473_v57 = vld [vmem:[%s16390_s3 + $0xcb8] sm:$0xff] }
 0x725   :  { %8414 = vmatpush1.msra.mxu0 %v10505_v8  ;;  %8127 = vmatprep.subr.mxu1 %v10437_v60  ;;  %v10540_v58 = vld [vmem:[%s16390_s3 + $0xeb8] sm:$0xff]  ;;  %v10539_v8 = vld [vmem:[%s16390_s3 + $0xeb0] sm:$0xff]  ;;  %v10471_v60 = vld [vmem:[%s16390_s3 + $0xca8] sm:$0xff] }
 0x726   :  { %8415 = vmatprep.subr.mxu0 %v10504_v61  ;;  %8128 = vmatpush1.msra.mxu1 %v10436_v62  ;;  %v10538_v61 = vld [vmem:[%s16390_s3 + $0xea8] sm:$0xff]  ;;  %v10470_v62 = vld [vmem:[%s16390_s3 + $0xca0] sm:$0xff] }
 0x727   :  { %8416 = vmatpush1.msra.mxu0 %v10503_v0  ;;  %8129 = vmatprep.subr.mxu1 %v10435_v1  ;;  %v10537_v0 = vld [vmem:[%s16390_s3 + $0xea0] sm:$0xff]  ;;  %v10469_v1 = vld [vmem:[%s16390_s3 + $0xc98] sm:$0xff] }
 0x728   :  { %8417 = vmatprep.subr.mxu0 %v10502_v2  ;;  %8130 = vmatpush1.msra.mxu1 %v10434_v3  ;;  %v10536_v2 = vld [vmem:[%s16390_s3 + $0xe98] sm:$0xff]  ;;  %v10468_v3 = vld [vmem:[%s16390_s3 + $0xc90] sm:$0xff] }
 0x729   :  { %8418 = vmatpush1.msra.mxu0 %v10501_v11  ;;  %8131 = vmatprep.subr.mxu1 %v10433_v15  ;;  %v10535_v11 = vld [vmem:[%s16390_s3 + $0xe90] sm:$0xff]  ;;  %v10467_v15 = vld [vmem:[%s16390_s3 + $0xc88] sm:$0xff] }
 0x72a   :  { %8419 = vmatprep.subr.mxu0 %v10500_v16  ;;  %8132 = vmatpush1.msra.mxu1 %v10432_v4  ;;  %v10534_v16 = vld [vmem:[%s16390_s3 + $0xe88] sm:$0xff]  ;;  %v10466_v4 = vld [vmem:[%s16390_s3 + $0xc80] sm:$0xff] }
 0x72b   :  { %8420 = vmatpush1.msra.mxu0 %v10499_v7  ;;  %8133 = vmatprep.subr.mxu1 %v10431_v19  ;;  %v10533_v7 = vld [vmem:[%s16390_s3 + $0xe80] sm:$0xff]  ;;  %v10527_v19 = vld [vmem:[%s16390_s3 + $0xe58] sm:$0xff] }
 0x72c   :  { %8421 = vmatprep.subr.mxu0 %v10498_v13  ;;  %8134 = vmatpush1.msra.mxu1 %v10430_v20  ;;  %v10532_v13 = vld [vmem:[%s16390_s3 + $0xe78] sm:$0xff]  ;;  %v10526_v20 = vld [vmem:[%s16390_s3 + $0xe50] sm:$0xff] }
 0x72d   :  { %8422 = vmatpush1.msra.mxu0 %v10497_v6  ;;  %8135 = vmatprep.subr.mxu1 %v10429_v23  ;;  %v10531_v6 = vld [vmem:[%s16390_s3 + $0xe70] sm:$0xff]  ;;  %v10525_v23 = vld [vmem:[%s16390_s3 + $0xe48] sm:$0xff] }
 0x72e   :  { %8423 = vmatprep.subr.mxu0 %v10496_v21  ;;  %8136 = vmatpush1.msra.mxu1 %v10428_v22  ;;  %v10530_v21 = vld [vmem:[%s16390_s3 + $0xe68] sm:$0xff]  ;;  %v10524_v22 = vld [vmem:[%s16390_s3 + $0xe40] sm:$0xff] }
 0x72f   :  { %8424 = vmatpush1.msra.mxu0 %v10495_v24  ;;  %8137 = vmatprep.subr.mxu1 %v10427_v25  ;;  %v10529_v24 = vld [vmem:[%s16390_s3 + $0xe60] sm:$0xff]  ;;  %v10522_v25 = vld [vmem:[%s16390_s3 + $0xe30] sm:$0xff] }
 0x730   :  { %8425 = vmatprep.subr.mxu0 %v10494_v5  ;;  %8138 = vmatpush1.msra.mxu1 %v10426_v9  ;;  %v8592_v5 = vpop.permute.xlu0 %8591  ;;  %v10521_v9 = vld [vmem:[%s16390_s3 + $0xe28] sm:$0xff] }
 0x731   :  { %8426 = vmatpush1.msra.mxu0 %v10493_v63  ;;  %8139 = vmatprep.subr.mxu1 %v10425_v17  ;;  %v10520_v63 = vld [vmem:[%s16390_s3 + $0xe20] sm:$0xff]  ;;  %v10519_v17 = vld [vmem:[%s16390_s3 + $0xe18] sm:$0xff] }
 0x732   :  { %8427 = vmatprep.subr.mxu0 %v10492_v26  ;;  %8140 = vmatpush1.msra.mxu1 %v10424_v10  ;;  %v10518_v26 = vld [vmem:[%s16390_s3 + $0xe10] sm:$0xff]  ;;  %v10517_v10 = vld [vmem:[%s16390_s3 + $0xe08] sm:$0xff] }
 0x733   :  { %8173 = vmatprep.mubr.f32.mxu1 %v11402_v12  ;;  %8428 = vmatpush1.msra.mxu0 %v10491_v14  ;;  %v10516_v14 = vld [vmem:[%s16390_s3 + $0xe00] sm:$0xff] }
 0x734   :  { %10444 = vmatmul.mubr.msk.f32.vlgmr.msra.gmra.mxu1 %vm1748_vm4, %v8106_v28  ;;  %8316 = vmatprep.subr.mxu1 %v10485_v27  ;;  %v10515_v27 = vld [vmem:[%s16390_s3 + $0xdf8] sm:$0xff]  ;;  %v10514_v28 = vld [vmem:[%s16390_s3 + $0xdf0] sm:$0xff] }
 0x735   :  { %8429 = vmatprep.subr.mxu0 %v10490_v29  ;;  %8317 = vmatpush1.msra.mxu1 %v10484_v30  ;;  %v10513_v29 = vld [vmem:[%s16390_s3 + $0xde8] sm:$0xff]  ;;  %v10512_v30 = vld [vmem:[%s16390_s3 + $0xde0] sm:$0xff] }
 0x736   :  { %8430 = vmatpush1.msra.mxu0 %v10489_v31  ;;  %8318 = vmatprep.subr.mxu1 %v10483_v32  ;;  %v10511_v31 = vld [vmem:[%s16390_s3 + $0xdd8] sm:$0xff]  ;;  %v10510_v32 = vld [vmem:[%s16390_s3 + $0xdd0] sm:$0xff] }
 0x737   :  { %8431 = vmatprep.subr.mxu0 %v10488_v33  ;;  %8319 = vmatpush1.msra.mxu1 %v10482_v35  ;;  %v10509_v33 = vld [vmem:[%s16390_s3 + $0xdc8] sm:$0xff]  ;;  %v10508_v35 = vld [vmem:[%s16390_s3 + $0xdc0] sm:$0xff] }
 0x738   :  { %8432 = vmatpush1.msra.mxu0 %v10487_v36  ;;  %8465 = vmatprep.mubr.f32.mxu0 %v11402_v12  ;;  %v10569_v36 = vld [vmem:[%s16390_s3 + $0xf98] sm:$0xff] }
 0x739   :  { %8320 = vmatprep.subr.mxu1 %v10481_v45  ;;  %10507 = vmatmul.mubr.msk.f32.vlgmr.msra.gmra.mxu0 %vm1748_vm4, %v8398_v41  ;;  %v10568_v45 = vld [vmem:[%s16390_s3 + $0xf90] sm:$0xff]  ;;  %v10566_v41 = vld [vmem:[%s16390_s3 + $0xf80] sm:$0xff] }
 0x73a   :  { %8607 = vmatprep.subr.mxu0 %v10548_v37  ;;  %8321 = vmatpush1.msra.mxu1 %v10480_v39  ;;  %v8495_v37 = vpop.permute.xlu1 %8494  ;;  %v10567_v39 = vld [vmem:[%s16390_s3 + $0xf88] sm:$0xff] }
 0x73b   :  { %8608 = vmatpush1.msra.mxu0 %v10547_v44  ;;  %8322 = vmatprep.subr.mxu1 %v10479_v46  ;;  %v10565_v44 = vld [vmem:[%s16390_s3 + $0xf78] sm:$0xff]  ;;  %v10564_v46 = vld [vmem:[%s16390_s3 + $0xf70] sm:$0xff] }
 0x73c   :  { %8609 = vmatprep.subr.mxu0 %v10546_v47  ;;  %8323 = vmatpush1.msra.mxu1 %v10478_v48  ;;  %v10563_v47 = vld [vmem:[%s16390_s3 + $0xf68] sm:$0xff]  ;;  %v10562_v48 = vld [vmem:[%s16390_s3 + $0xf60] sm:$0xff] }
 0x73d   :  { %8610 = vmatpush1.msra.mxu0 %v10545_v49  ;;  %8324 = vmatprep.subr.mxu1 %v10477_v50  ;;  %v10561_v49 = vld [vmem:[%s16390_s3 + $0xf58] sm:$0xff]  ;;  %v10560_v50 = vld [vmem:[%s16390_s3 + $0xf50] sm:$0xff] }
 0x73e   :  { %8611 = vmatprep.subr.mxu0 %v10544_v53  ;;  %8325 = vmatpush1.msra.mxu1 %v10476_v40  ;;  %v10559_v53 = vld [vmem:[%s16390_s3 + $0xf48] sm:$0xff]  ;;  %v10558_v40 = vld [vmem:[%s16390_s3 + $0xf40] sm:$0xff] }
 0x73f   :  { %8612 = vmatpush1.msra.mxu0 %v10543_v43  ;;  %8326 = vmatprep.subr.mxu1 %v10475_v52  ;;  %v10557_v43 = vld [vmem:[%s16390_s3 + $0xf38] sm:$0xff]  ;;  %v10556_v52 = vld [vmem:[%s16390_s3 + $0xf30] sm:$0xff] }
 0x740   :  { %8613 = vmatprep.subr.mxu0 %v10542_v54  ;;  %8327 = vmatpush1.msra.mxu1 %v10474_v42  ;;  %v10555_v54 = vld [vmem:[%s16390_s3 + $0xf28] sm:$0xff]  ;;  %v10554_v42 = vld [vmem:[%s16390_s3 + $0xf20] sm:$0xff] }
 0x741   :  { %8614 = vmatpush1.msra.mxu0 %v10541_v56  ;;  %8328 = vmatprep.subr.mxu1 %v10473_v57  ;;  %v10553_v56 = vld [vmem:[%s16390_s3 + $0xf18] sm:$0xff]  ;;  %v10552_v57 = vld [vmem:[%s16390_s3 + $0xf10] sm:$0xff] }
 0x742   :  { %8615 = vmatprep.subr.mxu0 %v10540_v58  ;;  %8329 = vmatpush1.msra.mxu1 %v10472_v34  ;;  %v10551_v58 = vld [vmem:[%s16390_s3 + $0xf08] sm:$0xff]  ;;  %v10550_v34 = vld [vmem:[%s16390_s3 + $0xf00] sm:$0xff] }
 0x743   :  { %8616 = vmatpush1.msra.mxu0 %v10539_v8  ;;  %8330 = vmatprep.subr.mxu1 %v10471_v60  ;;  %v8689_v8 = vpop.permute.xlu1 %8688  ;;  %v8815_v60 = vld [vmem:[%s16393_s6 + $0x78] sm:$0xff] }
 0x744   :  { %8617 = vmatprep.subr.mxu0 %v10538_v61  ;;  %8331 = vmatpush1.msra.mxu1 %v10470_v62  ;;  %v10586_v61 = vld [vmem:[%s16393_s6 + $0x108] sm:$0xff]  ;;  %v8814_v62 = vld [vmem:[%s16393_s6 + $0x70] sm:$0xff] }
 0x745   :  { %8618 = vmatpush1.msra.mxu0 %v10537_v0  ;;  %8332 = vmatprep.subr.mxu1 %v10469_v1  ;;  %v10585_v0 = vld [vmem:[%s16393_s6 + $0x100] sm:$0xff]  ;;  %v8813_v1 = vld [vmem:[%s16393_s6 + $0x68] sm:$0xff] }
 0x746   :  { %8619 = vmatprep.subr.mxu0 %v10536_v2  ;;  %8333 = vmatpush1.msra.mxu1 %v10468_v3  ;;  %v10584_v2 = vld [vmem:[%s16393_s6 + $0xf8] sm:$0xff]  ;;  %v8812_v3 = vld [vmem:[%s16393_s6 + $0x60] sm:$0xff] }
 0x747   :  { %8620 = vmatpush1.msra.mxu0 %v10535_v11  ;;  %8334 = vmatprep.subr.mxu1 %v10467_v15  ;;  %v10583_v11 = vld [vmem:[%s16393_s6 + $0xf0] sm:$0xff]  ;;  %v8811_v15 = vld [vmem:[%s16393_s6 + $0x58] sm:$0xff] }
 0x748   :  { %8621 = vmatprep.subr.mxu0 %v10534_v16  ;;  %8335 = vmatpush1.msra.mxu1 %v10466_v4  ;;  %v10582_v16 = vld [vmem:[%s16393_s6 + $0xe8] sm:$0xff]  ;;  %v8810_v4 = vld [vmem:[%s16393_s6 + $0x50] sm:$0xff] }
 0x749   :  { %8368 = vmatprep.mubr.f32.mxu1 %v11402_v12  ;;  %8622 = vmatpush1.msra.mxu0 %v10533_v7  ;;  %v10581_v7 = vld [vmem:[%s16393_s6 + $0xe0] sm:$0xff] }
 0x74a   :  { %10486 = vmatmul.mubr.msk.f32.vlgmr.msra.gmra.mxu1 %vm1748_vm4, %v14646_v59  ;;  %8510 = vmatprep.subr.mxu1 %v10527_v19  ;;  %v10523_v59 = vld [vmem:[%s16390_s3 + $0xe38] sm:$0xff]  ;;  %v8809_v19 = vld [vmem:[%s16393_s6 + $0x48] sm:$0xff] }
 0x74b   :  { %8623 = vmatprep.subr.mxu0 %v10532_v13  ;;  %8511 = vmatpush1.msra.mxu1 %v10526_v20  ;;  %v10580_v13 = vld [vmem:[%s16393_s6 + $0xd8] sm:$0xff]  ;;  %v6451_v20 = vpop.f32.mrf.mxu1 }
 0x74c   :  { %8624 = vmatpush1.msra.mxu0 %v10531_v6  ;;  %8512 = vmatprep.subr.mxu1 %v10525_v23  ;;  %v8808_v6 = vld [vmem:[%s16393_s6 + $0x40] sm:$0xff]  ;;  %v10579_v23 = vld [vmem:[%s16393_s6 + $0xd0] sm:$0xff] }
 0x74d   :  { %8625 = vmatprep.subr.mxu0 %v10530_v21  ;;  %8513 = vmatpush1.msra.mxu1 %v10524_v22  ;;  %v8807_v21 = vld [vmem:[%s16393_s6 + $0x38] sm:$0xff]  ;;  %v10578_v22 = vld [vmem:[%s16393_s6 + $0xc8] sm:$0xff] }
 0x74e   :  { %8626 = vmatpush1.msra.mxu0 %v10529_v24  ;;  %8659 = vmatprep.mubr.f32.mxu0 %v11402_v12  ;;  %v6453_v24 = vpop.f32.mrf.mxu1 }
 0x74f   :  { %8514 = vmatprep.subr.mxu1 %v10523_v59  ;;  %10549 = vmatmul.mubr.msk.f32.vlgmr.msra.gmra.mxu0 %vm1748_vm4, %v8592_v5  ;;  %v8806_v59 = vld [vmem:[%s16393_s6 + $0x30] sm:$0xff]  ;;  %v6524_v5 = vpop.f32.mrf.mxu0 }
 0x750   :  { %8515 = vmatpush1.msra.mxu1 %v10522_v25  ;;  %8562 = vmatprep.mubr.f32.mxu1 %v11402_v12  ;;  %v10577_v25 = vld [vmem:[%s16393_s6 + $0xc0] sm:$0xff] }
 0x751   :  { %8516 = vmatprep.subr.mxu1 %v10521_v9  ;;  %8846 = vmatprep.subr.mxu0 %v11402_v12  ;;  %v6619_v9 = vpop.f32.mrf.mxu1 }
 0x752   :  { %8517 = vmatpush1.msra.mxu1 %v10520_v63  ;;  %8847 = vmatpush1.msra.mxu0 %v10586_v61  ;;  %v8805_v63 = vld [vmem:[%s16393_s6 + $0x28] sm:$0xff] }
 0x753   :  { %8518 = vmatprep.subr.mxu1 %v10519_v17  ;;  %8848 = vmatprep.subr.mxu0 %v11402_v12  ;;  %v10576_v17 = vld [vmem:[%s16393_s6 + $0xb8] sm:$0xff] }
 0x754   :  { %8519 = vmatpush1.msra.mxu1 %v10518_v26  ;;  %8849 = vmatpush1.msra.mxu0 %v10585_v0  ;;  %v8804_v26 = vld [vmem:[%s16393_s6 + $0x20] sm:$0xff] }
 0x755   :  { %8520 = vmatprep.subr.mxu1 %v10517_v10  ;;  %8850 = vmatprep.subr.mxu0 %v11402_v12  ;;  %v10575_v10 = vld [vmem:[%s16393_s6 + $0xb0] sm:$0xff] }
 0x756   :  { %8521 = vmatpush1.msra.mxu1 %v10516_v14  ;;  %8851 = vmatpush1.msra.mxu0 %v10584_v2  ;;  %v6525_v14 = vadd.f32 %v6524_v5, %v6451_v20 }
 0x757   :  { %8522 = vmatprep.subr.mxu1 %v10515_v27  ;;  %8852 = vmatprep.subr.mxu0 %v11402_v12  ;;  %v6526_v27 = vpop.f32.mrf.mxu0 }
 0x758   :  { %8523 = vmatpush1.msra.mxu1 %v10514_v28  ;;  %8853 = vmatpush1.msra.mxu0 %v10583_v11  ;;  %v6621_v28 = vpop.f32.mrf.mxu1 }
 0x759   :  { %8524 = vmatprep.subr.mxu1 %v10513_v29  ;;  %8854 = vmatprep.subr.mxu0 %v11402_v12  ;;  %v8803_v29 = vld [vmem:[%s16393_s6 + $0x18] sm:$0xff] }
 0x75a   :  { %8525 = vmatpush1.msra.mxu1 %v10512_v30  ;;  %8855 = vmatpush1.msra.mxu0 %v10582_v16  ;;  %v10574_v30 = vld [vmem:[%s16393_s6 + $0xa8] sm:$0xff] }
 0x75b   :  { %8526 = vmatprep.subr.mxu1 %v10511_v31  ;;  %8856 = vmatprep.subr.mxu0 %v11402_v12  ;;  %v6527_v31 = vadd.f32 %v6526_v27, %v6453_v24 }
 0x75c   :  { %8527 = vmatpush1.msra.mxu1 %v10510_v32  ;;  %8857 = vmatpush1.msra.mxu0 %v10581_v7  ;;  %v6624_v32 = vadd.f32 %v6619_v9, %v6525_v14 }
 0x75d   :  { %8528 = vmatprep.subr.mxu1 %v10509_v33  ;;  %8858 = vmatprep.subr.mxu0 %v11402_v12  ;;  %v6716_v33 = vpop.f32.mrf.mxu0 }
 0x75e   :  { %8529 = vmatpush1.msra.mxu1 %v10508_v35  ;;  %8859 = vmatpush1.msra.mxu0 %v10580_v13  ;;  %v6813_v35 = vpop.f32.mrf.mxu1 }
 0x75f   :  { %10528 = vmatmul.mubr.msk.f32.vlgmr.msra.gmra.mxu1 %vm1748_vm4, %v8495_v37  ;;  %8704 = vmatprep.subr.mxu1 %v10569_v36  ;;  %v8802_v36 = vld [vmem:[%s16393_s6 + $0x10] sm:$0xff]  ;;  %v6625_v37 = vadd.f32 %v6621_v28, %v6527_v31 }
 0x760   :  { %8705 = vmatpush1.msra.mxu1 %v10568_v45  ;;  %8756 = vmatprep.mubr.f32.mxu1 %v11402_v12  ;;  %v10573_v45 = vld [vmem:[%s16393_s6 + $0xa0] sm:$0xff] }
 0x761   :  { %8706 = vmatprep.subr.mxu1 %v10567_v39  ;;  %8860 = vmatprep.subr.mxu0 %v11402_v12  ;;  %v8801_v39 = vld [vmem:[%s16393_s6 + $0x8] sm:$0xff] }
 0x762   :  { %8707 = vmatpush1.msra.mxu1 %v10566_v41  ;;  %8861 = vmatpush1.msra.mxu0 %v10579_v23  ;;  %v6721_v41 = vadd.f32 %v6716_v33, %v6624_v32 }
 0x763   :  { %8708 = vmatprep.subr.mxu1 %v10565_v44  ;;  %8862 = vmatprep.subr.mxu0 %v11402_v12  ;;  %v6718_v44 = vpop.f32.mrf.mxu0 }
 0x764   :  { %8709 = vmatpush1.msra.mxu1 %v10564_v46  ;;  %8863 = vmatpush1.msra.mxu0 %v10578_v22  ;;  %v6815_v46 = vpop.f32.mrf.mxu1 }
 0x765   :  { %8710 = vmatprep.subr.mxu1 %v10563_v47  ;;  %8864 = vmatprep.subr.mxu0 %v11402_v12  ;;  %v6818_v47 = vadd.f32 %v6813_v35, %v6721_v41 }
 0x766   :  { %8711 = vmatpush1.msra.mxu1 %v10562_v48  ;;  %8865 = vmatpush1.msra.mxu0 %v10577_v25  ;;  %v6722_v48 = vadd.f32 %v6718_v44, %v6625_v37 }
 0x767   :  { %8712 = vmatprep.subr.mxu1 %v10561_v49  ;;  %8866 = vmatprep.subr.mxu0 %v11402_v12  ;;  %v6912_v49 = vpop.f32.mrf.mxu0 }
 0x768   :  { %8713 = vmatpush1.msra.mxu1 %v10560_v50  ;;  %8867 = vmatpush1.msra.mxu0 %v10576_v17 }
 0x769   :  { %8714 = vmatprep.subr.mxu1 %v10559_v53  ;;  %8868 = vmatprep.subr.mxu0 %v11402_v12  ;;  %v6819_v53 = vadd.f32 %v6815_v46, %v6722_v48 }
 0x76a   :  { %8715 = vmatpush1.msra.mxu1 %v10558_v40  ;;  %8869 = vmatpush1.msra.mxu0 %v10575_v10  ;;  %v6917_v40 = vadd.f32 %v6912_v49, %v6818_v47 }
 0x76b   :  { %8716 = vmatprep.subr.mxu1 %v10557_v43  ;;  %8870 = vmatprep.subr.mxu0 %v11402_v12  ;;  %v6914_v43 = vpop.f32.mrf.mxu0 }
 0x76c   :  { %8717 = vmatpush1.msra.mxu1 %v10556_v52  ;;  %8871 = vmatpush1.msra.mxu0 %v10574_v30 }
 0x76d   :  { %8718 = vmatprep.subr.mxu1 %v10555_v54  ;;  %8872 = vmatprep.subr.mxu0 %v11402_v12 }
 0x76e   :  { %8719 = vmatpush1.msra.mxu1 %v10554_v42  ;;  %8873 = vmatpush1.msra.mxu0 %v10573_v45  ;;  %v6918_v42 = vadd.f32 %v6914_v43, %v6819_v53 }
 0x76f   :  { %8720 = vmatprep.subr.mxu1 %v10553_v56  ;;  %8874 = vmatprep.subr.mxu0 %v11402_v12  ;;  %v7106_v56 = vpop.f32.mrf.mxu0 }
 0x770   :  { %8721 = vmatpush1.msra.mxu1 %v10552_v57  ;;  %v7009_v50 = vpop.f32.mrf.mxu1 }
 0x771   :  { %8722 = vmatprep.subr.mxu1 %v10551_v58  ;;  %v7014_v54 = vadd.f32 %v7009_v50, %v6917_v40 }
 0x772   :  { %8723 = vmatpush1.msra.mxu1 %v10550_v34  ;;  %v7011_v52 = vpop.f32.mrf.mxu1 }
 0x773   :  { %10570 = vmatmul.mubr.msk.f32.vlgmr.msra.gmra.mxu1 %vm1748_vm4, %v8689_v8  ;;  %8921 = vmatprep.subr.mxu1 %v11402_v12  ;;  %v7015_v58 = vadd.f32 %v7011_v52, %v6918_v42  ;;  %v7111_v34 = vadd.f32 %v7106_v56, %v7014_v54  ;;  %v7108_v8 = vpop.f32.mrf.mxu0 }
 0x774   :  { %8922 = vmatpush1.msra.mxu1 %v8815_v60 }
 0x775   :  { %8923 = vmatprep.subr.mxu1 %v11402_v12  ;;  %v7300_v0 = vpop.f32.mrf.mxu0 }
 0x776   :  { %8924 = vmatpush1.msra.mxu1 %v8814_v62  ;;  %v7112_v62 = vadd.f32 %v7108_v8, %v7015_v58 }
 0x777   :  { %8925 = vmatprep.subr.mxu1 %v11402_v12  ;;  %v7302_v11 = vpop.f32.mrf.mxu0 }
 0x778   :  { %8926 = vmatpush1.msra.mxu1 %v8813_v1 }
 0x779   :  { %8927 = vmatprep.subr.mxu1 %v11402_v12 }
 0x77a   :  { %8928 = vmatpush1.msra.mxu1 %v8812_v3 }
 0x77b   :  { %8929 = vmatprep.subr.mxu1 %v11402_v12 }
 0x77c   :  { %8930 = vmatpush1.msra.mxu1 %v8811_v15 }
 0x77d   :  { %8931 = vmatprep.subr.mxu1 %v11402_v12 }
 0x77e   :  { %8932 = vmatpush1.msra.mxu1 %v8810_v4 }
 0x77f   :  { %8933 = vmatprep.subr.mxu1 %v11402_v12 }
 0x780   :  { %8934 = vmatpush1.msra.mxu1 %v8809_v19 }
 0x781   :  { %8935 = vmatprep.subr.mxu1 %v11402_v12 }
 0x782   :  { %8936 = vmatpush1.msra.mxu1 %v8808_v6 }
 0x783   :  { %8937 = vmatprep.subr.mxu1 %v11402_v12 }
 0x784   :  { %8938 = vmatpush1.msra.mxu1 %v8807_v21 }
 0x785   :  { %8939 = vmatprep.subr.mxu1 %v11402_v12 }
 0x786   :  { %8940 = vmatpush1.msra.mxu1 %v8806_v59  ;;  %v7203_v57 = vpop.f32.mrf.mxu1 }
 0x787   :  { %8941 = vmatprep.subr.mxu1 %v11402_v12  ;;  %v7208_v61 = vadd.f32 %v7203_v57, %v7111_v34 }
 0x788   :  { %8942 = vmatpush1.msra.mxu1 %v8805_v63  ;;  %v7205_v60 = vpop.f32.mrf.mxu1 }
 0x789   :  { %8943 = vmatprep.subr.mxu1 %v11402_v12  ;;  %v7209_v2 = vadd.f32 %v7205_v60, %v7112_v62  ;;  %v7305_v3 = vadd.f32 %v7300_v0, %v7208_v61  ;;  %v10572_v60 = vld [vmem:[%s16393_s6 + $0x98] sm:$0xff]  ;;  %v8800_v61 = vld [vmem:[%s16393_s6] sm:$0xff] }
 0x78a   :  { %8944 = vmatpush1.msra.mxu1 %v8804_v26  ;;  %v8765_v0 = vld [vmem:[%s16392_s5] sm:$0x3]  ;;  %8875 = vmatpush1.msra.mxu0 %v10572_v60  ;;  %v10616_v60 = vld [vmem:[%s16393_s6 + $0x1c8] sm:$0xff] }
 0x78b   :  { %8945 = vmatprep.subr.mxu1 %v11402_v12  ;;  %v7306_v4 = vadd.f32 %v7302_v11, %v7209_v2  ;;  %v7495_v7 = vpop.f32.mrf.mxu0  ;;  %8876 = vmatprep.subr.mxu0 %v11402_v12  ;;  %v10571_v2 = vld [vmem:[%s16393_s6 + $0x90] sm:$0xff] }
 0x78c   :  { %8946 = vmatpush1.msra.mxu1 %v8803_v29  ;;  %8877 = vmatpush1.msra.mxu0 %v10571_v2  ;;  %v10594_v2 = vld [vmem:[%s16393_s6 + $0x128] sm:$0xff] }
 0x78d   :  { %8947 = vmatprep.subr.mxu1 %v11402_v12  ;;  %v7497_v6 = vpop.f32.mrf.mxu0  ;;  %8906 = vmatprep.subr.mxu0 %v11402_v12 }
 0x78e   :  { %8948 = vmatpush1.msra.mxu1 %v8802_v36 }
 0x78f   :  { %8949 = vmatprep.subr.mxu1 %v11402_v12 }
 0x790   :  { %8950 = vmatpush1.msra.mxu1 %v8801_v39 }
 0x791   :  { %8951 = vmatprep.subr.mxu1 %v11402_v12 }
 0x792   :  { %8952 = vmatpush1.msra.mxu1 %v8800_v61  ;;  %v10596_v61 = vld [vmem:[%s16393_s6 + $0x138] sm:$0xff] }
 0x793   :  { %8981 = vmatprep.subr.mxu1 %v11402_v12 }
 0x79c   :  { %v7398_v1 = vpop.f32.mrf.mxu1 }
 0x79d   :  { %v7403_v16 = vadd.f32 %v7398_v1, %v7305_v3  ;;  %v8817_v3 = vld [vmem:[%s16393_s6 + $0x88] sm:$0xf] }
 0x79e   :  { %v7400_v15 = vpop.f32.mrf.mxu1  ;;  %10591 = vmatpush2.msk.msra.mxu1 %vm56_vm0, %v8817_v3  ;;  %v10613_v3 = vld [vmem:[%s16393_s6 + $0x1b0] sm:$0xff] }
 0x79f   :  { %v7404_v13 = vadd.f32 %v7400_v15, %v7306_v4  ;;  %v7500_v20 = vadd.f32 %v7495_v7, %v7403_v16  ;;  %v8770_v15 = vrot.slane %v8765_v0, %v4159_v51  ;;  %8983 = vmatprep.subr.mxu1 %v11402_v12  ;;  %v10588_v7 = vld [vmem:[%s16393_s6 + $0x118] sm:$0xf]  ;;  %v8774_v51 = vrot.slane %v8765_v0, %v4163_v55  ;;  %v10595_v0 = vld [vmem:[%s16393_s6 + $0x130] sm:$0xff] }
 0x7a0   :  { %10589 = vmatpush2.msk.msra.mxu0 %vm56_vm0, %v10588_v7 }
 0x7a1   :  { %v7501_v22 = vadd.f32 %v7497_v6, %v7404_v13  ;;  %v7689_v24 = vpop.f32.mrf.mxu0  ;;  %8908 = vmatprep.subr.mxu0 %v11402_v12 }
 0x7a3   :  { %v7691_v9 = vpop.f32.mrf.mxu0 }
 0x7b2   :  { %v7592_v19 = vpop.f32.mrf.mxu1 }
 0x7b3   :  { %v7597_v21 = vadd.f32 %v7592_v19, %v7500_v20  ;;  %v8816_v19 = vld [vmem:[%s16393_s6 + $0x80] sm:$0xff] }
 0x7b4   :  { %v7594_v23 = vpop.f32.mrf.mxu1  ;;  %8984 = vmatpush2.msra.mxu1 %v8816_v19  ;;  %v10609_v19 = vld [vmem:[%s16393_s6 + $0x1a0] sm:$0xff] }
 0x7b5   :  { %v7598_v25 = vadd.f32 %v7594_v23, %v7501_v22  ;;  %v7694_v5 = vadd.f32 %v7689_v24, %v7597_v21  ;;  %9114 = vmatprep.subr.mxu1 %v11402_v12  ;;  %v10587_v23 = vld [vmem:[%s16393_s6 + $0x110] sm:$0xff] }
 0x7b6   :  { %8909 = vmatpush2.msra.mxu0 %v10587_v23 }
 0x7b7   :  { %v7695_v26 = vadd.f32 %v7691_v9, %v7598_v25  ;;  %v7884_v10 = vpop.f32.mrf.mxu0  ;;  %9017 = vmatprep.subr.mxu0 %v11402_v12 }
 0x7b9   :  { %v7886_v29 = vpop.f32.mrf.mxu0 }
 0x7c8   :  { %v7786_v59 = vpop.f32.mrf.mxu1 }
 0x7c9   :  { %v7791_v17 = vadd.f32 %v7786_v59, %v7694_v5  ;;  %v4590_v5 = vld [vmem:[%s16396_s9] sm:$0x1] }
 0x7ca   :  { %v7788_v63 = vpop.f32.mrf.mxu1  ;;  %v16181_v9 = vadd.f32 %v14458_v38, %v4590_v5  ;;  %v9188_v5 = vld [vmem:[%s16395_s8] sm:$0xff] }
 0x7cb   :  { %v7792_v27 = vadd.f32 %v7788_v63, %v7695_v26  ;;  %v7889_v28 = vadd.f32 %v7884_v10, %v7791_v17 }
 0x7cc   :  { %v4670_v63 = vsel %vm4669_vm11, %v16181_v9, -inf }
 0x7cd   :  { %v7890_v32 = vadd.f32 %v7886_v29, %v7792_v27  ;;  %v8078_v33 = vpop.f32.mrf.mxu0 }
 0x7cf   :  { %v8080_v37 = vpop.f32.mrf.mxu0 }
 0x7de   :  { %v7981_v14 = vpop.f32.mrf.mxu1 }
 0x7df   :  { %v7986_v31 = vadd.f32 %v7981_v14, %v7889_v28 }
 0x7e0   :  { %v7983_v30 = vpop.f32.mrf.mxu1 }
 0x7e1   :  { %v7987_v36 = vadd.f32 %v7983_v30, %v7890_v32  ;;  %v8083_v45 = vadd.f32 %v8078_v33, %v7986_v31  ;;  %v10628_v30 = vld [vmem:[%s16393_s6 + $0x228] sm:$0xff]  ;;  %v10627_v33 = vld [vmem:[%s16393_s6 + $0x220] sm:$0xff] }
 0x7e3   :  { %v8084_v44 = vadd.f32 %v8080_v37, %v7987_v36  ;;  %v8272_v46 = vpop.f32.mrf.mxu0  ;;  %v10626_v37 = vld [vmem:[%s16393_s6 + $0x218] sm:$0xff] }
 0x7e5   :  { %v8274_v50 = vpop.f32.mrf.mxu0 }
 0x7f4   :  { %v8175_v35 = vpop.f32.mrf.mxu1 }
 0x7f5   :  { %v8180_v41 = vadd.f32 %v8175_v35, %v8083_v45  ;;  %v10608_v35 = vld [vmem:[%s16393_s6 + $0x198] sm:$0xff]  ;;  %v10607_v45 = vld [vmem:[%s16393_s6 + $0x190] sm:$0xff] }
 0x7f6   :  { %v8177_v39 = vpop.f32.mrf.mxu1 }
 0x7f7   :  { %v8181_v48 = vadd.f32 %v8177_v39, %v8084_v44  ;;  %v8277_v49 = vadd.f32 %v8272_v46, %v8180_v41  ;;  %v10606_v39 = vld [vmem:[%s16393_s6 + $0x188] sm:$0xff]  ;;  %v10625_v41 = vld [vmem:[%s16393_s6 + $0x210] sm:$0xff]  ;;  %v10605_v44 = vld [vmem:[%s16393_s6 + $0x180] sm:$0xff] }
 0x7f8   :  { %v10624_v46 = vld [vmem:[%s16393_s6 + $0x208] sm:$0xff] }
 0x7f9   :  { %v8278_v43 = vadd.f32 %v8274_v50, %v8181_v48  ;;  %v8467_v52 = vpop.f32.mrf.mxu0  ;;  %v10623_v48 = vld [vmem:[%s16393_s6 + $0x200] sm:$0xff]  ;;  %v10622_v50 = vld [vmem:[%s16393_s6 + $0x1f8] sm:$0xff] }
 0x7fb   :  { %v8469_v57 = vpop.f32.mrf.mxu0 }
 0x80a   :  { %v8370_v47 = vpop.f32.mrf.mxu1 }
 0x80b   :  { %v8375_v40 = vadd.f32 %v8370_v47, %v8277_v49  ;;  %v10604_v47 = vld [vmem:[%s16393_s6 + $0x178] sm:$0xff]  ;;  %v10603_v49 = vld [vmem:[%s16393_s6 + $0x170] sm:$0xff] }
 0x80c   :  { %v8372_v53 = vpop.f32.mrf.mxu1 }
 0x80d   :  { %v8376_v42 = vadd.f32 %v8372_v53, %v8278_v43  ;;  %v8472_v56 = vadd.f32 %v8467_v52, %v8375_v40  ;;  %v10602_v53 = vld [vmem:[%s16393_s6 + $0x168] sm:$0xff]  ;;  %v10621_v40 = vld [vmem:[%s16393_s6 + $0x1f0] sm:$0xff]  ;;  %v10601_v43 = vld [vmem:[%s16393_s6 + $0x160] sm:$0xff] }
 0x80e   :  { %v10620_v52 = vld [vmem:[%s16393_s6 + $0x1e8] sm:$0xff] }
 0x80f   :  { %v8473_v8 = vadd.f32 %v8469_v57, %v8376_v42  ;;  %v8661_v62 = vpop.f32.mrf.mxu0  ;;  %v10619_v42 = vld [vmem:[%s16393_s6 + $0x1e0] sm:$0xff]  ;;  %v10618_v57 = vld [vmem:[%s16393_s6 + $0x1d8] sm:$0xff] }
 0x811   :  { %v8663_v16 = vpop.f32.mrf.mxu0 }
 0x81f   :  { %v8564_v54 = vpop.f32.mrf.mxu1 }
 0x820   :  { %v8569_v34 = vadd.f32 %v8564_v54, %v8472_v56  ;;  %v10600_v54 = vld [vmem:[%s16393_s6 + $0x158] sm:$0xff]  ;;  %v10599_v56 = vld [vmem:[%s16393_s6 + $0x150] sm:$0xff] }
 0x821   :  { %v8566_v58 = vpop.f32.mrf.mxu1 }
 0x822   :  { %v8570_v1 = vadd.f32 %v8566_v58, %v8473_v8  ;;  %v8666_v11 = vadd.f32 %v8661_v62, %v8569_v34  ;;  %v10598_v58 = vld [vmem:[%s16393_s6 + $0x148] sm:$0xff]  ;;  %v10617_v34 = vld [vmem:[%s16393_s6 + $0x1d0] sm:$0xff]  ;;  %v10597_v8 = vld [vmem:[%s16393_s6 + $0x140] sm:$0xff] }
 0x823   :  { %v10615_v62 = vld [vmem:[%s16393_s6 + $0x1c0] sm:$0xff] }
 0x824   :  { %v8667_v20 = vadd.f32 %v8663_v16, %v8570_v1  ;;  %v10614_v1 = vld [vmem:[%s16393_s6 + $0x1b8] sm:$0xff]  ;;  %v10610_v16 = vld [vmem:[%s16393_s6 + $0x1a8] sm:$0xf] }
 0x833   :  { %v8758_v4 = vpop.f32.mrf.mxu1 }
 0x834   :  { %v8763_v13 = vadd.f32 %v8758_v4, %v8666_v11  ;;  %v10593_v11 = vld [vmem:[%s16393_s6 + $0x120] sm:$0xff]  ;;  %v10629_v4 = vld [vmem:[%s16393_s6 + $0x230] sm:$0xff] }
 0x835   :  { %v8760_v6 = vpop.f32.mrf.mxu1 }
 0x836   :  { %v8777_v21 = vadd.f32 %v8770_v15, %v8763_v13  ;;  %v8764_v22 = vadd.f32 %v8760_v6, %v8667_v20  ;;  %v10630_v15 = vld [vmem:[%s16393_s6 + $0x238] sm:$0xf] }
 0x838   :  { %v8781_v24 = vrot.slane %v8777_v21, 1  ;;  %v8778_v18 = vadd.f32 %v8774_v51, %v8764_v22  ;;  %v9194_v22 = vld [vmem:[%s16395_s8 + $0x30] sm:$0x3] }
 0x83a   :  { %v8782_v55 = vrot.slane %v8778_v18, 1  ;;  %v8785_v59 = vmax.f32 %v8777_v21, %v8781_v24  ;;  %v9193_v24 = vld [vmem:[%s16395_s8 + $0x28] sm:$0xff] }
 0x83c   :  { %8789 = vrot.lane.b32.xlu0 %v8785_v59, %s11406_s18  ;;  %v8786_v25 = vmax.f32 %v8778_v18, %v8782_v55  ;;  %v9192_v18 = vld [vmem:[%s16395_s8 + $0x20] sm:$0xff]  ;;  %v9191_v55 = vld [vmem:[%s16395_s8 + $0x18] sm:$0xff] }
 0x83e   :  { %8791 = vrot.lane.b32.xlu1 %v8786_v25, %s11406_s18 }
 0x85b   :  { %4671 = vmax.xlane.f32.xlu0 %v4670_v63 }
 0x8ae   :  { %v8790_v17 = vpop.permute.xlu0 %8789 }
 0x8b0   :  { %v8792_v26 = vpop.permute.xlu1 %8791 }
 0x8b1   :  { %v8793_v10 = vsel %vm4183_vm6, %v8790_v17, %v8792_v26  ;;  %v8797_v14 = vmax.f32 %v8786_v25, %v8792_v26  ;;  %v9189_v25 = vld [vmem:[%s16395_s8 + $0x8] sm:$0xff] }
 0x8b2   :  { %v8796_v27 = vmax.f32 %v8785_v59, %v8793_v10  ;;  %v9190_v59 = vld [vmem:[%s16395_s8 + $0x10] sm:$0xff] }
 0x8b3   :  { %v8799_v28 = vmax.f32 %v8797_v14, 0.0 }
 0x8b4   :  { %v16186_v29 = vmax.f32 %v8796_v27, 0.0 }
 0x8b5   :  { %10592 = vmatprep.mubr.msk.f32.mxu1 %vm4233_vm7, %v8799_v28  ;;  %v8839_v38 = vrot.slane %v8799_v28, 2  ;;  %v9107_v31 = vrot.slane %v8799_v28, 6  ;;  %v9010_v36 = vrot.slane %v8799_v28, 4 }
 0x8b6   :  { %8986 = vmatmul.mubr.f32.vlgmr.msra.gmra.mxu1 %v16186_v29  ;;  %v8838_v32 = vrot.slane %v16186_v29, 2  ;;  %v9106_v7 = vrot.slane %v16186_v29, 6  ;;  %v9009_v13 = vrot.slane %v16186_v29, 4 }
 0x8b7   :  { %9115 = vmatpush1.msra.mxu1 %v10628_v30  ;;  %10590 = vmatprep.mubr.msk.f32.mxu0 %vm4233_vm7, %v8839_v38 }
 0x8b8   :  { %9116 = vmatprep.subr.mxu1 %v11402_v12  ;;  %10632 = vmatprep.mubr.msk.f32.mxu1 %vm4233_vm7, %v9107_v31 }
 0x8b9   :  { %8911 = vmatmul.mubr.f32.vlgmr.msra.gmra.mxu0 %v8838_v32  ;;  %9117 = vmatpush1.msra.mxu1 %v10627_v33  ;;  %v9185_v32 = vld [vmem:[%s16394_s7] sm:$0x1]  ;;  %s11408_s7 = smov [#allocation2]  }
 0x8ba   :  { %9018 = vmatpush1.msra.mxu0 %v10608_v35  ;;  %10612 = vmatprep.mubr.msk.f32.mxu0 %vm4233_vm7, %v9010_v36  ;;  %s9291_s2 = sshll.u32 %s11408_s7, 4  ;;  %s9292_s2 = int_to_ptr.vmem [resolvable:$true] %s9291_s2 }
 0x8bb   :  { %9019 = vmatprep.subr.mxu0 %v11402_v12  ;;  %9118 = vmatprep.subr.mxu1 %v11402_v12  ;;  %p11385_p1 = scmp.lt.s32.totalorder %s9292_s2, %s9292_s2 }
 0x8bc   :  { %9020 = vmatpush1.msra.mxu0 %v10607_v45  ;;  %9119 = vmatpush1.msra.mxu1 %v10626_v37  ;;  %v9195_v37 = vld [vmem:[%s16396_s9] sm:$0x1]  ;;  %s11380_s9 = scalar_lea.vmem %s9292_s2, 32 }
 0x8bd   :  { %9021 = vmatprep.subr.mxu0 %v11402_v12  ;;  %9120 = vmatprep.subr.mxu1 %v11402_v12  ;;  %p11381_p0 = scmp.ne.s32.totalorder %s9292_s2, %s11380_s9  ;;  %p11386_p2 = scmp.lt.s32.totalorder %s11380_s9, %s11380_s9 }
 0x8be   :  { %9022 = vmatpush1.msra.mxu0 %v10606_v39  ;;  %9121 = vmatpush1.msra.mxu1 %v10625_v41 }
 0x8bf   :  { %9023 = vmatprep.subr.mxu0 %v11402_v12  ;;  %9122 = vmatprep.subr.mxu1 %v11402_v12  ;;  %p11387_p3 = por %p11386_p2, %p11385_p1 }
 0x8c0   :  { %9024 = vmatpush1.msra.mxu0 %v10605_v44  ;;  %9123 = vmatpush1.msra.mxu1 %v10624_v46 }
 0x8c1   :  { %9025 = vmatprep.subr.mxu0 %v11402_v12  ;;  %9124 = vmatprep.subr.mxu1 %v11402_v12  ;;  %p11388_p4 = pnand %p11387_p3, %p11381_p0 }
 0x8c2   :  { %9026 = vmatpush1.msra.mxu0 %v10604_v47  ;;  %9125 = vmatpush1.msra.mxu1 %v10623_v48 }
 0x8c3   :  { %9027 = vmatprep.subr.mxu0 %v11402_v12  ;;  %9126 = vmatprep.subr.mxu1 %v11402_v12 }
 0x8c4   :  { %9028 = vmatpush1.msra.mxu0 %v10603_v49  ;;  %9127 = vmatpush1.msra.mxu1 %v10622_v50 }
 0x8c5   :  { %9029 = vmatprep.subr.mxu0 %v11402_v12  ;;  %9128 = vmatprep.subr.mxu1 %v11402_v12 }
 0x8c6   :  { %9030 = vmatpush1.msra.mxu0 %v10602_v53  ;;  %9129 = vmatpush1.msra.mxu1 %v10621_v40 }
 0x8c7   :  { %9031 = vmatprep.subr.mxu0 %v11402_v12  ;;  %9130 = vmatprep.subr.mxu1 %v11402_v12 }
 0x8c8   :  { %9032 = vmatpush1.msra.mxu0 %v10601_v43  ;;  %9131 = vmatpush1.msra.mxu1 %v10620_v52 }
 0x8c9   :  { %9033 = vmatprep.subr.mxu0 %v11402_v12  ;;  %9132 = vmatprep.subr.mxu1 %v11402_v12 }
 0x8ca   :  { %9034 = vmatpush1.msra.mxu0 %v10600_v54  ;;  %9133 = vmatpush1.msra.mxu1 %v10619_v42 }
 0x8cb   :  { %9035 = vmatprep.subr.mxu0 %v11402_v12  ;;  %9134 = vmatprep.subr.mxu1 %v11402_v12 }
 0x8cc   :  { %9036 = vmatpush1.msra.mxu0 %v10599_v56  ;;  %9135 = vmatpush1.msra.mxu1 %v10618_v57 }
 0x8cd   :  { %9037 = vmatprep.subr.mxu0 %v11402_v12  ;;  %9136 = vmatprep.subr.mxu1 %v11402_v12 }
 0x8ce   :  { %9038 = vmatpush1.msra.mxu0 %v10598_v58  ;;  %9137 = vmatpush1.msra.mxu1 %v10617_v34 }
 0x8cf   :  { %9039 = vmatprep.subr.mxu0 %v11402_v12  ;;  %9138 = vmatprep.subr.mxu1 %v11402_v12 }
 0x8d0   :  { %9040 = vmatpush1.msra.mxu0 %v10597_v8  ;;  %9139 = vmatpush1.msra.mxu1 %v10616_v60 }
 0x8d1   :  { %9041 = vmatprep.subr.mxu0 %v11402_v12  ;;  %9140 = vmatprep.subr.mxu1 %v11402_v12 }
 0x8d2   :  { %9042 = vmatpush1.msra.mxu0 %v10596_v61  ;;  %9141 = vmatpush1.msra.mxu1 %v10615_v62 }
 0x8d3   :  { %9043 = vmatprep.subr.mxu0 %v11402_v12  ;;  %9142 = vmatprep.subr.mxu1 %v11402_v12 }
 0x8d4   :  { %9044 = vmatpush1.msra.mxu0 %v10595_v0  ;;  %9143 = vmatpush1.msra.mxu1 %v10614_v1 }
 0x8d5   :  { %9045 = vmatprep.subr.mxu0 %v11402_v12  ;;  %9144 = vmatprep.subr.mxu1 %v11402_v12 }
 0x8d6   :  { %9046 = vmatpush1.msra.mxu0 %v10594_v2  ;;  %9145 = vmatpush1.msra.mxu1 %v10613_v3 }
 0x8d7   :  { %9047 = vmatprep.subr.mxu0 %v11402_v12  ;;  %9174 = vmatprep.subr.mxu1 %v11402_v12 }
 0x8d8   :  { %9048 = vmatpush1.msra.mxu0 %v10593_v11  ;;  %10631 = vmatpush2.msk.msra.mxu1 %vm56_vm0, %v10630_v15 }
 0x8d9   :  { %9077 = vmatprep.subr.mxu0 %v11402_v12  ;;  %9176 = vmatprep.subr.mxu1 %v11402_v12 }
 0x8da   :  { %10611 = vmatpush2.msk.msra.mxu0 %vm56_vm0, %v10610_v16  ;;  %9177 = vmatpush2.msra.mxu1 %v10629_v4 }
 0x8db   :  { %9079 = vmatprep.subr.mxu0 %v11402_v12  ;;  %9179 = vmatmul.mubr.f32.vlgmr.msra.gmra.mxu1 %v9106_v7 }
 0x8dc   :  { %9080 = vmatpush2.msra.mxu0 %v10609_v19 }
 0x8dd   :  { %9082 = vmatmul.mubr.f32.vlgmr.msra.gmra.mxu0 %v9009_v13  ;;  %11348 = vmatprep.subr.mxu0 %v11402_v12 }
 0x8de   :  { %11362 = vmatprep.mubr.msk.f32.mxu0 %vm11407_vm9, %v11402_v12  ;;  %11349 = vmatpush3.msk.msra.mxu0 %vm4595_vm8, %v9194_v22 }
 0x8df   :  { %11350 = vmatprep.subr.mxu0 %v11402_v12 }
 0x8e0   :  { %11351 = vmatpush3.msra.mxu0 %v9193_v24 }
 0x8e1   :  { %11352 = vmatprep.subr.mxu0 %v11402_v12 }
 0x8e2   :  { %11353 = vmatpush3.msra.mxu0 %v9192_v18 }
 0x8e3   :  { %11354 = vmatprep.subr.mxu0 %v11402_v12 }
 0x8e4   :  { %v4672_v20 = vpop.xlane.xlu0 %4671  ;;  %11355 = vmatpush3.msra.mxu0 %v9191_v55 }
 0x8e5   :  { %v4673_v51 = vsub.f32 %v16181_v9, %v4672_v20  ;;  %11356 = vmatprep.subr.mxu0 %v11402_v12 }
 0x8e6   :  { %11357 = vmatpush3.msra.mxu0 %v9190_v59 }
 0x8e7   :  { %v4674_v6 = vmul.f32 1.442695, %v4673_v51  ;;  %11358 = vmatprep.subr.mxu0 %v11402_v12 }
 0x8e8   :  { %11359 = vmatpush3.msra.mxu0 %v9189_v25 }
 0x8e9   :  { %11372 = vpow2.f32 %v4674_v6  ;;  %11360 = vmatprep.subr.mxu0 %v11402_v12 }
 0x8ea   :  { %11361 = vmatpush3.msra.mxu0 %v9188_v5 }
 0x8f6   :  { %v11373_v23 = vpop.eup %11372 }
 0x8f7   :  { %v4676_v21 = vsel %vm4669_vm11, %v11373_v23, 0.0 }
 0x8f8   :  { %4677 = vadd.xlane.f32.xlu0 %v4676_v21 }
 0x976   :  { %v8987_v9 = vpop.f32.mrf.mxu1 }
 0x978   :  { %v8989_v63 = vpop.f32.mrf.mxu1 }
 0x979   :  { %v8912_v17 = vpop.f32.mrf.mxu0 }
 0x97a   :  { %v8988_v30 = vadd.f32 %v8987_v9, %v8912_v17 }
 0x97b   :  { %v8914_v26 = vpop.f32.mrf.mxu0 }
 0x981   :  { %v4678_v10 = vpop.xlane.xlu0 %4677 }
 0x982   :  { %11374 = vlog2.f32 %v4678_v10 }
 0x98f   :  { %v11375_v14 = vpop.eup %11374 }
 0x990   :  { %v4680_v27 = vmul.f32 0.6931472, %v11375_v14 }
 0x992   :  { %v4681_v28 = vsub.f32 %v4673_v51, %v4680_v27 }
 0x994   :  { %4682 = vst.msk [vmem:[#allocation2] sm:$0x1] %vm4669_vm11, %v4681_v28 }
 0x99b   :  { %v9180_v29 = vpop.f32.mrf.mxu1 }
 0x99d   :  { %v9083_v38 = vpop.f32.mrf.mxu0  ;;  %v9182_v12 = vpop.f32.mrf.mxu1 }
 0x99e   :  { %v9087_v31 = vadd.f32 %v9083_v38, %v8988_v30 }
 0x99f   :  { %v9085_v33 = vpop.f32.mrf.mxu0 }
 0x9a0   :  { %v9184_v35 = vadd.f32 %v9180_v29, %v9087_v31 }
 0x9a2   :  { %v9186_v36 = vadd.f32 %v9185_v32, %v9184_v35 }
 0x9a4   :  { %v9187_v45 = vmax.f32 %v9186_v36, 0.0 }
 0x9a6   :  { %11363 = vmatmul.mubr.msk.f32.vlgmr.msra.gmra.mxu0 %vm4591_vm10, %v9187_v45 }
 0xa66   :  { %v9268_v39 = vpop.f32.mrf.mxu0 }
 0xa67   :  { %v9269_v41 = vadd.f32 %v9268_v39, %v9195_v37 }
 0xa68   :  { %v11364_v44 = vpop.f32.mrf.mxu0 }
 0xa69   :  { %v9272_v46 = vsel %vm4669_vm11, %v9269_v41, -inf }
 0xa6a   :  { %9273 = vmax.xlane.f32.xlu1 %v9272_v46 }
 0xaf3   :  { %v9274_v47 = vpop.xlane.xlu1 %9273 }
 0xaf4   :  { %v9275_v48 = vsub.f32 %v9269_v41, %v9274_v47 }
 0xaf6   :  { %v9276_v49 = vmul.f32 1.442695, %v9275_v48 }
 0xaf8   :  { %11376 = vpow2.f32 %v9276_v49 }
 0xb05   :  { %v11377_v50 = vpop.eup %11376 }
 0xb06   :  { %v9278_v53 = vsel %vm4669_vm11, %v11377_v50, 0.0 }
 0xb07   :  { %9279 = vadd.xlane.f32.xlu0 %v9278_v53 }
 0xb90   :  { %v9280_v40 = vpop.xlane.xlu0 %9279 }
 0xb91   :  { %11378 = vlog2.f32 %v9280_v40 }
 0xb9e   :  { %v11379_v43 = vpop.eup %11378 }
 0xb9f   :  { %v9282_v52 = vmul.f32 0.6931472, %v11379_v43 }
 0xba1   :  { %v9283_v54 = vsub.f32 %v9275_v48, %v9282_v52 }
 0xba3   :  { %9284 = vst.msk [vmem:[#allocation2 + $0x1] sm:$0x1] %vm4669_vm11, %v9283_v54 }
 0xba4   :  { %11391 = shalt.err (!%p11388_p4)
}
 0xba5   :  { %9294 = dma.vmem_to_hbm [thread:$0]  %s9292_s2, 32, %s16397_s10, [#allocation3]  }
 0xba6   :  { %11400 = dma.done.wait [#allocation3], 32  }
 0xba7   :  { %11401 = vsyncadd [#allocation3], 4294967264 }
 0xba8   :  { %9298 = vsyncpa [#allocation3], 1 }

</bundles_post_ra>
